<compile_context>
chip_gen: v7x
topology: tpu7x:2x2x1
jax: 0.10.0
libtpu: 0.0.40
codegen_flags: <defaults>
</compile_context>

<pallas_src>
import jax
import jax.numpy as jnp
from jax.experimental import pallas as pl
from jax.experimental.pallas import tpu as pltpu


# -----------------------------------------------------------------------------
# Pallas kernel: one block of BB batch elements of multi-head self-attention
# -----------------------------------------------------------------------------
def _make_mha_kernel(n_heads, d_k, d_v, d_model, bb, q_len, with_attn):
    H, dk, dv, D, L = n_heads, d_k, d_v, d_model, q_len
    w = 2 * dk + dv          # per-head column width in the fused QKV result
    N = bb * L               # rows fed to the MXU per grid step

    def kernel(*refs):
        if with_attn:
            (src_ref, wqkv_ref, bqkv_ref, wo_ref, bo_ref,
             out_ref, attn_ref, o_scr) = refs
        else:
            (src_ref, wqkv_ref, bqkv_ref, wo_ref, bo_ref,
             out_ref, o_scr) = refs
            attn_ref = None

        # ---- fused Q/K/V projection: one lane-dense MXU matmul + one bias add ----
        x = src_ref[...].reshape(N, D)                         # (BB*L, D) bf16
        qkv = jnp.dot(x, wqkv_ref[...],
                      preferred_element_type=jnp.float32) + bqkv_ref[...]
        # softmax scale is already folded into the Q weight/bias columns
        qkv = qkv.astype(jnp.bfloat16)                         # (N, H*(2dk+dv))

        # ---- per-head attention; each head is ONE contiguous w-wide lane chunk ----
        for h in range(H):
            chunk = qkv[:, h * w:(h + 1) * w].reshape(bb, L, w)
            q_h = chunk[:, :, :dk]                             # (bb, L, dk)
            k_h = chunk[:, :, dk:2 * dk]                       # (bb, L, dk)
            v_h = chunk[:, :, 2 * dk:]                         # (bb, L, dv)

            s = jnp.einsum('bqe,bke->bqk', q_h, k_h,
                           preferred_element_type=jnp.float32)  # (bb, L, L) f32
            m = jnp.max(s, axis=-1, keepdims=True)
            p = jnp.exp(s - m)
            denom = jnp.sum(p, axis=-1, keepdims=True)
            attn = p * pl.reciprocal(denom, approx=True)        # EUP slot, ~1e-3 rel err
            if with_attn:
                attn_ref[:, h, :, :] = attn.astype(attn_ref.dtype)   # bf16 store

            o_h = jnp.einsum('bqk,bke->bqe', attn.astype(jnp.bfloat16), v_h,
                             preferred_element_type=jnp.float32)      # (bb, L, dv)
            # scratch accumulator bounds the live range of each head's partial
            o_scr[:, h * dv:(h + 1) * dv] = o_h.reshape(N, dv).astype(o_scr.dtype)

        # ---- single output projection over the concatenated heads ----
        out = jnp.dot(o_scr[...], wo_ref[...],
                      preferred_element_type=jnp.float32) + bo_ref[...]
        out_ref[...] = out.reshape(bb, L, D).astype(out_ref.dtype)

    return kernel


# -----------------------------------------------------------------------------
# Batch-block sizing: fill the MXU M dim / amortize per-step overhead
# -----------------------------------------------------------------------------
def _choose_batch_block(B, L, per_elem_bytes, *, row_target=256, budget_bytes=6 << 20):
    """Largest divisor of B whose per-step footprint fits the budget, stopping once
    BB*L reaches the MXU row target."""
    bb = 1
    for cand in range(1, B + 1):
        if B % cand:
            continue
        if cand * per_elem_bytes > budget_bytes:
            break
        bb = cand
        if cand * L >= row_target:
            break
    return bb


# -----------------------------------------------------------------------------
# Wrapper mirroring _MultiheadAttention.forward (res_attention=False path)
# -----------------------------------------------------------------------------
def multihead_attention(Q, params, *, n_heads, d_k, d_v, d_model,
                        K=None, V=None, prev=None,
                        key_padding_mask=None, attn_mask=None,
                        return_attn=True, batch_block=None):
    """Returns (output [B,L,D], attn_weights [B,H,L,L] (bf16) or None)."""
    # TODO(synk): cross-attention (K/V != Q), prev residual scores, attn_mask,
    # key_padding_mask and nonzero dropout are not implemented (unused by PatchTST).
    assert K is None and V is None and prev is None
    assert key_padding_mask is None and attn_mask is None

    wq, bq, wk, bk, wv, bv, wo, bo = params
    B, L, D = Q.shape
    H, dk, dv = n_heads, d_k, d_v
    # _ScaledDotProductAttention uses head_dim = d_model // n_heads for the scale
    # (even if d_k differs) -- match that exactly; do NOT "fix" to d_k ** -0.5.
    scale = float((d_model // n_heads) ** (-0.5))

    # Per-head column grouping [q_h*scale | k_h | v_h]; the scale is folded into the
    # Q weight/bias constants (weight fold, not an activation pre-scale).
    wqkv = jnp.concatenate([wq.reshape(D, H, dk) * scale,
                            wk.reshape(D, H, dk),
                            wv.reshape(D, H, dv)], axis=-1)          # (D, H, 2dk+dv)
    n_qkv = H * (2 * dk + dv)
    wqkv = wqkv.reshape(D, n_qkv).astype(jnp.bfloat16)
    bqkv = jnp.concatenate([bq.reshape(1, H, dk) * scale,
                            bk.reshape(1, H, dk),
                            bv.reshape(1, H, dv)], axis=-1).reshape(1, n_qkv)
    bqkv = bqkv.astype(jnp.float32)
    src_bf = Q.astype(jnp.bfloat16)
    wo_bf = wo.astype(jnp.bfloat16)
    bo_f = bo.astype(jnp.float32)

    # Per-batch-element VMEM footprint estimate (double-buffered blocks + live values).
    per_elem = (2 * (L * D * 2 + L * D * 4 + (H * L * L * 2 if return_attn else 0))
                + L * n_qkv * 6 + L * H * dv * 2 + 4 * L * L * 4)
    bb = batch_block if batch_block is not None else _choose_batch_block(B, L, per_elem)
    assert B % bb == 0
    grid = (B // bb,)
    N = bb * L

    weight_bytes = D * n_qkv * 2 + n_qkv * 4 + H * dv * D * 2 + D * 4
    scratch_bytes = N * H * dv * 2
    vmem_need = bb * per_elem + weight_bytes + scratch_bytes + (1 << 20)
    # Cap at 64 MiB so this stays legal on v7x (64 MiB physical VMEM).
    vmem_limit = int(min(max(vmem_need, 32 * 1024 * 1024), 64 * 1024 * 1024))

    flops = 2 * B * L * (D * n_qkv + H * L * (dk + dv) + H * dv * D)
    transcendentals = B * H * L * L
    bytes_accessed = (B * L * D * 2 + weight_bytes + B * L * D * 4
                      + (B * H * L * L * 2 if return_attn else 0))

    kernel = _make_mha_kernel(H, dk, dv, D, bb, L, return_attn)

    in_specs = [
        pl.BlockSpec((bb, L, D), lambda b: (b, 0, 0)),        # activations: pipelined
        pl.BlockSpec((D, n_qkv), lambda b: (0, 0)),           # weights: VMEM-resident
        pl.BlockSpec((1, n_qkv), lambda b: (0, 0)),
        pl.BlockSpec((H * dv, D), lambda b: (0, 0)),
        pl.BlockSpec((1, D), lambda b: (0, 0)),
    ]
    out_spec_main = pl.BlockSpec((bb, L, D), lambda b: (b, 0, 0))
    if return_attn:
        out_shape = (jax.ShapeDtypeStruct((B, L, D), Q.dtype),
                     jax.ShapeDtypeStruct((B, H, L, L), jnp.bfloat16))
        out_specs = (out_spec_main,
                     pl.BlockSpec((bb, H, L, L), lambda b: (b, 0, 0, 0)))
    else:
        out_shape = jax.ShapeDtypeStruct((B, L, D), Q.dtype)
        out_specs = out_spec_main

    res = pl.pallas_call(
        kernel,
        out_shape=out_shape,
        grid_spec=pltpu.PrefetchScalarGridSpec(
            num_scalar_prefetch=0,
            grid=grid,
            in_specs=in_specs,
            out_specs=out_specs,
            scratch_shapes=[pltpu.VMEM((N, H * dv), jnp.bfloat16)]),
        compiler_params=pltpu.CompilerParams(
            # TODO(synk): on v7x, CORE_PARALLEL on this axis would engage both TCs.
            dimension_semantics=("parallel",),
            vmem_limit_bytes=vmem_limit),
        cost_estimate=pl.CostEstimate(flops=flops,
                                      transcendentals=transcendentals,
                                      bytes_accessed=bytes_accessed),
    )(src_bf, wqkv, bqkv, wo_bf, bo_f)

    if return_attn:
        out, attn = res
        return out, attn
    return res, None


# -----------------------------------------------------------------------------
# Pure-JAX f32 reference (same math) for correctness check
# -----------------------------------------------------------------------------
def _mha_ref(Q, params, n_heads, d_k, d_v, d_model):
    wq, bq, wk, bk, wv, bv, wo, bo = params
    B, L, D = Q.shape
    scale = (d_model // n_heads) ** (-0.5)
    q = (Q @ wq + bq).reshape(B, L, n_heads, d_k).transpose(0, 2, 1, 3)
    k = (Q @ wk + bk).reshape(B, L, n_heads, d_k).transpose(0, 2, 1, 3)
    v = (Q @ wv + bv).reshape(B, L, n_heads, d_v).transpose(0, 2, 1, 3)
    scores = jnp.einsum('bhqe,bhke->bhqk', q, k) * scale
    attn = jax.nn.softmax(scores, axis=-1)
    o = jnp.einsum('bhqk,bhke->bhqe', attn, v).transpose(0, 2, 1, 3).reshape(B, L, -1)
    out = o @ wo + bo
    return out, attn


# -----------------------------------------------------------------------------
# Deterministic parameter construction (matches __init__ shapes, qkv_bias=True)
# -----------------------------------------------------------------------------
def init_mha_params(key, d_model, n_heads, d_k, d_v):
    ks = jax.random.split(key, 8)
    s = 0.08
    wq = jax.random.normal(ks[0], (d_model, n_heads * d_k), jnp.float32) * s
    bq = jax.random.normal(ks[1], (1, n_heads * d_k), jnp.float32) * s
    wk = jax.random.normal(ks[2], (d_model, n_heads * d_k), jnp.float32) * s
    bk = jax.random.normal(ks[3], (1, n_heads * d_k), jnp.float32) * s
    wv = jax.random.normal(ks[4], (d_model, n_heads * d_v), jnp.float32) * s
    bv = jax.random.normal(ks[5], (1, n_heads * d_v), jnp.float32) * s
    wo = jax.random.normal(ks[6], (n_heads * d_v, d_model), jnp.float32) * s
    bo = jax.random.normal(ks[7], (1, d_model), jnp.float32) * s
    return (wq, bq, wk, bk, wv, bv, wo, bo)


if __name__ == "__main__":
    # small config consistent with the module: Q [bs, q_len, d_model]
    B, q_len, d_model, n_heads = 32, 16, 64, 4
    d_k = d_v = d_model // n_heads

    key = jax.random.PRNGKey(0)
    k_src, k_par = jax.random.split(key)
    Q = jax.random.normal(k_src, (B, q_len, d_model), jnp.float32)
    params = init_mha_params(k_par, d_model, n_heads, d_k, d_v)

    out, attn = multihead_attention(Q, params, n_heads=n_heads,
                                    d_k=d_k, d_v=d_v, d_model=d_model,
                                    return_attn=True)
    out = jax.block_until_ready(out)
    attn = jax.block_until_ready(attn)

    # reference check (f32 reference vs bf16-MXU kernel -> relaxed tolerance)
    ref_out, ref_attn = _mha_ref(Q, params, n_heads, d_k, d_v, d_model)
    assert out.shape == (B, q_len, d_model)
    assert attn.shape == (B, n_heads, q_len, q_len)
    attn_f32 = attn.astype(jnp.float32)
    err_o = jnp.max(jnp.abs(out - ref_out))
    err_a = jnp.max(jnp.abs(attn_f32 - ref_attn))
    assert jnp.allclose(out, ref_out, atol=3e-2, rtol=3e-2), f"output max abs err {err_o}"
    assert jnp.allclose(attn_f32, ref_attn, atol=2e-2, rtol=2e-2), f"attn max abs err {err_a}"
    print("KERNEL_OK")
</pallas_src>

<mosaic_0001>
module attributes {stable_mosaic.version = 11 : i64} {
  func.func @kernel(%arg0: i32, %arg1: memref<16x16x64xbf16, #tpu.memory_space<vmem>>, %arg2: memref<64x192xbf16, #tpu.memory_space<vmem>>, %arg3: memref<1x192xf32, #tpu.memory_space<vmem>>, %arg4: memref<64x64xbf16, #tpu.memory_space<vmem>>, %arg5: memref<1x64xf32, #tpu.memory_space<vmem>>, %arg6: memref<16x16x64xf32, #tpu.memory_space<vmem>>, %arg7: memref<16x4x16x16xbf16, #tpu.memory_space<vmem>>, %arg8: memref<256x64xbf16, #tpu.memory_space<vmem>>) attributes {dimension_semantics = [#tpu.dimension_semantics<parallel>], iteration_bounds = array<i64: 2>, scalar_prefetch = 0 : i64, scratch_operands = 1 : i64, tpu.core_type = #tpu.core_type<tc>, window_params = [{transform_indices = @transform_0, window_bounds = array<i64: 16, 16, 64>}, {pipeline_mode = #tpu.pipeline_mode<synchronous>, transform_indices = @transform_1, window_bounds = array<i64: 64, 192>}, {pipeline_mode = #tpu.pipeline_mode<synchronous>, transform_indices = @transform_2, window_bounds = array<i64: 1, 192>}, {pipeline_mode = #tpu.pipeline_mode<synchronous>, transform_indices = @transform_3, window_bounds = array<i64: 64, 64>}, {pipeline_mode = #tpu.pipeline_mode<synchronous>, transform_indices = @transform_4, window_bounds = array<i64: 1, 64>}, {transform_indices = @transform_5, window_bounds = array<i64: 16, 16, 64>}, {transform_indices = @transform_6, window_bounds = array<i64: 16, 4, 16, 16>}]} {
    %c0 = arith.constant 0 : index
    %c0_0 = arith.constant 0 : index
    %c0_1 = arith.constant 0 : index
    %0 = vector.load %arg1[%c0, %c0_0, %c0_1] : memref<16x16x64xbf16, #tpu.memory_space<vmem>>, vector<16x16x64xbf16>
    %1 = vector.shape_cast %0 : vector<16x16x64xbf16> to vector<256x64xbf16>
    %c0_2 = arith.constant 0 : index
    %c0_3 = arith.constant 0 : index
    %2 = vector.load %arg2[%c0_2, %c0_3] : memref<64x192xbf16, #tpu.memory_space<vmem>>, vector<64x192xbf16>
    %cst = arith.constant dense<0.000000e+00> : vector<256x192xf32>
    %3 = tpu.matmul %1, %2, %cst {dimension_numbers = #tpu.dot_dimension_numbers<[1], [0], [0], [1], [0, 0, 1, 1], [], []>} : vector<256x64xbf16>, vector<64x192xbf16>, vector<256x192xf32> -> vector<256x192xf32>
    %c0_4 = arith.constant 0 : index
    %c0_5 = arith.constant 0 : index
    %4 = vector.load %arg3[%c0_4, %c0_5] : memref<1x192xf32, #tpu.memory_space<vmem>>, vector<1x192xf32>
    %5 = vector.broadcast %4 : vector<1x192xf32> to vector<256x192xf32>
    %6 = arith.addf %3, %5 : vector<256x192xf32>
    %7 = arith.truncf %6 : vector<256x192xf32> to vector<256x192xbf16>
    %8 = vector.extract_strided_slice %7 {offsets = [0, 0], sizes = [256, 48], strides = [1, 1]} : vector<256x192xbf16> to vector<256x48xbf16>
    %9 = vector.shape_cast %8 : vector<256x48xbf16> to vector<16x16x48xbf16>
    %10 = vector.extract_strided_slice %9 {offsets = [0, 0, 0], sizes = [16, 16, 16], strides = [1, 1, 1]} : vector<16x16x48xbf16> to vector<16x16x16xbf16>
    %11 = vector.extract_strided_slice %9 {offsets = [0, 0, 16], sizes = [16, 16, 16], strides = [1, 1, 1]} : vector<16x16x48xbf16> to vector<16x16x16xbf16>
    %12 = vector.extract_strided_slice %9 {offsets = [0, 0, 32], sizes = [16, 16, 16], strides = [1, 1, 1]} : vector<16x16x48xbf16> to vector<16x16x16xbf16>
    "tpu.trace_start"() <{level = 10 : i32, message = "bqe,bke->bqk"}> : () -> ()
    %cst_6 = arith.constant dense<0.000000e+00> : vector<16x16x16xf32>
    %13 = tpu.matmul %10, %11, %cst_6 {dimension_numbers = #tpu.dot_dimension_numbers<[2], [2], [1], [1], [0, 0, 0, 1, 1, 1], [0], [0]>} : vector<16x16x16xbf16>, vector<16x16x16xbf16>, vector<16x16x16xf32> -> vector<16x16x16xf32>
    "tpu.trace_stop"() : () -> ()
    %cst_7 = arith.constant dense<0xFF800000> : vector<16x16xf32>
    %14 = vector.multi_reduction <maximumf>, %13, %cst_7 [2] : vector<16x16x16xf32> to vector<16x16xf32>
    %15 = vector.shape_cast %14 : vector<16x16xf32> to vector<16x16x1xf32>
    %16 = vector.broadcast %15 : vector<16x16x1xf32> to vector<16x16x16xf32>
    %17 = arith.subf %13, %16 : vector<16x16x16xf32>
    %18 = math.exp %17 : vector<16x16x16xf32>
    %cst_8 = arith.constant dense<0.000000e+00> : vector<16x16xf32>
    %19 = vector.multi_reduction <add>, %18, %cst_8 [2] : vector<16x16x16xf32> to vector<16x16xf32>
    %20 = vector.shape_cast %19 : vector<16x16xf32> to vector<16x16x1xf32>
    %21 = tpu.reciprocal %20 {approx = true} : vector<16x16x1xf32> -> vector<16x16x1xf32>
    %22 = vector.broadcast %21 : vector<16x16x1xf32> to vector<16x16x16xf32>
    %23 = arith.mulf %18, %22 : vector<16x16x16xf32>
    %24 = arith.truncf %23 : vector<16x16x16xf32> to vector<16x16x16xbf16>
    %c0_9 = arith.constant 0 : index
    %c0_10 = arith.constant 0 : index
    %c0_11 = arith.constant 0 : index
    %c0_12 = arith.constant 0 : index
    %25 = vector.load %arg7[%c0_9, %c0_10, %c0_11, %c0_12] : memref<16x4x16x16xbf16, #tpu.memory_space<vmem>>, vector<16x1x16x16xbf16>
    %26 = vector.shape_cast %25 : vector<16x1x16x16xbf16> to vector<16x16x16xbf16>
    %27 = vector.shape_cast %24 : vector<16x16x16xbf16> to vector<16x1x16x16xbf16>
    tpu.vector_store %arg7[%c0_9, %c0_10, %c0_11, %c0_12], %27 {strides = array<i32>} : memref<16x4x16x16xbf16, #tpu.memory_space<vmem>>, vector<16x1x16x16xbf16>,
    %28 = arith.truncf %23 : vector<16x16x16xf32> to vector<16x16x16xbf16>
    "tpu.trace_start"() <{level = 10 : i32, message = "bqk,bke->bqe"}> : () -> ()
    %cst_13 = arith.constant dense<0.000000e+00> : vector<16x16x16xf32>
    %29 = tpu.matmul %28, %12, %cst_13 {dimension_numbers = #tpu.dot_dimension_numbers<[2], [1], [1], [2], [0, 0, 0, 1, 1, 2], [0], [0]>} : vector<16x16x16xbf16>, vector<16x16x16xbf16>, vector<16x16x16xf32> -> vector<16x16x16xf32>
    "tpu.trace_stop"() : () -> ()
    %30 = vector.shape_cast %29 : vector<16x16x16xf32> to vector<256x16xf32>
    %31 = arith.truncf %30 : vector<256x16xf32> to vector<256x16xbf16>
    %c0_14 = arith.constant 0 : index
    %c0_15 = arith.constant 0 : index
    %32 = vector.load %arg8[%c0_14, %c0_15] : memref<256x64xbf16, #tpu.memory_space<vmem>>, vector<256x16xbf16>
    tpu.vector_store %arg8[%c0_14, %c0_15], %31 {strides = array<i32>} : memref<256x64xbf16, #tpu.memory_space<vmem>>, vector<256x16xbf16>,
    %33 = vector.extract_strided_slice %7 {offsets = [0, 48], sizes = [256, 48], strides = [1, 1]} : vector<256x192xbf16> to vector<256x48xbf16>
    %34 = vector.shape_cast %33 : vector<256x48xbf16> to vector<16x16x48xbf16>
    %35 = vector.extract_strided_slice %34 {offsets = [0, 0, 0], sizes = [16, 16, 16], strides = [1, 1, 1]} : vector<16x16x48xbf16> to vector<16x16x16xbf16>
    %36 = vector.extract_strided_slice %34 {offsets = [0, 0, 16], sizes = [16, 16, 16], strides = [1, 1, 1]} : vector<16x16x48xbf16> to vector<16x16x16xbf16>
    %37 = vector.extract_strided_slice %34 {offsets = [0, 0, 32], sizes = [16, 16, 16], strides = [1, 1, 1]} : vector<16x16x48xbf16> to vector<16x16x16xbf16>
    "tpu.trace_start"() <{level = 10 : i32, message = "bqe,bke->bqk"}> : () -> ()
    %cst_16 = arith.constant dense<0.000000e+00> : vector<16x16x16xf32>
    %38 = tpu.matmul %35, %36, %cst_16 {dimension_numbers = #tpu.dot_dimension_numbers<[2], [2], [1], [1], [0, 0, 0, 1, 1, 1], [0], [0]>} : vector<16x16x16xbf16>, vector<16x16x16xbf16>, vector<16x16x16xf32> -> vector<16x16x16xf32>
    "tpu.trace_stop"() : () -> ()
    %cst_17 = arith.constant dense<0xFF800000> : vector<16x16xf32>
    %39 = vector.multi_reduction <maximumf>, %38, %cst_17 [2] : vector<16x16x16xf32> to vector<16x16xf32>
    %40 = vector.shape_cast %39 : vector<16x16xf32> to vector<16x16x1xf32>
    %41 = vector.broadcast %40 : vector<16x16x1xf32> to vector<16x16x16xf32>
    %42 = arith.subf %38, %41 : vector<16x16x16xf32>
    %43 = math.exp %42 : vector<16x16x16xf32>
    %cst_18 = arith.constant dense<0.000000e+00> : vector<16x16xf32>
    %44 = vector.multi_reduction <add>, %43, %cst_18 [2] : vector<16x16x16xf32> to vector<16x16xf32>
    %45 = vector.shape_cast %44 : vector<16x16xf32> to vector<16x16x1xf32>
    %46 = tpu.reciprocal %45 {approx = true} : vector<16x16x1xf32> -> vector<16x16x1xf32>
    %47 = vector.broadcast %46 : vector<16x16x1xf32> to vector<16x16x16xf32>
    %48 = arith.mulf %43, %47 : vector<16x16x16xf32>
    %49 = arith.truncf %48 : vector<16x16x16xf32> to vector<16x16x16xbf16>
    %c0_19 = arith.constant 0 : index
    %c1 = arith.constant 1 : index
    %c0_20 = arith.constant 0 : index
    %c0_21 = arith.constant 0 : index
    %50 = vector.load %arg7[%c0_19, %c1, %c0_20, %c0_21] : memref<16x4x16x16xbf16, #tpu.memory_space<vmem>>, vector<16x1x16x16xbf16>
    %51 = vector.shape_cast %50 : vector<16x1x16x16xbf16> to vector<16x16x16xbf16>
    %52 = vector.shape_cast %49 : vector<16x16x16xbf16> to vector<16x1x16x16xbf16>
    tpu.vector_store %arg7[%c0_19, %c1, %c0_20, %c0_21], %52 {strides = array<i32>} : memref<16x4x16x16xbf16, #tpu.memory_space<vmem>>, vector<16x1x16x16xbf16>,
    %53 = arith.truncf %48 : vector<16x16x16xf32> to vector<16x16x16xbf16>
    "tpu.trace_start"() <{level = 10 : i32, message = "bqk,bke->bqe"}> : () -> ()
    %cst_22 = arith.constant dense<0.000000e+00> : vector<16x16x16xf32>
    %54 = tpu.matmul %53, %37, %cst_22 {dimension_numbers = #tpu.dot_dimension_numbers<[2], [1], [1], [2], [0, 0, 0, 1, 1, 2], [0], [0]>} : vector<16x16x16xbf16>, vector<16x16x16xbf16>, vector<16x16x16xf32> -> vector<16x16x16xf32>
    "tpu.trace_stop"() : () -> ()
    %55 = vector.shape_cast %54 : vector<16x16x16xf32> to vector<256x16xf32>
    %56 = arith.truncf %55 : vector<256x16xf32> to vector<256x16xbf16>
    %c0_23 = arith.constant 0 : index
    %c16 = arith.constant 16 : index
    %57 = vector.load %arg8[%c0_23, %c16] : memref<256x64xbf16, #tpu.memory_space<vmem>>, vector<256x16xbf16>
    tpu.vector_store %arg8[%c0_23, %c16], %56 {strides = array<i32>} : memref<256x64xbf16, #tpu.memory_space<vmem>>, vector<256x16xbf16>,
    %58 = vector.extract_strided_slice %7 {offsets = [0, 96], sizes = [256, 48], strides = [1, 1]} : vector<256x192xbf16> to vector<256x48xbf16>
    %59 = vector.shape_cast %58 : vector<256x48xbf16> to vector<16x16x48xbf16>
    %60 = vector.extract_strided_slice %59 {offsets = [0, 0, 0], sizes = [16, 16, 16], strides = [1, 1, 1]} : vector<16x16x48xbf16> to vector<16x16x16xbf16>
    %61 = vector.extract_strided_slice %59 {offsets = [0, 0, 16], sizes = [16, 16, 16], strides = [1, 1, 1]} : vector<16x16x48xbf16> to vector<16x16x16xbf16>
    %62 = vector.extract_strided_slice %59 {offsets = [0, 0, 32], sizes = [16, 16, 16], strides = [1, 1, 1]} : vector<16x16x48xbf16> to vector<16x16x16xbf16>
    "tpu.trace_start"() <{level = 10 : i32, message = "bqe,bke->bqk"}> : () -> ()
    %cst_24 = arith.constant dense<0.000000e+00> : vector<16x16x16xf32>
    %63 = tpu.matmul %60, %61, %cst_24 {dimension_numbers = #tpu.dot_dimension_numbers<[2], [2], [1], [1], [0, 0, 0, 1, 1, 1], [0], [0]>} : vector<16x16x16xbf16>, vector<16x16x16xbf16>, vector<16x16x16xf32> -> vector<16x16x16xf32>
    "tpu.trace_stop"() : () -> ()
    %cst_25 = arith.constant dense<0xFF800000> : vector<16x16xf32>
    %64 = vector.multi_reduction <maximumf>, %63, %cst_25 [2] : vector<16x16x16xf32> to vector<16x16xf32>
    %65 = vector.shape_cast %64 : vector<16x16xf32> to vector<16x16x1xf32>
    %66 = vector.broadcast %65 : vector<16x16x1xf32> to vector<16x16x16xf32>
    %67 = arith.subf %63, %66 : vector<16x16x16xf32>
    %68 = math.exp %67 : vector<16x16x16xf32>
    %cst_26 = arith.constant dense<0.000000e+00> : vector<16x16xf32>
    %69 = vector.multi_reduction <add>, %68, %cst_26 [2] : vector<16x16x16xf32> to vector<16x16xf32>
    %70 = vector.shape_cast %69 : vector<16x16xf32> to vector<16x16x1xf32>
    %71 = tpu.reciprocal %70 {approx = true} : vector<16x16x1xf32> -> vector<16x16x1xf32>
    %72 = vector.broadcast %71 : vector<16x16x1xf32> to vector<16x16x16xf32>
    %73 = arith.mulf %68, %72 : vector<16x16x16xf32>
    %74 = arith.truncf %73 : vector<16x16x16xf32> to vector<16x16x16xbf16>
    %c0_27 = arith.constant 0 : index
    %c2 = arith.constant 2 : index
    %c0_28 = arith.constant 0 : index
    %c0_29 = arith.constant 0 : index
    %75 = vector.load %arg7[%c0_27, %c2, %c0_28, %c0_29] : memref<16x4x16x16xbf16, #tpu.memory_space<vmem>>, vector<16x1x16x16xbf16>
    %76 = vector.shape_cast %75 : vector<16x1x16x16xbf16> to vector<16x16x16xbf16>
    %77 = vector.shape_cast %74 : vector<16x16x16xbf16> to vector<16x1x16x16xbf16>
    tpu.vector_store %arg7[%c0_27, %c2, %c0_28, %c0_29], %77 {strides = array<i32>} : memref<16x4x16x16xbf16, #tpu.memory_space<vmem>>, vector<16x1x16x16xbf16>,
    %78 = arith.truncf %73 : vector<16x16x16xf32> to vector<16x16x16xbf16>
    "tpu.trace_start"() <{level = 10 : i32, message = "bqk,bke->bqe"}> : () -> ()
    %cst_30 = arith.constant dense<0.000000e+00> : vector<16x16x16xf32>
    %79 = tpu.matmul %78, %62, %cst_30 {dimension_numbers = #tpu.dot_dimension_numbers<[2], [1], [1], [2], [0, 0, 0, 1, 1, 2], [0], [0]>} : vector<16x16x16xbf16>, vector<16x16x16xbf16>, vector<16x16x16xf32> -> vector<16x16x16xf32>
    "tpu.trace_stop"() : () -> ()
    %80 = vector.shape_cast %79 : vector<16x16x16xf32> to vector<256x16xf32>
    %81 = arith.truncf %80 : vector<256x16xf32> to vector<256x16xbf16>
    %c0_31 = arith.constant 0 : index
    %c32 = arith.constant 32 : index
    %82 = vector.load %arg8[%c0_31, %c32] : memref<256x64xbf16, #tpu.memory_space<vmem>>, vector<256x16xbf16>
    tpu.vector_store %arg8[%c0_31, %c32], %81 {strides = array<i32>} : memref<256x64xbf16, #tpu.memory_space<vmem>>, vector<256x16xbf16>,
    %83 = vector.extract_strided_slice %7 {offsets = [0, 144], sizes = [256, 48], strides = [1, 1]} : vector<256x192xbf16> to vector<256x48xbf16>
    %84 = vector.shape_cast %83 : vector<256x48xbf16> to vector<16x16x48xbf16>
    %85 = vector.extract_strided_slice %84 {offsets = [0, 0, 0], sizes = [16, 16, 16], strides = [1, 1, 1]} : vector<16x16x48xbf16> to vector<16x16x16xbf16>
    %86 = vector.extract_strided_slice %84 {offsets = [0, 0, 16], sizes = [16, 16, 16], strides = [1, 1, 1]} : vector<16x16x48xbf16> to vector<16x16x16xbf16>
    %87 = vector.extract_strided_slice %84 {offsets = [0, 0, 32], sizes = [16, 16, 16], strides = [1, 1, 1]} : vector<16x16x48xbf16> to vector<16x16x16xbf16>
    "tpu.trace_start"() <{level = 10 : i32, message = "bqe,bke->bqk"}> : () -> ()
    %cst_32 = arith.constant dense<0.000000e+00> : vector<16x16x16xf32>
    %88 = tpu.matmul %85, %86, %cst_32 {dimension_numbers = #tpu.dot_dimension_numbers<[2], [2], [1], [1], [0, 0, 0, 1, 1, 1], [0], [0]>} : vector<16x16x16xbf16>, vector<16x16x16xbf16>, vector<16x16x16xf32> -> vector<16x16x16xf32>
    "tpu.trace_stop"() : () -> ()
    %cst_33 = arith.constant dense<0xFF800000> : vector<16x16xf32>
    %89 = vector.multi_reduction <maximumf>, %88, %cst_33 [2] : vector<16x16x16xf32> to vector<16x16xf32>
    %90 = vector.shape_cast %89 : vector<16x16xf32> to vector<16x16x1xf32>
    %91 = vector.broadcast %90 : vector<16x16x1xf32> to vector<16x16x16xf32>
    %92 = arith.subf %88, %91 : vector<16x16x16xf32>
    %93 = math.exp %92 : vector<16x16x16xf32>
    %cst_34 = arith.constant dense<0.000000e+00> : vector<16x16xf32>
    %94 = vector.multi_reduction <add>, %93, %cst_34 [2] : vector<16x16x16xf32> to vector<16x16xf32>
    %95 = vector.shape_cast %94 : vector<16x16xf32> to vector<16x16x1xf32>
    %96 = tpu.reciprocal %95 {approx = true} : vector<16x16x1xf32> -> vector<16x16x1xf32>
    %97 = vector.broadcast %96 : vector<16x16x1xf32> to vector<16x16x16xf32>
    %98 = arith.mulf %93, %97 : vector<16x16x16xf32>
    %99 = arith.truncf %98 : vector<16x16x16xf32> to vector<16x16x16xbf16>
    %c0_35 = arith.constant 0 : index
    %c3 = arith.constant 3 : index
    %c0_36 = arith.constant 0 : index
    %c0_37 = arith.constant 0 : index
    %100 = vector.load %arg7[%c0_35, %c3, %c0_36, %c0_37] : memref<16x4x16x16xbf16, #tpu.memory_space<vmem>>, vector<16x1x16x16xbf16>
    %101 = vector.shape_cast %100 : vector<16x1x16x16xbf16> to vector<16x16x16xbf16>
    %102 = vector.shape_cast %99 : vector<16x16x16xbf16> to vector<16x1x16x16xbf16>
    tpu.vector_store %arg7[%c0_35, %c3, %c0_36, %c0_37], %102 {strides = array<i32>} : memref<16x4x16x16xbf16, #tpu.memory_space<vmem>>, vector<16x1x16x16xbf16>,
    %103 = arith.truncf %98 : vector<16x16x16xf32> to vector<16x16x16xbf16>
    "tpu.trace_start"() <{level = 10 : i32, message = "bqk,bke->bqe"}> : () -> ()
    %cst_38 = arith.constant dense<0.000000e+00> : vector<16x16x16xf32>
    %104 = tpu.matmul %103, %87, %cst_38 {dimension_numbers = #tpu.dot_dimension_numbers<[2], [1], [1], [2], [0, 0, 0, 1, 1, 2], [0], [0]>} : vector<16x16x16xbf16>, vector<16x16x16xbf16>, vector<16x16x16xf32> -> vector<16x16x16xf32>
    "tpu.trace_stop"() : () -> ()
    %105 = vector.shape_cast %104 : vector<16x16x16xf32> to vector<256x16xf32>
    %106 = arith.truncf %105 : vector<256x16xf32> to vector<256x16xbf16>
    %c0_39 = arith.constant 0 : index
    %c48 = arith.constant 48 : index
    %107 = vector.load %arg8[%c0_39, %c48] : memref<256x64xbf16, #tpu.memory_space<vmem>>, vector<256x16xbf16>
    tpu.vector_store %arg8[%c0_39, %c48], %106 {strides = array<i32>} : memref<256x64xbf16, #tpu.memory_space<vmem>>, vector<256x16xbf16>,
    %c0_40 = arith.constant 0 : index
    %c0_41 = arith.constant 0 : index
    %108 = vector.load %arg8[%c0_40, %c0_41] : memref<256x64xbf16, #tpu.memory_space<vmem>>, vector<256x64xbf16>
    %c0_42 = arith.constant 0 : index
    %c0_43 = arith.constant 0 : index
    %109 = vector.load %arg4[%c0_42, %c0_43] : memref<64x64xbf16, #tpu.memory_space<vmem>>, vector<64x64xbf16>
    %cst_44 = arith.constant dense<0.000000e+00> : vector<256x64xf32>
    %110 = tpu.matmul %108, %109, %cst_44 {dimension_numbers = #tpu.dot_dimension_numbers<[1], [0], [0], [1], [0, 0, 1, 1], [], []>} : vector<256x64xbf16>, vector<64x64xbf16>, vector<256x64xf32> -> vector<256x64xf32>
    %c0_45 = arith.constant 0 : index
    %c0_46 = arith.constant 0 : index
    %111 = vector.load %arg5[%c0_45, %c0_46] : memref<1x64xf32, #tpu.memory_space<vmem>>, vector<1x64xf32>
    %112 = vector.broadcast %111 : vector<1x64xf32> to vector<256x64xf32>
    %113 = arith.addf %110, %112 : vector<256x64xf32>
    %114 = vector.shape_cast %113 : vector<256x64xf32> to vector<16x16x64xf32>
    %c0_47 = arith.constant 0 : index
    %c0_48 = arith.constant 0 : index
    %c0_49 = arith.constant 0 : index
    %115 = vector.load %arg6[%c0_47, %c0_48, %c0_49] : memref<16x16x64xf32, #tpu.memory_space<vmem>>, vector<16x16x64xf32>
    tpu.vector_store %arg6[%c0_47, %c0_48, %c0_49], %114 {strides = array<i32>} : memref<16x16x64xf32, #tpu.memory_space<vmem>>, vector<16x16x64xf32>,
    return
  }
  func.func @transform_0(%arg0: i32) -> (i32, i32, i32) {
    %c0_i32 = arith.constant 0 : i32
    %c0_i32_0 = arith.constant 0 : i32
    %c0_i32_1 = arith.constant 0 : i32
    return %arg0, %c0_i32, %c0_i32_0 : i32, i32, i32
  }
  func.func @transform_1(%arg0: i32) -> (i32, i32) {
    %c0_i32 = arith.constant 0 : i32
    %c0_i32_0 = arith.constant 0 : i32
    %c0_i32_1 = arith.constant 0 : i32
    return %c0_i32, %c0_i32_0 : i32, i32
  }
  func.func @transform_2(%arg0: i32) -> (i32, i32) {
    %c0_i32 = arith.constant 0 : i32
    %c0_i32_0 = arith.constant 0 : i32
    %c0_i32_1 = arith.constant 0 : i32
    return %c0_i32, %c0_i32_0 : i32, i32
  }
  func.func @transform_3(%arg0: i32) -> (i32, i32) {
    %c0_i32 = arith.constant 0 : i32
    %c0_i32_0 = arith.constant 0 : i32
    %c0_i32_1 = arith.constant 0 : i32
    return %c0_i32, %c0_i32_0 : i32, i32
  }
  func.func @transform_4(%arg0: i32) -> (i32, i32) {
    %c0_i32 = arith.constant 0 : i32
    %c0_i32_0 = arith.constant 0 : i32
    %c0_i32_1 = arith.constant 0 : i32
    return %c0_i32, %c0_i32_0 : i32, i32
  }
  func.func @transform_5(%arg0: i32) -> (i32, i32, i32) {
    %c0_i32 = arith.constant 0 : i32
    %c0_i32_0 = arith.constant 0 : i32
    %c0_i32_1 = arith.constant 0 : i32
    return %arg0, %c0_i32, %c0_i32_0 : i32, i32, i32
  }
  func.func @transform_6(%arg0: i32) -> (i32, i32, i32, i32) {
    %c0_i32 = arith.constant 0 : i32
    %c0_i32_0 = arith.constant 0 : i32
    %c0_i32_1 = arith.constant 0 : i32
    %c0_i32_2 = arith.constant 0 : i32
    return %arg0, %c0_i32, %c0_i32_0, %c0_i32_1 : i32, i32, i32, i32
  }
}

</mosaic_0001>

<bundles_post_ra>
// kernel: tpu_custom_call.1
= control target key start
LH: loop header
LB: loop body
LE: loop exit
PB: predicated region body
PF: predicated region fallthrough
CT: control target
= control target key end

     0   :  { %12 = vsyncpa [#allocation4], 0  ;;  %s15865_s0 = inlined_call_operand.hbm [shape: bf16[32,16,64], index: 0, kind: input, shape index: {}]   ;;  %s15866_s1 = inlined_call_operand.hbm [shape: bf16[64,192], index: 1, kind: input, shape index: {}]   ;;  %s15867_s2 = inlined_call_operand.vmem [shape: f32[1,192], index: 2, kind: input, shape index: {}]   ;;  %s15868_s3 = inlined_call_operand.hbm [shape: bf16[64,64], index: 3, kind: input, shape index: {}]   ;;  %s15869_s4 = inlined_call_operand.vmem [shape: f32[1,64], index: 4, kind: input, shape index: {}]   ;;  %s15870_s5 = inlined_call_operand.hbm [shape: f32[32,16,64], index: 5, kind: output, shape index: {0}]   ;;  %s15871_s6 = inlined_call_operand.vmem [shape: bf16[32,4,16,16], index: 6, kind: output, shape index: {1}]  }
   0x1   :  { %14 = vsyncpa [#allocation4 + $0x1], 0 }
   0x2   :  { %15 = vsyncpa [#allocation7], 0 }
   0x3   :  { %16 = vsyncpa [#allocation5], 0 }
   0x4   :  { %18 = vsyncpa [#allocation5 + $0x1], 0  ;;  %s12305_s21 = smov 0   ;;  %s12307_s22 = smov 0  }
   0x5   :  { %s12309_s23 = smov 0   ;;  %s12311_s24 = smov 0  }
   0x6 LB: > { %s12326_s25 = sadd.s32 4294967295, %s12248_s24   ;;  %s9804_s26 = sadd.s32 4294967294, %s12248_s24   ;;  %s12248_s24 = sphi %s12311_s24, %s16192_s24   ;;  %s12244_s23 = sphi %s12309_s23, %s16191_s23   ;;  %s12240_s22 = sphi %s12307_s22, %s16190_s22   ;;  %s12236_s21 = sphi %s12305_s21, %s16189_s21  }
   0x7   : > { %p44_p0 = scmp.ne.s32.totalorder %s12240_s22, %s12236_s21  ;;  %p15872_p1 = scmp.eq.s32.totalorder %s12326_s25, 0 }
   0x8   : > { %p158_p3 = scmp.eq.s32.totalorder %s9804_s26, 1  ;;  %p9805_p5 = scmp.ge.s32.totalorder %s12248_s24, 1 }
   0x9   : > { %p12335_p4 = por %p15872_p1, %p44_p0  ;;  %p191_p7 = scmp.lt.s32.totalorder %s12248_s24, 3 }
   0xa   : > { %p12340_p6 = por %p158_p3, %p44_p0  ;;  %s12250_s30 = smov [#allocation6]  }
   0xb   : > { %s15948_s27 = scalar_select %p12335_p4, 1, 0 }
   0xc   : > { %s15949_s28 = scalar_select %p12340_p6, 1, 0 }
   0xd   : > { %p12345_p8 = pnand %p9805_p5, %p191_p7  ;;  %s203_s7 = sshll.u32 %s12250_s30, 4  ;;  %s12349_s7 = int_to_ptr.vmem [resolvable:$true] %s203_s7 }
   0xe   : > { %s12251_s9 = smov [#allocation8]   ;;  %s12092_s13 = scalar_lea.hbm %s15866_s1, 1024 }
   0xf   : > { %p11477_p9 = pneg %p12345_p8  ;;  %s219_s10 = sshll.u32 %s12251_s9, 4  ;;  %s12360_s10 = int_to_ptr.vmem [resolvable:$true] %s219_s10 }
  0x10   : > { %p12093_p12 = scmp.ne.s32.totalorder %s15866_s1, %s12092_s13  ;;  %p12099_p5 = scmp.lt.u32.totalorder %s12092_s13, %s15866_s1 }
  0x11   : > { %p12356_p11 = pnand %p11477_p9, %p15872_p1 }
  0x13   : > { %p12094_p13 = pneg %p12356_p11 }
  0x15   : > { %p12095_p0 = pnand %p12094_p13, %p12093_p12 }
  0x17   : > { %p12096_p3 = pneg %p12095_p0 }
  0x19   : > { %p12101_p7 = pnand %p12099_p5, %p12096_p3 }
  0x1b   : > { %12104 = shalt.err (!%p12101_p7)
}
  0x1c   : > { %s12105_s18 = scalar_lea.vmem %s12349_s7, 1024  ;;  %p12113_p2 = scmp.lt.s32.totalorder %s12349_s7, %s12349_s7 }
  0x1d   : > { %p12106_p9 = scmp.ne.s32.totalorder %s12349_s7, %s12105_s18  ;;  %p12114_p12 = scmp.lt.s32.totalorder %s12105_s18, %s12105_s18 }
  0x1f   : > { %p12108_p10 = pnand %p12106_p9, %p12094_p13  ;;  %p12115_p0 = por %p12114_p12, %p12113_p2 }
  0x21   : > { %p12109_p1 = pneg %p12108_p10 }
  0x23   : > { %p12116_p6 = pnand %p12115_p0, %p12109_p1 }
  0x25   : > { %12119 = shalt.err (!%p12116_p6)
}
  0x26   : > { %s12252_s19 = smov 128   ;;  %s12253_s20 = smov 8  }
  0x27   : > { %11480 = dma.hbm_to_vmem [thread:$0]  (!%p12356_p11), %s15866_s1, 1024, %s12349_s7, [#allocation7], %s12252_s19, %s12252_s19, %s12253_s20  }
  0x28   : > { %s12120_s12 = scalar_lea.hbm %s15868_s3, 512 }
  0x29   : > { %p12121_p2 = scmp.ne.s32.totalorder %s15868_s3, %s12120_s12  ;;  %p12127_p10 = scmp.lt.u32.totalorder %s12120_s12, %s15868_s3 }
  0x2b   : > { %p12123_p1 = pnand %p12121_p2, %p12094_p13 }
  0x2d   : > { %p12124_p6 = pneg %p12123_p1 }
  0x2f   : > { %p12129_p3 = pnand %p12127_p10, %p12124_p6 }
  0x31   : > { %12132 = shalt.err (!%p12129_p3)
}
  0x32   : > { %s12133_s7 = scalar_lea.vmem %s12360_s10, 512  ;;  %p12141_p12 = scmp.lt.s32.totalorder %s12360_s10, %s12360_s10 }
  0x33   : > { %p12134_p5 = scmp.ne.s32.totalorder %s12360_s10, %s12133_s7  ;;  %p12142_p0 = scmp.lt.s32.totalorder %s12133_s7, %s12133_s7 }
  0x35   : > { %p12136_p7 = pnand %p12134_p5, %p12094_p13  ;;  %p12143_p2 = por %p12142_p0, %p12141_p12 }
  0x37   : > { %p12137_p9 = pneg %p12136_p7 }
  0x39   : > { %p12144_p1 = pnand %p12143_p2, %p12137_p9 }
  0x3b   : > { %12147 = shalt.err (!%p12144_p1)
}
  0x3c   : > { %s12254_s17 = smov 64   ;;  %s12255_s18 = smov 4  }
  0x3d   : > { %11483 = dma.hbm_to_vmem [thread:$0]  (!%p12356_p11), %s15868_s3, 512, %s12360_s10, [#allocation7], %s12254_s17, %s12254_s17, %s12255_s18  }
  0x3e   : > { %s12418_s26 = sadd.s32 1, %s12248_s24   ;;  %s31_s9 = sadd.s32 1, %s12244_s23 }
  0x3f   : > { %s28_s30 = ssub.s32 %s12248_s24, %s12418_s26  ;;  %p38_p6 = scmp.ne.s32.totalorder %s12244_s23, %s12240_s22 }
  0x40   : > { %p29_p13 = scmp.eq.s32.totalorder %s28_s30, 0  ;;  %p39_p10 = scmp.eq.s32.totalorder %s12248_s24, 0 }
  0x41   : > { %p15952_p5 = scmp.eq.s32.totalorder %s12326_s25, 1  ;;  %p11494_p9 = scmp.lt.s32.totalorder %s12248_s24, 2 }
  0x42   : > { %s12427_s11 = scalar_select %p29_p13, %s12244_s23, %s31_s9  }
  0x43   : > { %p40_p3 = por %p39_p10, %p38_p6  ;;  %p12431_p7 = por %p15952_p5, %p38_p6 }
  0x44   : > { %s236_s12 = sand.u32 1, %s12244_s23   ;;  %s10241_s10 = sshll.u32 %s12248_s24, 11 }
  0x45   : > { %s15953_s8 = scalar_select %p12431_p7, 1, 0 }
  0x46   : > { %s9809_s13 = sshll.u32 %s236_s12, 7  ;;  %s12441_s16 = scalar_lea.hbm %s15865_s0, %s10241_s10 }
  0x47   : > { %s240_s7 = scalar_lea.vmem [#allocation3], %s9809_s13  ;;  %p12445_p11 = pnand %p11494_p9, %p40_p3 }
  0x48   : > { %s248_s19 = sshll.u32 %s240_s7, 4  ;;  %s12449_s30 = scalar_lea.sflag [#allocation4], %s236_s12  ;;  %s12443_s19 = int_to_ptr.vmem [resolvable:$true] %s248_s19 }
  0x49   : > { %s12148_s9 = scalar_lea.hbm %s12441_s16, 2048  ;;  %p12150_p0 = pneg %p12445_p11 }
  0x4a   : > { %p12149_p12 = scmp.ne.s32.totalorder %s12441_s16, %s12148_s9  ;;  %s12153_s14 = scalar_lea.hbm %s15865_s0, 4096 }
  0x4b   : > { %p12154_p13 = scmp.lt.u32.totalorder %s12441_s16, %s15865_s0  ;;  %p12155_p6 = scmp.lt.u32.totalorder %s12153_s14, %s12148_s9 }
  0x4c   : > { %p12151_p2 = pnand %p12150_p0, %p12149_p12  ;;  %p12157_p3 = scmp.lt.u32.totalorder %s12148_s9, %s12441_s16 }
  0x4d   : > { %p12156_p10 = por %p12155_p6, %p12154_p13 }
  0x4e   : > { %p12152_p1 = pneg %p12151_p2 }
  0x4f   : > { %p12158_p5 = por %p12157_p3, %p12156_p10 }
  0x51   : > { %p12159_p9 = pnand %p12158_p5, %p12152_p1 }
  0x53   : > { %12162 = shalt.err (!%p12159_p9)
}
  0x54   : > { %s12163_s12 = scalar_lea.vmem %s12443_s19, 2048  ;;  %s12256_s13 = smov [#allocation3]  }
  0x55   : > { %p12164_p12 = scmp.ne.s32.totalorder %s12443_s19, %s12163_s12  ;;  %s12168_s10 = sshll.u32 %s12256_s13, 4  ;;  %s12169_s10 = int_to_ptr.vmem [resolvable:$false] %s12168_s10 }
  0x56   : > { %s12170_s15 = scalar_lea.vmem %s12169_s10, 4096  ;;  %p12171_p4 = scmp.lt.s32.totalorder %s12443_s19, %s12169_s10 }
  0x57   : > { %p12166_p2 = pnand %p12164_p12, %p12150_p0  ;;  %p12172_p13 = scmp.lt.s32.totalorder %s12170_s15, %s12163_s12 }
  0x59   : > { %p12167_p7 = pneg %p12166_p2  ;;  %p12173_p6 = por %p12172_p13, %p12171_p4 }
  0x5b   : > { %p12174_p10 = pnand %p12173_p6, %p12167_p7 }
  0x5d   : > { %12177 = shalt.err (!%p12174_p10)
}
  0x5e   : > { %11487 = dma.hbm_to_vmem [thread:$0]  (!%p12445_p11), %s12441_s16, 2048, %s12443_s19, %s12449_s30, %s12254_s17, %s12254_s17, %s12255_s18  }
  0x5f   : > { %260 = sbr.rel (%p12345_p8) target bundleno = 3494 (0xda6), region = 40 }
  0x66   : > { %s12483_s9 = sand.u32 1, %s12240_s22   ;;  %p15955_p4 = scmp.ne.s32.totalorder %s15948_s27, 0 }
  0x67   : > { %s9814_s14 = sshll.u32 %s12483_s9, 7  ;;  %s263_s7 = scalar_lea.sflag [#allocation4], %s12483_s9 }
  0x68   : > { %s12487_s12 = scalar_lea.vmem [#allocation3], %s9814_s14 }
  0x69   : > { %12223 = dma.done.wait (%p15955_p4), %s263_s7, 2048  }
  0x6a   : > { %12225 = vsyncadd (%p15955_p4), %s263_s7, 4294965248  ;;  %p15956_p7 = scmp.eq.s32.totalorder %s12326_s25, 0 }
  0x6c   : > { %12227 = dma.done.wait (%p15956_p7), [#allocation7], 1536   ;;  %p15957_p8 = pmov %p15956_p7 }
  0x6d   : > { %v12257_v0 = vmov 0   ;;  %v11548_v1 = vld [vmem:[#allocation6 + $0x4] ss:$8 sps:$4 sm:$0xff]   ;;  %v11550_v2 = vld [vmem:[#allocation6] ss:$8 sps:$4 sm:$0xff]   ;;  %vm491_vm0 = vcmask 523264   ;;  %v361_v25 = vlaneseq }
  0x6e   : > { %12229 = vsyncadd (%p15957_p8), [#allocation7], 4294965760  ;;  %572 = vmatprep.mubr.bf16.mxu0 %v12257_v0  ;;  %540 = vmatprep.subr.bf16.mxu0 %v11548_v1  ;;  %v11551_v3 = vld [vmem:[#allocation6 + $0x14] ss:$8 sps:$4 sm:$0xff]   ;;  %v11553_v4 = vld [vmem:[#allocation6 + $0x10] ss:$8 sps:$4 sm:$0xff]  }
  0x6f   : > { %541 = vmatpush1.bf16.msra.mxu0 %v11550_v2  ;;  %v11554_v5 = vld [vmem:[#allocation6 + $0x24] ss:$8 sps:$4 sm:$0xff]   ;;  %v11556_v6 = vld [vmem:[#allocation6 + $0x20] ss:$8 sps:$4 sm:$0xff]   ;;  %v11557_v7 = vld [vmem:[#allocation6 + $0x34] ss:$8 sps:$4 sm:$0xff]  }
  0x70   : > { %542 = vmatprep.subr.bf16.mxu0 %v11551_v3  ;;  %v11559_v8 = vld [vmem:[#allocation6 + $0x30] ss:$8 sps:$4 sm:$0xff]   ;;  %v11560_v9 = vld [vmem:[%s12487_s12] sm:$0xff]   ;;  %v11561_v10 = vld [vmem:[%s12487_s12 + $0x8] sm:$0xff]   ;;  %v362_v26 = vshrl.u32 %v361_v25, 7  ;;  %v15875_v27 = vmov 0.0  }
  0x71   : > { %v11562_v11 = vld [vmem:[%s12487_s12 + $0x10] sm:$0xff]   ;;  %v11563_v12 = vld [vmem:[%s12487_s12 + $0x18] sm:$0xff]   ;;  %v11564_v13 = vld [vmem:[%s12487_s12 + $0x20] sm:$0xff]   ;;  %10649 = vmatprep.subr.bf16.mxu1 %v15875_v27  ;;  %vm12259_vm1 = vmmov 0   ;;  %s12260_s17 = smov 112   ;;  %vm768_vm2 = vcmask 130048  }
  0x72   : > { %v11565_v14 = vld [vmem:[%s12487_s12 + $0x28] sm:$0xff]   ;;  %v11566_v15 = vld [vmem:[%s12487_s12 + $0x30] sm:$0xff]   ;;  %v11567_v16 = vld [vmem:[%s12487_s12 + $0x38] sm:$0xff]   ;;  %v363_v28 = vsub.s32 0, %v362_v26  ;;  %v367_v30 = vsub.s32 1, %v362_v26  ;;  %10651 = vmatprep.mubr.msk.bf16.mxu1 %vm12259_vm1, %v15875_v27  ;;  %s12261_s18 = smov 96  }
  0x73   : > { %543 = vmatpush1.bf16.msra.mxu0 %v11553_v4  ;;  %v11568_v17 = vld [vmem:[%s12487_s12 + $0x40] sm:$0xff]   ;;  %v11569_v18 = vld [vmem:[%s12487_s12 + $0x48] sm:$0xff]   ;;  %v11570_v19 = vld [vmem:[%s12487_s12 + $0x50] sm:$0xff]   ;;  %s12262_s16 = smov 64   ;;  %s12263_s19 = smov 80   ;;  %vm2046_vm3 = vcmask 125952  }
  0x74   : > { %544 = vmatprep.subr.bf16.mxu0 %v11554_v5  ;;  %v11571_v20 = vld [vmem:[%s12487_s12 + $0x58] sm:$0xff]   ;;  %v11572_v21 = vld [vmem:[%s12487_s12 + $0x60] sm:$0xff]   ;;  %v11573_v22 = vld [vmem:[%s12487_s12 + $0x68] sm:$0xff]   ;;  %s9818_s20 = sshll.u32 %s12326_s25, 4  ;;  %s12264_s14 = smov 48   ;;  %vm5024_vm4 = vcmask 261248  }
  0x75   : > { %v11574_v23 = vld [vmem:[%s12487_s12 + $0x70] sm:$0xff]   ;;  %v11575_v24 = vld [vmem:[%s12487_s12 + $0x78] sm:$0xff]   ;;  %v359_v29 = vld [vmem:[%s15867_s2] sm:$0x3]  ;;  %p312_p11 = scmp.lt.s32.totalorder %s9818_s20, 31  ;;  %s12265_s7 = smov 16  }
  0x76   : > { %v12550_v31 = vrot.slane %v359_v29, %v363_v28  ;;  %v12552_v33 = vrot.slane %v359_v29, %v367_v30  ;;  %s12266_s12 = smov 32   ;;  %vm7154_vm5 = vcmask 392448   ;;  %vm9348_vm6 = vcmask 523648   ;;  %s9817_s27 = sshll.u32 %s12483_s9, 8 }
  0x77   : > { %545 = vmatpush1.bf16.msra.mxu0 %v11556_v6  ;;  %s16194_s20 = smov (!%p312_p11, %s9818_s20), 31  ;;  %p16186_p1 = scmp.ne.s32.totalorder %s15953_s8, 0 }
  0x78   : > { %546 = vmatprep.subr.bf16.mxu0 %v11557_v7  ;;  %s10242_s30 = sshll.u32 %s16194_s20, 5 }
  0x79   : > { %s13199_s15 = scalar_lea.vmem %s15871_s6, %s10242_s30 }
  0x7b   : > { %547 = vmatpush1.bf16.msra.mxu0 %v11559_v8 }
  0x7c   : > { %10751 = vmatprep.subr.bf16.mxu0 %v15875_v27 }
  0x7e   : > { %9845 = vmatmul.mubr.msk.bf16.vlgmr.msra.gmra.mrb[0].mxu0 %vm491_vm0, %v11560_v9 }
  0x7f   : > { %582 = vmatprep.mubr.bf16.mxu0 %v12257_v0 }
  0x86   : > { %9846 = vmatmul.mubr.msk.bf16.gmra.mrb[4].mxu0 %vm491_vm0, %v11561_v10 }
  0x87   : > { %592 = vmatprep.mubr.bf16.mxu0 %v12257_v0 }
  0x8e   : > { %9847 = vmatmul.mubr.msk.bf16.gmra.mrb[8].mxu0 %vm491_vm0, %v11562_v11 }
  0x8f   : > { %602 = vmatprep.mubr.bf16.mxu0 %v12257_v0 }
  0x96   : > { %9848 = vmatmul.mubr.msk.bf16.gmra.mrb[12].mxu0 %vm491_vm0, %v11563_v12 }
  0x97   : > { %612 = vmatprep.mubr.bf16.mxu0 %v12257_v0 }
  0x9e   : > { %9849 = vmatmul.mubr.msk.bf16.gmra.mrb[16].mxu0 %vm491_vm0, %v11564_v13 }
  0x9f   : > { %622 = vmatprep.mubr.bf16.mxu0 %v12257_v0 }
  0xa6   : > { %9850 = vmatmul.mubr.msk.bf16.gmra.mrb[20].mxu0 %vm491_vm0, %v11565_v14 }
  0xa7   : > { %632 = vmatprep.mubr.bf16.mxu0 %v12257_v0 }
  0xae   : > { %9851 = vmatmul.mubr.msk.bf16.gmra.mrb[24].mxu0 %vm491_vm0, %v11566_v15 }
  0xaf   : > { %642 = vmatprep.mubr.bf16.mxu0 %v12257_v0 }
  0xb6   : > { %9852 = vmatmul.mubr.msk.bf16.gmra.mrb[28].mxu0 %vm491_vm0, %v11567_v16 }
  0xb7   : > { %652 = vmatprep.mubr.bf16.mxu0 %v12257_v0 }
  0xbe   : > { %9853 = vmatmul.mubr.msk.bf16.gmra.mrb[32].mxu0 %vm491_vm0, %v11568_v17 }
  0xbf   : > { %662 = vmatprep.mubr.bf16.mxu0 %v12257_v0 }
  0xc6   : > { %9854 = vmatmul.mubr.msk.bf16.gmra.mrb[36].mxu0 %vm491_vm0, %v11569_v18 }
  0xc7   : > { %672 = vmatprep.mubr.bf16.mxu0 %v12257_v0 }
  0xce   : > { %9855 = vmatmul.mubr.msk.bf16.gmra.mrb[40].mxu0 %vm491_vm0, %v11570_v19 }
  0xcf   : > { %682 = vmatprep.mubr.bf16.mxu0 %v12257_v0 }
  0xd6   : > { %9856 = vmatmul.mubr.msk.bf16.gmra.mrb[44].mxu0 %vm491_vm0, %v11571_v20 }
  0xd7   : > { %692 = vmatprep.mubr.bf16.mxu0 %v12257_v0 }
  0xde   : > { %9857 = vmatmul.mubr.msk.bf16.gmra.mrb[48].mxu0 %vm491_vm0, %v11572_v21 }
  0xdf   : > { %702 = vmatprep.mubr.bf16.mxu0 %v12257_v0 }
  0xe6   : > { %9858 = vmatmul.mubr.msk.bf16.gmra.mrb[52].mxu0 %vm491_vm0, %v11573_v22 }
  0xe7   : > { %712 = vmatprep.mubr.bf16.mxu0 %v12257_v0 }
  0xee   : > { %9859 = vmatmul.mubr.msk.bf16.gmra.mrb[56].mxu0 %vm491_vm0, %v11574_v23 }
  0xef   : > { %722 = vmatprep.mubr.bf16.mxu0 %v12257_v0 }
  0xf6   : > { %9860 = vmatmul.mubr.msk.bf16.gmra.mrb[60].mxu0 %vm491_vm0, %v11575_v24 }
  0xf7   : > { %10753 = vmatprep.mubr.msk.bf16.mxu0 %vm12259_vm1, %v15875_v27 }
 0x151   : > { %v574_v32 = vpop.f32.mrb[0].mxu0 }
 0x152   : > { %v576_v34 = vpop.f32.mrb[1].mxu0  ;;  %v575_v36 = vadd.f32 %v574_v32, %v12550_v31 }
 0x153   : > { %v578_v35 = vpop.f32.mrb[2].mxu0  ;;  %v577_v39 = vadd.f32 %v576_v34, %v12552_v33 }
 0x154   : > { %v579_v37 = vadd.f32 %v578_v35, %v12550_v31  ;;  %v580_v38 = vpop.f32.mrb[3].mxu0 }
 0x155   : > { %v581_v40 = vadd.f32 %v580_v38, %v12552_v33 }
 0x156   : > { %v12562_v41 = vpack.c.bf16 %v579_v37, %v575_v36 }
 0x157   : > { %v12564_v42 = vpack.c.bf16 %v581_v40, %v577_v39 }
 0x158   : > { %766 = vrot.lane.b32.xlu0 %v12562_v41, %s12260_s17 }
 0x159   : > { %15958 = vst [vmem:[#allocation13_spill] sm:$0xff] %v12564_v42  ;;  %v584_v43 = vpop.f32.mrb[4].mxu0 }
 0x15a   : > { %v586_v44 = vpop.f32.mrb[5].mxu0  ;;  %v585_v46 = vadd.f32 %v584_v43, %v12550_v31 }
 0x15b   : > { %v588_v45 = vpop.f32.mrb[6].mxu0  ;;  %v587_v49 = vadd.f32 %v586_v44, %v12552_v33 }
 0x15c   : > { %v589_v47 = vadd.f32 %v588_v45, %v12550_v31  ;;  %v590_v48 = vpop.f32.mrb[7].mxu0 }
 0x15d   : > { %v591_v50 = vadd.f32 %v590_v48, %v12552_v33 }
 0x15e   : > { %v12572_v51 = vpack.c.bf16 %v589_v47, %v585_v46 }
 0x15f   : > { %v12574_v52 = vpack.c.bf16 %v591_v50, %v587_v49 }
 0x160   : > { %817 = vrot.lane.b32.xlu0 %v12572_v51, %s12260_s17 }
 0x161   : > { %15959 = vst [vmem:[#allocation14_spill] sm:$0xff] %v12574_v52  ;;  %v594_v53 = vpop.f32.mrb[8].mxu0 }
 0x162   : > { %v596_v54 = vpop.f32.mrb[9].mxu0  ;;  %v595_v56 = vadd.f32 %v594_v53, %v12550_v31 }
 0x163   : > { %v598_v55 = vpop.f32.mrb[10].mxu0  ;;  %v597_v59 = vadd.f32 %v596_v54, %v12552_v33 }
 0x164   : > { %v599_v57 = vadd.f32 %v598_v55, %v12550_v31  ;;  %v600_v58 = vpop.f32.mrb[11].mxu0 }
 0x165   : > { %v601_v60 = vadd.f32 %v600_v58, %v12552_v33 }
 0x166   : > { %v12582_v61 = vpack.c.bf16 %v599_v57, %v595_v56 }
 0x167   : > { %v12584_v62 = vpack.c.bf16 %v601_v60, %v597_v59 }
 0x168   : > { %867 = vrot.lane.b32.xlu1 %v12582_v61, %s12260_s17 }
 0x169   : > { %15960 = vst [vmem:[#allocation15_spill] sm:$0xff] %v12584_v62  ;;  %v604_v63 = vpop.f32.mrb[12].mxu0 }
 0x16a   : > { %v606_v0 = vpop.f32.mrb[13].mxu0  ;;  %v605_v2 = vadd.f32 %v604_v63, %v12550_v31 }
 0x16b   : > { %v608_v1 = vpop.f32.mrb[14].mxu0  ;;  %v607_v5 = vadd.f32 %v606_v0, %v12552_v33 }
 0x16c   : > { %v609_v3 = vadd.f32 %v608_v1, %v12550_v31  ;;  %v610_v4 = vpop.f32.mrb[15].mxu0 }
 0x16d   : > { %v611_v6 = vadd.f32 %v610_v4, %v12552_v33 }
 0x16e   : > { %v12592_v7 = vpack.c.bf16 %v609_v3, %v605_v2 }
 0x16f   : > { %v12594_v8 = vpack.c.bf16 %v611_v6, %v607_v5 }
 0x170   : > { %917 = vrot.lane.b32.xlu1 %v12592_v7, %s12260_s17 }
 0x171   : > { %15961 = vst [vmem:[#allocation16_spill] sm:$0xff] %v12594_v8  ;;  %v614_v9 = vpop.f32.mrb[16].mxu0 }
 0x172   : > { %v616_v10 = vpop.f32.mrb[17].mxu0  ;;  %v615_v12 = vadd.f32 %v614_v9, %v12550_v31 }
 0x173   : > { %v618_v11 = vpop.f32.mrb[18].mxu0  ;;  %v617_v15 = vadd.f32 %v616_v10, %v12552_v33 }
 0x174   : > { %v619_v13 = vadd.f32 %v618_v11, %v12550_v31  ;;  %v620_v14 = vpop.f32.mrb[19].mxu0 }
 0x175   : > { %v621_v16 = vadd.f32 %v620_v14, %v12552_v33 }
 0x176   : > { %v12602_v17 = vpack.c.bf16 %v619_v13, %v615_v12 }
 0x177   : > { %v12604_v18 = vpack.c.bf16 %v621_v16, %v617_v15 }
 0x178   : > { %967 = vrot.lane.b32.xlu0 %v12602_v17, %s12260_s17 }
 0x179   : > { %15962 = vst [vmem:[#allocation17_spill] sm:$0xff] %v12604_v18  ;;  %v624_v19 = vpop.f32.mrb[20].mxu0 }
 0x17a   : > { %v626_v20 = vpop.f32.mrb[21].mxu0  ;;  %v625_v22 = vadd.f32 %v624_v19, %v12550_v31 }
 0x17b   : > { %v628_v21 = vpop.f32.mrb[22].mxu0  ;;  %v627_v25 = vadd.f32 %v626_v20, %v12552_v33 }
 0x17c   : > { %v629_v23 = vadd.f32 %v628_v21, %v12550_v31  ;;  %v630_v24 = vpop.f32.mrb[23].mxu0 }
 0x17d   : > { %v631_v26 = vadd.f32 %v630_v24, %v12552_v33 }
 0x17e   : > { %v12612_v28 = vpack.c.bf16 %v629_v23, %v625_v22 }
 0x17f   : > { %v12614_v29 = vpack.c.bf16 %v631_v26, %v627_v25 }
 0x180   : > { %1017 = vrot.lane.b32.xlu1 %v12612_v28, %s12260_s17 }
 0x181   : > { %15963 = vst [vmem:[#allocation18_spill] sm:$0xff] %v12614_v29  ;;  %v634_v30 = vpop.f32.mrb[24].mxu0 }
 0x182   : > { %v636_v32 = vpop.f32.mrb[25].mxu0  ;;  %v635_v35 = vadd.f32 %v634_v30, %v12550_v31 }
 0x183   : > { %v638_v34 = vpop.f32.mrb[26].mxu0  ;;  %v637_v38 = vadd.f32 %v636_v32, %v12552_v33 }
 0x184   : > { %v639_v36 = vadd.f32 %v638_v34, %v12550_v31  ;;  %v640_v37 = vpop.f32.mrb[27].mxu0 }
 0x185   : > { %v641_v39 = vadd.f32 %v640_v37, %v12552_v33 }
 0x186   : > { %v12622_v40 = vpack.c.bf16 %v639_v36, %v635_v35 }
 0x187   : > { %v12624_v43 = vpack.c.bf16 %v641_v39, %v637_v38 }
 0x188   : > { %1067 = vrot.lane.b32.xlu0 %v12622_v40, %s12260_s17 }
 0x189   : > { %15964 = vst [vmem:[#allocation19_spill] sm:$0xff] %v12624_v43  ;;  %v644_v44 = vpop.f32.mrb[28].mxu0 }
 0x18a   : > { %v646_v45 = vpop.f32.mrb[29].mxu0  ;;  %v645_v47 = vadd.f32 %v644_v44, %v12550_v31 }
 0x18b   : > { %v648_v46 = vpop.f32.mrb[30].mxu0  ;;  %v647_v50 = vadd.f32 %v646_v45, %v12552_v33 }
 0x18c   : > { %v649_v48 = vadd.f32 %v648_v46, %v12550_v31  ;;  %v650_v49 = vpop.f32.mrb[31].mxu0 }
 0x18d   : > { %v651_v53 = vadd.f32 %v650_v49, %v12552_v33 }
 0x18e   : > { %v12632_v54 = vpack.c.bf16 %v649_v48, %v645_v47 }
 0x18f   : > { %v12634_v55 = vpack.c.bf16 %v651_v53, %v647_v50 }
 0x190   : > { %1117 = vrot.lane.b32.xlu1 %v12632_v54, %s12260_s17 }
 0x191   : > { %15965 = vst [vmem:[#allocation20_spill] sm:$0xff] %v12634_v55  ;;  %v654_v56 = vpop.f32.mrb[32].mxu0 }
 0x192   : > { %v656_v57 = vpop.f32.mrb[33].mxu0  ;;  %v655_v59 = vadd.f32 %v654_v56, %v12550_v31 }
 0x193   : > { %v658_v58 = vpop.f32.mrb[34].mxu0  ;;  %v657_v0 = vadd.f32 %v656_v57, %v12552_v33 }
 0x194   : > { %v659_v60 = vadd.f32 %v658_v58, %v12550_v31  ;;  %v660_v63 = vpop.f32.mrb[35].mxu0 }
 0x195   : > { %v661_v1 = vadd.f32 %v660_v63, %v12552_v33 }
 0x196   : > { %v12642_v2 = vpack.c.bf16 %v659_v60, %v655_v59 }
 0x197   : > { %v12644_v3 = vpack.c.bf16 %v661_v1, %v657_v0 }
 0x198   : > { %1167 = vrot.lane.b32.xlu0 %v12642_v2, %s12260_s17 }
 0x199   : > { %15966 = vst [vmem:[#allocation21_spill] sm:$0xff] %v12644_v3  ;;  %v664_v4 = vpop.f32.mrb[36].mxu0 }
 0x19a   : > { %v666_v5 = vpop.f32.mrb[37].mxu0  ;;  %v665_v9 = vadd.f32 %v664_v4, %v12550_v31 }
 0x19b   : > { %v668_v6 = vpop.f32.mrb[38].mxu0  ;;  %v667_v12 = vadd.f32 %v666_v5, %v12552_v33 }
 0x19c   : > { %v669_v10 = vadd.f32 %v668_v6, %v12550_v31  ;;  %v670_v11 = vpop.f32.mrb[39].mxu0 }
 0x19d   : > { %v671_v13 = vadd.f32 %v670_v11, %v12552_v33 }
 0x19e   : > { %v12652_v14 = vpack.c.bf16 %v669_v10, %v665_v9 }
 0x19f   : > { %v12654_v15 = vpack.c.bf16 %v671_v13, %v667_v12 }
 0x1a0   : > { %1217 = vrot.lane.b32.xlu1 %v12652_v14, %s12260_s17 }
 0x1a1   : > { %15967 = vst [vmem:[#allocation22_spill] sm:$0xff] %v12654_v15  ;;  %v674_v16 = vpop.f32.mrb[40].mxu0 }
 0x1a2   : > { %v676_v19 = vpop.f32.mrb[41].mxu0  ;;  %v675_v21 = vadd.f32 %v674_v16, %v12550_v31 }
 0x1a3   : > { %v678_v20 = vpop.f32.mrb[42].mxu0  ;;  %v677_v24 = vadd.f32 %v676_v19, %v12552_v33 }
 0x1a4   : > { %v679_v22 = vadd.f32 %v678_v20, %v12550_v31  ;;  %v680_v23 = vpop.f32.mrb[43].mxu0 }
 0x1a5   : > { %v681_v25 = vadd.f32 %v680_v23, %v12552_v33 }
 0x1a6   : > { %v12662_v26 = vpack.c.bf16 %v679_v22, %v675_v21 }
 0x1a7   : > { %v12664_v30 = vpack.c.bf16 %v681_v25, %v677_v24 }
 0x1a8   : > { %1267 = vrot.lane.b32.xlu0 %v12662_v26, %s12260_s17 }
 0x1a9   : > { %15968 = vst [vmem:[#allocation23_spill] sm:$0xff] %v12664_v30  ;;  %v684_v32 = vpop.f32.mrb[44].mxu0 }
 0x1aa   : > { %v686_v34 = vpop.f32.mrb[45].mxu0  ;;  %v685_v36 = vadd.f32 %v684_v32, %v12550_v31 }
 0x1ab   : > { %v688_v35 = vpop.f32.mrb[46].mxu0  ;;  %v687_v39 = vadd.f32 %v686_v34, %v12552_v33 }
 0x1ac   : > { %v689_v37 = vadd.f32 %v688_v35, %v12550_v31  ;;  %v690_v38 = vpop.f32.mrb[47].mxu0 }
 0x1ad   : > { %v691_v44 = vadd.f32 %v690_v38, %v12552_v33 }
 0x1ae   : > { %v12672_v45 = vpack.c.bf16 %v689_v37, %v685_v36 }
 0x1af   : > { %v12674_v46 = vpack.c.bf16 %v691_v44, %v687_v39 }
 0x1b0   : > { %1317 = vrot.lane.b32.xlu1 %v12672_v45, %s12260_s17 }
 0x1b1   : > { %15969 = vst [vmem:[#allocation24_spill] sm:$0xff] %v12674_v46  ;;  %v694_v47 = vpop.f32.mrb[48].mxu0 }
 0x1b2   : > { %v696_v48 = vpop.f32.mrb[49].mxu0  ;;  %v695_v50 = vadd.f32 %v694_v47, %v12550_v31 }
 0x1b3   : > { %v698_v49 = vpop.f32.mrb[50].mxu0  ;;  %v697_v57 = vadd.f32 %v696_v48, %v12552_v33 }
 0x1b4   : > { %v699_v53 = vadd.f32 %v698_v49, %v12550_v31  ;;  %v700_v56 = vpop.f32.mrb[51].mxu0 }
 0x1b5   : > { %v701_v58 = vadd.f32 %v700_v56, %v12552_v33 }
 0x1b6   : > { %v12682_v59 = vpack.c.bf16 %v699_v53, %v695_v50 }
 0x1b7   : > { %v12684_v60 = vpack.c.bf16 %v701_v58, %v697_v57 }
 0x1b8   : > { %1367 = vrot.lane.b32.xlu0 %v12682_v59, %s12260_s17 }
 0x1b9   : > { %15970 = vst [vmem:[#allocation25_spill] sm:$0xff] %v12684_v60  ;;  %v704_v63 = vpop.f32.mrb[52].mxu0 }
 0x1ba   : > { %v706_v0 = vpop.f32.mrb[53].mxu0  ;;  %v705_v4 = vadd.f32 %v704_v63, %v12550_v31 }
 0x1bb   : > { %v708_v1 = vpop.f32.mrb[54].mxu0  ;;  %v707_v9 = vadd.f32 %v706_v0, %v12552_v33 }
 0x1bc   : > { %v709_v5 = vadd.f32 %v708_v1, %v12550_v31  ;;  %v710_v6 = vpop.f32.mrb[55].mxu0 }
 0x1bd   : > { %v711_v10 = vadd.f32 %v710_v6, %v12552_v33 }
 0x1be   : > { %v12692_v11 = vpack.c.bf16 %v709_v5, %v705_v4 }
 0x1bf   : > { %v12694_v12 = vpack.c.bf16 %v711_v10, %v707_v9 }
 0x1c0   : > { %15971 = vst [vmem:[#allocation26_spill] sm:$0xff] %v12692_v11  ;;  %1417 = vrot.lane.b32.xlu1 %v12692_v11, %s12260_s17 }
 0x1c1   : > { %15972 = vst [vmem:[#allocation27_spill] sm:$0xff] %v12694_v12  ;;  %v714_v13 = vpop.f32.mrb[56].mxu0 }
 0x1c2   : > { %v716_v16 = vpop.f32.mrb[57].mxu0  ;;  %v715_v20 = vadd.f32 %v714_v13, %v12550_v31 }
 0x1c3   : > { %v718_v19 = vpop.f32.mrb[58].mxu0  ;;  %v717_v23 = vadd.f32 %v716_v16, %v12552_v33 }
 0x1c4   : > { %v719_v21 = vadd.f32 %v718_v19, %v12550_v31  ;;  %v720_v22 = vpop.f32.mrb[59].mxu0 }
 0x1c5   : > { %v721_v24 = vadd.f32 %v720_v22, %v12552_v33 }
 0x1c6   : > { %v12702_v25 = vpack.c.bf16 %v719_v21, %v715_v20 }
 0x1c7   : > { %v12704_v32 = vpack.c.bf16 %v721_v24, %v717_v23 }
 0x1c8   : > { %15973 = vst [vmem:[#allocation28_spill] sm:$0xff] %v12702_v25  ;;  %1467 = vrot.lane.b32.xlu0 %v12702_v25, %s12260_s17 }
 0x1c9   : > { %15974 = vst [vmem:[#allocation29_spill] sm:$0xff] %v12704_v32  ;;  %v724_v34 = vpop.f32.mrb[60].mxu0 }
 0x1ca   : > { %v726_v35 = vpop.f32.mrb[61].mxu0  ;;  %v767_v36 = vpop.permute.xlu0 %766  ;;  %v725_v39 = vadd.f32 %v724_v34, %v12550_v31 }
 0x1cb   : > { %v728_v37 = vpop.f32.mrb[62].mxu0  ;;  %v773_v38 = vsel %vm768_vm2, %v767_v36, 0  ;;  %v727_v48 = vadd.f32 %v726_v35, %v12552_v33 }
 0x1cc   : > { %v729_v44 = vadd.f32 %v728_v37, %v12550_v31  ;;  %v730_v47 = vpop.f32.mrb[63].mxu0  ;;  %2126 = vrot.lane.b32.xlu0 %v12572_v51, %s12261_s18  ;;  %10650 = vmatpush3.bf16.xpose.msra.mxu1 %v773_v38 }
 0x1cd   : > { %v731_v49 = vadd.f32 %v730_v47, %v12552_v33  ;;  %10655 = vmatprep.subr.bf16.mxu1 %v15875_v27 }
 0x1ce   : > { %v12716_v50 = vpack.c.bf16 %v729_v44, %v725_v39 }
 0x1cf   : > { %v12718_v53 = vpack.c.bf16 %v731_v49, %v727_v48 }
 0x1d0   : > { %15975 = vst [vmem:[#allocation30_spill] sm:$0xff] %v12716_v50  ;;  %1517 = vrot.lane.b32.xlu1 %v12716_v50, %s12260_s17  ;;  %2220 = vrot.lane.b32.xlu0 %v12592_v7, %s12261_s18 }
 0x1d1   : > { %15976 = vst [vmem:[#allocation31_spill] sm:$0xff] %v12718_v53 }
 0x1d2   : > { %v818_v31 = vpop.permute.xlu0 %817 }
 0x1d3   : > { %v823_v56 = vsel %vm768_vm2, %v818_v31, 0  ;;  %10652 = vmatmul.mubr.msk.bf16.vlgmr.msra.gmra.mrb[0].mxu1 %vm768_vm2, %v12562_v41 }
 0x1d4   : > { %2079 = vrot.lane.b32.xlu1 %v12562_v41, %s12261_s18  ;;  %2314 = vrot.lane.b32.xlu0 %v12612_v28, %s12261_s18 }
 0x1d5   : > { %10656 = vmatpush3.bf16.xpose.msra.mxu1 %v823_v56  ;;  %10657 = vmatprep.mubr.msk.bf16.mxu1 %vm12259_vm1, %v15875_v27 }
 0x1d6   : > { %10661 = vmatprep.subr.bf16.mxu1 %v15875_v27 }
 0x1d8   : > { %2173 = vrot.lane.b32.xlu1 %v12582_v61, %s12261_s18  ;;  %2408 = vrot.lane.b32.xlu0 %v12632_v54, %s12261_s18 }
 0x1da   : > { %v868_v33 = vpop.permute.xlu1 %867 }
 0x1db   : > { %v873_v57 = vsel %vm768_vm2, %v868_v33, 0 }
 0x1dc   : > { %10658 = vmatmul.mubr.msk.bf16.vlgmr.msra.gmra.mrb[4].mxu1 %vm768_vm2, %v12572_v51  ;;  %2267 = vrot.lane.b32.xlu1 %v12602_v17, %s12261_s18 }
 0x1dd   : > { %2502 = vrot.lane.b32.xlu0 %v12652_v14, %s12261_s18  ;;  %10662 = vmatpush3.bf16.xpose.msra.mxu1 %v873_v57 }
 0x1de   : > { %10663 = vmatprep.mubr.msk.bf16.mxu1 %vm12259_vm1, %v15875_v27  ;;  %10667 = vmatprep.subr.bf16.mxu1 %v15875_v27 }
 0x1e0   : > { %2361 = vrot.lane.b32.xlu1 %v12622_v40, %s12261_s18 }
 0x1e1   : > { %2643 = vrot.lane.b32.xlu0 %v12682_v59, %s12261_s18 }
 0x1e2   : > { %v918_v58 = vpop.permute.xlu1 %917 }
 0x1e3   : > { %v923_v63 = vsel %vm768_vm2, %v918_v58, 0 }
 0x1e4   : > { %10664 = vmatmul.mubr.msk.bf16.vlgmr.msra.gmra.mrb[8].mxu1 %vm768_vm2, %v12582_v61  ;;  %2455 = vrot.lane.b32.xlu1 %v12642_v2, %s12261_s18 }
 0x1e5   : > { %10668 = vmatpush3.bf16.xpose.msra.mxu1 %v923_v63  ;;  %10669 = vmatprep.mubr.msk.bf16.mxu1 %vm12259_vm1, %v15875_v27 }
 0x1e6   : > { %10673 = vmatprep.subr.bf16.mxu1 %v15875_v27 }
 0x1e8   : > { %2549 = vrot.lane.b32.xlu1 %v12662_v26, %s12261_s18 }
 0x1ea   : > { %v968_v0 = vpop.permute.xlu0 %967 }
 0x1eb   : > { %v973_v1 = vsel %vm768_vm2, %v968_v0, 0 }
 0x1ec   : > { %10670 = vmatmul.mubr.msk.bf16.vlgmr.msra.gmra.mrb[12].mxu1 %vm768_vm2, %v12592_v7  ;;  %2596 = vrot.lane.b32.xlu1 %v12672_v45, %s12261_s18 }
 0x1ed   : > { %10674 = vmatpush3.bf16.xpose.msra.mxu1 %v973_v1  ;;  %10675 = vmatprep.mubr.msk.bf16.mxu1 %vm12259_vm1, %v15875_v27 }
 0x1ee   : > { %10679 = vmatprep.subr.bf16.mxu1 %v15875_v27 }
 0x1f0   : > { %2690 = vrot.lane.b32.xlu1 %v12692_v11, %s12261_s18 }
 0x1f2   : > { %v1018_v4 = vpop.permute.xlu1 %1017 }
 0x1f3   : > { %v1023_v5 = vsel %vm768_vm2, %v1018_v4, 0 }
 0x1f4   : > { %10676 = vmatmul.mubr.msk.bf16.vlgmr.msra.gmra.mrb[16].mxu1 %vm768_vm2, %v12602_v17 }
 0x1f5   : > { %10680 = vmatpush3.bf16.xpose.msra.mxu1 %v1023_v5  ;;  %10681 = vmatprep.mubr.msk.bf16.mxu1 %vm12259_vm1, %v15875_v27 }
 0x1f6   : > { %10685 = vmatprep.subr.bf16.mxu1 %v15875_v27 }
 0x1fa   : > { %v1068_v6 = vpop.permute.xlu0 %1067 }
 0x1fb   : > { %v1073_v9 = vsel %vm768_vm2, %v1068_v6, 0 }
 0x1fc   : > { %10682 = vmatmul.mubr.msk.bf16.vlgmr.msra.gmra.mrb[20].mxu1 %vm768_vm2, %v12612_v28 }
 0x1fd   : > { %10686 = vmatpush3.bf16.xpose.msra.mxu1 %v1073_v9  ;;  %10687 = vmatprep.mubr.msk.bf16.mxu1 %vm12259_vm1, %v15875_v27 }
 0x1fe   : > { %10691 = vmatprep.subr.bf16.mxu1 %v15875_v27 }
 0x202   : > { %v1118_v10 = vpop.permute.xlu1 %1117 }
 0x203   : > { %v1123_v13 = vsel %vm768_vm2, %v1118_v10, 0 }
 0x204   : > { %10688 = vmatmul.mubr.msk.bf16.vlgmr.msra.gmra.mrb[24].mxu1 %vm768_vm2, %v12622_v40 }
 0x205   : > { %10692 = vmatpush3.bf16.xpose.msra.mxu1 %v1123_v13  ;;  %10693 = vmatprep.mubr.msk.bf16.mxu1 %vm12259_vm1, %v15875_v27 }
 0x206   : > { %10697 = vmatprep.subr.bf16.mxu1 %v15875_v27 }
 0x20a   : > { %v1168_v16 = vpop.permute.xlu0 %1167 }
 0x20b   : > { %v1173_v19 = vsel %vm768_vm2, %v1168_v16, 0 }
 0x20c   : > { %10694 = vmatmul.mubr.msk.bf16.vlgmr.msra.gmra.mrb[28].mxu1 %vm768_vm2, %v12632_v54 }
 0x20d   : > { %10698 = vmatpush3.bf16.xpose.msra.mxu1 %v1173_v19  ;;  %10699 = vmatprep.mubr.msk.bf16.mxu1 %vm12259_vm1, %v15875_v27 }
 0x20e   : > { %10703 = vmatprep.subr.bf16.mxu1 %v15875_v27 }
 0x212   : > { %v1218_v20 = vpop.permute.xlu1 %1217 }
 0x213   : > { %v1223_v21 = vsel %vm768_vm2, %v1218_v20, 0 }
 0x214   : > { %10700 = vmatmul.mubr.msk.bf16.vlgmr.msra.gmra.mrb[32].mxu1 %vm768_vm2, %v12642_v2 }
 0x215   : > { %10704 = vmatpush3.bf16.xpose.msra.mxu1 %v1223_v21  ;;  %10705 = vmatprep.mubr.msk.bf16.mxu1 %vm12259_vm1, %v15875_v27 }
 0x216   : > { %10709 = vmatprep.subr.bf16.mxu1 %v15875_v27 }
 0x21a   : > { %v1268_v22 = vpop.permute.xlu0 %1267 }
 0x21b   : > { %v1273_v23 = vsel %vm768_vm2, %v1268_v22, 0 }
 0x21c   : > { %10706 = vmatmul.mubr.msk.bf16.vlgmr.msra.gmra.mrb[36].mxu1 %vm768_vm2, %v12652_v14 }
 0x21d   : > { %10710 = vmatpush3.bf16.xpose.msra.mxu1 %v1273_v23  ;;  %10711 = vmatprep.mubr.msk.bf16.mxu1 %vm12259_vm1, %v15875_v27 }
 0x21e   : > { %10715 = vmatprep.subr.bf16.mxu1 %v15875_v27 }
 0x222   : > { %v1318_v24 = vpop.permute.xlu1 %1317 }
 0x223   : > { %v1323_v34 = vsel %vm768_vm2, %v1318_v24, 0 }
 0x224   : > { %10712 = vmatmul.mubr.msk.bf16.vlgmr.msra.gmra.mrb[40].mxu1 %vm768_vm2, %v12662_v26 }
 0x225   : > { %10716 = vmatpush3.bf16.xpose.msra.mxu1 %v1323_v34  ;;  %10717 = vmatprep.mubr.msk.bf16.mxu1 %vm12259_vm1, %v15875_v27 }
 0x226   : > { %10721 = vmatprep.subr.bf16.mxu1 %v15875_v27 }
 0x22a   : > { %v1368_v35 = vpop.permute.xlu0 %1367 }
 0x22b   : > { %v1373_v36 = vsel %vm768_vm2, %v1368_v35, 0 }
 0x22c   : > { %10718 = vmatmul.mubr.msk.bf16.vlgmr.msra.gmra.mrb[44].mxu1 %vm768_vm2, %v12672_v45 }
 0x22d   : > { %10722 = vmatpush3.bf16.xpose.msra.mxu1 %v1373_v36  ;;  %10723 = vmatprep.mubr.msk.bf16.mxu1 %vm12259_vm1, %v15875_v27 }
 0x22e   : > { %10727 = vmatprep.subr.bf16.mxu1 %v15875_v27 }
 0x232   : > { %v1418_v37 = vpop.permute.xlu1 %1417 }
 0x233   : > { %v1423_v38 = vsel %vm768_vm2, %v1418_v37, 0 }
 0x234   : > { %10724 = vmatmul.mubr.msk.bf16.vlgmr.msra.gmra.mrb[48].mxu1 %vm768_vm2, %v12682_v59 }
 0x235   : > { %10728 = vmatpush3.bf16.xpose.msra.mxu1 %v1423_v38  ;;  %10729 = vmatprep.mubr.msk.bf16.mxu1 %vm12259_vm1, %v15875_v27 }
 0x236   : > { %10733 = vmatprep.subr.bf16.mxu1 %v15875_v27 }
 0x23a   : > { %v1468_v39 = vpop.permute.xlu0 %1467 }
 0x23b   : > { %v1473_v44 = vsel %vm768_vm2, %v1468_v39, 0 }
 0x23c   : > { %10730 = vmatmul.mubr.msk.bf16.vlgmr.msra.gmra.mrb[52].mxu1 %vm768_vm2, %v12692_v11 }
 0x23d   : > { %10734 = vmatpush3.bf16.xpose.msra.mxu1 %v1473_v44  ;;  %10735 = vmatprep.mubr.msk.bf16.mxu1 %vm12259_vm1, %v15875_v27 }
 0x23e   : > { %v2127_v47 = vpop.permute.xlu0 %2126  ;;  %10739 = vmatprep.subr.bf16.mxu1 %v15875_v27 }
 0x23f   : > { %10752 = vmatpush3.bf16.msra.mxu0 %v2127_v47 }
 0x240   : > { %10763 = vmatprep.subr.bf16.mxu0 %v15875_v27 }
 0x242   : > { %v1518_v48 = vpop.permute.xlu1 %1517  ;;  %v12968_v30 = vpop.permute.xlu0 %2220 }
 0x243   : > { %v1523_v49 = vsel %vm768_vm2, %v1518_v48, 0 }
 0x244   : > { %10736 = vmatmul.mubr.msk.bf16.vlgmr.msra.gmra.mrb[56].mxu1 %vm768_vm2, %v12702_v25 }
 0x245   : > { %10740 = vmatpush3.bf16.xpose.msra.mxu1 %v1523_v49  ;;  %10741 = vmatprep.mubr.msk.bf16.mxu1 %vm12259_vm1, %v15875_v27 }
 0x246   : > { %10745 = vmatprep.subr.bf16.mxu1 %v15875_v27  ;;  %v2080_v31 = vpop.permute.xlu1 %2079 }
 0x24a   : > { %v12956_v12 = vpop.permute.xlu1 %2173 }
 0x24c   : > { %10742 = vmatmul.mubr.msk.bf16.vlgmr.msra.gmra.mrb[60].mxu1 %vm768_vm2, %v12716_v50 }
 0x24d   : > { %10746 = vmatpush3.bf16.msra.mxu1 %v2080_v31  ;;  %10747 = vmatprep.mubr.msk.bf16.mxu1 %vm12259_vm1, %v15875_v27 }
 0x24e   : > { %10757 = vmatprep.subr.bf16.mxu1 %v15875_v27 }
 0x2a6   : > { %v12844_v56 = vpop.f32.mrb[0].mxu1 }
 0x2a7   : > { %v10653_v33 = vpop.f32.mrb[1].mxu1  ;;  %v1566_v57 = vsel %vm768_vm2, %v12844_v56, -inf }
 0x2a8   : > { %1567 = vmax.xlane.f32.xlu0 %v1566_v57  ;;  %v12848_v58 = vpop.f32.mrb[2].mxu1 }
 0x2a9   : > { %v10654_v63 = vpop.f32.mrb[3].mxu1  ;;  %v1569_v0 = vsel %vm768_vm2, %v12848_v58, -inf }
 0x2aa   : > { %1570 = vmax.xlane.f32.xlu1 %v1569_v0 }
 0x2af   : > { %v12852_v1 = vpop.f32.mrb[4].mxu1 }
 0x2b0   : > { %v10659_v4 = vpop.f32.mrb[5].mxu1  ;;  %v1572_v5 = vsel %vm768_vm2, %v12852_v1, -inf }
 0x2b1   : > { %1573 = vmax.xlane.f32.xlu0 %v1572_v5  ;;  %v12856_v6 = vpop.f32.mrb[6].mxu1 }
 0x2b2   : > { %v10660_v9 = vpop.f32.mrb[7].mxu1  ;;  %v1575_v10 = vsel %vm768_vm2, %v12856_v6, -inf }
 0x2b5   : > { %1576 = vmax.xlane.f32.xlu0 %v1575_v10 }
 0x2b7   : > { %v12860_v13 = vpop.f32.mrb[8].mxu1 }
 0x2b8   : > { %v10665_v16 = vpop.f32.mrb[9].mxu1  ;;  %v1578_v19 = vsel %vm768_vm2, %v12860_v13, -inf }
 0x2b9   : > { %1579 = vmax.xlane.f32.xlu1 %v1578_v19  ;;  %v12864_v20 = vpop.f32.mrb[10].mxu1 }
 0x2ba   : > { %v10666_v21 = vpop.f32.mrb[11].mxu1  ;;  %v1581_v22 = vsel %vm768_vm2, %v12864_v20, -inf }
 0x2bb   : > { %1582 = vmax.xlane.f32.xlu0 %v1581_v22 }
 0x2bf   : > { %v12868_v23 = vpop.f32.mrb[12].mxu1 }
 0x2c0   : > { %v10671_v24 = vpop.f32.mrb[13].mxu1  ;;  %v1584_v34 = vsel %vm768_vm2, %v12868_v23, -inf }
 0x2c1   : > { %1585 = vmax.xlane.f32.xlu1 %v1584_v34  ;;  %v12872_v35 = vpop.f32.mrb[14].mxu1 }
 0x2c2   : > { %v10672_v36 = vpop.f32.mrb[15].mxu1  ;;  %v1587_v37 = vsel %vm768_vm2, %v12872_v35, -inf }
 0x2c3   : > { %1588 = vmax.xlane.f32.xlu0 %v1587_v37 }
 0x2c7   : > { %v12876_v38 = vpop.f32.mrb[16].mxu1 }
 0x2c8   : > { %v10677_v39 = vpop.f32.mrb[17].mxu1  ;;  %v1590_v44 = vsel %vm768_vm2, %v12876_v38, -inf }
 0x2c9   : > { %1591 = vmax.xlane.f32.xlu1 %v1590_v44  ;;  %v12880_v47 = vpop.f32.mrb[18].mxu1 }
 0x2ca   : > { %v10678_v48 = vpop.f32.mrb[19].mxu1  ;;  %v1593_v49 = vsel %vm768_vm2, %v12880_v47, -inf }
 0x2cb   : > { %1594 = vmax.xlane.f32.xlu0 %v1593_v49 }
 0x2cf   : > { %v12884_v31 = vpop.f32.mrb[20].mxu1 }
 0x2d0   : > { %v10683_v33 = vpop.f32.mrb[21].mxu1  ;;  %v1596_v57 = vsel %vm768_vm2, %v12884_v31, -inf }
 0x2d1   : > { %1597 = vmax.xlane.f32.xlu1 %v1596_v57  ;;  %v12888_v63 = vpop.f32.mrb[22].mxu1 }
 0x2d2   : > { %v10684_v0 = vpop.f32.mrb[23].mxu1  ;;  %v1599_v4 = vsel %vm768_vm2, %v12888_v63, -inf }
 0x2d3   : > { %1600 = vmax.xlane.f32.xlu0 %v1599_v4 }
 0x2d7   : > { %v12892_v5 = vpop.f32.mrb[24].mxu1 }
 0x2d8   : > { %v10689_v9 = vpop.f32.mrb[25].mxu1  ;;  %v1602_v10 = vsel %vm768_vm2, %v12892_v5, -inf }
 0x2d9   : > { %1603 = vmax.xlane.f32.xlu1 %v1602_v10  ;;  %v12896_v16 = vpop.f32.mrb[26].mxu1 }
 0x2da   : > { %v10690_v19 = vpop.f32.mrb[27].mxu1  ;;  %v1605_v21 = vsel %vm768_vm2, %v12896_v16, -inf }
 0x2db   : > { %1606 = vmax.xlane.f32.xlu0 %v1605_v21 }
 0x2df   : > { %v12900_v22 = vpop.f32.mrb[28].mxu1 }
 0x2e0   : > { %v10695_v24 = vpop.f32.mrb[29].mxu1  ;;  %v1608_v34 = vsel %vm768_vm2, %v12900_v22, -inf }
 0x2e1   : > { %1609 = vmax.xlane.f32.xlu1 %v1608_v34  ;;  %v12904_v36 = vpop.f32.mrb[30].mxu1 }
 0x2e2   : > { %v10696_v37 = vpop.f32.mrb[31].mxu1  ;;  %v1611_v39 = vsel %vm768_vm2, %v12904_v36, -inf }
 0x2e3   : > { %1612 = vmax.xlane.f32.xlu0 %v1611_v39 }
 0x2e7   : > { %v12908_v44 = vpop.f32.mrb[32].mxu1 }
 0x2e8   : > { %v10701_v48 = vpop.f32.mrb[33].mxu1  ;;  %v1614_v49 = vsel %vm768_vm2, %v12908_v44, -inf }
 0x2e9   : > { %1615 = vmax.xlane.f32.xlu1 %v1614_v49  ;;  %v12912_v33 = vpop.f32.mrb[34].mxu1 }
 0x2ea   : > { %v10702_v57 = vpop.f32.mrb[35].mxu1  ;;  %v1617_v0 = vsel %vm768_vm2, %v12912_v33, -inf }
 0x2eb   : > { %1618 = vmax.xlane.f32.xlu0 %v1617_v0 }
 0x2ef   : > { %v12916_v4 = vpop.f32.mrb[36].mxu1 }
 0x2f0   : > { %v10707_v9 = vpop.f32.mrb[37].mxu1  ;;  %v1620_v10 = vsel %vm768_vm2, %v12916_v4, -inf }
 0x2f1   : > { %1621 = vmax.xlane.f32.xlu1 %v1620_v10  ;;  %v12920_v19 = vpop.f32.mrb[38].mxu1 }
 0x2f2   : > { %v10708_v21 = vpop.f32.mrb[39].mxu1  ;;  %v1623_v24 = vsel %vm768_vm2, %v12920_v19, -inf }
 0x2f3   : > { %1624 = vmax.xlane.f32.xlu0 %v1623_v24 }
 0x2f7   : > { %v12924_v34 = vpop.f32.mrb[40].mxu1 }
 0x2f8   : > { %v10713_v37 = vpop.f32.mrb[41].mxu1  ;;  %v1626_v39 = vsel %vm768_vm2, %v12924_v34, -inf }
 0x2f9   : > { %1627 = vmax.xlane.f32.xlu1 %v1626_v39  ;;  %v12928_v48 = vpop.f32.mrb[42].mxu1 }
 0x2fa   : > { %v10714_v49 = vpop.f32.mrb[43].mxu1  ;;  %v1629_v57 = vsel %vm768_vm2, %v12928_v48, -inf }
 0x2fb   : > { %1630 = vmax.xlane.f32.xlu0 %v1629_v57 }
 0x2ff   : > { %v12932_v0 = vpop.f32.mrb[44].mxu1 }
 0x300   : > { %v10719_v9 = vpop.f32.mrb[45].mxu1  ;;  %v1632_v10 = vsel %vm768_vm2, %v12932_v0, -inf }
 0x301   : > { %1633 = vmax.xlane.f32.xlu1 %v1632_v10  ;;  %v12936_v21 = vpop.f32.mrb[46].mxu1 }
 0x302   : > { %v10720_v24 = vpop.f32.mrb[47].mxu1  ;;  %v1635_v37 = vsel %vm768_vm2, %v12936_v21, -inf }
 0x303   : > { %1636 = vmax.xlane.f32.xlu0 %v1635_v37 }
 0x307   : > { %v12940_v39 = vpop.f32.mrb[48].mxu1 }
 0x308   : > { %v10725_v49 = vpop.f32.mrb[49].mxu1  ;;  %v1638_v57 = vsel %vm768_vm2, %v12940_v39, -inf }
 0x309   : > { %1639 = vmax.xlane.f32.xlu1 %v1638_v57  ;;  %v12944_v27 = vpop.f32.mrb[50].mxu1 }
 0x30a   : > { %v10726_v9 = vpop.f32.mrb[51].mxu1  ;;  %v1641_v10 = vsel %vm768_vm2, %v12944_v27, -inf }
 0x30b   : > { %1642 = vmax.xlane.f32.xlu0 %v1641_v10 }
 0x30f   : > { %v12948_v53 = vpop.f32.mrb[52].mxu1 }
 0x310   : > { %v10731_v24 = vpop.f32.mrb[53].mxu1  ;;  %v1644_v37 = vsel %vm768_vm2, %v12948_v53, -inf }
 0x311   : > { %1645 = vmax.xlane.f32.xlu1 %v1644_v37  ;;  %v12952_v32 = vpop.f32.mrb[54].mxu1 }
 0x312   : > { %v10732_v49 = vpop.f32.mrb[55].mxu1  ;;  %v1647_v57 = vsel %vm768_vm2, %v12952_v32, -inf }
 0x313   : > { %1648 = vmax.xlane.f32.xlu0 %v1647_v57  ;;  %v12966_v49 = vpop.permute.xlu1 %2267 }
 0x317   : > { %v12958_v9 = vpop.f32.mrb[56].mxu1  ;;  %v12978_v55 = vpop.permute.xlu1 %2361 }
 0x318   : > { %v10737_v60 = vpop.f32.mrb[57].mxu1  ;;  %v1650_v10 = vsel %vm768_vm2, %v12958_v9, -inf  ;;  %15977 = vst [vmem:[#allocation32_spill] sm:$0xff] %v12978_v55 }
 0x319   : > { %1651 = vmax.xlane.f32.xlu1 %v1650_v10  ;;  %v12962_v24 = vpop.f32.mrb[58].mxu1 }
 0x31a   : > { %v10738_v46 = vpop.f32.mrb[59].mxu1  ;;  %v1653_v37 = vsel %vm768_vm2, %v12962_v24, -inf }
 0x31b   : > { %1654 = vmax.xlane.f32.xlu0 %v1653_v37  ;;  %v12980_v37 = vpop.permute.xlu0 %2314  ;;  %v12982_v43 = vpop.permute.xlu1 %2455 }
 0x31c   : > { %15978 = vst [vmem:[#allocation33_spill] sm:$0xff] %v12980_v37  ;;  %15979 = vst [vmem:[#allocation34_spill] sm:$0xff] %v12982_v43 }
 0x31f   : > { %v12970_v57 = vpop.f32.mrb[60].mxu1  ;;  %v12984_v29 = vpop.permute.xlu0 %2408 }
 0x320   : > { %v10743_v15 = vpop.f32.mrb[61].mxu1  ;;  %v1656_v60 = vsel %vm768_vm2, %v12970_v57, -inf  ;;  %15980 = vst [vmem:[#allocation35_spill] sm:$0xff] %v12984_v29 }
 0x321   : > { %1657 = vmax.xlane.f32.xlu1 %v1656_v60  ;;  %v12974_v3 = vpop.f32.mrb[62].mxu1  ;;  %v12986_v15 = vpop.permute.xlu1 %2549 }
 0x322   : > { %v10744_v10 = vpop.f32.mrb[63].mxu1  ;;  %v1659_v46 = vsel %vm768_vm2, %v12974_v3, -inf  ;;  %15981 = vst [vmem:[#allocation36_spill] sm:$0xff] %v12986_v15 }
 0x323   : > { %1660 = vmax.xlane.f32.xlu0 %v1659_v46  ;;  %v12988_v18 = vpop.permute.xlu0 %2502 }
 0x324   : > { %15982 = vst [vmem:[#allocation37_spill] sm:$0xff] %v12988_v18 }
 0x325   : > { %v12992_v60 = vpop.permute.xlu1 %2596 }
 0x326   : > { %15983 = vst [vmem:[#allocation38_spill] sm:$0xff] %v12992_v60 }
 0x327   : > { %v12994_v10 = vpop.permute.xlu0 %2643 }
 0x328   : > { %15984 = vst [vmem:[#allocation39_spill] sm:$0xff] %v12994_v10 }
 0x329   : > { %v12998_v8 = vpop.permute.xlu1 %2690 }
 0x32a   : > { %15985 = vst [vmem:[#allocation40_spill] sm:$0xff] %v12998_v8 }
 0x332   : > { %2784 = vrot.lane.b32.xlu1 %v12716_v50, %s12261_s18 }
 0x335   : > { %v1568_v46 = vpop.xlane.xlu0 %1567 }
 0x336   : > { %v1662_v42 = vsub.f32 %v12844_v56, %v1568_v46 }
 0x337   : > { %v1571_v52 = vpop.xlane.xlu1 %1570 }
 0x338   : > { %v1663_v15 = vsub.f32 %v12848_v58, %v1571_v52  ;;  %v1694_v43 = vmul.f32 1.442695, %v1662_v42 }
 0x339   : > { %2737 = vrot.lane.b32.xlu0 %v12702_v25, %s12261_s18 }
 0x33a   : > { %v1696_v50 = vmul.f32 1.442695, %v1663_v15  ;;  %11580 = vpow2.f32 %v1694_v43 }
 0x33c   : > { %11582 = vpow2.f32 %v1696_v50 }
 0x33e   : > { %v1574_v62 = vpop.xlane.xlu0 %1573 }
 0x33f   : > { %v1664_v29 = vsub.f32 %v12852_v1, %v1574_v62 }
 0x341   : > { %v1698_v55 = vmul.f32 1.442695, %v1664_v29 }
 0x342   : > { %v1577_v18 = vpop.xlane.xlu0 %1576 }
 0x343   : > { %v1665_v60 = vsub.f32 %v12856_v6, %v1577_v18  ;;  %11584 = vpow2.f32 %v1698_v55 }
 0x344   : > { %v13008_v29 = vpop.eup %11580 }
 0x345   : > { %v1700_v8 = vmul.f32 1.442695, %v1665_v60  ;;  %v1758_v55 = vsel %vm768_vm2, %v13008_v29, 0.0 }
 0x346   : > { %v1580_v10 = vpop.xlane.xlu1 %1579  ;;  %v13010_v50 = vpop.eup %11582 }
 0x347   : > { %v1666_v25 = vsub.f32 %v12860_v13, %v1580_v10  ;;  %11586 = vpow2.f32 %v1700_v8  ;;  %v1761_v6 = vsel %vm768_vm2, %v13010_v50, 0.0 }
 0x348   : > { %v1583_v37 = vpop.xlane.xlu0 %1582 }
 0x349   : > { %v1667_v11 = vsub.f32 %v12864_v20, %v1583_v37  ;;  %v1702_v56 = vmul.f32 1.442695, %v1666_v25 }
 0x34b   : > { %v1704_v52 = vmul.f32 1.442695, %v1667_v11  ;;  %11588 = vpow2.f32 %v1702_v56 }
 0x34d   : > { %11590 = vpow2.f32 %v1704_v52  ;;  %v13014_v8 = vpop.eup %11584 }
 0x34e   : > { %v1586_v42 = vpop.xlane.xlu1 %1585  ;;  %v1764_v37 = vsel %vm768_vm2, %v13014_v8, 0.0 }
 0x34f   : > { %v1668_v62 = vsub.f32 %v12868_v23, %v1586_v42 }
 0x350   : > { %v1589_v58 = vpop.xlane.xlu0 %1588 }
 0x351   : > { %v1706_v18 = vmul.f32 1.442695, %v1668_v62  ;;  %v1669_v43 = vsub.f32 %v12872_v35, %v1589_v58  ;;  %v13019_v13 = vpop.eup %11586 }
 0x353   : > { %v1708_v1 = vmul.f32 1.442695, %v1669_v43  ;;  %11592 = vpow2.f32 %v1706_v18 }
 0x355   : > { %11594 = vpow2.f32 %v1708_v1  ;;  %v13024_v15 = vpop.eup %11588 }
 0x356   : > { %v1592_v11 = vpop.xlane.xlu1 %1591  ;;  %1759 = vadd.xlane.f32.xlu1 %v1758_v55  ;;  %v1770_v46 = vsel %vm768_vm2, %v13024_v15, 0.0 }
 0x357   : > { %v1670_v25 = vsub.f32 %v12876_v38, %v1592_v11  ;;  %v1767_v38 = vsel %vm768_vm2, %v13019_v13, 0.0  ;;  %v13028_v10 = vpop.eup %11590 }
 0x358   : > { %1762 = vadd.xlane.f32.xlu0 %v1761_v6  ;;  %v1595_v20 = vpop.xlane.xlu0 %1594  ;;  %v1773_v42 = vsel %vm768_vm2, %v13028_v10, 0.0 }
 0x359   : > { %v1710_v23 = vmul.f32 1.442695, %v1670_v25  ;;  %v1671_v35 = vsub.f32 %v12880_v47, %v1595_v20 }
 0x35a   : > { %1765 = vadd.xlane.f32.xlu1 %v1764_v37 }
 0x35b   : > { %11596 = vpow2.f32 %v1710_v23  ;;  %v1712_v60 = vmul.f32 1.442695, %v1671_v35 }
 0x35c   : > { %1768 = vadd.xlane.f32.xlu0 %v1767_v38 }
 0x35d   : > { %11598 = vpow2.f32 %v1712_v60  ;;  %v13032_v56 = vpop.eup %11592 }
 0x35e   : > { %v1598_v47 = vpop.xlane.xlu1 %1597  ;;  %1771 = vadd.xlane.f32.xlu1 %v1770_v46  ;;  %v1776_v1 = vsel %vm768_vm2, %v13032_v56, 0.0 }
 0x35f   : > { %v1672_v52 = vsub.f32 %v12884_v31, %v1598_v47  ;;  %v13037_v62 = vpop.eup %11594 }
 0x360   : > { %1774 = vadd.xlane.f32.xlu0 %v1773_v42  ;;  %v1601_v58 = vpop.xlane.xlu0 %1600  ;;  %v1779_v11 = vsel %vm768_vm2, %v13037_v62, 0.0 }
 0x361   : > { %v1714_v18 = vmul.f32 1.442695, %v1672_v52  ;;  %v1673_v43 = vsub.f32 %v12888_v63, %v1601_v58 }
 0x362   : > { %1777 = vadd.xlane.f32.xlu1 %v1776_v1 }
 0x363   : > { %11600 = vpow2.f32 %v1714_v18  ;;  %v1716_v55 = vmul.f32 1.442695, %v1673_v43 }
 0x364   : > { %1780 = vadd.xlane.f32.xlu0 %v1779_v11 }
 0x365   : > { %v13044_v31 = vpop.eup %11596  ;;  %11602 = vpow2.f32 %v1716_v55 }
 0x366   : > { %v1604_v25 = vpop.xlane.xlu1 %1603  ;;  %v1782_v6 = vsel %vm768_vm2, %v13044_v31, 0.0 }
 0x367   : > { %v13048_v20 = vpop.eup %11598  ;;  %v1674_v63 = vsub.f32 %v12892_v5, %v1604_v25  ;;  %1783 = vadd.xlane.f32.xlu1 %v1782_v6 }
 0x368   : > { %v1607_v23 = vpop.xlane.xlu0 %1606  ;;  %v1785_v35 = vsel %vm768_vm2, %v13048_v20, 0.0 }
 0x369   : > { %v1718_v37 = vmul.f32 1.442695, %v1674_v63  ;;  %v1675_v60 = vsub.f32 %v12896_v16, %v1607_v23  ;;  %1786 = vadd.xlane.f32.xlu0 %v1785_v35 }
 0x36b   : > { %11604 = vpow2.f32 %v1718_v37  ;;  %v1720_v38 = vmul.f32 1.442695, %v1675_v60 }
 0x36d   : > { %v13054_v46 = vpop.eup %11600  ;;  %11606 = vpow2.f32 %v1720_v38 }
 0x36e   : > { %v1610_v47 = vpop.xlane.xlu1 %1609  ;;  %v1788_v52 = vsel %vm768_vm2, %v13054_v46, 0.0 }
 0x36f   : > { %v13058_v42 = vpop.eup %11602  ;;  %v1676_v5 = vsub.f32 %v12900_v22, %v1610_v47  ;;  %1789 = vadd.xlane.f32.xlu1 %v1788_v52 }
 0x370   : > { %v1613_v58 = vpop.xlane.xlu0 %1612  ;;  %v1791_v18 = vsel %vm768_vm2, %v13058_v42, 0.0 }
 0x371   : > { %v1722_v16 = vmul.f32 1.442695, %v1676_v5  ;;  %v1677_v43 = vsub.f32 %v12904_v36, %v1613_v58  ;;  %1792 = vadd.xlane.f32.xlu0 %v1791_v18 }
 0x373   : > { %11608 = vpow2.f32 %v1722_v16  ;;  %v1724_v1 = vmul.f32 1.442695, %v1677_v43 }
 0x375   : > { %v13064_v55 = vpop.eup %11604  ;;  %11610 = vpow2.f32 %v1724_v1 }
 0x376   : > { %v1616_v11 = vpop.xlane.xlu1 %1615  ;;  %v1794_v25 = vsel %vm768_vm2, %v13064_v55, 0.0 }
 0x377   : > { %v13068_v6 = vpop.eup %11606  ;;  %v1678_v22 = vsub.f32 %v12908_v44, %v1616_v11  ;;  %1795 = vadd.xlane.f32.xlu1 %v1794_v25 }
 0x378   : > { %v1619_v63 = vpop.xlane.xlu0 %1618  ;;  %v1797_v23 = vsel %vm768_vm2, %v13068_v6, 0.0 }
 0x379   : > { %v1726_v36 = vmul.f32 1.442695, %v1678_v22  ;;  %v1679_v35 = vsub.f32 %v12912_v33, %v1619_v63  ;;  %1798 = vadd.xlane.f32.xlu0 %v1797_v23 }
 0x37b   : > { %11612 = vpow2.f32 %v1726_v36  ;;  %v1728_v37 = vmul.f32 1.442695, %v1679_v35 }
 0x37d   : > { %v13074_v60 = vpop.eup %11608  ;;  %11614 = vpow2.f32 %v1728_v37 }
 0x37e   : > { %v1622_v38 = vpop.xlane.xlu1 %1621  ;;  %v1800_v47 = vsel %vm768_vm2, %v13074_v60, 0.0 }
 0x37f   : > { %v13078_v52 = vpop.eup %11610  ;;  %v1680_v44 = vsub.f32 %v12916_v4, %v1622_v38  ;;  %1801 = vadd.xlane.f32.xlu1 %v1800_v47 }
 0x380   : > { %v1625_v5 = vpop.xlane.xlu0 %1624  ;;  %v1803_v58 = vsel %vm768_vm2, %v13078_v52, 0.0 }
 0x381   : > { %v1730_v33 = vmul.f32 1.442695, %v1680_v44  ;;  %v1681_v18 = vsub.f32 %v12920_v19, %v1625_v5  ;;  %1804 = vadd.xlane.f32.xlu0 %v1803_v58 }
 0x383   : > { %11616 = vpow2.f32 %v1730_v33  ;;  %v1732_v16 = vmul.f32 1.442695, %v1681_v18 }
 0x385   : > { %v13084_v43 = vpop.eup %11612  ;;  %11618 = vpow2.f32 %v1732_v16 }
 0x386   : > { %v1628_v1 = vpop.xlane.xlu1 %1627  ;;  %v1806_v11 = vsel %vm768_vm2, %v13084_v43, 0.0 }
 0x387   : > { %v13088_v25 = vpop.eup %11614  ;;  %v1682_v4 = vsub.f32 %v12924_v34, %v1628_v1  ;;  %1807 = vadd.xlane.f32.xlu1 %v1806_v11 }
 0x388   : > { %v1631_v22 = vpop.xlane.xlu0 %1630  ;;  %v1809_v63 = vsel %vm768_vm2, %v13088_v25, 0.0 }
 0x389   : > { %v1734_v19 = vmul.f32 1.442695, %v1682_v4  ;;  %v1683_v23 = vsub.f32 %v12928_v48, %v1631_v22  ;;  %1810 = vadd.xlane.f32.xlu0 %v1809_v63 }
 0x38b   : > { %11620 = vpow2.f32 %v1734_v19  ;;  %v1736_v36 = vmul.f32 1.442695, %v1683_v23 }
 0x38d   : > { %v13094_v35 = vpop.eup %11616  ;;  %11622 = vpow2.f32 %v1736_v36 }
 0x38e   : > { %v1634_v37 = vpop.xlane.xlu1 %1633  ;;  %v1812_v38 = vsel %vm768_vm2, %v13094_v35, 0.0 }
 0x38f   : > { %v13098_v47 = vpop.eup %11618  ;;  %v1684_v34 = vsub.f32 %v12932_v0, %v1634_v37  ;;  %1813 = vadd.xlane.f32.xlu1 %v1812_v38 }
 0x390   : > { %v1637_v44 = vpop.xlane.xlu0 %1636  ;;  %v1815_v5 = vsel %vm768_vm2, %v13098_v47, 0.0 }
 0x391   : > { %v1738_v48 = vmul.f32 1.442695, %v1684_v34  ;;  %v1685_v58 = vsub.f32 %v12936_v21, %v1637_v44  ;;  %1816 = vadd.xlane.f32.xlu0 %v1815_v5 }
 0x393   : > { %11624 = vpow2.f32 %v1738_v48  ;;  %v1740_v33 = vmul.f32 1.442695, %v1685_v58 }
 0x395   : > { %v13104_v18 = vpop.eup %11620  ;;  %11626 = vpow2.f32 %v1740_v33 }
 0x396   : > { %v1640_v16 = vpop.xlane.xlu1 %1639  ;;  %v1818_v1 = vsel %vm768_vm2, %v13104_v18, 0.0 }
 0x397   : > { %v13108_v11 = vpop.eup %11622  ;;  %v1686_v0 = vsub.f32 %v12940_v39, %v1640_v16  ;;  %1819 = vadd.xlane.f32.xlu1 %v1818_v1 }
 0x398   : > { %v1643_v4 = vpop.xlane.xlu0 %1642  ;;  %v1821_v22 = vsel %vm768_vm2, %v13108_v11, 0.0 }
 0x399   : > { %v1742_v21 = vmul.f32 1.442695, %v1686_v0  ;;  %v1687_v63 = vsub.f32 %v12944_v27, %v1643_v4  ;;  %1822 = vadd.xlane.f32.xlu0 %v1821_v22 }
 0x39b   : > { %11628 = vpow2.f32 %v1742_v21  ;;  %v1744_v19 = vmul.f32 1.442695, %v1687_v63 }
 0x39d   : > { %v13114_v23 = vpop.eup %11624  ;;  %11630 = vpow2.f32 %v1744_v19 }
 0x39e   : > { %v1646_v36 = vpop.xlane.xlu1 %1645  ;;  %v1824_v37 = vsel %vm768_vm2, %v13114_v23, 0.0 }
 0x39f   : > { %v13118_v38 = vpop.eup %11626  ;;  %v1688_v39 = vsub.f32 %v12948_v53, %v1646_v36  ;;  %1825 = vadd.xlane.f32.xlu1 %v1824_v37 }
 0x3a0   : > { %v1649_v34 = vpop.xlane.xlu0 %1648  ;;  %v1827_v44 = vsel %vm768_vm2, %v13118_v38, 0.0 }
 0x3a1   : > { %v1746_v27 = vmul.f32 1.442695, %v1688_v39  ;;  %v1689_v5 = vsub.f32 %v12952_v32, %v1649_v34  ;;  %1828 = vadd.xlane.f32.xlu0 %v1827_v44 }
 0x3a3   : > { %11632 = vpow2.f32 %v1746_v27  ;;  %v1748_v48 = vmul.f32 1.442695, %v1689_v5 }
 0x3a5   : > { %v13124_v58 = vpop.eup %11628  ;;  %11634 = vpow2.f32 %v1748_v48 }
 0x3a6   : > { %v1652_v33 = vpop.xlane.xlu1 %1651  ;;  %v1830_v16 = vsel %vm768_vm2, %v13124_v58, 0.0 }
 0x3a7   : > { %v13128_v1 = vpop.eup %11630  ;;  %v1690_v53 = vsub.f32 %v12958_v9, %v1652_v33  ;;  %1831 = vadd.xlane.f32.xlu1 %v1830_v16 }
 0x3a8   : > { %v1655_v0 = vpop.xlane.xlu0 %1654  ;;  %v1833_v4 = vsel %vm768_vm2, %v13128_v1, 0.0 }
 0x3a9   : > { %v1750_v32 = vmul.f32 1.442695, %v1690_v53  ;;  %v1691_v22 = vsub.f32 %v12962_v24, %v1655_v0  ;;  %1834 = vadd.xlane.f32.xlu0 %v1833_v4 }
 0x3ab   : > { %11636 = vpow2.f32 %v1750_v32  ;;  %v1752_v21 = vmul.f32 1.442695, %v1691_v22 }
 0x3ad   : > { %v13134_v63 = vpop.eup %11632  ;;  %11638 = vpow2.f32 %v1752_v21 }
 0x3ae   : > { %v1658_v19 = vpop.xlane.xlu1 %1657  ;;  %v1836_v36 = vsel %vm768_vm2, %v13134_v63, 0.0 }
 0x3af   : > { %v13138_v37 = vpop.eup %11634  ;;  %v1692_v9 = vsub.f32 %v12970_v57, %v1658_v19  ;;  %1837 = vadd.xlane.f32.xlu1 %v1836_v36 }
 0x3b0   : > { %v1661_v39 = vpop.xlane.xlu0 %1660  ;;  %v1839_v34 = vsel %vm768_vm2, %v13138_v37, 0.0 }
 0x3b1   : > { %v1754_v24 = vmul.f32 1.442695, %v1692_v9  ;;  %v1693_v44 = vsub.f32 %v12974_v3, %v1661_v39  ;;  %1840 = vadd.xlane.f32.xlu0 %v1839_v34 }
 0x3b2   : > { %v13172_v4 = vpop.permute.xlu1 %2784 }
 0x3b3   : > { %11640 = vpow2.f32 %v1754_v24  ;;  %v1756_v27 = vmul.f32 1.442695, %v1693_v44 }
 0x3b4   : > { %v13178_v32 = vpop.permute.xlu0 %2737 }
 0x3b5   : > { %v13144_v5 = vpop.eup %11636  ;;  %11642 = vpow2.f32 %v1756_v27 }
 0x3b6   : > { %v1842_v48 = vsel %vm768_vm2, %v13144_v5, 0.0 }
 0x3b7   : > { %v13148_v33 = vpop.eup %11638  ;;  %1843 = vadd.xlane.f32.xlu1 %v1842_v48 }
 0x3b8   : > { %v1845_v57 = vsel %vm768_vm2, %v13148_v33, 0.0 }
 0x3b9   : > { %1846 = vadd.xlane.f32.xlu0 %v1845_v57 }
 0x3bd   : > { %v13152_v16 = vpop.eup %11640 }
 0x3be   : > { %v1848_v3 = vsel %vm768_vm2, %v13152_v16, 0.0 }
 0x3bf   : > { %v13156_v53 = vpop.eup %11642  ;;  %1849 = vadd.xlane.f32.xlu1 %v1848_v3 }
 0x3c0   : > { %v1851_v0 = vsel %vm768_vm2, %v13156_v53, 0.0 }
 0x3c1   : > { %1852 = vadd.xlane.f32.xlu0 %v1851_v0 }
 0x3d0   : > { %2916 = vrot.lane.b32.xlu1 %v12572_v51, %s12262_s16 }
 0x3d4   : > { %2967 = vrot.lane.b32.xlu1 %v12582_v61, %s12262_s16 }
 0x3d7   : > { %2865 = vrot.lane.b32.xlu0 %v12562_v41, %s12262_s16 }
 0x3d8   : > { %3018 = vrot.lane.b32.xlu1 %v12592_v7, %s12262_s16 }
 0x3db   : > { %2863 = vrot.lane.b32.xlu0 %v12562_v41, %s12263_s19 }
 0x3dc   : > { %3069 = vrot.lane.b32.xlu1 %v12602_v17, %s12262_s16 }
 0x3df   : > { %2914 = vrot.lane.b32.xlu0 %v12572_v51, %s12263_s19 }
 0x3e0   : > { %3120 = vrot.lane.b32.xlu1 %v12612_v28, %s12262_s16 }
 0x3e3   : > { %v1760_v22 = vpop.xlane.xlu1 %1759  ;;  %2965 = vrot.lane.b32.xlu0 %v12582_v61, %s12263_s19 }
 0x3e4   : > { %11644 = vrcp.f32 %v1760_v22  ;;  %3171 = vrot.lane.b32.xlu1 %v12622_v40, %s12262_s16 }
 0x3e5   : > { %v1763_v21 = vpop.xlane.xlu0 %1762 }
 0x3e6   : > { %11646 = vrcp.f32 %v1763_v21 }
 0x3e7   : > { %v1766_v19 = vpop.xlane.xlu1 %1765  ;;  %3016 = vrot.lane.b32.xlu0 %v12592_v7, %s12263_s19 }
 0x3e8   : > { %11648 = vrcp.f32 %v1766_v19  ;;  %3222 = vrot.lane.b32.xlu1 %v12632_v54, %s12262_s16 }
 0x3e9   : > { %v1769_v36 = vpop.xlane.xlu0 %1768 }
 0x3ea   : > { %11650 = vrcp.f32 %v1769_v36 }
 0x3eb   : > { %v1772_v9 = vpop.xlane.xlu1 %1771  ;;  %3067 = vrot.lane.b32.xlu0 %v12602_v17, %s12263_s19 }
 0x3ec   : > { %11652 = vrcp.f32 %v1772_v9  ;;  %3273 = vrot.lane.b32.xlu1 %v12642_v2, %s12262_s16 }
 0x3ed   : > { %v1775_v39 = vpop.xlane.xlu0 %1774 }
 0x3ee   : > { %v11645_v34 = vpop.eup %11644  ;;  %11654 = vrcp.f32 %v1775_v39 }
 0x3ef   : > { %v1886_v24 = vmul.f32 %v11645_v34, %v13008_v29  ;;  %v1778_v44 = vpop.xlane.xlu1 %1777  ;;  %3118 = vrot.lane.b32.xlu0 %v12612_v28, %s12263_s19  ;;  %v15986_v34 = vmov 0.0  }
 0x3f0   : > { %v11647_v27 = vpop.eup %11646  ;;  %11656 = vrcp.f32 %v1778_v44  ;;  %3324 = vrot.lane.b32.xlu1 %v12652_v14, %s12262_s16 }
 0x3f1   : > { %v10243_v48 = vpack.c.bf16 %v1886_v24, %v1886_v24  ;;  %v1887_v29 = vmul.f32 %v11647_v27, %v13010_v50  ;;  %v1781_v57 = vpop.xlane.xlu0 %1780 }
 0x3f2   : > { %v11649_v3 = vpop.eup %11648  ;;  %11658 = vrcp.f32 %v1781_v57 }
 0x3f3   : > { %2047 = vst.msk [vmem:[%s13199_s15] sm:$0xf] %vm2046_vm3, %v10243_v48  ;;  %v10244_v0 = vpack.c.bf16 %v1887_v29, %v1887_v29  ;;  %v1888_v22 = vmul.f32 %v11649_v3, %v13014_v8  ;;  %3169 = vrot.lane.b32.xlu0 %v12622_v40, %s12263_s19  ;;  %v1918_v21 = vpack.c.bf16 %v1887_v29, %v1886_v24 }
 0x3f4   : > { %v11651_v19 = vpop.eup %11650  ;;  %3375 = vrot.lane.b32.xlu1 %v12662_v26, %s12262_s16  ;;  %v1784_v36 = vpop.xlane.xlu1 %1783 }
 0x3f5   : > { %2048 = vst.msk [vmem:[%s13199_s15 + $0x4] sm:$0xf] %vm2046_vm3, %v10244_v0  ;;  %v10245_v50 = vpack.c.bf16 %v1888_v22, %v1888_v22  ;;  %v1889_v9 = vmul.f32 %v11651_v19, %v13019_v13  ;;  %11660 = vrcp.f32 %v1784_v36  ;;  %10748 = vmatmul.mubr.msk.bf16.vlgmr.msra.gmra.mrb[64].mxu1 %vm768_vm2, %v1918_v21 }
 0x3f6   : > { %v11653_v39 = vpop.eup %11652  ;;  %10758 = vmatpush3.bf16.msra.mxu1 %v12956_v12  ;;  %v1787_v8 = vpop.xlane.xlu0 %1786  ;;  %10759 = vmatprep.mubr.msk.bf16.mxu1 %vm12259_vm1, %v15986_v34 }
 0x3f7   : > { %2049 = vst.msk [vmem:[%s13199_s15 + $0x20] sm:$0xf] %vm2046_vm3, %v10245_v50  ;;  %v1919_v24 = vpack.c.bf16 %v1889_v9, %v1888_v22  ;;  %v10246_v44 = vpack.c.bf16 %v1889_v9, %v1889_v9  ;;  %v1890_v27 = vmul.f32 %v11653_v39, %v13024_v15  ;;  %11662 = vrcp.f32 %v1787_v8  ;;  %3220 = vrot.lane.b32.xlu0 %v12632_v54, %s12263_s19  ;;  %v15988_v8 = vld [vmem:[#allocation33_spill] sm:$0xff] }
 0x3f8   : > { %10769 = vmatprep.subr.bf16.mxu1 %v15986_v34  ;;  %v11655_v13 = vpop.eup %11654  ;;  %3426 = vrot.lane.b32.xlu1 %v12672_v45, %s12262_s16 }
 0x3f9   : > { %2050 = vst.msk [vmem:[%s13199_s15 + $0x24] sm:$0xf] %vm2046_vm3, %v10246_v44  ;;  %v10247_v12 = vpack.c.bf16 %v1890_v27, %v1890_v27  ;;  %v1891_v48 = vmul.f32 %v11655_v13, %v13028_v10  ;;  %10754 = vmatmul.mubr.msk.bf16.vlgmr.msra.gmra.mrb[64].mxu0 %vm768_vm2, %v1919_v24  ;;  %v15989_v24 = vld [vmem:[#allocation28_spill] sm:$0xff] }
 0x3fa   : > { %v11657_v29 = vpop.eup %11656  ;;  %10764 = vmatpush3.bf16.msra.mxu0 %v12968_v30  ;;  %10765 = vmatprep.mubr.msk.bf16.mxu0 %vm12259_vm1, %v15986_v34 }
 0x3fb   : > { %2051 = vst.msk [vmem:[%s13199_s15 + $0x40] sm:$0xf] %vm2046_vm3, %v10247_v12  ;;  %v10248_v15 = vpack.c.bf16 %v1891_v48, %v1891_v48  ;;  %v1892_v57 = vmul.f32 %v11657_v29, %v13032_v56  ;;  %3271 = vrot.lane.b32.xlu0 %v12642_v2, %s12263_s19  ;;  %v1920_v3 = vpack.c.bf16 %v1891_v48, %v1890_v27  ;;  %v15990_v12 = vld [vmem:[#allocation32_spill] sm:$0xff]  ;;  %v15991_v29 = vld [vmem:[#allocation30_spill] sm:$0xff] }
 0x3fc   : > { %10775 = vmatprep.subr.bf16.mxu0 %v15986_v34  ;;  %v11659_v10 = vpop.eup %11658  ;;  %3477 = vrot.lane.b32.xlu1 %v12682_v59, %s12262_s16  ;;  %v1790_v30 = vpop.xlane.xlu1 %1789 }
 0x3fd   : > { %2052 = vst.msk [vmem:[%s13199_s15 + $0x44] sm:$0xf] %vm2046_vm3, %v10248_v15  ;;  %v10249_v0 = vpack.c.bf16 %v1892_v57, %v1892_v57  ;;  %v1893_v22 = vmul.f32 %v11659_v10, %v13037_v62  ;;  %11664 = vrcp.f32 %v1790_v30  ;;  %10760 = vmatmul.mubr.msk.bf16.vlgmr.msra.gmra.mrb[68].mxu1 %vm768_vm2, %v1920_v3 }
 0x3fe   : > { %10770 = vmatpush3.bf16.msra.mxu1 %v12966_v49  ;;  %v1793_v56 = vpop.xlane.xlu0 %1792  ;;  %10771 = vmatprep.mubr.msk.bf16.mxu1 %vm12259_vm1, %v15986_v34  ;;  %v15987_v49 = vld [vmem:[#allocation26_spill] sm:$0xff] }
 0x3ff   : > { %v11661_v21 = vpop.eup %11660  ;;  %2053 = vst.msk [vmem:[%s13199_s15 + $0x60] sm:$0xf] %vm2046_vm3, %v10249_v0  ;;  %v10250_v19 = vpack.c.bf16 %v1893_v22, %v1893_v22  ;;  %11666 = vrcp.f32 %v1793_v56  ;;  %3322 = vrot.lane.b32.xlu0 %v12652_v14, %s12263_s19  ;;  %v1921_v62 = vpack.c.bf16 %v1893_v22, %v1892_v57  ;;  %10781 = vmatprep.subr.bf16.mxu1 %v15986_v34 }
 0x400   : > { %v1894_v36 = vmul.f32 %v11661_v21, %v13044_v31  ;;  %3528 = vrot.lane.b32.xlu1 %v15987_v49, %s12262_s16 }
 0x401   : > { %v11663_v50 = vpop.eup %11662  ;;  %2054 = vst.msk [vmem:[%s13199_s15 + $0x64] sm:$0xf] %vm2046_vm3, %v10250_v19  ;;  %10766 = vmatmul.mubr.msk.bf16.vlgmr.msra.gmra.mrb[68].mxu0 %vm768_vm2, %v1921_v62 }
 0x402   : > { %v10251_v9 = vpack.c.bf16 %v1894_v36, %v1894_v36  ;;  %v1895_v39 = vmul.f32 %v11663_v50, %v13048_v20  ;;  %10776 = vmatpush3.bf16.msra.mxu0 %v15988_v8  ;;  %10777 = vmatprep.mubr.msk.bf16.mxu0 %vm12259_vm1, %v15986_v34 }
 0x403   : > { %3373 = vrot.lane.b32.xlu0 %v12662_v26, %s12263_s19  ;;  %10787 = vmatprep.subr.bf16.mxu0 %v15986_v34 }
 0x404   : > { %2055 = vst.msk [vmem:[%s13199_s15 + $0x80] sm:$0xf] %vm2046_vm3, %v10251_v9  ;;  %v10252_v31 = vpack.c.bf16 %v1895_v39, %v1895_v39  ;;  %3579 = vrot.lane.b32.xlu1 %v15989_v24, %s12262_s16  ;;  %v1796_v44 = vpop.xlane.xlu1 %1795  ;;  %v1922_v27 = vpack.c.bf16 %v1895_v39, %v1894_v36 }
 0x405   : > { %11668 = vrcp.f32 %v1796_v44 }
 0x406   : > { %2056 = vst.msk [vmem:[%s13199_s15 + $0x84] sm:$0xf] %vm2046_vm3, %v10252_v31  ;;  %10772 = vmatmul.mubr.msk.bf16.vlgmr.msra.gmra.mrb[72].mxu1 %vm768_vm2, %v1922_v27  ;;  %v1799_v20 = vpop.xlane.xlu0 %1798 }
 0x407   : > { %v11665_v13 = vpop.eup %11664  ;;  %10782 = vmatpush3.bf16.msra.mxu1 %v15990_v12  ;;  %11670 = vrcp.f32 %v1799_v20  ;;  %3424 = vrot.lane.b32.xlu0 %v12672_v45, %s12263_s19 }
 0x408   : > { %v1896_v48 = vmul.f32 %v11665_v13, %v13054_v46  ;;  %3630 = vrot.lane.b32.xlu1 %v15991_v29, %s12262_s16  ;;  %10783 = vmatprep.mubr.msk.bf16.mxu1 %vm12259_vm1, %v15986_v34  ;;  %s10372_s16 = sshll.u32 %s12326_s25, 12  ;;  %s9662_s25 = scalar_lea.sflag [#allocation5], %s12483_s9 }
 0x409   : > { %v11667_v15 = vpop.eup %11666  ;;  %10793 = vmatprep.subr.bf16.mxu1 %v15986_v34  ;;  %s15812_s13 = scalar_lea.hbm %s15870_s5, %s10372_s16 }
 0x40a   : > { %v10253_v57 = vpack.c.bf16 %v1896_v48, %v1896_v48  ;;  %v1897_v3 = vmul.f32 %v11667_v15, %v13058_v42  ;;  %v15992_v42 = vld [vmem:[#allocation35_spill] sm:$0xff] }
 0x40b   : > { %3475 = vrot.lane.b32.xlu0 %v12682_v59, %s12263_s19 }
 0x40c   : > { %2057 = vst.msk [vmem:[%s13199_s15 + $0xa0] sm:$0xf] %vm2046_vm3, %v10253_v57  ;;  %v10254_v10 = vpack.c.bf16 %v1897_v3, %v1897_v3  ;;  %3628 = vrot.lane.b32.xlu1 %v15991_v29, %s12263_s19  ;;  %v1802_v46 = vpop.xlane.xlu1 %1801  ;;  %v1923_v30 = vpack.c.bf16 %v1897_v3, %v1896_v48 }
 0x40d   : > { %11672 = vrcp.f32 %v1802_v46 }
 0x40e   : > { %2058 = vst.msk [vmem:[%s13199_s15 + $0xa4] sm:$0xf] %vm2046_vm3, %v10254_v10  ;;  %10778 = vmatmul.mubr.msk.bf16.vlgmr.msra.gmra.mrb[72].mxu0 %vm768_vm2, %v1923_v30  ;;  %v1805_v0 = vpop.xlane.xlu0 %1804 }
 0x40f   : > { %v11669_v22 = vpop.eup %11668  ;;  %10788 = vmatpush3.bf16.msra.mxu0 %v15992_v42  ;;  %11674 = vrcp.f32 %v1805_v0  ;;  %3526 = vrot.lane.b32.xlu0 %v15987_v49, %s12263_s19 }
 0x410   : > { %v1898_v56 = vmul.f32 %v11669_v22, %v13064_v55  ;;  %4192 = vrot.lane.b32.xlu1 %v12562_v41, %s12264_s14  ;;  %10789 = vmatprep.mubr.msk.bf16.mxu0 %vm12259_vm1, %v15986_v34 }
 0x411   : > { %v11671_v21 = vpop.eup %11670  ;;  %10799 = vmatprep.subr.bf16.mxu0 %v15986_v34 }
 0x412   : > { %v10255_v19 = vpack.c.bf16 %v1898_v56, %v1898_v56  ;;  %v1899_v62 = vmul.f32 %v11671_v21, %v13068_v6  ;;  %v15993_v6 = vld [vmem:[#allocation34_spill] sm:$0xff] }
 0x413   : > { %3577 = vrot.lane.b32.xlu0 %v15989_v24, %s12263_s19 }
 0x414   : > { %2059 = vst.msk [vmem:[%s13199_s15 + $0xc0] sm:$0xf] %vm2046_vm3, %v10255_v19  ;;  %v10256_v36 = vpack.c.bf16 %v1899_v62, %v1899_v62  ;;  %4286 = vrot.lane.b32.xlu1 %v12582_v61, %s12264_s14  ;;  %v1808_v55 = vpop.xlane.xlu1 %1807  ;;  %v1924_v50 = vpack.c.bf16 %v1899_v62, %v1898_v56 }
 0x415   : > { %11676 = vrcp.f32 %v1808_v55 }
 0x416   : > { %2060 = vst.msk [vmem:[%s13199_s15 + $0xc4] sm:$0xf] %vm2046_vm3, %v10256_v36  ;;  %10784 = vmatmul.mubr.msk.bf16.vlgmr.msra.gmra.mrb[76].mxu1 %vm768_vm2, %v1924_v50  ;;  %v1811_v9 = vpop.xlane.xlu0 %1810  ;;  %v15996_v50 = vld [vmem:[#allocation38_spill] sm:$0xff] }
 0x417   : > { %v11673_v39 = vpop.eup %11672  ;;  %10794 = vmatpush3.bf16.msra.mxu1 %v15993_v6  ;;  %11678 = vrcp.f32 %v1811_v9  ;;  %4239 = vrot.lane.b32.xlu0 %v12572_v51, %s12264_s14 }
 0x418   : > { %v1900_v8 = vmul.f32 %v11673_v39, %v13074_v60  ;;  %4380 = vrot.lane.b32.xlu1 %v12602_v17, %s12264_s14  ;;  %10795 = vmatprep.mubr.msk.bf16.mxu1 %vm12259_vm1, %v15986_v34 }
 0x419   : > { %v11675_v31 = vpop.eup %11674  ;;  %10805 = vmatprep.subr.bf16.mxu1 %v15986_v34 }
 0x41a   : > { %v10257_v44 = vpack.c.bf16 %v1900_v8, %v1900_v8  ;;  %v1901_v27 = vmul.f32 %v11675_v31, %v13078_v52  ;;  %v15994_v52 = vld [vmem:[#allocation37_spill] sm:$0xff] }
 0x41b   : > { %4333 = vrot.lane.b32.xlu0 %v12592_v7, %s12264_s14 }
 0x41c   : > { %2061 = vst.msk [vmem:[%s13199_s15 + $0xe0] sm:$0xf] %vm2046_vm3, %v10257_v44  ;;  %v10258_v20 = vpack.c.bf16 %v1901_v27, %v1901_v27  ;;  %4474 = vrot.lane.b32.xlu1 %v12622_v40, %s12264_s14  ;;  %v1814_v60 = vpop.xlane.xlu1 %1813  ;;  %v1925_v13 = vpack.c.bf16 %v1901_v27, %v1900_v8 }
 0x41d   : > { %11680 = vrcp.f32 %v1814_v60  ;;  %v15997_v60 = vld [vmem:[#allocation39_spill] sm:$0xff] }
 0x41e   : > { %2062 = vst.msk [vmem:[%s13199_s15 + $0xe4] sm:$0xf] %vm2046_vm3, %v10258_v20  ;;  %10790 = vmatmul.mubr.msk.bf16.vlgmr.msra.gmra.mrb[76].mxu0 %vm768_vm2, %v1925_v13  ;;  %v1817_v12 = vpop.xlane.xlu0 %1816 }
 0x41f   : > { %v11677_v48 = vpop.eup %11676  ;;  %10800 = vmatpush3.bf16.msra.mxu0 %v15994_v52  ;;  %11682 = vrcp.f32 %v1817_v12  ;;  %4427 = vrot.lane.b32.xlu0 %v12612_v28, %s12264_s14 }
 0x420   : > { %v1902_v15 = vmul.f32 %v11677_v48, %v13084_v43  ;;  %4568 = vrot.lane.b32.xlu1 %v12642_v2, %s12264_s14  ;;  %10801 = vmatprep.mubr.msk.bf16.mxu0 %vm12259_vm1, %v15986_v34 }
 0x421   : > { %v11679_v57 = vpop.eup %11678  ;;  %10811 = vmatprep.subr.bf16.mxu0 %v15986_v34 }
 0x422   : > { %v10259_v3 = vpack.c.bf16 %v1902_v15, %v1902_v15  ;;  %v1903_v10 = vmul.f32 %v11679_v57, %v13088_v25  ;;  %v15995_v25 = vld [vmem:[#allocation36_spill] sm:$0xff] }
 0x423   : > { %4521 = vrot.lane.b32.xlu0 %v12632_v54, %s12264_s14 }
 0x424   : > { %2063 = vst.msk [vmem:[%s13199_s15 + $0x100] sm:$0xf] %vm2046_vm3, %v10259_v3  ;;  %v10260_v46 = vpack.c.bf16 %v1903_v10, %v1903_v10  ;;  %4662 = vrot.lane.b32.xlu1 %v12662_v26, %s12264_s14  ;;  %v1820_v43 = vpop.xlane.xlu1 %1819  ;;  %v1926_v30 = vpack.c.bf16 %v1903_v10, %v1902_v15  ;;  %v15998_v10 = vld [vmem:[#allocation40_spill] sm:$0xff] }
 0x425   : > { %11684 = vrcp.f32 %v1820_v43 }
 0x426   : > { %2064 = vst.msk [vmem:[%s13199_s15 + $0x104] sm:$0xf] %vm2046_vm3, %v10260_v46  ;;  %10796 = vmatmul.mubr.msk.bf16.vlgmr.msra.gmra.mrb[80].mxu1 %vm768_vm2, %v1926_v30  ;;  %v1823_v0 = vpop.xlane.xlu0 %1822 }
 0x427   : > { %v11681_v22 = vpop.eup %11680  ;;  %10806 = vmatpush3.bf16.msra.mxu1 %v15995_v25  ;;  %11686 = vrcp.f32 %v1823_v0  ;;  %4615 = vrot.lane.b32.xlu0 %v12652_v14, %s12264_s14 }
 0x428   : > { %v1904_v42 = vmul.f32 %v11681_v22, %v13094_v35  ;;  %4709 = vrot.lane.b32.xlu1 %v12672_v45, %s12264_s14  ;;  %10807 = vmatprep.mubr.msk.bf16.mxu1 %vm12259_vm1, %v15986_v34 }
 0x429   : > { %v11683_v56 = vpop.eup %11682  ;;  %10817 = vmatprep.subr.bf16.mxu1 %v15986_v34 }
 0x42a   : > { %v10261_v21 = vpack.c.bf16 %v1904_v42, %v1904_v42  ;;  %v1905_v19 = vmul.f32 %v11683_v56, %v13098_v47 }
 0x42b   : > { %4756 = vrot.lane.b32.xlu0 %v12682_v59, %s12264_s14 }
 0x42c   : > { %2065 = vst.msk [vmem:[%s13199_s15 + $0x120] sm:$0xf] %vm2046_vm3, %v10261_v21  ;;  %v10262_v62 = vpack.c.bf16 %v1905_v19, %v1905_v19  ;;  %4803 = vrot.lane.b32.xlu1 %v15987_v49, %s12264_s14  ;;  %v1826_v35 = vpop.xlane.xlu1 %1825  ;;  %v1927_v36 = vpack.c.bf16 %v1905_v19, %v1904_v42 }
 0x42d   : > { %11688 = vrcp.f32 %v1826_v35 }
 0x42e   : > { %2066 = vst.msk [vmem:[%s13199_s15 + $0x124] sm:$0xf] %vm2046_vm3, %v10262_v62  ;;  %10802 = vmatmul.mubr.msk.bf16.vlgmr.msra.gmra.mrb[80].mxu0 %vm768_vm2, %v1927_v36  ;;  %v1829_v55 = vpop.xlane.xlu0 %1828 }
 0x42f   : > { %v11685_v47 = vpop.eup %11684  ;;  %10812 = vmatpush3.bf16.msra.mxu0 %v15996_v50  ;;  %11690 = vrcp.f32 %v1829_v55  ;;  %10813 = vmatprep.mubr.msk.bf16.mxu0 %vm12259_vm1, %v15986_v34 }
 0x430   : > { %v1906_v9 = vmul.f32 %v11685_v47, %v13104_v18  ;;  %10823 = vmatprep.subr.bf16.mxu0 %v15986_v34 }
 0x431   : > { %v11687_v39 = vpop.eup %11686 }
 0x432   : > { %v10263_v6 = vpack.c.bf16 %v1906_v9, %v1906_v9  ;;  %v1907_v8 = vmul.f32 %v11687_v39, %v13108_v11 }
 0x434   : > { %2067 = vst.msk [vmem:[%s13199_s15 + $0x140] sm:$0xf] %vm2046_vm3, %v10263_v6  ;;  %v10264_v31 = vpack.c.bf16 %v1907_v8, %v1907_v8  ;;  %v1832_v44 = vpop.xlane.xlu1 %1831  ;;  %v1928_v27 = vpack.c.bf16 %v1907_v8, %v1906_v9 }
 0x435   : > { %11692 = vrcp.f32 %v1832_v44 }
 0x436   : > { %2068 = vst.msk [vmem:[%s13199_s15 + $0x144] sm:$0xf] %vm2046_vm3, %v10264_v31  ;;  %10808 = vmatmul.mubr.msk.bf16.vlgmr.msra.gmra.mrb[84].mxu1 %vm768_vm2, %v1928_v27  ;;  %v1835_v20 = vpop.xlane.xlu0 %1834 }
 0x437   : > { %v11689_v18 = vpop.eup %11688  ;;  %10818 = vmatpush3.bf16.msra.mxu1 %v15997_v60  ;;  %11694 = vrcp.f32 %v1835_v20  ;;  %10819 = vmatprep.mubr.msk.bf16.mxu1 %vm12259_vm1, %v15986_v34 }
 0x438   : > { %v1908_v11 = vmul.f32 %v11689_v18, %v13114_v23  ;;  %10829 = vmatprep.subr.bf16.mxu1 %v15986_v34 }
 0x439   : > { %v11691_v13 = vpop.eup %11690 }
 0x43a   : > { %v10265_v12 = vpack.c.bf16 %v1908_v11, %v1908_v11  ;;  %v1909_v48 = vmul.f32 %v11691_v13, %v13118_v38 }
 0x43c   : > { %2069 = vst.msk [vmem:[%s13199_s15 + $0x160] sm:$0xf] %vm2046_vm3, %v10265_v12  ;;  %v10266_v52 = vpack.c.bf16 %v1909_v48, %v1909_v48  ;;  %v1838_v15 = vpop.xlane.xlu1 %1837  ;;  %v1929_v57 = vpack.c.bf16 %v1909_v48, %v1908_v11 }
 0x43d   : > { %11696 = vrcp.f32 %v1838_v15 }
 0x43e   : > { %2070 = vst.msk [vmem:[%s13199_s15 + $0x164] sm:$0xf] %vm2046_vm3, %v10266_v52  ;;  %10814 = vmatmul.mubr.msk.bf16.vlgmr.msra.gmra.mrb[84].mxu0 %vm768_vm2, %v1929_v57  ;;  %v1841_v3 = vpop.xlane.xlu0 %1840 }
 0x43f   : > { %v11693_v23 = vpop.eup %11692  ;;  %10824 = vmatpush3.bf16.msra.mxu0 %v15998_v10  ;;  %11698 = vrcp.f32 %v1841_v3  ;;  %10825 = vmatprep.mubr.msk.bf16.mxu0 %vm12259_vm1, %v15986_v34 }
 0x440   : > { %v1910_v38 = vmul.f32 %v11693_v23, %v13124_v58  ;;  %10835 = vmatprep.subr.bf16.mxu0 %v15986_v34 }
 0x441   : > { %v11695_v46 = vpop.eup %11694 }
 0x442   : > { %v10267_v43 = vpack.c.bf16 %v1910_v38, %v1910_v38  ;;  %v1911_v30 = vmul.f32 %v11695_v46, %v13128_v1 }
 0x444   : > { %2071 = vst.msk [vmem:[%s13199_s15 + $0x180] sm:$0xf] %vm2046_vm3, %v10267_v43  ;;  %v10268_v0 = vpack.c.bf16 %v1911_v30, %v1911_v30  ;;  %v1844_v22 = vpop.xlane.xlu1 %1843  ;;  %v1930_v25 = vpack.c.bf16 %v1911_v30, %v1910_v38 }
 0x445   : > { %11700 = vrcp.f32 %v1844_v22 }
 0x446   : > { %2072 = vst.msk [vmem:[%s13199_s15 + $0x184] sm:$0xf] %vm2046_vm3, %v10268_v0  ;;  %10820 = vmatmul.mubr.msk.bf16.vlgmr.msra.gmra.mrb[88].mxu1 %vm768_vm2, %v1930_v25  ;;  %v1847_v42 = vpop.xlane.xlu0 %1846 }
 0x447   : > { %v11697_v58 = vpop.eup %11696  ;;  %10830 = vmatpush3.bf16.msra.mxu1 %v13178_v32  ;;  %11702 = vrcp.f32 %v1847_v42  ;;  %10831 = vmatprep.mubr.msk.bf16.mxu1 %vm12259_vm1, %v15986_v34 }
 0x448   : > { %v1912_v1 = vmul.f32 %v11697_v58, %v13134_v63  ;;  %10841 = vmatprep.subr.bf16.mxu1 %v15986_v34 }
 0x449   : > { %v11699_v56 = vpop.eup %11698 }
 0x44a   : > { %v10269_v21 = vpack.c.bf16 %v1912_v1, %v1912_v1  ;;  %v1913_v19 = vmul.f32 %v11699_v56, %v13138_v37 }
 0x44c   : > { %2073 = vst.msk [vmem:[%s13199_s15 + $0x1a0] sm:$0xf] %vm2046_vm3, %v10269_v21  ;;  %v10270_v62 = vpack.c.bf16 %v1913_v19, %v1913_v19  ;;  %v1850_v35 = vpop.xlane.xlu1 %1849  ;;  %v1931_v36 = vpack.c.bf16 %v1913_v19, %v1912_v1 }
 0x44d   : > { %11704 = vrcp.f32 %v1850_v35 }
 0x44e   : > { %2074 = vst.msk [vmem:[%s13199_s15 + $0x1a4] sm:$0xf] %vm2046_vm3, %v10270_v62  ;;  %10826 = vmatmul.mubr.msk.bf16.vlgmr.msra.gmra.mrb[88].mxu0 %vm768_vm2, %v1931_v36  ;;  %v1853_v32 = vpop.xlane.xlu0 %1852 }
 0x44f   : > { %v11701_v63 = vpop.eup %11700  ;;  %10836 = vmatpush3.bf16.msra.mxu0 %v13172_v4  ;;  %11706 = vrcp.f32 %v1853_v32  ;;  %10837 = vmatprep.mubr.msk.bf16.mxu0 %vm12259_vm1, %v15986_v34 }
 0x450   : > { %v1914_v37 = vmul.f32 %v11701_v63, %v13144_v5  ;;  %v2917_v55 = vpop.permute.xlu1 %2916  ;;  %10847 = vmatprep.subr.bf16.mxu0 %v15986_v34 }
 0x451   : > { %v11703_v47 = vpop.eup %11702  ;;  %v2922_v52 = vsel %vm768_vm2, %v2917_v55, 0 }
 0x452   : > { %v10271_v50 = vpack.c.bf16 %v1914_v37, %v1914_v37  ;;  %v1915_v9 = vmul.f32 %v11703_v47, %v13148_v33  ;;  %v2866_v39 = vpop.permute.xlu0 %2865 }
 0x453   : > { %v2871_v31 = vsel %vm768_vm2, %v2866_v39, 0 }
 0x454   : > { %2075 = vst.msk [vmem:[%s13199_s15 + $0x1c0] sm:$0xf] %vm2046_vm3, %v10271_v50  ;;  %v10272_v6 = vpack.c.bf16 %v1915_v9, %v1915_v9  ;;  %v2968_v8 = vpop.permute.xlu1 %2967  ;;  %v1932_v4 = vpack.c.bf16 %v1915_v9, %v1914_v37 }
 0x455   : > { %v2973_v15 = vsel %vm768_vm2, %v2968_v8, 0 }
 0x456   : > { %2076 = vst.msk [vmem:[%s13199_s15 + $0x1c4] sm:$0xf] %vm2046_vm3, %v10272_v6  ;;  %10832 = vmatmul.mubr.msk.bf16.vlgmr.msra.gmra.mrb[92].mxu1 %vm768_vm2, %v1932_v4  ;;  %v2864_v5 = vpop.permute.xlu0 %2863 }
 0x457   : > { %v11705_v44 = vpop.eup %11704  ;;  %10842 = vmatpush3.bf16.xpose.msra.mxu1 %v2871_v31  ;;  %10843 = vmatprep.mubr.msk.bf16.mxu1 %vm12259_vm1, %v15986_v34 }
 0x458   : > { %v1916_v33 = vmul.f32 %v11705_v44, %v13152_v16  ;;  %v3019_v27 = vpop.permute.xlu1 %3018  ;;  %10853 = vmatprep.subr.bf16.mxu1 %v15986_v34 }
 0x459   : > { %v11707_v20 = vpop.eup %11706  ;;  %v3024_v23 = vsel %vm768_vm2, %v3019_v27, 0 }
 0x45a   : > { %v10273_v18 = vpack.c.bf16 %v1916_v33, %v1916_v33  ;;  %v1917_v60 = vmul.f32 %v11707_v20, %v13156_v53  ;;  %v2915_v11 = vpop.permute.xlu0 %2914 }
 0x45c   : > { %2077 = vst.msk [vmem:[%s13199_s15 + $0x1e0] sm:$0xf] %vm2046_vm3, %v10273_v18  ;;  %v10274_v13 = vpack.c.bf16 %v1917_v60, %v1917_v60  ;;  %v3070_v12 = vpop.permute.xlu1 %3069  ;;  %v1933_v48 = vpack.c.bf16 %v1917_v60, %v1916_v33 }
 0x45d   : > { %v3075_v10 = vsel %vm768_vm2, %v3070_v12, 0 }
 0x45e   : > { %2078 = vst.msk [vmem:[%s13199_s15 + $0x1e4] sm:$0xf] %vm2046_vm3, %v10274_v13  ;;  %10838 = vmatmul.mubr.msk.bf16.vlgmr.msra.gmra.mrb[92].mxu0 %vm768_vm2, %v1933_v48  ;;  %10844 = vmatmul.mubr.msk.bf16.vlgmr.msra.gmra.mrb[96].mxu1 %vm768_vm2, %v2864_v5  ;;  %v2966_v16 = vpop.permute.xlu0 %2965 }
 0x45f   : > { %10848 = vmatpush3.bf16.xpose.msra.mxu0 %v2922_v52  ;;  %10854 = vmatpush3.bf16.xpose.msra.mxu1 %v2973_v15 }
 0x460   : > { %v3121_v53 = vpop.permute.xlu1 %3120  ;;  %10849 = vmatprep.mubr.msk.bf16.mxu0 %vm12259_vm1, %v15986_v34  ;;  %10855 = vmatprep.mubr.msk.bf16.mxu1 %vm12259_vm1, %v15986_v34 }
 0x461   : > { %10859 = vmatprep.subr.bf16.mxu0 %v15986_v34  ;;  %10865 = vmatprep.subr.bf16.mxu1 %v15986_v34  ;;  %v3126_v0 = vsel %vm768_vm2, %v3121_v53, 0 }
 0x462   : > { %v3017_v57 = vpop.permute.xlu0 %3016 }
 0x464   : > { %v3172_v3 = vpop.permute.xlu1 %3171 }
 0x465   : > { %v3177_v22 = vsel %vm768_vm2, %v3172_v3, 0 }
 0x466   : > { %10850 = vmatmul.mubr.msk.bf16.vlgmr.msra.gmra.mrb[96].mxu0 %vm768_vm2, %v2915_v11  ;;  %10856 = vmatmul.mubr.msk.bf16.vlgmr.msra.gmra.mrb[100].mxu1 %vm768_vm2, %v2966_v16  ;;  %v3068_v38 = vpop.permute.xlu0 %3067 }
 0x467   : > { %10860 = vmatpush3.bf16.xpose.msra.mxu0 %v3024_v23  ;;  %10866 = vmatpush3.bf16.xpose.msra.mxu1 %v3075_v10 }
 0x468   : > { %v3223_v46 = vpop.permute.xlu1 %3222  ;;  %10861 = vmatprep.mubr.msk.bf16.mxu0 %vm12259_vm1, %v15986_v34  ;;  %10867 = vmatprep.mubr.msk.bf16.mxu1 %vm12259_vm1, %v15986_v34 }
 0x469   : > { %10871 = vmatprep.subr.bf16.mxu0 %v15986_v34  ;;  %10877 = vmatprep.subr.bf16.mxu1 %v15986_v34  ;;  %v3228_v56 = vsel %vm768_vm2, %v3223_v46, 0 }
 0x46a   : > { %v3119_v43 = vpop.permute.xlu0 %3118 }
 0x46c   : > { %v3274_v30 = vpop.permute.xlu1 %3273 }
 0x46d   : > { %v3279_v21 = vsel %vm768_vm2, %v3274_v30, 0 }
 0x46e   : > { %10862 = vmatmul.mubr.msk.bf16.vlgmr.msra.gmra.mrb[100].mxu0 %vm768_vm2, %v3017_v57  ;;  %10868 = vmatmul.mubr.msk.bf16.vlgmr.msra.gmra.mrb[104].mxu1 %vm768_vm2, %v3068_v38  ;;  %v3170_v25 = vpop.permute.xlu0 %3169 }
 0x46f   : > { %10872 = vmatpush3.bf16.xpose.msra.mxu0 %v3126_v0  ;;  %10878 = vmatpush3.bf16.xpose.msra.mxu1 %v3177_v22 }
 0x470   : > { %v3325_v42 = vpop.permute.xlu1 %3324  ;;  %10873 = vmatprep.mubr.msk.bf16.mxu0 %vm12259_vm1, %v15986_v34  ;;  %10879 = vmatprep.mubr.msk.bf16.mxu1 %vm12259_vm1, %v15986_v34 }
 0x471   : > { %10883 = vmatprep.subr.bf16.mxu0 %v15986_v34  ;;  %10889 = vmatprep.subr.bf16.mxu1 %v15986_v34  ;;  %v3330_v32 = vsel %vm768_vm2, %v3325_v42, 0 }
 0x472   : > { %v3221_v58 = vpop.permute.xlu0 %3220 }
 0x474   : > { %v3376_v1 = vpop.permute.xlu1 %3375 }
 0x475   : > { %v3381_v63 = vsel %vm768_vm2, %v3376_v1, 0 }
 0x476   : > { %10874 = vmatmul.mubr.msk.bf16.vlgmr.msra.gmra.mrb[104].mxu0 %vm768_vm2, %v3119_v43  ;;  %10880 = vmatmul.mubr.msk.bf16.vlgmr.msra.gmra.mrb[108].mxu1 %vm768_vm2, %v3170_v25  ;;  %v3272_v19 = vpop.permute.xlu0 %3271 }
 0x477   : > { %10884 = vmatpush3.bf16.xpose.msra.mxu0 %v3228_v56  ;;  %10890 = vmatpush3.bf16.xpose.msra.mxu1 %v3279_v21 }
 0x478   : > { %v3427_v62 = vpop.permute.xlu1 %3426  ;;  %10885 = vmatprep.mubr.msk.bf16.mxu0 %vm12259_vm1, %v15986_v34  ;;  %10891 = vmatprep.mubr.msk.bf16.mxu1 %vm12259_vm1, %v15986_v34 }
 0x479   : > { %10895 = vmatprep.subr.bf16.mxu0 %v15986_v34  ;;  %10901 = vmatprep.subr.bf16.mxu1 %v15986_v34  ;;  %v3432_v9 = vsel %vm768_vm2, %v3427_v62, 0 }
 0x47a   : > { %v3323_v35 = vpop.permute.xlu0 %3322 }
 0x47c   : > { %v3478_v36 = vpop.permute.xlu1 %3477 }
 0x47d   : > { %v3483_v39 = vsel %vm768_vm2, %v3478_v36, 0 }
 0x47e   : > { %10886 = vmatmul.mubr.msk.bf16.vlgmr.msra.gmra.mrb[108].mxu0 %vm768_vm2, %v3221_v58  ;;  %10892 = vmatmul.mubr.msk.bf16.vlgmr.msra.gmra.mrb[112].mxu1 %vm768_vm2, %v3272_v19  ;;  %v3374_v37 = vpop.permute.xlu0 %3373 }
 0x47f   : > { %10896 = vmatpush3.bf16.xpose.msra.mxu0 %v3330_v32  ;;  %10902 = vmatpush3.bf16.xpose.msra.mxu1 %v3381_v63 }
 0x480   : > { %v3529_v55 = vpop.permute.xlu1 %3528  ;;  %10897 = vmatprep.mubr.msk.bf16.mxu0 %vm12259_vm1, %v15986_v34  ;;  %10903 = vmatprep.mubr.msk.bf16.mxu1 %vm12259_vm1, %v15986_v34 }
 0x481   : > { %10907 = vmatprep.subr.bf16.mxu0 %v15986_v34  ;;  %10913 = vmatprep.subr.bf16.mxu1 %v15986_v34  ;;  %v3534_v4 = vsel %vm768_vm2, %v3529_v55, 0 }
 0x482   : > { %v3425_v47 = vpop.permute.xlu0 %3424 }
 0x484   : > { %v3580_v50 = vpop.permute.xlu1 %3579 }
 0x485   : > { %v3585_v31 = vsel %vm768_vm2, %v3580_v50, 0 }
 0x486   : > { %10898 = vmatmul.mubr.msk.bf16.vlgmr.msra.gmra.mrb[112].mxu0 %vm768_vm2, %v3323_v35  ;;  %10904 = vmatmul.mubr.msk.bf16.vlgmr.msra.gmra.mrb[116].mxu1 %vm768_vm2, %v3374_v37  ;;  %v3476_v6 = vpop.permute.xlu0 %3475 }
 0x487   : > { %10908 = vmatpush3.bf16.xpose.msra.mxu0 %v3432_v9  ;;  %10914 = vmatpush3.bf16.xpose.msra.mxu1 %v3483_v39 }
 0x488   : > { %10909 = vmatprep.mubr.msk.bf16.mxu0 %vm12259_vm1, %v15986_v34  ;;  %10915 = vmatprep.mubr.msk.bf16.mxu1 %vm12259_vm1, %v15986_v34  ;;  %v3631_v8 = vpop.permute.xlu1 %3630 }
 0x489   : > { %10919 = vmatprep.subr.bf16.mxu0 %v15986_v34  ;;  %10925 = vmatprep.subr.bf16.mxu1 %v15986_v34  ;;  %v3636_v27 = vsel %vm768_vm2, %v3631_v8, 0 }
 0x48a   : > { %v3527_v5 = vpop.permute.xlu0 %3526 }
 0x48c   : > { %v3629_v44 = vpop.permute.xlu1 %3628 }
 0x48e   : > { %10910 = vmatmul.mubr.msk.bf16.vlgmr.msra.gmra.mrb[116].mxu0 %vm768_vm2, %v3425_v47  ;;  %10916 = vmatmul.mubr.msk.bf16.vlgmr.msra.gmra.mrb[120].mxu1 %vm768_vm2, %v3476_v6  ;;  %v3578_v33 = vpop.permute.xlu0 %3577 }
 0x48f   : > { %10920 = vmatpush3.bf16.xpose.msra.mxu0 %v3534_v4  ;;  %10926 = vmatpush3.bf16.xpose.msra.mxu1 %v3585_v31 }
 0x490   : > { %10921 = vmatprep.mubr.msk.bf16.mxu0 %vm12259_vm1, %v15986_v34  ;;  %10927 = vmatprep.mubr.msk.bf16.mxu1 %vm12259_vm1, %v15986_v34  ;;  %v4193_v20 = vpop.permute.xlu1 %4192 }
 0x491   : > { %10931 = vmatprep.subr.bf16.mxu0 %v15986_v34  ;;  %10937 = vmatprep.subr.bf16.mxu1 %v15986_v34 }
 0x492   : > { %v4240_v18 = vpop.permute.xlu0 %4239 }
 0x496   : > { %10922 = vmatmul.mubr.msk.bf16.vlgmr.msra.gmra.mrb[120].mxu0 %vm768_vm2, %v3527_v5  ;;  %10928 = vmatmul.mubr.msk.bf16.vlgmr.msra.gmra.mrb[124].mxu1 %vm768_vm2, %v3578_v33 }
 0x497   : > { %10932 = vmatpush3.bf16.xpose.msra.mxu0 %v3636_v27  ;;  %10938 = vmatpush3.bf16.msra.mxu1 %v4193_v20 }
 0x498   : > { %10933 = vmatprep.mubr.msk.bf16.mxu0 %vm12259_vm1, %v15986_v34  ;;  %10943 = vmatprep.subr.bf16.mxu0 %v15986_v34 }
 0x499   : > { %10939 = vmatprep.mubr.msk.bf16.mxu1 %vm12259_vm1, %v15986_v34  ;;  %10949 = vmatprep.subr.bf16.mxu1 %v15986_v34 }
 0x49e   : > { %10934 = vmatmul.mubr.msk.bf16.vlgmr.msra.gmra.mrb[124].mxu0 %vm768_vm2, %v3629_v44 }
 0x49f   : > { %10944 = vmatpush3.bf16.msra.mxu0 %v4240_v18  ;;  %10945 = vmatprep.mubr.msk.bf16.mxu0 %vm12259_vm1, %v15986_v34 }
 0x4a0   : > { %10955 = vmatprep.subr.bf16.mxu0 %v15986_v34 }
 0x4c8   : > { %v2119_v60 = vpop.f32.mrb[64].mxu1 }
 0x4c9   : > { %v10749_v11 = vpop.f32.mrb[65].mxu1 }
 0x4ca   : > { %v2122_v13 = vpop.f32.mrb[66].mxu1 }
 0x4cb   : > { %v2831_v12 = vpack.c.bf16 %v2122_v13, %v2119_v60  ;;  %v10750_v48 = vpop.f32.mrb[67].mxu1 }
 0x4cc   : > { %v2166_v52 = vpop.f32.mrb[64].mxu0 }
 0x4cd   : > { %2847 = vst.msk [vmem:[#allocation2] sm:$0xff] %vm768_vm2, %v2831_v12  ;;  %v10755_v15 = vpop.f32.mrb[65].mxu0 }
 0x4ce   : > { %v2169_v16 = vpop.f32.mrb[66].mxu0 }
 0x4cf   : > { %v2832_v53 = vpack.c.bf16 %v2169_v16, %v2166_v52  ;;  %v10756_v57 = vpop.f32.mrb[67].mxu0 }
 0x4d0   : > { %v2213_v3 = vpop.f32.mrb[68].mxu1 }
 0x4d1   : > { %2848 = vst.msk [vmem:[#allocation2 + $0x8] sm:$0xff] %vm768_vm2, %v2832_v53  ;;  %v10761_v23 = vpop.f32.mrb[69].mxu1 }
 0x4d2   : > { %v2216_v10 = vpop.f32.mrb[70].mxu1 }
 0x4d3   : > { %v2833_v38 = vpack.c.bf16 %v2216_v10, %v2213_v3  ;;  %v10762_v46 = vpop.f32.mrb[71].mxu1 }
 0x4d4   : > { %v2260_v43 = vpop.f32.mrb[68].mxu0 }
 0x4d5   : > { %2849 = vst.msk [vmem:[#allocation2 + $0x10] sm:$0xff] %vm768_vm2, %v2833_v38  ;;  %v10767_v30 = vpop.f32.mrb[69].mxu0 }
 0x4d6   : > { %v2263_v0 = vpop.f32.mrb[70].mxu0 }
 0x4d7   : > { %v2834_v22 = vpack.c.bf16 %v2263_v0, %v2260_v43  ;;  %v10768_v25 = vpop.f32.mrb[71].mxu0 }
 0x4d9   : > { %2850 = vst.msk [vmem:[#allocation2 + $0x18] sm:$0xff] %vm768_vm2, %v2834_v22  ;;  %v2307_v42 = vpop.f32.mrb[72].mxu1 }
 0x4da   : > { %v10773_v58 = vpop.f32.mrb[73].mxu1 }
 0x4db   : > { %v2310_v1 = vpop.f32.mrb[74].mxu1 }
 0x4dc   : > { %v2835_v56 = vpack.c.bf16 %v2310_v1, %v2307_v42  ;;  %v10774_v21 = vpop.f32.mrb[75].mxu1 }
 0x4de   : > { %2851 = vst.msk [vmem:[#allocation2 + $0x20] sm:$0xff] %vm768_vm2, %v2835_v56 }
 0x4e1   : > { %v2354_v19 = vpop.f32.mrb[72].mxu0 }
 0x4e2   : > { %v10779_v62 = vpop.f32.mrb[73].mxu0 }
 0x4e3   : > { %v2357_v35 = vpop.f32.mrb[74].mxu0 }
 0x4e4   : > { %v2836_v36 = vpack.c.bf16 %v2357_v35, %v2354_v19  ;;  %v10780_v32 = vpop.f32.mrb[75].mxu0 }
 0x4e6   : > { %2852 = vst.msk [vmem:[#allocation2 + $0x28] sm:$0xff] %vm768_vm2, %v2836_v36 }
 0x4e9   : > { %v2401_v63 = vpop.f32.mrb[76].mxu1 }
 0x4ea   : > { %v10785_v37 = vpop.f32.mrb[77].mxu1 }
 0x4eb   : > { %v2404_v55 = vpop.f32.mrb[78].mxu1 }
 0x4ec   : > { %v2837_v47 = vpack.c.bf16 %v2404_v55, %v2401_v63  ;;  %v10786_v50 = vpop.f32.mrb[79].mxu1 }
 0x4ee   : > { %2853 = vst.msk [vmem:[#allocation2 + $0x30] sm:$0xff] %vm768_vm2, %v2837_v47 }
 0x4f1   : > { %v2448_v9 = vpop.f32.mrb[76].mxu0 }
 0x4f2   : > { %v10791_v39 = vpop.f32.mrb[77].mxu0 }
 0x4f3   : > { %v2451_v6 = vpop.f32.mrb[78].mxu0 }
 0x4f4   : > { %v2838_v8 = vpack.c.bf16 %v2451_v6, %v2448_v9  ;;  %v10792_v4 = vpop.f32.mrb[79].mxu0 }
 0x4f6   : > { %2854 = vst.msk [vmem:[#allocation2 + $0x38] sm:$0xff] %vm768_vm2, %v2838_v8 }
 0x4f9   : > { %v2495_v31 = vpop.f32.mrb[80].mxu1 }
 0x4fa   : > { %v10797_v5 = vpop.f32.mrb[81].mxu1 }
 0x4fb   : > { %v2498_v44 = vpop.f32.mrb[82].mxu1 }
 0x4fc   : > { %v2839_v33 = vpack.c.bf16 %v2498_v44, %v2495_v31  ;;  %v10798_v27 = vpop.f32.mrb[83].mxu1 }
 0x4fe   : > { %2855 = vst.msk [vmem:[#allocation2 + $0x40] sm:$0xff] %vm768_vm2, %v2839_v33 }
 0x501   : > { %v2542_v20 = vpop.f32.mrb[80].mxu0 }
 0x502   : > { %v10803_v18 = vpop.f32.mrb[81].mxu0 }
 0x503   : > { %v2545_v60 = vpop.f32.mrb[82].mxu0 }
 0x504   : > { %v2840_v11 = vpack.c.bf16 %v2545_v60, %v2542_v20  ;;  %v10804_v13 = vpop.f32.mrb[83].mxu0 }
 0x506   : > { %2856 = vst.msk [vmem:[#allocation2 + $0x48] sm:$0xff] %vm768_vm2, %v2840_v11 }
 0x509   : > { %v2589_v12 = vpop.f32.mrb[84].mxu1 }
 0x50a   : > { %v10809_v48 = vpop.f32.mrb[85].mxu1 }
 0x50b   : > { %v2592_v52 = vpop.f32.mrb[86].mxu1 }
 0x50c   : > { %v2841_v15 = vpack.c.bf16 %v2592_v52, %v2589_v12  ;;  %v10810_v16 = vpop.f32.mrb[87].mxu1 }
 0x50e   : > { %2857 = vst.msk [vmem:[#allocation2 + $0x50] sm:$0xff] %vm768_vm2, %v2841_v15 }
 0x511   : > { %v2636_v53 = vpop.f32.mrb[84].mxu0 }
 0x512   : > { %v10815_v57 = vpop.f32.mrb[85].mxu0 }
 0x513   : > { %v2639_v3 = vpop.f32.mrb[86].mxu0 }
 0x514   : > { %v2842_v23 = vpack.c.bf16 %v2639_v3, %v2636_v53  ;;  %v10816_v10 = vpop.f32.mrb[87].mxu0 }
 0x516   : > { %2858 = vst.msk [vmem:[#allocation2 + $0x58] sm:$0xff] %vm768_vm2, %v2842_v23 }
 0x519   : > { %v2683_v38 = vpop.f32.mrb[88].mxu1 }
 0x51a   : > { %v10821_v46 = vpop.f32.mrb[89].mxu1 }
 0x51b   : > { %v2686_v43 = vpop.f32.mrb[90].mxu1 }
 0x51c   : > { %v2843_v30 = vpack.c.bf16 %v2686_v43, %v2683_v38  ;;  %v10822_v0 = vpop.f32.mrb[91].mxu1 }
 0x51e   : > { %2859 = vst.msk [vmem:[#allocation2 + $0x60] sm:$0xff] %vm768_vm2, %v2843_v30 }
 0x521   : > { %v2730_v22 = vpop.f32.mrb[88].mxu0 }
 0x522   : > { %v10827_v25 = vpop.f32.mrb[89].mxu0 }
 0x523   : > { %v2733_v42 = vpop.f32.mrb[90].mxu0 }
 0x524   : > { %v2844_v58 = vpack.c.bf16 %v2733_v42, %v2730_v22  ;;  %v10828_v1 = vpop.f32.mrb[91].mxu0 }
 0x526   : > { %2860 = vst.msk [vmem:[#allocation2 + $0x68] sm:$0xff] %vm768_vm2, %v2844_v58 }
 0x529   : > { %v2777_v56 = vpop.f32.mrb[92].mxu1 }
 0x52a   : > { %v10833_v21 = vpop.f32.mrb[93].mxu1 }
 0x52b   : > { %v2780_v19 = vpop.f32.mrb[94].mxu1 }
 0x52c   : > { %v2845_v62 = vpack.c.bf16 %v2780_v19, %v2777_v56  ;;  %v10834_v35 = vpop.f32.mrb[95].mxu1 }
 0x52e   : > { %2861 = vst.msk [vmem:[#allocation2 + $0x70] sm:$0xff] %vm768_vm2, %v2845_v62 }
 0x531   : > { %v2824_v36 = vpop.f32.mrb[92].mxu0  ;;  %v13531_v32 = vpop.f32.mrb[96].mxu1 }
 0x532   : > { %v10839_v63 = vpop.f32.mrb[93].mxu0  ;;  %v10845_v37 = vpop.f32.mrb[97].mxu1  ;;  %v3679_v55 = vsel %vm768_vm2, %v13531_v32, -inf }
 0x533   : > { %v2827_v47 = vpop.f32.mrb[94].mxu0  ;;  %3680 = vmax.xlane.f32.xlu0 %v3679_v55  ;;  %v13535_v50 = vpop.f32.mrb[98].mxu1 }
 0x534   : > { %v2846_v9 = vpack.c.bf16 %v2827_v47, %v2824_v36  ;;  %v10840_v39 = vpop.f32.mrb[95].mxu0  ;;  %v10846_v6 = vpop.f32.mrb[99].mxu1  ;;  %v3682_v8 = vsel %vm768_vm2, %v13535_v50, -inf }
 0x535   : > { %3683 = vmax.xlane.f32.xlu1 %v3682_v8 }
 0x536   : > { %2862 = vst.msk [vmem:[#allocation2 + $0x78] sm:$0xff] %vm768_vm2, %v2846_v9 }
 0x539   : > { %v13540_v4 = vpop.f32.mrb[96].mxu0  ;;  %v13542_v31 = vpop.f32.mrb[100].mxu1 }
 0x53a   : > { %v10851_v5 = vpop.f32.mrb[97].mxu0  ;;  %v10857_v44 = vpop.f32.mrb[101].mxu1  ;;  %v3685_v33 = vsel %vm768_vm2, %v13540_v4, -inf  ;;  %v3691_v27 = vsel %vm768_vm2, %v13542_v31, -inf }
 0x53b   : > { %3686 = vmax.xlane.f32.xlu0 %v3685_v33  ;;  %v13548_v20 = vpop.f32.mrb[98].mxu0  ;;  %3692 = vmax.xlane.f32.xlu1 %v3691_v27  ;;  %v13550_v18 = vpop.f32.mrb[102].mxu1 }
 0x53c   : > { %v10852_v60 = vpop.f32.mrb[99].mxu0  ;;  %v10858_v11 = vpop.f32.mrb[103].mxu1  ;;  %v3688_v13 = vsel %vm768_vm2, %v13548_v20, -inf  ;;  %v3694_v16 = vsel %vm768_vm2, %v13550_v18, -inf }
 0x53f   : > { %3689 = vmax.xlane.f32.xlu0 %v3688_v13 }
 0x541   : > { %v13554_v12 = vpop.f32.mrb[100].mxu0  ;;  %v13556_v48 = vpop.f32.mrb[104].mxu1 }
 0x542   : > { %v10863_v52 = vpop.f32.mrb[101].mxu0  ;;  %v10869_v15 = vpop.f32.mrb[105].mxu1  ;;  %v3697_v53 = vsel %vm768_vm2, %v13554_v12, -inf  ;;  %v3703_v46 = vsel %vm768_vm2, %v13556_v48, -inf }
 0x543   : > { %3695 = vmax.xlane.f32.xlu0 %v3694_v16  ;;  %3698 = vmax.xlane.f32.xlu1 %v3697_v53  ;;  %v13562_v57 = vpop.f32.mrb[102].mxu0  ;;  %v13564_v3 = vpop.f32.mrb[106].mxu1 }
 0x544   : > { %v10864_v23 = vpop.f32.mrb[103].mxu0  ;;  %v10870_v10 = vpop.f32.mrb[107].mxu1  ;;  %v3700_v38 = vsel %vm768_vm2, %v13562_v57, -inf  ;;  %v3706_v25 = vsel %vm768_vm2, %v13564_v3, -inf }
 0x547   : > { %3701 = vmax.xlane.f32.xlu0 %v3700_v38  ;;  %3704 = vmax.xlane.f32.xlu1 %v3703_v46 }
 0x549   : > { %v13570_v43 = vpop.f32.mrb[104].mxu0  ;;  %v13572_v30 = vpop.f32.mrb[108].mxu1 }
 0x54a   : > { %v10875_v0 = vpop.f32.mrb[105].mxu0  ;;  %v10881_v22 = vpop.f32.mrb[109].mxu1  ;;  %v3709_v42 = vsel %vm768_vm2, %v13570_v43, -inf  ;;  %v3715_v62 = vsel %vm768_vm2, %v13572_v30, -inf }
 0x54b   : > { %3707 = vmax.xlane.f32.xlu0 %v3706_v25  ;;  %3710 = vmax.xlane.f32.xlu1 %v3709_v42  ;;  %v13578_v58 = vpop.f32.mrb[106].mxu0  ;;  %v13580_v1 = vpop.f32.mrb[110].mxu1 }
 0x54c   : > { %v10876_v56 = vpop.f32.mrb[107].mxu0  ;;  %v10882_v21 = vpop.f32.mrb[111].mxu1  ;;  %v3712_v19 = vsel %vm768_vm2, %v13578_v58, -inf  ;;  %v3718_v55 = vsel %vm768_vm2, %v13580_v1, -inf }
 0x54f   : > { %3713 = vmax.xlane.f32.xlu0 %v3712_v19  ;;  %3716 = vmax.xlane.f32.xlu1 %v3715_v62 }
 0x551   : > { %v13586_v35 = vpop.f32.mrb[108].mxu0  ;;  %v13588_v36 = vpop.f32.mrb[112].mxu1 }
 0x552   : > { %v10887_v63 = vpop.f32.mrb[109].mxu0  ;;  %v10893_v37 = vpop.f32.mrb[113].mxu1  ;;  %v3721_v47 = vsel %vm768_vm2, %v13586_v35, -inf  ;;  %v3727_v44 = vsel %vm768_vm2, %v13588_v36, -inf }
 0x553   : > { %3719 = vmax.xlane.f32.xlu0 %v3718_v55  ;;  %3722 = vmax.xlane.f32.xlu1 %v3721_v47  ;;  %v13594_v9 = vpop.f32.mrb[110].mxu0  ;;  %v13596_v39 = vpop.f32.mrb[114].mxu1 }
 0x554   : > { %v10888_v6 = vpop.f32.mrb[111].mxu0  ;;  %v10894_v8 = vpop.f32.mrb[115].mxu1  ;;  %v3724_v5 = vsel %vm768_vm2, %v13594_v9, -inf  ;;  %v3730_v13 = vsel %vm768_vm2, %v13596_v39, -inf }
 0x557   : > { %3725 = vmax.xlane.f32.xlu0 %v3724_v5  ;;  %3728 = vmax.xlane.f32.xlu1 %v3727_v44 }
 0x559   : > { %v13602_v33 = vpop.f32.mrb[112].mxu0  ;;  %v13604_v27 = vpop.f32.mrb[116].mxu1 }
 0x55a   : > { %v10899_v60 = vpop.f32.mrb[113].mxu0  ;;  %v10905_v11 = vpop.f32.mrb[117].mxu1  ;;  %v3733_v52 = vsel %vm768_vm2, %v13602_v33, -inf  ;;  %v3739_v38 = vsel %vm768_vm2, %v13604_v27, -inf }
 0x55b   : > { %3731 = vmax.xlane.f32.xlu0 %v3730_v13  ;;  %3734 = vmax.xlane.f32.xlu1 %v3733_v52  ;;  %v13610_v15 = vpop.f32.mrb[114].mxu0  ;;  %v13612_v16 = vpop.f32.mrb[118].mxu1 }
 0x55c   : > { %v10900_v53 = vpop.f32.mrb[115].mxu0  ;;  %v10906_v23 = vpop.f32.mrb[119].mxu1  ;;  %v3736_v10 = vsel %vm768_vm2, %v13610_v15, -inf  ;;  %v3742_v42 = vsel %vm768_vm2, %v13612_v16, -inf }
 0x55f   : > { %3737 = vmax.xlane.f32.xlu0 %v3736_v10  ;;  %3740 = vmax.xlane.f32.xlu1 %v3739_v38 }
 0x561   : > { %v13618_v46 = vpop.f32.mrb[116].mxu0  ;;  %v13620_v0 = vpop.f32.mrb[120].mxu1 }
 0x562   : > { %v10911_v22 = vpop.f32.mrb[117].mxu0  ;;  %v10917_v25 = vpop.f32.mrb[121].mxu1  ;;  %v3745_v56 = vsel %vm768_vm2, %v13618_v46, -inf  ;;  %v3751_v55 = vsel %vm768_vm2, %v13620_v0, -inf }
 0x563   : > { %3743 = vmax.xlane.f32.xlu0 %v3742_v42  ;;  %3746 = vmax.xlane.f32.xlu1 %v3745_v56  ;;  %v13626_v21 = vpop.f32.mrb[118].mxu0  ;;  %v13628_v19 = vpop.f32.mrb[122].mxu1 }
 0x564   : > { %v10912_v62 = vpop.f32.mrb[119].mxu0  ;;  %v10918_v63 = vpop.f32.mrb[123].mxu1  ;;  %v3748_v37 = vsel %vm768_vm2, %v13626_v21, -inf  ;;  %v3754_v44 = vsel %vm768_vm2, %v13628_v19, -inf }
 0x567   : > { %3749 = vmax.xlane.f32.xlu0 %v3748_v37  ;;  %3752 = vmax.xlane.f32.xlu1 %v3751_v55  ;;  %v13664_v37 = vpop.permute.xlu1 %4286 }
 0x569   : > { %v13634_v47 = vpop.f32.mrb[120].mxu0  ;;  %v13636_v6 = vpop.f32.mrb[124].mxu1 }
 0x56a   : > { %v10923_v8 = vpop.f32.mrb[121].mxu0  ;;  %v10929_v5 = vpop.f32.mrb[125].mxu1  ;;  %v3757_v60 = vsel %vm768_vm2, %v13634_v47, -inf  ;;  %v3763_v10 = vsel %vm768_vm2, %v13636_v6, -inf }
 0x56b   : > { %3755 = vmax.xlane.f32.xlu0 %v3754_v44  ;;  %3758 = vmax.xlane.f32.xlu1 %v3757_v60  ;;  %v13642_v11 = vpop.f32.mrb[122].mxu0  ;;  %v13644_v13 = vpop.f32.mrb[126].mxu1 }
 0x56c   : > { %v10924_v52 = vpop.f32.mrb[123].mxu0  ;;  %v10930_v53 = vpop.f32.mrb[127].mxu1  ;;  %v3760_v23 = vsel %vm768_vm2, %v13642_v11, -inf  ;;  %v3766_v42 = vsel %vm768_vm2, %v13644_v13, -inf }
 0x56d   : > { %v13666_v55 = vpop.permute.xlu1 %4380  ;;  %v13668_v8 = vpop.permute.xlu0 %4333 }
 0x56e   : > { %15999 = vst [vmem:[#allocation26_spill] sm:$0xff] %v13666_v55  ;;  %16000 = vst [vmem:[#allocation33_spill] sm:$0xff] %v13668_v8 }
 0x56f   : > { %3761 = vmax.xlane.f32.xlu0 %v3760_v23  ;;  %3764 = vmax.xlane.f32.xlu1 %v3763_v10 }
 0x571   : > { %v13650_v38 = vpop.f32.mrb[124].mxu0  ;;  %v13670_v5 = vpop.permute.xlu1 %4474 }
 0x572   : > { %v10935_v22 = vpop.f32.mrb[125].mxu0  ;;  %v3769_v25 = vsel %vm768_vm2, %v13650_v38, -inf  ;;  %16001 = vst [vmem:[#allocation28_spill] sm:$0xff] %v13670_v5  ;;  %v13672_v44 = vpop.permute.xlu0 %4427 }
 0x573   : > { %v13656_v56 = vpop.f32.mrb[126].mxu0  ;;  %3770 = vmax.xlane.f32.xlu1 %v3769_v25  ;;  %3767 = vmax.xlane.f32.xlu0 %v3766_v42  ;;  %16002 = vst [vmem:[#allocation32_spill] sm:$0xff] %v13672_v44 }
 0x574   : > { %v10936_v62 = vpop.f32.mrb[127].mxu0  ;;  %v3772_v63 = vsel %vm768_vm2, %v13656_v56, -inf }
 0x575   : > { %v13674_v60 = vpop.permute.xlu1 %4568 }
 0x576   : > { %16003 = vst [vmem:[#allocation30_spill] sm:$0xff] %v13674_v60  ;;  %v13676_v52 = vpop.permute.xlu0 %4521 }
 0x577   : > { %3773 = vmax.xlane.f32.xlu0 %v3772_v63  ;;  %16004 = vst [vmem:[#allocation35_spill] sm:$0xff] %v13676_v52 }
 0x579   : > { %v13678_v53 = vpop.permute.xlu1 %4662 }
 0x57a   : > { %16005 = vst [vmem:[#allocation34_spill] sm:$0xff] %v13678_v53  ;;  %v13680_v23 = vpop.permute.xlu0 %4615 }
 0x57b   : > { %16006 = vst [vmem:[#allocation37_spill] sm:$0xff] %v13680_v23 }
 0x57d   : > { %v13682_v10 = vpop.permute.xlu1 %4709 }
 0x57e   : > { %16007 = vst [vmem:[#allocation36_spill] sm:$0xff] %v13682_v10  ;;  %v13684_v22 = vpop.permute.xlu0 %4756 }
 0x57f   : > { %16008 = vst [vmem:[#allocation38_spill] sm:$0xff] %v13684_v22 }
 0x581   : > { %v13686_v25 = vpop.permute.xlu1 %4803 }
 0x582   : > { %16009 = vst [vmem:[#allocation39_spill] sm:$0xff] %v13686_v25 }
 0x584   : > { %4897 = vrot.lane.b32.xlu1 %v15991_v29, %s12264_s14 }
 0x58d   : > { %4850 = vrot.lane.b32.xlu0 %v15989_v24, %s12264_s14 }
 0x5c0   : > { %v3681_v42 = vpop.xlane.xlu0 %3680 }
 0x5c1   : > { %v3775_v62 = vsub.f32 %v13531_v32, %v3681_v42 }
 0x5c2   : > { %v3684_v63 = vpop.xlane.xlu1 %3683 }
 0x5c3   : > { %v3807_v5 = vmul.f32 1.442695, %v3775_v62  ;;  %v3776_v44 = vsub.f32 %v13535_v50, %v3684_v63 }
 0x5c5   : > { %11708 = vpow2.f32 %v3807_v5  ;;  %v3809_v60 = vmul.f32 1.442695, %v3776_v44 }
 0x5c7   : > { %11710 = vpow2.f32 %v3809_v60 }
 0x5c8   : > { %v3693_v52 = vpop.xlane.xlu1 %3692  ;;  %v3687_v53 = vpop.xlane.xlu0 %3686 }
 0x5c9   : > { %v3779_v23 = vsub.f32 %v13542_v31, %v3693_v52  ;;  %v3777_v10 = vsub.f32 %v13540_v4, %v3687_v53 }
 0x5cb   : > { %v3811_v55 = vmul.f32 1.442695, %v3777_v10  ;;  %v3815_v22 = vmul.f32 1.442695, %v3779_v23 }
 0x5cc   : > { %v3690_v8 = vpop.xlane.xlu0 %3689 }
 0x5cd   : > { %v3778_v25 = vsub.f32 %v13548_v20, %v3690_v8  ;;  %11712 = vpow2.f32 %v3811_v55 }
 0x5ce   : > { %11714 = vpow2.f32 %v3815_v22 }
 0x5cf   : > { %v13693_v32 = vpop.eup %11708  ;;  %v3813_v42 = vmul.f32 1.442695, %v3778_v25 }
 0x5d0   : > { %v3699_v50 = vpop.xlane.xlu1 %3698  ;;  %v3696_v5 = vpop.xlane.xlu0 %3695  ;;  %v3871_v44 = vsel %vm768_vm2, %v13693_v32, 0.0 }
 0x5d1   : > { %v13697_v60 = vpop.eup %11710  ;;  %11716 = vpow2.f32 %v3813_v42  ;;  %v3781_v4 = vsub.f32 %v13554_v12, %v3699_v50  ;;  %v3780_v31 = vsub.f32 %v13550_v18, %v3696_v5  ;;  %3872 = vadd.xlane.f32.xlu1 %v3871_v44 }
 0x5d2   : > { %v3874_v20 = vsel %vm768_vm2, %v13697_v60, 0.0 }
 0x5d3   : > { %v3819_v55 = vmul.f32 1.442695, %v3781_v4  ;;  %v3817_v8 = vmul.f32 1.442695, %v3780_v31  ;;  %3875 = vadd.xlane.f32.xlu0 %v3874_v20 }
 0x5d4   : > { %v3705_v52 = vpop.xlane.xlu1 %3704  ;;  %v3702_v53 = vpop.xlane.xlu0 %3701 }
 0x5d5   : > { %11718 = vpow2.f32 %v3819_v55  ;;  %v3783_v23 = vsub.f32 %v13556_v48, %v3705_v52  ;;  %v3782_v10 = vsub.f32 %v13562_v57, %v3702_v53 }
 0x5d6   : > { %11720 = vpow2.f32 %v3817_v8 }
 0x5d7   : > { %v3823_v22 = vmul.f32 1.442695, %v3783_v23  ;;  %v3821_v25 = vmul.f32 1.442695, %v3782_v10  ;;  %v13705_v12 = vpop.eup %11712 }
 0x5d8   : > { %v3711_v18 = vpop.xlane.xlu1 %3710  ;;  %v3708_v62 = vpop.xlane.xlu0 %3707  ;;  %v3877_v50 = vsel %vm768_vm2, %v13705_v12, 0.0 }
 0x5d9   : > { %11722 = vpow2.f32 %v3823_v22  ;;  %v3785_v63 = vsub.f32 %v13570_v43, %v3711_v18  ;;  %v3784_v42 = vsub.f32 %v13564_v3, %v3708_v62  ;;  %v13711_v5 = vpop.eup %11714  ;;  %3878 = vadd.xlane.f32.xlu1 %v3877_v50 }
 0x5da   : > { %11724 = vpow2.f32 %v3821_v25  ;;  %v3883_v55 = vsel %vm768_vm2, %v13711_v5, 0.0 }
 0x5db   : > { %v13713_v48 = vpop.eup %11716  ;;  %v3827_v57 = vmul.f32 1.442695, %v3785_v63  ;;  %v3825_v44 = vmul.f32 1.442695, %v3784_v42 }
 0x5dc   : > { %v3717_v4 = vpop.xlane.xlu1 %3716  ;;  %v3714_v31 = vpop.xlane.xlu0 %3713  ;;  %v3880_v20 = vsel %vm768_vm2, %v13713_v48, 0.0 }
 0x5dd   : > { %11726 = vpow2.f32 %v3827_v57  ;;  %v3787_v43 = vsub.f32 %v13572_v30, %v3717_v4  ;;  %v3786_v3 = vsub.f32 %v13578_v58, %v3714_v31  ;;  %3881 = vadd.xlane.f32.xlu0 %v3880_v20  ;;  %3884 = vadd.xlane.f32.xlu1 %v3883_v55 }
 0x5de   : > { %11728 = vpow2.f32 %v3825_v44 }
 0x5df   : > { %v13721_v8 = vpop.eup %11718  ;;  %v3831_v52 = vmul.f32 1.442695, %v3787_v43  ;;  %v3829_v53 = vmul.f32 1.442695, %v3786_v3 }
 0x5e0   : > { %v13723_v23 = vpop.eup %11720  ;;  %v3723_v10 = vpop.xlane.xlu1 %3722  ;;  %v3889_v25 = vsel %vm768_vm2, %v13721_v8, 0.0 }
 0x5e1   : > { %v3720_v22 = vpop.xlane.xlu0 %3719  ;;  %11730 = vpow2.f32 %v3831_v52  ;;  %v3789_v30 = vsub.f32 %v13586_v35, %v3723_v10  ;;  %v3886_v18 = vsel %vm768_vm2, %v13723_v23, 0.0  ;;  %3890 = vadd.xlane.f32.xlu1 %v3889_v25 }
 0x5e2   : > { %v3788_v58 = vsub.f32 %v13580_v1, %v3720_v22  ;;  %11732 = vpow2.f32 %v3829_v53  ;;  %3887 = vadd.xlane.f32.xlu0 %v3886_v18 }
 0x5e3   : > { %v13731_v62 = vpop.eup %11722  ;;  %v3835_v63 = vmul.f32 1.442695, %v3789_v30 }
 0x5e4   : > { %v3833_v42 = vmul.f32 1.442695, %v3788_v58  ;;  %v13733_v50 = vpop.eup %11724  ;;  %v3729_v57 = vpop.xlane.xlu1 %3728  ;;  %v3895_v4 = vsel %vm768_vm2, %v13731_v62, 0.0 }
 0x5e5   : > { %v3726_v44 = vpop.xlane.xlu0 %3725  ;;  %11734 = vpow2.f32 %v3835_v63  ;;  %v3791_v1 = vsub.f32 %v13588_v36, %v3729_v57  ;;  %v3892_v31 = vsel %vm768_vm2, %v13733_v50, 0.0  ;;  %3896 = vadd.xlane.f32.xlu1 %v3895_v4 }
 0x5e6   : > { %v3790_v35 = vsub.f32 %v13594_v9, %v3726_v44  ;;  %11736 = vpow2.f32 %v3833_v42  ;;  %3893 = vadd.xlane.f32.xlu0 %v3892_v31 }
 0x5e7   : > { %v13741_v20 = vpop.eup %11726  ;;  %v3839_v43 = vmul.f32 1.442695, %v3791_v1 }
 0x5e8   : > { %v3837_v3 = vmul.f32 1.442695, %v3790_v35  ;;  %v13743_v55 = vpop.eup %11728  ;;  %v3735_v52 = vpop.xlane.xlu1 %3734  ;;  %v3901_v10 = vsel %vm768_vm2, %v13741_v20, 0.0 }
 0x5e9   : > { %v3732_v53 = vpop.xlane.xlu0 %3731  ;;  %11738 = vpow2.f32 %v3839_v43  ;;  %v3793_v36 = vsub.f32 %v13602_v33, %v3735_v52  ;;  %v3898_v22 = vsel %vm768_vm2, %v13743_v55, 0.0  ;;  %3902 = vadd.xlane.f32.xlu1 %v3901_v10 }
 0x5ea   : > { %v3792_v9 = vsub.f32 %v13596_v39, %v3732_v53  ;;  %11740 = vpow2.f32 %v3837_v3  ;;  %3899 = vadd.xlane.f32.xlu0 %v3898_v22 }
 0x5eb   : > { %v13751_v25 = vpop.eup %11730  ;;  %v3843_v30 = vmul.f32 1.442695, %v3793_v36 }
 0x5ec   : > { %v3841_v58 = vmul.f32 1.442695, %v3792_v9  ;;  %v13753_v18 = vpop.eup %11732  ;;  %v3741_v63 = vpop.xlane.xlu1 %3740  ;;  %v3907_v57 = vsel %vm768_vm2, %v13751_v25, 0.0 }
 0x5ed   : > { %v3738_v42 = vpop.xlane.xlu0 %3737  ;;  %11742 = vpow2.f32 %v3843_v30  ;;  %v3795_v39 = vsub.f32 %v13604_v27, %v3741_v63  ;;  %v3904_v44 = vsel %vm768_vm2, %v13753_v18, 0.0  ;;  %3908 = vadd.xlane.f32.xlu1 %v3907_v57 }
 0x5ee   : > { %v3794_v33 = vsub.f32 %v13610_v15, %v3738_v42  ;;  %11744 = vpow2.f32 %v3841_v58  ;;  %3905 = vadd.xlane.f32.xlu0 %v3904_v44 }
 0x5ef   : > { %v13761_v4 = vpop.eup %11734  ;;  %v3847_v1 = vmul.f32 1.442695, %v3795_v39 }
 0x5f0   : > { %v3845_v35 = vmul.f32 1.442695, %v3794_v33  ;;  %v13763_v31 = vpop.eup %11736  ;;  %v3747_v43 = vpop.xlane.xlu1 %3746  ;;  %v3913_v52 = vsel %vm768_vm2, %v13761_v4, 0.0 }
 0x5f1   : > { %v3744_v3 = vpop.xlane.xlu0 %3743  ;;  %11746 = vpow2.f32 %v3847_v1  ;;  %v3797_v27 = vsub.f32 %v13618_v46, %v3747_v43  ;;  %v3910_v53 = vsel %vm768_vm2, %v13763_v31, 0.0  ;;  %3914 = vadd.xlane.f32.xlu1 %v3913_v52 }
 0x5f2   : > { %v3796_v15 = vsub.f32 %v13612_v16, %v3744_v3  ;;  %11748 = vpow2.f32 %v3845_v35  ;;  %3911 = vadd.xlane.f32.xlu0 %v3910_v53 }
 0x5f3   : > { %v13771_v10 = vpop.eup %11738  ;;  %v3851_v36 = vmul.f32 1.442695, %v3797_v27 }
 0x5f4   : > { %v3849_v9 = vmul.f32 1.442695, %v3796_v15  ;;  %v13773_v22 = vpop.eup %11740  ;;  %v3753_v30 = vpop.xlane.xlu1 %3752  ;;  %v3919_v63 = vsel %vm768_vm2, %v13771_v10, 0.0 }
 0x5f5   : > { %v3750_v58 = vpop.xlane.xlu0 %3749  ;;  %11750 = vpow2.f32 %v3851_v36  ;;  %v3799_v16 = vsub.f32 %v13620_v0, %v3753_v30  ;;  %v3916_v42 = vsel %vm768_vm2, %v13773_v22, 0.0  ;;  %3920 = vadd.xlane.f32.xlu1 %v3919_v63 }
 0x5f6   : > { %v3798_v46 = vsub.f32 %v13626_v21, %v3750_v58  ;;  %11752 = vpow2.f32 %v3849_v9  ;;  %3917 = vadd.xlane.f32.xlu0 %v3916_v42 }
 0x5f7   : > { %v13781_v57 = vpop.eup %11742  ;;  %v3855_v39 = vmul.f32 1.442695, %v3799_v16 }
 0x5f8   : > { %v3853_v33 = vmul.f32 1.442695, %v3798_v46  ;;  %v13783_v44 = vpop.eup %11744  ;;  %v3759_v1 = vpop.xlane.xlu1 %3758  ;;  %v3925_v43 = vsel %vm768_vm2, %v13781_v57, 0.0 }
 0x5f9   : > { %v3756_v35 = vpop.xlane.xlu0 %3755  ;;  %11754 = vpow2.f32 %v3855_v39  ;;  %v3801_v0 = vsub.f32 %v13634_v47, %v3759_v1  ;;  %v3922_v3 = vsel %vm768_vm2, %v13783_v44, 0.0  ;;  %3926 = vadd.xlane.f32.xlu1 %v3925_v43 }
 0x5fa   : > { %v3800_v21 = vsub.f32 %v13628_v19, %v3756_v35  ;;  %11756 = vpow2.f32 %v3853_v33  ;;  %3923 = vadd.xlane.f32.xlu0 %v3922_v3 }
 0x5fb   : > { %v13791_v52 = vpop.eup %11746  ;;  %v3859_v27 = vmul.f32 1.442695, %v3801_v0 }
 0x5fc   : > { %v3857_v15 = vmul.f32 1.442695, %v3800_v21  ;;  %v13793_v53 = vpop.eup %11748  ;;  %v3765_v36 = vpop.xlane.xlu1 %3764  ;;  %v3931_v30 = vsel %vm768_vm2, %v13791_v52, 0.0 }
 0x5fd   : > { %v3762_v9 = vpop.xlane.xlu0 %3761  ;;  %11758 = vpow2.f32 %v3859_v27  ;;  %v3803_v19 = vsub.f32 %v13636_v6, %v3765_v36  ;;  %v3928_v58 = vsel %vm768_vm2, %v13793_v53, 0.0  ;;  %3932 = vadd.xlane.f32.xlu1 %v3931_v30 }
 0x5fe   : > { %v3802_v47 = vsub.f32 %v13642_v11, %v3762_v9  ;;  %11760 = vpow2.f32 %v3857_v15  ;;  %3929 = vadd.xlane.f32.xlu0 %v3928_v58 }
 0x5ff   : > { %v13801_v63 = vpop.eup %11750  ;;  %v3863_v16 = vmul.f32 1.442695, %v3803_v19 }
 0x600   : > { %v3861_v46 = vmul.f32 1.442695, %v3802_v47  ;;  %v13803_v42 = vpop.eup %11752  ;;  %v3771_v39 = vpop.xlane.xlu1 %3770  ;;  %v3937_v1 = vsel %vm768_vm2, %v13801_v63, 0.0 }
 0x601   : > { %v3768_v33 = vpop.xlane.xlu0 %3767  ;;  %11762 = vpow2.f32 %v3863_v16  ;;  %v3805_v6 = vsub.f32 %v13650_v38, %v3771_v39  ;;  %v3934_v35 = vsel %vm768_vm2, %v13803_v42, 0.0  ;;  %3938 = vadd.xlane.f32.xlu1 %v3937_v1 }
 0x602   : > { %v3804_v11 = vsub.f32 %v13644_v13, %v3768_v33  ;;  %11764 = vpow2.f32 %v3861_v46  ;;  %3935 = vadd.xlane.f32.xlu0 %v3934_v35 }
 0x603   : > { %v13811_v43 = vpop.eup %11754  ;;  %v3867_v0 = vmul.f32 1.442695, %v3805_v6 }
 0x604   : > { %v3865_v21 = vmul.f32 1.442695, %v3804_v11  ;;  %v13813_v3 = vpop.eup %11756  ;;  %v3943_v15 = vsel %vm768_vm2, %v13811_v43, 0.0 }
 0x605   : > { %v3774_v27 = vpop.xlane.xlu0 %3773  ;;  %11766 = vpow2.f32 %v3867_v0  ;;  %v3940_v13 = vsel %vm768_vm2, %v13813_v3, 0.0  ;;  %3944 = vadd.xlane.f32.xlu1 %v3943_v15 }
 0x606   : > { %v3806_v38 = vsub.f32 %v13656_v56, %v3774_v27  ;;  %11768 = vpow2.f32 %v3865_v21  ;;  %3941 = vadd.xlane.f32.xlu0 %v3940_v13 }
 0x607   : > { %v13820_v36 = vpop.eup %11758 }
 0x608   : > { %v3869_v9 = vmul.f32 1.442695, %v3806_v38  ;;  %v13822_v30 = vpop.eup %11760  ;;  %v3949_v19 = vsel %vm768_vm2, %v13820_v36, 0.0 }
 0x609   : > { %v3946_v47 = vsel %vm768_vm2, %v13822_v30, 0.0  ;;  %3950 = vadd.xlane.f32.xlu1 %v3949_v19 }
 0x60a   : > { %11770 = vpow2.f32 %v3869_v9  ;;  %3947 = vadd.xlane.f32.xlu0 %v3946_v47 }
 0x60b   : > { %v13828_v56 = vpop.eup %11762 }
 0x60c   : > { %v13830_v58 = vpop.eup %11764  ;;  %v3955_v16 = vsel %vm768_vm2, %v13828_v56, 0.0 }
 0x60d   : > { %v3952_v46 = vsel %vm768_vm2, %v13830_v58, 0.0  ;;  %3956 = vadd.xlane.f32.xlu1 %v3955_v16 }
 0x60e   : > { %3953 = vadd.xlane.f32.xlu0 %v3952_v46 }
 0x60f   : > { %v13836_v39 = vpop.eup %11766 }
 0x610   : > { %v13838_v33 = vpop.eup %11768  ;;  %v3961_v1 = vsel %vm768_vm2, %v13836_v39, 0.0 }
 0x611   : > { %v3958_v6 = vsel %vm768_vm2, %v13838_v33, 0.0  ;;  %3962 = vadd.xlane.f32.xlu1 %v3961_v1 }
 0x612   : > { %3959 = vadd.xlane.f32.xlu0 %v3958_v6 }
 0x614   : > { %v13844_v11 = vpop.eup %11770 }
 0x615   : > { %v3964_v35 = vsel %vm768_vm2, %v13844_v11, 0.0 }
 0x616   : > { %3965 = vadd.xlane.f32.xlu0 %v3964_v35 }
 0x622   : > { %5094 = vrot.lane.b32.xlu1 %v12572_v51, %s12265_s7 }
 0x626   : > { %5145 = vrot.lane.b32.xlu1 %v12582_v61, %s12265_s7 }
 0x62a   : > { %5196 = vrot.lane.b32.xlu1 %v12592_v7, %s12265_s7 }
 0x62c   : > { %5043 = vrot.lane.b32.xlu0 %v12562_v41, %s12265_s7 }
 0x62e   : > { %5247 = vrot.lane.b32.xlu1 %v12602_v17, %s12265_s7 }
 0x630   : > { %5041 = vrot.lane.b32.xlu0 %v12562_v41, %s12266_s12  ;;  %v13900_v41 = vpop.permute.xlu1 %4897 }
 0x632   : > { %5298 = vrot.lane.b32.xlu1 %v12612_v28, %s12265_s7 }
 0x634   : > { %5092 = vrot.lane.b32.xlu0 %v12572_v51, %s12266_s12  ;;  %v13904_v51 = vpop.permute.xlu0 %4850 }
 0x636   : > { %5349 = vrot.lane.b32.xlu1 %v12622_v40, %s12265_s7 }
 0x638   : > { %5143 = vrot.lane.b32.xlu0 %v12582_v61, %s12266_s12 }
 0x63a   : > { %5400 = vrot.lane.b32.xlu1 %v12632_v54, %s12265_s7 }
 0x63c   : > { %5194 = vrot.lane.b32.xlu0 %v12592_v7, %s12266_s12 }
 0x63e   : > { %5451 = vrot.lane.b32.xlu1 %v12642_v2, %s12265_s7 }
 0x640   : > { %5245 = vrot.lane.b32.xlu0 %v12602_v17, %s12266_s12 }
 0x642   : > { %5502 = vrot.lane.b32.xlu1 %v12652_v14, %s12265_s7 }
 0x644   : > { %5296 = vrot.lane.b32.xlu0 %v12612_v28, %s12266_s12 }
 0x646   : > { %5553 = vrot.lane.b32.xlu1 %v12662_v26, %s12265_s7 }
 0x648   : > { %5347 = vrot.lane.b32.xlu0 %v12622_v40, %s12266_s12 }
 0x64a   : > { %5604 = vrot.lane.b32.xlu1 %v12672_v45, %s12265_s7 }
 0x64c   : > { %5398 = vrot.lane.b32.xlu0 %v12632_v54, %s12266_s12 }
 0x64e   : > { %5655 = vrot.lane.b32.xlu1 %v12682_v59, %s12265_s7 }
 0x650   : > { %5449 = vrot.lane.b32.xlu0 %v12642_v2, %s12266_s12 }
 0x652   : > { %5706 = vrot.lane.b32.xlu1 %v15987_v49, %s12265_s7 }
 0x654   : > { %5500 = vrot.lane.b32.xlu0 %v12652_v14, %s12266_s12 }
 0x656   : > { %5757 = vrot.lane.b32.xlu1 %v15989_v24, %s12265_s7 }
 0x658   : > { %5551 = vrot.lane.b32.xlu0 %v12662_v26, %s12266_s12 }
 0x65a   : > { %5808 = vrot.lane.b32.xlu1 %v15991_v29, %s12265_s7 }
 0x65c   : > { %5602 = vrot.lane.b32.xlu0 %v12672_v45, %s12266_s12 }
 0x65e   : > { %v3873_v61 = vpop.xlane.xlu1 %3872  ;;  %5806 = vrot.lane.b32.xlu1 %v15991_v29, %s12266_s12 }
 0x65f   : > { %11772 = vrcp.f32 %v3873_v61 }
 0x660   : > { %5653 = vrot.lane.b32.xlu0 %v12682_v59, %s12266_s12  ;;  %v3876_v7 = vpop.xlane.xlu0 %3875 }
 0x661   : > { %11774 = vrcp.f32 %v3876_v7 }
 0x664   : > { %5704 = vrot.lane.b32.xlu0 %v15987_v49, %s12266_s12 }
 0x666   : > { %v3879_v17 = vpop.xlane.xlu1 %3878 }
 0x667   : > { %11776 = vrcp.f32 %v3879_v17 }
 0x668   : > { %5755 = vrot.lane.b32.xlu0 %v15989_v24, %s12266_s12 }
 0x669   : > { %v11773_v28 = vpop.eup %11772 }
 0x66a   : > { %v3999_v40 = vmul.f32 %v11773_v28, %v13693_v32  ;;  %v3882_v54 = vpop.xlane.xlu0 %3881  ;;  %v3885_v14 = vpop.xlane.xlu1 %3884 }
 0x66b   : > { %v11775_v2 = vpop.eup %11774  ;;  %11778 = vrcp.f32 %v3882_v54 }
 0x66c   : > { %v10275_v26 = vpack.c.bf16 %v3999_v40, %v3999_v40  ;;  %v4000_v45 = vmul.f32 %v11775_v2, %v13697_v60  ;;  %11780 = vrcp.f32 %v3885_v14 }
 0x66e   : > { %9973 = vst.msk [vmem:[%s13199_s15 + $0x8] sm:$0xf] %vm2046_vm3, %v10275_v26  ;;  %v10276_v59 = vpack.c.bf16 %v4000_v45, %v4000_v45  ;;  %v4031_v49 = vpack.c.bf16 %v4000_v45, %v3999_v40  ;;  %v3891_v29 = vpop.xlane.xlu1 %3890  ;;  %v16011_v45 = vld [vmem:[#allocation26_spill] sm:$0xff] }
 0x66f   : > { %v3888_v0 = vpop.xlane.xlu0 %3887  ;;  %11782 = vrcp.f32 %v3891_v29 }
 0x670   : > { %9974 = vst.msk [vmem:[%s13199_s15 + $0xc] sm:$0xf] %vm2046_vm3, %v10276_v59  ;;  %10940 = vmatmul.mubr.msk.bf16.vlgmr.msra.gmra.mrb[128].mxu1 %vm768_vm2, %v4031_v49  ;;  %11784 = vrcp.f32 %v3888_v0 }
 0x671   : > { %10950 = vmatpush3.bf16.msra.mxu1 %v13664_v37  ;;  %10951 = vmatprep.mubr.msk.bf16.mxu1 %vm12259_vm1, %v15986_v34  ;;  %v11777_v24 = vpop.eup %11776 }
 0x672   : > { %10961 = vmatprep.subr.bf16.mxu1 %v15986_v34  ;;  %v4001_v32 = vmul.f32 %v11777_v24, %v13705_v12  ;;  %v3897_v60 = vpop.xlane.xlu1 %3896 }
 0x673   : > { %v3894_v21 = vpop.xlane.xlu0 %3893  ;;  %11786 = vrcp.f32 %v3897_v60 }
 0x674   : > { %v10277_v15 = vpack.c.bf16 %v4001_v32, %v4001_v32  ;;  %11788 = vrcp.f32 %v3894_v21  ;;  %v16012_v21 = vld [vmem:[#allocation32_spill] sm:$0xff] }
 0x675   : > { %v11779_v27 = vpop.eup %11778 }
 0x676   : > { %v11781_v38 = vpop.eup %11780  ;;  %v4002_v13 = vmul.f32 %v11779_v27, %v13713_v48  ;;  %9975 = vst.msk [vmem:[%s13199_s15 + $0x28] sm:$0xf] %vm2046_vm3, %v10277_v15  ;;  %v3903_v9 = vpop.xlane.xlu1 %3902 }
 0x677   : > { %v4003_v37 = vmul.f32 %v11781_v38, %v13711_v5  ;;  %v3900_v19 = vpop.xlane.xlu0 %3899  ;;  %11790 = vrcp.f32 %v3903_v9  ;;  %v16010_v5 = vld [vmem:[#allocation33_spill] sm:$0xff] }
 0x678   : > { %v10278_v47 = vpack.c.bf16 %v4002_v13, %v4002_v13  ;;  %v4032_v12 = vpack.c.bf16 %v4002_v13, %v4001_v32  ;;  %11792 = vrcp.f32 %v3900_v19 }
 0x679   : > { %v10279_v16 = vpack.c.bf16 %v4003_v37, %v4003_v37  ;;  %v11783_v46 = vpop.eup %11782 }
 0x67a   : > { %9976 = vst.msk [vmem:[%s13199_s15 + $0x2c] sm:$0xf] %vm2046_vm3, %v10278_v47  ;;  %10946 = vmatmul.mubr.msk.bf16.vlgmr.msra.gmra.mrb[128].mxu0 %vm768_vm2, %v4032_v12  ;;  %v11785_v1 = vpop.eup %11784  ;;  %v4005_v48 = vmul.f32 %v11783_v46, %v13721_v8  ;;  %v3909_v6 = vpop.xlane.xlu1 %3908  ;;  %v16013_v47 = vld [vmem:[#allocation28_spill] sm:$0xff] }
 0x67b   : > { %9977 = vst.msk [vmem:[%s13199_s15 + $0x48] sm:$0xf] %vm2046_vm3, %v10279_v16  ;;  %10956 = vmatpush3.bf16.msra.mxu0 %v16010_v5  ;;  %v3906_v35 = vpop.xlane.xlu0 %3905  ;;  %10957 = vmatprep.mubr.msk.bf16.mxu0 %vm12259_vm1, %v15986_v34  ;;  %v4004_v61 = vmul.f32 %v11785_v1, %v13723_v23  ;;  %11794 = vrcp.f32 %v3909_v6 }
 0x67c   : > { %10967 = vmatprep.subr.bf16.mxu0 %v15986_v34  ;;  %v10281_v7 = vpack.c.bf16 %v4005_v48, %v4005_v48  ;;  %11796 = vrcp.f32 %v3906_v35  ;;  %v16014_v35 = vld [vmem:[#allocation35_spill] sm:$0xff] }
 0x67d   : > { %v11787_v17 = vpop.eup %11786  ;;  %v10280_v28 = vpack.c.bf16 %v4004_v61, %v4004_v61  ;;  %v4033_v40 = vpack.c.bf16 %v4004_v61, %v4003_v37 }
 0x67e   : > { %v11789_v54 = vpop.eup %11788  ;;  %9979 = vst.msk [vmem:[%s13199_s15 + $0x68] sm:$0xf] %vm2046_vm3, %v10281_v7  ;;  %v4007_v8 = vmul.f32 %v11787_v17, %v13731_v62  ;;  %v3915_v2 = vpop.xlane.xlu1 %3914 }
 0x67f   : > { %v3912_v14 = vpop.xlane.xlu0 %3911  ;;  %9978 = vst.msk [vmem:[%s13199_s15 + $0x4c] sm:$0xf] %vm2046_vm3, %v10280_v28  ;;  %v4006_v23 = vmul.f32 %v11789_v54, %v13733_v50  ;;  %11798 = vrcp.f32 %v3915_v2  ;;  %10952 = vmatmul.mubr.msk.bf16.vlgmr.msra.gmra.mrb[132].mxu1 %vm768_vm2, %v4033_v40  ;;  %v16015_v2 = vld [vmem:[#allocation30_spill] sm:$0xff] }
 0x680   : > { %v10283_v26 = vpack.c.bf16 %v4007_v8, %v4007_v8  ;;  %10962 = vmatpush3.bf16.msra.mxu1 %v16011_v45  ;;  %11800 = vrcp.f32 %v3912_v14  ;;  %10963 = vmatprep.mubr.msk.bf16.mxu1 %vm12259_vm1, %v15986_v34 }
 0x681   : > { %v11791_v59 = vpop.eup %11790  ;;  %v10282_v62 = vpack.c.bf16 %v4006_v23, %v4006_v23  ;;  %v4034_v49 = vpack.c.bf16 %v4006_v23, %v4005_v48  ;;  %10973 = vmatprep.subr.bf16.mxu1 %v15986_v34 }
 0x682   : > { %v11793_v29 = vpop.eup %11792  ;;  %9981 = vst.msk [vmem:[%s13199_s15 + $0x88] sm:$0xf] %vm2046_vm3, %v10283_v26  ;;  %v4009_v50 = vmul.f32 %v11791_v59, %v13741_v20  ;;  %v3921_v0 = vpop.xlane.xlu1 %3920 }
 0x683   : > { %v3918_v24 = vpop.xlane.xlu0 %3917  ;;  %9980 = vst.msk [vmem:[%s13199_s15 + $0x6c] sm:$0xf] %vm2046_vm3, %v10282_v62  ;;  %v4008_v32 = vmul.f32 %v11793_v29, %v13743_v55  ;;  %11802 = vrcp.f32 %v3921_v0  ;;  %10958 = vmatmul.mubr.msk.bf16.vlgmr.msra.gmra.mrb[132].mxu0 %vm768_vm2, %v4034_v49  ;;  %v16016_v29 = vld [vmem:[#allocation37_spill] sm:$0xff] }
 0x684   : > { %v10285_v60 = vpack.c.bf16 %v4009_v50, %v4009_v50  ;;  %10968 = vmatpush3.bf16.msra.mxu0 %v16012_v21  ;;  %11804 = vrcp.f32 %v3918_v24  ;;  %10969 = vmatprep.mubr.msk.bf16.mxu0 %vm12259_vm1, %v15986_v34 }
 0x685   : > { %v11795_v27 = vpop.eup %11794  ;;  %v10284_v20 = vpack.c.bf16 %v4008_v32, %v4008_v32  ;;  %v4035_v15 = vpack.c.bf16 %v4008_v32, %v4007_v8  ;;  %10979 = vmatprep.subr.bf16.mxu0 %v15986_v34 }
 0x686   : > { %v11797_v38 = vpop.eup %11796  ;;  %9983 = vst.msk [vmem:[%s13199_s15 + $0xa8] sm:$0xf] %vm2046_vm3, %v10285_v60  ;;  %v4011_v55 = vmul.f32 %v11795_v27, %v13751_v25  ;;  %v3927_v13 = vpop.xlane.xlu1 %3926 }
 0x687   : > { %v3924_v37 = vpop.xlane.xlu0 %3923  ;;  %9982 = vst.msk [vmem:[%s13199_s15 + $0x8c] sm:$0xf] %vm2046_vm3, %v10284_v20  ;;  %v4010_v9 = vmul.f32 %v11797_v38, %v13753_v18  ;;  %11806 = vrcp.f32 %v3927_v13  ;;  %10964 = vmatmul.mubr.msk.bf16.vlgmr.msra.gmra.mrb[136].mxu1 %vm768_vm2, %v4035_v15  ;;  %v16017_v20 = vld [vmem:[#allocation34_spill] sm:$0xff] }
 0x688   : > { %v10287_v19 = vpack.c.bf16 %v4011_v55, %v4011_v55  ;;  %10974 = vmatpush3.bf16.msra.mxu1 %v16013_v47  ;;  %11808 = vrcp.f32 %v3924_v37  ;;  %10975 = vmatprep.mubr.msk.bf16.mxu1 %vm12259_vm1, %v15986_v34  ;;  %v16018_v47 = vld [vmem:[#allocation36_spill] sm:$0xff] }
 0x689   : > { %v11799_v12 = vpop.eup %11798  ;;  %v10286_v25 = vpack.c.bf16 %v4010_v9, %v4010_v9  ;;  %v4036_v16 = vpack.c.bf16 %v4010_v9, %v4009_v50  ;;  %10985 = vmatprep.subr.bf16.mxu1 %v15986_v34 }
 0x68a   : > { %v11801_v46 = vpop.eup %11800  ;;  %9985 = vst.msk [vmem:[%s13199_s15 + $0xc8] sm:$0xf] %vm2046_vm3, %v10287_v19  ;;  %v4013_v18 = vmul.f32 %v11799_v12, %v13761_v4  ;;  %v3933_v1 = vpop.xlane.xlu1 %3932 }
 0x68b   : > { %v3930_v48 = vpop.xlane.xlu0 %3929  ;;  %9984 = vst.msk [vmem:[%s13199_s15 + $0xac] sm:$0xf] %vm2046_vm3, %v10286_v25  ;;  %v4012_v6 = vmul.f32 %v11801_v46, %v13763_v31  ;;  %11810 = vrcp.f32 %v3933_v1  ;;  %10970 = vmatmul.mubr.msk.bf16.vlgmr.msra.gmra.mrb[136].mxu0 %vm768_vm2, %v4036_v16 }
 0x68c   : > { %v10289_v5 = vpack.c.bf16 %v4013_v18, %v4013_v18  ;;  %10980 = vmatpush3.bf16.msra.mxu0 %v16014_v35  ;;  %11812 = vrcp.f32 %v3930_v48  ;;  %10981 = vmatprep.mubr.msk.bf16.mxu0 %vm12259_vm1, %v15986_v34 }
 0x68d   : > { %v11803_v61 = vpop.eup %11802  ;;  %v10288_v4 = vpack.c.bf16 %v4012_v6, %v4012_v6  ;;  %v4037_v7 = vpack.c.bf16 %v4012_v6, %v4011_v55  ;;  %10991 = vmatprep.subr.bf16.mxu0 %v15986_v34  ;;  %v16019_v6 = vld [vmem:[#allocation38_spill] sm:$0xff] }
 0x68e   : > { %v11805_v17 = vpop.eup %11804  ;;  %9987 = vst.msk [vmem:[%s13199_s15 + $0xe8] sm:$0xf] %vm2046_vm3, %v10289_v5  ;;  %v4015_v31 = vmul.f32 %v11803_v61, %v13771_v10  ;;  %v3939_v28 = vpop.xlane.xlu1 %3938 }
 0x68f   : > { %v3936_v40 = vpop.xlane.xlu0 %3935  ;;  %9986 = vst.msk [vmem:[%s13199_s15 + $0xcc] sm:$0xf] %vm2046_vm3, %v10288_v4  ;;  %v4014_v54 = vmul.f32 %v11805_v17, %v13773_v22  ;;  %11814 = vrcp.f32 %v3939_v28  ;;  %10976 = vmatmul.mubr.msk.bf16.vlgmr.msra.gmra.mrb[140].mxu1 %vm768_vm2, %v4037_v7  ;;  %v16020_v28 = vld [vmem:[#allocation39_spill] sm:$0xff] }
 0x690   : > { %v10291_v8 = vpack.c.bf16 %v4015_v31, %v4015_v31  ;;  %10986 = vmatpush3.bf16.msra.mxu1 %v16015_v2  ;;  %11816 = vrcp.f32 %v3936_v40  ;;  %10987 = vmatprep.mubr.msk.bf16.mxu1 %vm12259_vm1, %v15986_v34 }
 0x691   : > { %v11807_v14 = vpop.eup %11806  ;;  %v10290_v10 = vpack.c.bf16 %v4014_v54, %v4014_v54  ;;  %v4038_v23 = vpack.c.bf16 %v4014_v54, %v4013_v18  ;;  %10997 = vmatprep.subr.bf16.mxu1 %v15986_v34 }
 0x692   : > { %v11809_v26 = vpop.eup %11808  ;;  %9989 = vst.msk [vmem:[%s13199_s15 + $0x108] sm:$0xf] %vm2046_vm3, %v10291_v8  ;;  %v4017_v22 = vmul.f32 %v11807_v14, %v13781_v57  ;;  %v3945_v45 = vpop.xlane.xlu1 %3944 }
 0x693   : > { %v3942_v59 = vpop.xlane.xlu0 %3941  ;;  %9988 = vst.msk [vmem:[%s13199_s15 + $0xec] sm:$0xf] %vm2046_vm3, %v10290_v10  ;;  %v4016_v62 = vmul.f32 %v11809_v26, %v13783_v44  ;;  %11818 = vrcp.f32 %v3945_v45  ;;  %10982 = vmatmul.mubr.msk.bf16.vlgmr.msra.gmra.mrb[140].mxu0 %vm768_vm2, %v4038_v23 }
 0x694   : > { %v10293_v49 = vpack.c.bf16 %v4017_v22, %v4017_v22  ;;  %10992 = vmatpush3.bf16.msra.mxu0 %v16016_v29  ;;  %11820 = vrcp.f32 %v3942_v59  ;;  %10993 = vmatprep.mubr.msk.bf16.mxu0 %vm12259_vm1, %v15986_v34 }
 0x695   : > { %v11811_v50 = vpop.eup %11810  ;;  %v10292_v57 = vpack.c.bf16 %v4016_v62, %v4016_v62  ;;  %v4039_v0 = vpack.c.bf16 %v4016_v62, %v4015_v31  ;;  %11003 = vmatprep.subr.bf16.mxu0 %v15986_v34 }
 0x696   : > { %v11813_v24 = vpop.eup %11812  ;;  %9991 = vst.msk [vmem:[%s13199_s15 + $0x128] sm:$0xf] %vm2046_vm3, %v10293_v49  ;;  %v4019_v44 = vmul.f32 %v11811_v50, %v13791_v52  ;;  %v3951_v32 = vpop.xlane.xlu1 %3950 }
 0x697   : > { %v3948_v60 = vpop.xlane.xlu0 %3947  ;;  %9990 = vst.msk [vmem:[%s13199_s15 + $0x10c] sm:$0xf] %vm2046_vm3, %v10292_v57  ;;  %v4018_v21 = vmul.f32 %v11813_v24, %v13793_v53  ;;  %11822 = vrcp.f32 %v3951_v32  ;;  %10988 = vmatmul.mubr.msk.bf16.vlgmr.msra.gmra.mrb[144].mxu1 %vm768_vm2, %v4039_v0 }
 0x698   : > { %v10295_v27 = vpack.c.bf16 %v4019_v44, %v4019_v44  ;;  %10998 = vmatpush3.bf16.msra.mxu1 %v16017_v20  ;;  %11824 = vrcp.f32 %v3948_v60  ;;  %10999 = vmatprep.mubr.msk.bf16.mxu1 %vm12259_vm1, %v15986_v34 }
 0x699   : > { %v11815_v15 = vpop.eup %11814  ;;  %v10294_v52 = vpack.c.bf16 %v4018_v21, %v4018_v21  ;;  %v4040_v38 = vpack.c.bf16 %v4018_v21, %v4017_v22  ;;  %11009 = vmatprep.subr.bf16.mxu1 %v15986_v34 }
 0x69a   : > { %v11817_v55 = vpop.eup %11816  ;;  %9993 = vst.msk [vmem:[%s13199_s15 + $0x148] sm:$0xf] %vm2046_vm3, %v10295_v27  ;;  %v4021_v53 = vmul.f32 %v11815_v15, %v13801_v63  ;;  %v3957_v13 = vpop.xlane.xlu1 %3956 }
 0x69b   : > { %v3954_v37 = vpop.xlane.xlu0 %3953  ;;  %9992 = vst.msk [vmem:[%s13199_s15 + $0x12c] sm:$0xf] %vm2046_vm3, %v10294_v52  ;;  %v4020_v9 = vmul.f32 %v11817_v55, %v13803_v42  ;;  %11826 = vrcp.f32 %v3957_v13  ;;  %10994 = vmatmul.mubr.msk.bf16.vlgmr.msra.gmra.mrb[144].mxu0 %vm768_vm2, %v4040_v38 }
 0x69c   : > { %v10297_v19 = vpack.c.bf16 %v4021_v53, %v4021_v53  ;;  %11004 = vmatpush3.bf16.msra.mxu0 %v16018_v47  ;;  %11828 = vrcp.f32 %v3954_v37  ;;  %11005 = vmatprep.mubr.msk.bf16.mxu0 %vm12259_vm1, %v15986_v34 }
 0x69d   : > { %v11819_v12 = vpop.eup %11818  ;;  %v10296_v63 = vpack.c.bf16 %v4020_v9, %v4020_v9  ;;  %v4041_v25 = vpack.c.bf16 %v4020_v9, %v4019_v44  ;;  %11015 = vmatprep.subr.bf16.mxu0 %v15986_v34 }
 0x69e   : > { %v11821_v16 = vpop.eup %11820  ;;  %9995 = vst.msk [vmem:[%s13199_s15 + $0x168] sm:$0xf] %vm2046_vm3, %v10297_v19  ;;  %v4023_v42 = vmul.f32 %v11819_v12, %v13811_v43  ;;  %v3963_v46 = vpop.xlane.xlu1 %3962 }
 0x69f   : > { %v3960_v18 = vpop.xlane.xlu0 %3959  ;;  %9994 = vst.msk [vmem:[%s13199_s15 + $0x14c] sm:$0xf] %vm2046_vm3, %v10296_v63  ;;  %v4022_v1 = vmul.f32 %v11821_v16, %v13813_v3  ;;  %11830 = vrcp.f32 %v3963_v46  ;;  %11000 = vmatmul.mubr.msk.bf16.vlgmr.msra.gmra.mrb[148].mxu1 %vm768_vm2, %v4041_v25 }
 0x6a0   : > { %v10299_v48 = vpack.c.bf16 %v4023_v42, %v4023_v42  ;;  %11010 = vmatpush3.bf16.msra.mxu1 %v16019_v6  ;;  %11832 = vrcp.f32 %v3960_v18  ;;  %11011 = vmatprep.mubr.msk.bf16.mxu1 %vm12259_vm1, %v15986_v34 }
 0x6a1   : > { %v11823_v5 = vpop.eup %11822  ;;  %v10298_v43 = vpack.c.bf16 %v4022_v1, %v4022_v1  ;;  %v4042_v35 = vpack.c.bf16 %v4022_v1, %v4021_v53  ;;  %11021 = vmatprep.subr.bf16.mxu1 %v15986_v34 }
 0x6a2   : > { %v11825_v61 = vpop.eup %11824  ;;  %9997 = vst.msk [vmem:[%s13199_s15 + $0x188] sm:$0xf] %vm2046_vm3, %v10299_v48  ;;  %v4025_v3 = vmul.f32 %v11823_v5, %v13820_v36  ;;  %v5095_v4 = vpop.permute.xlu1 %5094 }
 0x6a3   : > { %v3966_v7 = vpop.xlane.xlu0 %3965  ;;  %9996 = vst.msk [vmem:[%s13199_s15 + $0x16c] sm:$0xf] %vm2046_vm3, %v10298_v43  ;;  %v4024_v17 = vmul.f32 %v11825_v61, %v13822_v30  ;;  %11006 = vmatmul.mubr.msk.bf16.vlgmr.msra.gmra.mrb[148].mxu0 %vm768_vm2, %v4042_v35 }
 0x6a4   : > { %11834 = vrcp.f32 %v3966_v7  ;;  %v10301_v31 = vpack.c.bf16 %v4025_v3, %v4025_v3  ;;  %11016 = vmatpush3.bf16.msra.mxu0 %v16020_v28  ;;  %11017 = vmatprep.mubr.msk.bf16.mxu0 %vm12259_vm1, %v15986_v34 }
 0x6a5   : > { %v11827_v40 = vpop.eup %11826  ;;  %v10300_v54 = vpack.c.bf16 %v4024_v17, %v4024_v17  ;;  %v4043_v8 = vpack.c.bf16 %v4024_v17, %v4023_v42  ;;  %11027 = vmatprep.subr.bf16.mxu0 %v15986_v34 }
 0x6a6   : > { %v11829_v36 = vpop.eup %11828  ;;  %9999 = vst.msk [vmem:[%s13199_s15 + $0x1a8] sm:$0xf] %vm2046_vm3, %v10301_v31  ;;  %v4027_v30 = vmul.f32 %v11827_v40, %v13828_v56  ;;  %v5146_v2 = vpop.permute.xlu1 %5145 }
 0x6a7   : > { %v5044_v14 = vpop.permute.xlu0 %5043  ;;  %9998 = vst.msk [vmem:[%s13199_s15 + $0x18c] sm:$0xf] %vm2046_vm3, %v10300_v54  ;;  %v4026_v10 = vmul.f32 %v11829_v36, %v13830_v58  ;;  %11012 = vmatmul.mubr.msk.bf16.vlgmr.msra.gmra.mrb[152].mxu1 %vm768_vm2, %v4043_v8  ;;  %v5151_v20 = vsel %vm768_vm2, %v5146_v2, 0  ;;  %v16021_v36 = vld [vmem:[#allocation13_spill] sm:$0xff]  ;;  %v16022_v2 = vld [vmem:[#allocation14_spill] sm:$0xff] }
 0x6a8   : > { %v10303_v23 = vpack.c.bf16 %v4027_v30, %v4027_v30  ;;  %11022 = vmatpush3.bf16.msra.mxu1 %v13904_v51  ;;  %11023 = vmatprep.mubr.msk.bf16.mxu1 %vm12259_vm1, %v15986_v34  ;;  %v5049_v24 = vsel %vm768_vm2, %v5044_v14, 0 }
 0x6a9   : > { %v11831_v26 = vpop.eup %11830  ;;  %v10302_v22 = vpack.c.bf16 %v4026_v10, %v4026_v10  ;;  %v4044_v45 = vpack.c.bf16 %v4026_v10, %v4025_v3  ;;  %11033 = vmatprep.subr.bf16.mxu1 %v15986_v34 }
 0x6aa   : > { %v11833_v56 = vpop.eup %11832  ;;  %10001 = vst.msk [vmem:[%s13199_s15 + $0x1c8] sm:$0xf] %vm2046_vm3, %v10303_v23  ;;  %v4029_v59 = vmul.f32 %v11831_v26, %v13836_v39  ;;  %v5197_v58 = vpop.permute.xlu1 %5196 }
 0x6ab   : > { %v5042_v62 = vpop.permute.xlu0 %5041  ;;  %10000 = vst.msk [vmem:[%s13199_s15 + $0x1ac] sm:$0xf] %vm2046_vm3, %v10302_v22  ;;  %v4028_v51 = vmul.f32 %v11833_v56, %v13838_v33  ;;  %11018 = vmatmul.mubr.msk.bf16.vlgmr.msra.gmra.mrb[152].mxu0 %vm768_vm2, %v4044_v45  ;;  %v5202_v38 = vsel %vm768_vm2, %v5197_v58, 0 }
 0x6ac   : > { %v10305_v49 = vpack.c.bf16 %v4029_v59, %v4029_v59  ;;  %11028 = vmatpush3.bf16.msra.mxu0 %v13900_v41  ;;  %11029 = vmatprep.mubr.msk.bf16.mxu0 %vm12259_vm1, %v15986_v34 }
 0x6ad   : > { %v10304_v50 = vpack.c.bf16 %v4028_v51, %v4028_v51  ;;  %v4045_v57 = vpack.c.bf16 %v4028_v51, %v4027_v30  ;;  %11039 = vmatprep.subr.bf16.mxu0 %v15986_v34 }
 0x6ae   : > { %v11835_v29 = vpop.eup %11834  ;;  %10003 = vst.msk [vmem:[%s13199_s15 + $0x1e8] sm:$0xf] %vm2046_vm3, %v10305_v49  ;;  %v5248_v0 = vpop.permute.xlu1 %5247 }
 0x6af   : > { %v4030_v39 = vmul.f32 %v11835_v29, %v13844_v11  ;;  %v5093_v33 = vpop.permute.xlu0 %5092  ;;  %10002 = vst.msk [vmem:[%s13199_s15 + $0x1cc] sm:$0xf] %vm2046_vm3, %v10304_v50  ;;  %11024 = vmatmul.mubr.msk.bf16.vlgmr.msra.gmra.mrb[156].mxu1 %vm768_vm2, %v4045_v57  ;;  %v5100_v11 = vsel %vm768_vm2, %v5095_v4, 0  ;;  %v5253_v13 = vsel %vm768_vm2, %v5248_v0, 0 }
 0x6b0   : > { %11035 = vmatprep.mubr.msk.bf16.mxu1 %vm12259_vm1, %v15986_v34 }
 0x6b1   : > { %v10306_v41 = vpack.c.bf16 %v4030_v39, %v4030_v39  ;;  %v4046_v44 = vpack.c.bf16 %v4030_v39, %v4029_v59  ;;  %11034 = vmatpush3.bf16.xpose.msra.mxu1 %v5049_v24 }
 0x6b2   : > { %v5299_v32 = vpop.permute.xlu1 %5298  ;;  %11045 = vmatprep.subr.bf16.mxu1 %v15986_v34 }
 0x6b3   : > { %10004 = vst.msk [vmem:[%s13199_s15 + $0x1ec] sm:$0xf] %vm2046_vm3, %v10306_v41  ;;  %v5144_v60 = vpop.permute.xlu0 %5143  ;;  %11030 = vmatmul.mubr.msk.bf16.vlgmr.msra.gmra.mrb[156].mxu0 %vm768_vm2, %v4046_v44  ;;  %v5304_v9 = vsel %vm768_vm2, %v5299_v32, 0 }
 0x6b4   : > { %11041 = vmatprep.mubr.msk.bf16.mxu0 %vm12259_vm1, %v15986_v34 }
 0x6b5   : > { %11040 = vmatpush3.bf16.xpose.msra.mxu0 %v5100_v11 }
 0x6b6   : > { %v5350_v21 = vpop.permute.xlu1 %5349  ;;  %11051 = vmatprep.subr.bf16.mxu0 %v15986_v34 }
 0x6b7   : > { %v5195_v27 = vpop.permute.xlu0 %5194  ;;  %v5355_v12 = vsel %vm768_vm2, %v5350_v21, 0 }
 0x6b8   : > { %11036 = vmatmul.mubr.msk.bf16.vlgmr.msra.gmra.mrb[160].mxu1 %vm768_vm2, %v5042_v62 }
 0x6b9   : > { %11046 = vmatpush3.bf16.xpose.msra.mxu1 %v5151_v20  ;;  %11047 = vmatprep.mubr.msk.bf16.mxu1 %vm12259_vm1, %v15986_v34 }
 0x6ba   : > { %v5401_v15 = vpop.permute.xlu1 %5400  ;;  %11057 = vmatprep.subr.bf16.mxu1 %v15986_v34 }
 0x6bb   : > { %v5246_v52 = vpop.permute.xlu0 %5245  ;;  %v5406_v16 = vsel %vm768_vm2, %v5401_v15, 0 }
 0x6bc   : > { %11042 = vmatmul.mubr.msk.bf16.vlgmr.msra.gmra.mrb[160].mxu0 %vm768_vm2, %v5093_v33 }
 0x6bd   : > { %11052 = vmatpush3.bf16.xpose.msra.mxu0 %v5202_v38  ;;  %11053 = vmatprep.mubr.msk.bf16.mxu0 %vm12259_vm1, %v15986_v34 }
 0x6be   : > { %11063 = vmatprep.subr.bf16.mxu0 %v15986_v34  ;;  %v5452_v53 = vpop.permute.xlu1 %5451 }
 0x6bf   : > { %v5297_v55 = vpop.permute.xlu0 %5296  ;;  %v5457_v42 = vsel %vm768_vm2, %v5452_v53, 0 }
 0x6c0   : > { %11048 = vmatmul.mubr.msk.bf16.vlgmr.msra.gmra.mrb[164].mxu1 %vm768_vm2, %v5144_v60 }
 0x6c1   : > { %11058 = vmatpush3.bf16.xpose.msra.mxu1 %v5253_v13  ;;  %11059 = vmatprep.mubr.msk.bf16.mxu1 %vm12259_vm1, %v15986_v34 }
 0x6c2   : > { %11069 = vmatprep.subr.bf16.mxu1 %v15986_v34  ;;  %v5503_v19 = vpop.permute.xlu1 %5502 }
 0x6c3   : > { %v5348_v37 = vpop.permute.xlu0 %5347  ;;  %v5508_v1 = vsel %vm768_vm2, %v5503_v19, 0 }
 0x6c4   : > { %11054 = vmatmul.mubr.msk.bf16.vlgmr.msra.gmra.mrb[164].mxu0 %vm768_vm2, %v5195_v27 }
 0x6c5   : > { %11064 = vmatpush3.bf16.xpose.msra.mxu0 %v5304_v9  ;;  %11065 = vmatprep.mubr.msk.bf16.mxu0 %vm12259_vm1, %v15986_v34 }
 0x6c6   : > { %11075 = vmatprep.subr.bf16.mxu0 %v15986_v34  ;;  %v5554_v63 = vpop.permute.xlu1 %5553 }
 0x6c7   : > { %v5399_v47 = vpop.permute.xlu0 %5398  ;;  %v5559_v5 = vsel %vm768_vm2, %v5554_v63, 0 }
 0x6c8   : > { %11060 = vmatmul.mubr.msk.bf16.vlgmr.msra.gmra.mrb[168].mxu1 %vm768_vm2, %v5246_v52 }
 0x6c9   : > { %11070 = vmatpush3.bf16.xpose.msra.mxu1 %v5355_v12  ;;  %11071 = vmatprep.mubr.msk.bf16.mxu1 %vm12259_vm1, %v15986_v34 }
 0x6ca   : > { %11081 = vmatprep.subr.bf16.mxu1 %v15986_v34  ;;  %v5605_v46 = vpop.permute.xlu1 %5604 }
 0x6cb   : > { %v5450_v25 = vpop.permute.xlu0 %5449  ;;  %v5610_v43 = vsel %vm768_vm2, %v5605_v46, 0 }
 0x6cc   : > { %11066 = vmatmul.mubr.msk.bf16.vlgmr.msra.gmra.mrb[168].mxu0 %vm768_vm2, %v5297_v55 }
 0x6cd   : > { %11076 = vmatpush3.bf16.xpose.msra.mxu0 %v5406_v16  ;;  %11077 = vmatprep.mubr.msk.bf16.mxu0 %vm12259_vm1, %v15986_v34 }
 0x6ce   : > { %11087 = vmatprep.subr.bf16.mxu0 %v15986_v34  ;;  %v5656_v48 = vpop.permute.xlu1 %5655 }
 0x6cf   : > { %v5501_v18 = vpop.permute.xlu0 %5500  ;;  %v5661_v3 = vsel %vm768_vm2, %v5656_v48, 0 }
 0x6d0   : > { %11072 = vmatmul.mubr.msk.bf16.vlgmr.msra.gmra.mrb[172].mxu1 %vm768_vm2, %v5348_v37 }
 0x6d1   : > { %11082 = vmatpush3.bf16.xpose.msra.mxu1 %v5457_v42  ;;  %11083 = vmatprep.mubr.msk.bf16.mxu1 %vm12259_vm1, %v15986_v34 }
 0x6d2   : > { %11093 = vmatprep.subr.bf16.mxu1 %v15986_v34  ;;  %v5707_v35 = vpop.permute.xlu1 %5706 }
 0x6d3   : > { %v5552_v6 = vpop.permute.xlu0 %5551  ;;  %v5712_v17 = vsel %vm768_vm2, %v5707_v35, 0 }
 0x6d4   : > { %11078 = vmatmul.mubr.msk.bf16.vlgmr.msra.gmra.mrb[172].mxu0 %vm768_vm2, %v5399_v47 }
 0x6d5   : > { %11088 = vmatpush3.bf16.xpose.msra.mxu0 %v5508_v1  ;;  %11089 = vmatprep.mubr.msk.bf16.mxu0 %vm12259_vm1, %v15986_v34 }
 0x6d6   : > { %11099 = vmatprep.subr.bf16.mxu0 %v15986_v34  ;;  %v5758_v4 = vpop.permute.xlu1 %5757 }
 0x6d7   : > { %v5603_v61 = vpop.permute.xlu0 %5602  ;;  %v5763_v31 = vsel %vm768_vm2, %v5758_v4, 0 }
 0x6d8   : > { %11084 = vmatmul.mubr.msk.bf16.vlgmr.msra.gmra.mrb[176].mxu1 %vm768_vm2, %v5450_v25 }
 0x6d9   : > { %11094 = vmatpush3.bf16.xpose.msra.mxu1 %v5559_v5  ;;  %11095 = vmatprep.mubr.msk.bf16.mxu1 %vm12259_vm1, %v15986_v34 }
 0x6da   : > { %11105 = vmatprep.subr.bf16.mxu1 %v15986_v34  ;;  %v5809_v28 = vpop.permute.xlu1 %5808 }
 0x6db   : > { %v5654_v7 = vpop.permute.xlu0 %5653  ;;  %v5814_v54 = vsel %vm768_vm2, %v5809_v28, 0 }
 0x6dc   : > { %11090 = vmatmul.mubr.msk.bf16.vlgmr.msra.gmra.mrb[176].mxu0 %vm768_vm2, %v5501_v18 }
 0x6dd   : > { %11100 = vmatpush3.bf16.xpose.msra.mxu0 %v5610_v43  ;;  %11101 = vmatprep.mubr.msk.bf16.mxu0 %vm12259_vm1, %v15986_v34 }
 0x6de   : > { %11111 = vmatprep.subr.bf16.mxu0 %v15986_v34  ;;  %v5807_v30 = vpop.permute.xlu1 %5806 }
 0x6df   : > { %v5705_v40 = vpop.permute.xlu0 %5704 }
 0x6e0   : > { %11096 = vmatmul.mubr.msk.bf16.vlgmr.msra.gmra.mrb[180].mxu1 %vm768_vm2, %v5552_v6 }
 0x6e1   : > { %11106 = vmatpush3.bf16.xpose.msra.mxu1 %v5661_v3  ;;  %11107 = vmatprep.mubr.msk.bf16.mxu1 %vm12259_vm1, %v15986_v34 }
 0x6e2   : > { %11117 = vmatprep.subr.bf16.mxu1 %v15986_v34 }
 0x6e3   : > { %v5756_v8 = vpop.permute.xlu0 %5755 }
 0x6e4   : > { %11102 = vmatmul.mubr.msk.bf16.vlgmr.msra.gmra.mrb[180].mxu0 %vm768_vm2, %v5603_v61 }
 0x6e5   : > { %11112 = vmatpush3.bf16.xpose.msra.mxu0 %v5712_v17  ;;  %11113 = vmatprep.mubr.msk.bf16.mxu0 %vm12259_vm1, %v15986_v34 }
 0x6e6   : > { %11123 = vmatprep.subr.bf16.mxu0 %v15986_v34 }
 0x6e8   : > { %11108 = vmatmul.mubr.msk.bf16.vlgmr.msra.gmra.mrb[184].mxu1 %vm768_vm2, %v5654_v7 }
 0x6e9   : > { %11118 = vmatpush3.bf16.xpose.msra.mxu1 %v5763_v31  ;;  %11119 = vmatprep.mubr.msk.bf16.mxu1 %vm12259_vm1, %v15986_v34 }
 0x6ea   : > { %11129 = vmatprep.subr.bf16.mxu1 %v15986_v34 }
 0x6ec   : > { %11114 = vmatmul.mubr.msk.bf16.vlgmr.msra.gmra.mrb[184].mxu0 %vm768_vm2, %v5705_v40 }
 0x6ed   : > { %11124 = vmatpush3.bf16.xpose.msra.mxu0 %v5814_v54  ;;  %11125 = vmatprep.mubr.msk.bf16.mxu0 %vm12259_vm1, %v15986_v34 }
 0x6ee   : > { %11135 = vmatprep.subr.bf16.mxu0 %v15986_v34 }
 0x6f0   : > { %11120 = vmatmul.mubr.msk.bf16.vlgmr.msra.gmra.mrb[188].mxu1 %vm768_vm2, %v5756_v8 }
 0x6f1   : > { %11130 = vmatpush3.bf16.msra.mxu1 %v16021_v36  ;;  %11131 = vmatprep.mubr.msk.bf16.mxu1 %vm12259_vm1, %v15986_v34 }
 0x6f2   : > { %11141 = vmatprep.subr.bf16.mxu1 %v15986_v34 }
 0x6f4   : > { %11126 = vmatmul.mubr.msk.bf16.vlgmr.msra.gmra.mrb[188].mxu0 %vm768_vm2, %v5807_v30 }
 0x6f5   : > { %11136 = vmatpush3.bf16.msra.mxu0 %v16022_v2  ;;  %11137 = vmatprep.mubr.msk.bf16.mxu0 %vm12259_vm1, %v15986_v34 }
 0x6f6   : > { %11147 = vmatprep.subr.bf16.mxu0 %v15986_v34 }
 0x743   : > { %v14172_v14 = vpop.f32.mrb[128].mxu1 }
 0x744   : > { %16023 = vst [vmem:[#allocation40_spill] sm:$0xff] %v14172_v14  ;;  %v10941_v10 = vpop.f32.mrb[129].mxu1 }
 0x745   : > { %v14174_v23 = vpop.f32.mrb[130].mxu1 }
 0x746   : > { %16024 = vst [vmem:[#allocation33_spill] sm:$0xff] %v14174_v23  ;;  %v10942_v22 = vpop.f32.mrb[131].mxu1 }
 0x74d   : > { %v14178_v45 = vpop.f32.mrb[128].mxu0 }
 0x74e   : > { %16025 = vst [vmem:[#allocation26_spill] sm:$0xff] %v14178_v45  ;;  %v10947_v56 = vpop.f32.mrb[129].mxu0 }
 0x74f   : > { %v14180_v59 = vpop.f32.mrb[130].mxu0 }
 0x750   : > { %16026 = vst [vmem:[#allocation32_spill] sm:$0xff] %v14180_v59  ;;  %v10948_v62 = vpop.f32.mrb[131].mxu0 }
 0x752   : > { %v14184_v51 = vpop.f32.mrb[132].mxu1 }
 0x753   : > { %16027 = vst [vmem:[#allocation28_spill] sm:$0xff] %v14184_v51  ;;  %v10953_v49 = vpop.f32.mrb[133].mxu1 }
 0x754   : > { %v14186_v29 = vpop.f32.mrb[134].mxu1 }
 0x755   : > { %16028 = vst [vmem:[#allocation35_spill] sm:$0xff] %v14186_v29  ;;  %v10954_v57 = vpop.f32.mrb[135].mxu1 }
 0x756   : > { %v14190_v39 = vpop.f32.mrb[132].mxu0 }
 0x757   : > { %16029 = vst [vmem:[#allocation30_spill] sm:$0xff] %v14190_v39  ;;  %v10959_v0 = vpop.f32.mrb[133].mxu0 }
 0x758   : > { %v14192_v33 = vpop.f32.mrb[134].mxu0 }
 0x759   : > { %16030 = vst [vmem:[#allocation37_spill] sm:$0xff] %v14192_v33  ;;  %v10960_v24 = vpop.f32.mrb[135].mxu0 }
 0x75a   : > { %v14196_v44 = vpop.f32.mrb[136].mxu1 }
 0x75b   : > { %16031 = vst [vmem:[#allocation34_spill] sm:$0xff] %v14196_v44  ;;  %v10965_v32 = vpop.f32.mrb[137].mxu1 }
 0x75c   : > { %v14198_v60 = vpop.f32.mrb[138].mxu1 }
 0x75d   : > { %16032 = vst [vmem:[#allocation36_spill] sm:$0xff] %v14198_v60  ;;  %v10966_v21 = vpop.f32.mrb[139].mxu1 }
 0x75e   : > { %v14202_v27 = vpop.f32.mrb[136].mxu0 }
 0x75f   : > { %16033 = vst [vmem:[#allocation38_spill] sm:$0xff] %v14202_v27  ;;  %v10971_v20 = vpop.f32.mrb[137].mxu0 }
 0x760   : > { %v14204_v15 = vpop.f32.mrb[138].mxu0 }
 0x761   : > { %16034 = vst [vmem:[#allocation39_spill] sm:$0xff] %v14204_v15  ;;  %v10972_v38 = vpop.f32.mrb[139].mxu0 }
 0x762   : > { %v14208_v55 = vpop.f32.mrb[140].mxu1 }
 0x763   : > { %v10977_v53 = vpop.f32.mrb[141].mxu1 }
 0x764   : > { %v14210_v13 = vpop.f32.mrb[142].mxu1 }
 0x765   : > { %v10978_v9 = vpop.f32.mrb[143].mxu1 }
 0x766   : > { %v14214_v19 = vpop.f32.mrb[140].mxu0 }
 0x767   : > { %v10983_v47 = vpop.f32.mrb[141].mxu0 }
 0x768   : > { %v14216_v12 = vpop.f32.mrb[142].mxu0 }
 0x769   : > { %v10984_v25 = vpop.f32.mrb[143].mxu0 }
 0x76a   : > { %v14220_v16 = vpop.f32.mrb[144].mxu1 }
 0x76b   : > { %16035 = vst [vmem:[#allocation13_spill] sm:$0xff] %v14220_v16  ;;  %v10989_v42 = vpop.f32.mrb[145].mxu1 }
 0x76c   : > { %v14222_v46 = vpop.f32.mrb[146].mxu1 }
 0x76d   : > { %16036 = vst [vmem:[#allocation14_spill] sm:$0xff] %v14222_v46  ;;  %v10990_v1 = vpop.f32.mrb[147].mxu1 }
 0x76e   : > { %v14226_v48 = vpop.f32.mrb[144].mxu0 }
 0x76f   : > { %v10995_v6 = vpop.f32.mrb[145].mxu0 }
 0x770   : > { %v14228_v5 = vpop.f32.mrb[146].mxu0 }
 0x771   : > { %v10996_v35 = vpop.f32.mrb[147].mxu0 }
 0x772   : > { %v14232_v61 = vpop.f32.mrb[148].mxu1 }
 0x773   : > { %16037 = vst [vmem:[#allocation41_spill] sm:$0xff] %v14232_v61  ;;  %v11001_v3 = vpop.f32.mrb[149].mxu1 }
 0x774   : > { %v14234_v4 = vpop.f32.mrb[150].mxu1 }
 0x775   : > { %16038 = vst [vmem:[#allocation42_spill] sm:$0xff] %v14234_v4  ;;  %v11002_v17 = vpop.f32.mrb[151].mxu1 }
 0x776   : > { %v14238_v31 = vpop.f32.mrb[148].mxu0 }
 0x777   : > { %16039 = vst [vmem:[#allocation43_spill] sm:$0xff] %v14238_v31  ;;  %v11007_v28 = vpop.f32.mrb[149].mxu0 }
 0x778   : > { %v14240_v40 = vpop.f32.mrb[150].mxu0 }
 0x779   : > { %16040 = vst [vmem:[#allocation44_spill] sm:$0xff] %v14240_v40  ;;  %v11008_v8 = vpop.f32.mrb[151].mxu0 }
 0x77a   : > { %v14244_v30 = vpop.f32.mrb[152].mxu1 }
 0x77b   : > { %16041 = vst [vmem:[#allocation45_spill] sm:$0xff] %v14244_v30  ;;  %v11013_v10 = vpop.f32.mrb[153].mxu1 }
 0x77c   : > { %v14246_v22 = vpop.f32.mrb[154].mxu1 }
 0x77d   : > { %16042 = vst [vmem:[#allocation46_spill] sm:$0xff] %v14246_v22  ;;  %v11014_v62 = vpop.f32.mrb[155].mxu1 }
 0x77e   : > { %v14250_v49 = vpop.f32.mrb[152].mxu0 }
 0x77f   : > { %16043 = vst [vmem:[#allocation47_spill] sm:$0xff] %v14250_v49  ;;  %v11019_v57 = vpop.f32.mrb[153].mxu0 }
 0x780   : > { %v14252_v0 = vpop.f32.mrb[154].mxu0 }
 0x781   : > { %16044 = vst [vmem:[#allocation48_spill] sm:$0xff] %v14252_v0  ;;  %v11020_v32 = vpop.f32.mrb[155].mxu0 }
 0x782   : > { %v14256_v21 = vpop.f32.mrb[156].mxu1 }
 0x783   : > { %16045 = vst [vmem:[#allocation49_spill] sm:$0xff] %v14256_v21  ;;  %v11025_v20 = vpop.f32.mrb[157].mxu1 }
 0x784   : > { %v14258_v38 = vpop.f32.mrb[158].mxu1 }
 0x785   : > { %16046 = vst [vmem:[#allocation50_spill] sm:$0xff] %v14258_v38  ;;  %v11026_v9 = vpop.f32.mrb[159].mxu1 }
 0x786   : > { %v14262_v47 = vpop.f32.mrb[156].mxu0 }
 0x787   : > { %16047 = vst [vmem:[#allocation51_spill] sm:$0xff] %v14262_v47  ;;  %v11031_v25 = vpop.f32.mrb[157].mxu0 }
 0x788   : > { %v14264_v42 = vpop.f32.mrb[158].mxu0 }
 0x789   : > { %16048 = vst [vmem:[#allocation52_spill] sm:$0xff] %v14264_v42  ;;  %v11032_v6 = vpop.f32.mrb[159].mxu0 }
 0x78b   : > { %v14268_v35 = vpop.f32.mrb[160].mxu1 }
 0x78c   : > { %v11037_v3 = vpop.f32.mrb[161].mxu1  ;;  %v5857_v17 = vsel %vm768_vm2, %v14268_v35, -inf }
 0x78d   : > { %5858 = vmax.xlane.f32.xlu0 %v5857_v17  ;;  %v14272_v28 = vpop.f32.mrb[162].mxu1 }
 0x78e   : > { %v11038_v8 = vpop.f32.mrb[163].mxu1  ;;  %v5860_v10 = vsel %vm768_vm2, %v14272_v28, -inf }
 0x78f   : > { %5861 = vmax.xlane.f32.xlu1 %v5860_v10  ;;  %v14276_v62 = vpop.f32.mrb[160].mxu0 }
 0x790   : > { %v11043_v57 = vpop.f32.mrb[161].mxu0  ;;  %v5863_v32 = vsel %vm768_vm2, %v14276_v62, -inf }
 0x791   : > { %5864 = vmax.xlane.f32.xlu0 %v5863_v32  ;;  %v14280_v20 = vpop.f32.mrb[162].mxu0 }
 0x792   : > { %v11044_v9 = vpop.f32.mrb[163].mxu0  ;;  %v5866_v3 = vsel %vm768_vm2, %v14280_v20, -inf }
 0x793   : > { %v14282_v25 = vpop.f32.mrb[164].mxu1 }
 0x794   : > { %v11049_v6 = vpop.f32.mrb[165].mxu1  ;;  %v5869_v17 = vsel %vm768_vm2, %v14282_v25, -inf }
 0x795   : > { %5867 = vmax.xlane.f32.xlu0 %v5866_v3  ;;  %5870 = vmax.xlane.f32.xlu1 %v5869_v17  ;;  %v14288_v8 = vpop.f32.mrb[166].mxu1 }
 0x796   : > { %v11050_v10 = vpop.f32.mrb[167].mxu1  ;;  %v5872_v9 = vsel %vm768_vm2, %v14288_v8, -inf }
 0x797   : > { %v14290_v57 = vpop.f32.mrb[164].mxu0 }
 0x798   : > { %v11055_v32 = vpop.f32.mrb[165].mxu0  ;;  %v5875_v6 = vsel %vm768_vm2, %v14290_v57, -inf }
 0x799   : > { %5873 = vmax.xlane.f32.xlu0 %v5872_v9  ;;  %5876 = vmax.xlane.f32.xlu1 %v5875_v6  ;;  %v14296_v52 = vpop.f32.mrb[166].mxu0 }
 0x79a   : > { %v11056_v11 = vpop.f32.mrb[167].mxu0  ;;  %v5878_v17 = vsel %vm768_vm2, %v14296_v52, -inf }
 0x79b   : > { %v14298_v1 = vpop.f32.mrb[168].mxu1 }
 0x79c   : > { %v11061_v3 = vpop.f32.mrb[169].mxu1  ;;  %v5881_v10 = vsel %vm768_vm2, %v14298_v1, -inf }
 0x79d   : > { %5879 = vmax.xlane.f32.xlu0 %v5878_v17  ;;  %5882 = vmax.xlane.f32.xlu1 %v5881_v10  ;;  %v14304_v32 = vpop.f32.mrb[170].mxu1 }
 0x79e   : > { %v11062_v53 = vpop.f32.mrb[171].mxu1  ;;  %v5884_v11 = vsel %vm768_vm2, %v14304_v32, -inf }
 0x79f   : > { %v14306_v41 = vpop.f32.mrb[168].mxu0 }
 0x7a0   : > { %v11067_v9 = vpop.f32.mrb[169].mxu0  ;;  %v5887_v6 = vsel %vm768_vm2, %v14306_v41, -inf }
 0x7a1   : > { %5885 = vmax.xlane.f32.xlu0 %v5884_v11  ;;  %5888 = vmax.xlane.f32.xlu1 %v5887_v6  ;;  %v14312_v3 = vpop.f32.mrb[170].mxu0 }
 0x7a2   : > { %v11068_v50 = vpop.f32.mrb[171].mxu0  ;;  %v5890_v53 = vsel %vm768_vm2, %v14312_v3, -inf }
 0x7a3   : > { %v14314_v24 = vpop.f32.mrb[172].mxu1 }
 0x7a4   : > { %v11073_v17 = vpop.f32.mrb[173].mxu1  ;;  %v5893_v10 = vsel %vm768_vm2, %v14314_v24, -inf }
 0x7a5   : > { %5891 = vmax.xlane.f32.xlu0 %v5890_v53  ;;  %5894 = vmax.xlane.f32.xlu1 %v5893_v10  ;;  %v14320_v9 = vpop.f32.mrb[174].mxu1 }
 0x7a6   : > { %v11074_v56 = vpop.f32.mrb[175].mxu1  ;;  %v5896_v50 = vsel %vm768_vm2, %v14320_v9, -inf }
 0x7a7   : > { %v14322_v58 = vpop.f32.mrb[172].mxu0 }
 0x7a8   : > { %v11079_v11 = vpop.f32.mrb[173].mxu0  ;;  %v5899_v6 = vsel %vm768_vm2, %v14322_v58, -inf }
 0x7a9   : > { %5897 = vmax.xlane.f32.xlu0 %v5896_v50  ;;  %5900 = vmax.xlane.f32.xlu1 %v5899_v6  ;;  %v14328_v17 = vpop.f32.mrb[174].mxu0 }
 0x7aa   : > { %v11080_v26 = vpop.f32.mrb[175].mxu0  ;;  %v5902_v56 = vsel %vm768_vm2, %v14328_v17, -inf }
 0x7ab   : > { %v14330_v54 = vpop.f32.mrb[176].mxu1 }
 0x7ac   : > { %v11085_v53 = vpop.f32.mrb[177].mxu1  ;;  %v5905_v10 = vsel %vm768_vm2, %v14330_v54, -inf }
 0x7ad   : > { %5903 = vmax.xlane.f32.xlu0 %v5902_v56  ;;  %5906 = vmax.xlane.f32.xlu1 %v5905_v10  ;;  %v14336_v11 = vpop.f32.mrb[178].mxu1 }
 0x7ae   : > { %v11086_v18 = vpop.f32.mrb[179].mxu1  ;;  %v5908_v26 = vsel %vm768_vm2, %v14336_v11, -inf }
 0x7af   : > { %v14338_v7 = vpop.f32.mrb[176].mxu0 }
 0x7b0   : > { %v11091_v50 = vpop.f32.mrb[177].mxu0  ;;  %v5911_v6 = vsel %vm768_vm2, %v14338_v7, -inf }
 0x7b1   : > { %5909 = vmax.xlane.f32.xlu0 %v5908_v26  ;;  %5912 = vmax.xlane.f32.xlu1 %v5911_v6  ;;  %v14344_v53 = vpop.f32.mrb[178].mxu0 }
 0x7b2   : > { %v11092_v37 = vpop.f32.mrb[179].mxu0  ;;  %v5914_v18 = vsel %vm768_vm2, %v14344_v53, -inf }
 0x7b3   : > { %v14346_v43 = vpop.f32.mrb[180].mxu1 }
 0x7b4   : > { %v11097_v56 = vpop.f32.mrb[181].mxu1  ;;  %v5917_v10 = vsel %vm768_vm2, %v14346_v43, -inf }
 0x7b5   : > { %5915 = vmax.xlane.f32.xlu0 %v5914_v18  ;;  %5918 = vmax.xlane.f32.xlu1 %v5917_v10  ;;  %v14352_v50 = vpop.f32.mrb[182].mxu1 }
 0x7b6   : > { %v11098_v63 = vpop.f32.mrb[183].mxu1  ;;  %v5920_v37 = vsel %vm768_vm2, %v14352_v50, -inf }
 0x7b7   : > { %v14354_v27 = vpop.f32.mrb[180].mxu0 }
 0x7b8   : > { %v11103_v26 = vpop.f32.mrb[181].mxu0  ;;  %v5923_v6 = vsel %vm768_vm2, %v14354_v27, -inf }
 0x7b9   : > { %5921 = vmax.xlane.f32.xlu0 %v5920_v37  ;;  %5924 = vmax.xlane.f32.xlu1 %v5923_v6  ;;  %v14360_v56 = vpop.f32.mrb[182].mxu0 }
 0x7ba   : > { %v11104_v15 = vpop.f32.mrb[183].mxu0  ;;  %v5926_v63 = vsel %vm768_vm2, %v14360_v56, -inf }
 0x7bb   : > { %v14362_v44 = vpop.f32.mrb[184].mxu1 }
 0x7bc   : > { %v11109_v18 = vpop.f32.mrb[185].mxu1  ;;  %v5929_v10 = vsel %vm768_vm2, %v14362_v44, -inf }
 0x7bd   : > { %5927 = vmax.xlane.f32.xlu0 %v5926_v63  ;;  %5930 = vmax.xlane.f32.xlu1 %v5929_v10  ;;  %v14368_v26 = vpop.f32.mrb[186].mxu1 }
 0x7be   : > { %v11110_v60 = vpop.f32.mrb[187].mxu1  ;;  %v5932_v15 = vsel %vm768_vm2, %v14368_v26, -inf }
 0x7bf   : > { %v14370_v47 = vpop.f32.mrb[184].mxu0 }
 0x7c0   : > { %v11115_v37 = vpop.f32.mrb[185].mxu0  ;;  %v5935_v6 = vsel %vm768_vm2, %v14370_v47, -inf }
 0x7c1   : > { %5933 = vmax.xlane.f32.xlu0 %v5932_v15  ;;  %5936 = vmax.xlane.f32.xlu1 %v5935_v6  ;;  %v14376_v18 = vpop.f32.mrb[186].mxu0 }
 0x7c2   : > { %v11116_v42 = vpop.f32.mrb[187].mxu0  ;;  %v5938_v60 = vsel %vm768_vm2, %v14376_v18, -inf }
 0x7c3   : > { %v14378_v21 = vpop.f32.mrb[188].mxu1 }
 0x7c4   : > { %v11121_v63 = vpop.f32.mrb[189].mxu1  ;;  %v5941_v10 = vsel %vm768_vm2, %v14378_v21, -inf }
 0x7c5   : > { %5939 = vmax.xlane.f32.xlu0 %v5938_v60  ;;  %5942 = vmax.xlane.f32.xlu1 %v5941_v10  ;;  %v14384_v37 = vpop.f32.mrb[190].mxu1 }
 0x7c6   : > { %v11122_v38 = vpop.f32.mrb[191].mxu1  ;;  %v5944_v6 = vsel %vm768_vm2, %v14384_v37, -inf }
 0x7c7   : > { %v14386_v39 = vpop.f32.mrb[188].mxu0 }
 0x7c8   : > { %v11127_v15 = vpop.f32.mrb[189].mxu0  ;;  %v5947_v42 = vsel %vm768_vm2, %v14386_v39, -inf }
 0x7c9   : > { %v14392_v63 = vpop.f32.mrb[190].mxu0  ;;  %5948 = vmax.xlane.f32.xlu1 %v5947_v42  ;;  %5945 = vmax.xlane.f32.xlu0 %v5944_v6 }
 0x7ca   : > { %v11128_v33 = vpop.f32.mrb[191].mxu0  ;;  %v5950_v60 = vsel %vm768_vm2, %v14392_v63, -inf }
 0x7cd   : > { %5951 = vmax.xlane.f32.xlu0 %v5950_v60 }
 0x7da   : > { %7174 = vrot.lane.b32.xlu1 %v16021_v36, %s12261_s18 }
 0x81a   : > { %v5859_v38 = vpop.xlane.xlu0 %5858 }
 0x81b   : > { %v5953_v10 = vsub.f32 %v14268_v35, %v5859_v38 }
 0x81c   : > { %v5862_v15 = vpop.xlane.xlu1 %5861 }
 0x81d   : > { %v5985_v51 = vmul.f32 1.442695, %v5953_v10  ;;  %v5954_v29 = vsub.f32 %v14272_v28, %v5862_v15 }
 0x81e   : > { %v5865_v49 = vpop.xlane.xlu0 %5864 }
 0x81f   : > { %11836 = vpow2.f32 %v5985_v51  ;;  %v5987_v0 = vmul.f32 1.442695, %v5954_v29  ;;  %v5955_v42 = vsub.f32 %v14276_v62, %v5865_v49 }
 0x821   : > { %11838 = vpow2.f32 %v5987_v0  ;;  %v5989_v33 = vmul.f32 1.442695, %v5955_v42 }
 0x822   : > { %v5871_v6 = vpop.xlane.xlu1 %5870  ;;  %v5868_v30 = vpop.xlane.xlu0 %5867 }
 0x823   : > { %11840 = vpow2.f32 %v5989_v33  ;;  %v5957_v60 = vsub.f32 %v14282_v25, %v5871_v6  ;;  %v5956_v22 = vsub.f32 %v14280_v20, %v5868_v30 }
 0x825   : > { %v5993_v45 = vmul.f32 1.442695, %v5957_v60  ;;  %v5991_v35 = vmul.f32 1.442695, %v5956_v22 }
 0x826   : > { %v5877_v38 = vpop.xlane.xlu1 %5876  ;;  %v5874_v10 = vpop.xlane.xlu0 %5873 }
 0x827   : > { %11842 = vpow2.f32 %v5993_v45  ;;  %v5959_v28 = vsub.f32 %v14290_v57, %v5877_v38  ;;  %v5958_v51 = vsub.f32 %v14288_v8, %v5874_v10 }
 0x828   : > { %11844 = vpow2.f32 %v5991_v35 }
 0x829   : > { %v14405_v29 = vpop.eup %11836  ;;  %v5997_v49 = vmul.f32 1.442695, %v5959_v28  ;;  %v5995_v0 = vmul.f32 1.442695, %v5958_v51 }
 0x82a   : > { %v5883_v62 = vpop.xlane.xlu1 %5882  ;;  %v5880_v15 = vpop.xlane.xlu0 %5879  ;;  %v6049_v25 = vsel %vm768_vm2, %v14405_v29, 0.0 }
 0x82b   : > { %v14409_v30 = vpop.eup %11838  ;;  %11846 = vpow2.f32 %v5997_v49  ;;  %v5961_v22 = vsub.f32 %v14298_v1, %v5883_v62  ;;  %v5960_v45 = vsub.f32 %v14296_v52, %v5880_v15  ;;  %6050 = vadd.xlane.f32.xlu1 %v6049_v25 }
 0x82c   : > { %11848 = vpow2.f32 %v5995_v0  ;;  %v6052_v20 = vsel %vm768_vm2, %v14409_v30, 0.0 }
 0x82d   : > { %v14415_v8 = vpop.eup %11840  ;;  %v6001_v57 = vmul.f32 1.442695, %v5961_v22  ;;  %v5999_v42 = vmul.f32 1.442695, %v5960_v45  ;;  %6053 = vadd.xlane.f32.xlu0 %v6052_v20 }
 0x82e   : > { %v5889_v33 = vpop.xlane.xlu1 %5888  ;;  %v5886_v6 = vpop.xlane.xlu0 %5885  ;;  %v6055_v60 = vsel %vm768_vm2, %v14415_v8, 0.0 }
 0x82f   : > { %11850 = vpow2.f32 %v6001_v57  ;;  %v5963_v1 = vsub.f32 %v14306_v41, %v5889_v33  ;;  %v5962_v52 = vsub.f32 %v14304_v32, %v5886_v6  ;;  %6056 = vadd.xlane.f32.xlu1 %v6055_v60 }
 0x830   : > { %11852 = vpow2.f32 %v5999_v42 }
 0x831   : > { %v14421_v35 = vpop.eup %11842  ;;  %v6005_v38 = vmul.f32 1.442695, %v5963_v1  ;;  %v6003_v10 = vmul.f32 1.442695, %v5962_v52 }
 0x832   : > { %v14423_v28 = vpop.eup %11844  ;;  %v5895_v51 = vpop.xlane.xlu1 %5894  ;;  %v6061_v0 = vsel %vm768_vm2, %v14421_v35, 0.0 }
 0x833   : > { %v5892_v49 = vpop.xlane.xlu0 %5891  ;;  %11854 = vpow2.f32 %v6005_v38  ;;  %v5965_v62 = vsub.f32 %v14314_v24, %v5895_v51  ;;  %6062 = vadd.xlane.f32.xlu1 %v6061_v0  ;;  %v6058_v32 = vsel %vm768_vm2, %v14423_v28, 0.0 }
 0x834   : > { %v5964_v41 = vsub.f32 %v14312_v3, %v5892_v49  ;;  %11856 = vpow2.f32 %v6003_v10  ;;  %6059 = vadd.xlane.f32.xlu0 %v6058_v32 }
 0x835   : > { %v14431_v15 = vpop.eup %11846  ;;  %v6009_v25 = vmul.f32 1.442695, %v5965_v62 }
 0x836   : > { %v6007_v22 = vmul.f32 1.442695, %v5964_v41  ;;  %v14433_v45 = vpop.eup %11848  ;;  %v5901_v20 = vpop.xlane.xlu1 %5900  ;;  %v6067_v42 = vsel %vm768_vm2, %v14431_v15, 0.0 }
 0x837   : > { %v5898_v57 = vpop.xlane.xlu0 %5897  ;;  %11858 = vpow2.f32 %v6009_v25  ;;  %v5967_v24 = vsub.f32 %v14322_v58, %v5901_v20  ;;  %6068 = vadd.xlane.f32.xlu1 %v6067_v42  ;;  %v6064_v33 = vsel %vm768_vm2, %v14433_v45, 0.0 }
 0x838   : > { %v5966_v3 = vsub.f32 %v14320_v9, %v5898_v57  ;;  %11860 = vpow2.f32 %v6007_v22  ;;  %6065 = vadd.xlane.f32.xlu0 %v6064_v33 }
 0x839   : > { %v14441_v6 = vpop.eup %11850  ;;  %v6013_v60 = vmul.f32 1.442695, %v5967_v24 }
 0x83a   : > { %v6011_v1 = vmul.f32 1.442695, %v5966_v3  ;;  %v14443_v52 = vpop.eup %11852  ;;  %v5907_v38 = vpop.xlane.xlu1 %5906  ;;  %v6073_v51 = vsel %vm768_vm2, %v14441_v6, 0.0 }
 0x83b   : > { %v5904_v10 = vpop.xlane.xlu0 %5903  ;;  %11862 = vpow2.f32 %v6013_v60  ;;  %v5969_v58 = vsub.f32 %v14330_v54, %v5907_v38  ;;  %6074 = vadd.xlane.f32.xlu1 %v6073_v51  ;;  %v6070_v49 = vsel %vm768_vm2, %v14443_v52, 0.0 }
 0x83c   : > { %v5968_v9 = vsub.f32 %v14328_v17, %v5904_v10  ;;  %11864 = vpow2.f32 %v6011_v1  ;;  %6071 = vadd.xlane.f32.xlu0 %v6070_v49 }
 0x83d   : > { %v14451_v0 = vpop.eup %11854  ;;  %v6017_v62 = vmul.f32 1.442695, %v5969_v58 }
 0x83e   : > { %v6015_v41 = vmul.f32 1.442695, %v5968_v9  ;;  %v14453_v32 = vpop.eup %11856  ;;  %v5913_v25 = vpop.xlane.xlu1 %5912  ;;  %v6079_v20 = vsel %vm768_vm2, %v14451_v0, 0.0 }
 0x83f   : > { %v5910_v22 = vpop.xlane.xlu0 %5909  ;;  %11866 = vpow2.f32 %v6017_v62  ;;  %v5971_v54 = vsub.f32 %v14338_v7, %v5913_v25  ;;  %6080 = vadd.xlane.f32.xlu1 %v6079_v20  ;;  %v6076_v57 = vsel %vm768_vm2, %v14453_v32, 0.0 }
 0x840   : > { %v5970_v17 = vsub.f32 %v14336_v11, %v5910_v22  ;;  %11868 = vpow2.f32 %v6015_v41  ;;  %6077 = vadd.xlane.f32.xlu0 %v6076_v57 }
 0x841   : > { %v14461_v42 = vpop.eup %11858  ;;  %v6021_v24 = vmul.f32 1.442695, %v5971_v54 }
 0x842   : > { %v6019_v3 = vmul.f32 1.442695, %v5970_v17  ;;  %v14463_v33 = vpop.eup %11860  ;;  %v5919_v60 = vpop.xlane.xlu1 %5918  ;;  %v6085_v38 = vsel %vm768_vm2, %v14461_v42, 0.0 }
 0x843   : > { %v5916_v1 = vpop.xlane.xlu0 %5915  ;;  %11870 = vpow2.f32 %v6021_v24  ;;  %v5973_v7 = vsub.f32 %v14346_v43, %v5919_v60  ;;  %6086 = vadd.xlane.f32.xlu1 %v6085_v38  ;;  %v6082_v10 = vsel %vm768_vm2, %v14463_v33, 0.0 }
 0x844   : > { %v5972_v11 = vsub.f32 %v14344_v53, %v5916_v1  ;;  %11872 = vpow2.f32 %v6019_v3  ;;  %6083 = vadd.xlane.f32.xlu0 %v6082_v10 }
 0x845   : > { %v14471_v51 = vpop.eup %11862  ;;  %v6025_v58 = vmul.f32 1.442695, %v5973_v7 }
 0x846   : > { %v6023_v9 = vmul.f32 1.442695, %v5972_v11  ;;  %v14473_v49 = vpop.eup %11864  ;;  %v5925_v62 = vpop.xlane.xlu1 %5924  ;;  %v6091_v25 = vsel %vm768_vm2, %v14471_v51, 0.0 }
 0x847   : > { %v5922_v41 = vpop.xlane.xlu0 %5921  ;;  %11874 = vpow2.f32 %v6025_v58  ;;  %v5975_v43 = vsub.f32 %v14354_v27, %v5925_v62  ;;  %6092 = vadd.xlane.f32.xlu1 %v6091_v25  ;;  %v6088_v22 = vsel %vm768_vm2, %v14473_v49, 0.0 }
 0x848   : > { %v5974_v53 = vsub.f32 %v14352_v50, %v5922_v41  ;;  %11876 = vpow2.f32 %v6023_v9  ;;  %6089 = vadd.xlane.f32.xlu0 %v6088_v22 }
 0x849   : > { %v14481_v20 = vpop.eup %11866  ;;  %v6029_v54 = vmul.f32 1.442695, %v5975_v43 }
 0x84a   : > { %v6027_v17 = vmul.f32 1.442695, %v5974_v53  ;;  %v14483_v57 = vpop.eup %11868  ;;  %v5931_v24 = vpop.xlane.xlu1 %5930  ;;  %v6097_v60 = vsel %vm768_vm2, %v14481_v20, 0.0 }
 0x84b   : > { %v5928_v3 = vpop.xlane.xlu0 %5927  ;;  %11878 = vpow2.f32 %v6029_v54  ;;  %v5977_v27 = vsub.f32 %v14362_v44, %v5931_v24  ;;  %6098 = vadd.xlane.f32.xlu1 %v6097_v60  ;;  %v6094_v1 = vsel %vm768_vm2, %v14483_v57, 0.0 }
 0x84c   : > { %v5976_v50 = vsub.f32 %v14360_v56, %v5928_v3  ;;  %11880 = vpow2.f32 %v6027_v17  ;;  %6095 = vadd.xlane.f32.xlu0 %v6094_v1 }
 0x84d   : > { %v14491_v38 = vpop.eup %11870  ;;  %v6033_v7 = vmul.f32 1.442695, %v5977_v27 }
 0x84e   : > { %v6031_v11 = vmul.f32 1.442695, %v5976_v50  ;;  %v14493_v10 = vpop.eup %11872  ;;  %v5937_v58 = vpop.xlane.xlu1 %5936  ;;  %v6103_v62 = vsel %vm768_vm2, %v14491_v38, 0.0 }
 0x84f   : > { %v5934_v9 = vpop.xlane.xlu0 %5933  ;;  %11882 = vpow2.f32 %v6033_v7  ;;  %v5979_v44 = vsub.f32 %v14370_v47, %v5937_v58  ;;  %6104 = vadd.xlane.f32.xlu1 %v6103_v62  ;;  %v6100_v41 = vsel %vm768_vm2, %v14493_v10, 0.0 }
 0x850   : > { %v5978_v56 = vsub.f32 %v14368_v26, %v5934_v9  ;;  %11884 = vpow2.f32 %v6031_v11  ;;  %6101 = vadd.xlane.f32.xlu0 %v6100_v41 }
 0x851   : > { %v14501_v25 = vpop.eup %11874  ;;  %v6037_v43 = vmul.f32 1.442695, %v5979_v44 }
 0x852   : > { %v6035_v53 = vmul.f32 1.442695, %v5978_v56  ;;  %v14503_v22 = vpop.eup %11876  ;;  %v5943_v54 = vpop.xlane.xlu1 %5942  ;;  %v6109_v24 = vsel %vm768_vm2, %v14501_v25, 0.0 }
 0x853   : > { %v5940_v17 = vpop.xlane.xlu0 %5939  ;;  %11886 = vpow2.f32 %v6037_v43  ;;  %v5981_v47 = vsub.f32 %v14378_v21, %v5943_v54  ;;  %6110 = vadd.xlane.f32.xlu1 %v6109_v24  ;;  %v6106_v3 = vsel %vm768_vm2, %v14503_v22, 0.0 }
 0x854   : > { %v5980_v26 = vsub.f32 %v14376_v18, %v5940_v17  ;;  %11888 = vpow2.f32 %v6035_v53  ;;  %6107 = vadd.xlane.f32.xlu0 %v6106_v3 }
 0x855   : > { %v14511_v60 = vpop.eup %11878  ;;  %v6041_v27 = vmul.f32 1.442695, %v5981_v47 }
 0x856   : > { %v6039_v50 = vmul.f32 1.442695, %v5980_v26  ;;  %v14513_v1 = vpop.eup %11880  ;;  %v5949_v7 = vpop.xlane.xlu1 %5948  ;;  %v6115_v58 = vsel %vm768_vm2, %v14511_v60, 0.0 }
 0x857   : > { %v5946_v11 = vpop.xlane.xlu0 %5945  ;;  %11890 = vpow2.f32 %v6041_v27  ;;  %v5983_v21 = vsub.f32 %v14386_v39, %v5949_v7  ;;  %6116 = vadd.xlane.f32.xlu1 %v6115_v58  ;;  %v6112_v9 = vsel %vm768_vm2, %v14513_v1, 0.0 }
 0x858   : > { %v5982_v18 = vsub.f32 %v14384_v37, %v5946_v11  ;;  %11892 = vpow2.f32 %v6039_v50  ;;  %6113 = vadd.xlane.f32.xlu0 %v6112_v9 }
 0x859   : > { %v14521_v62 = vpop.eup %11882  ;;  %v6045_v44 = vmul.f32 1.442695, %v5983_v21 }
 0x85a   : > { %v6043_v56 = vmul.f32 1.442695, %v5982_v18  ;;  %v14523_v41 = vpop.eup %11884  ;;  %v6121_v53 = vsel %vm768_vm2, %v14521_v62, 0.0  ;;  %v14614_v59 = vpop.permute.xlu1 %7174 }
 0x85b   : > { %v5952_v43 = vpop.xlane.xlu0 %5951  ;;  %11894 = vpow2.f32 %v6045_v44  ;;  %6122 = vadd.xlane.f32.xlu1 %v6121_v53  ;;  %v6118_v37 = vsel %vm768_vm2, %v14523_v41, 0.0  ;;  %v16049_v44 = vld [vmem:[#allocation15_spill] sm:$0xff]  ;;  %v16052_v53 = vld [vmem:[#allocation18_spill] sm:$0xff] }
 0x85c   : > { %v5984_v39 = vsub.f32 %v14392_v63, %v5952_v43  ;;  %11896 = vpow2.f32 %v6043_v56  ;;  %6119 = vadd.xlane.f32.xlu0 %v6118_v37  ;;  %v16050_v56 = vld [vmem:[#allocation16_spill] sm:$0xff]  ;;  %v16051_v43 = vld [vmem:[#allocation17_spill] sm:$0xff] }
 0x85d   : > { %v14530_v54 = vpop.eup %11886  ;;  %v16054_v37 = vld [vmem:[#allocation20_spill] sm:$0xff] }
 0x85e   : > { %v6047_v17 = vmul.f32 1.442695, %v5984_v39  ;;  %v14532_v24 = vpop.eup %11888  ;;  %v6127_v47 = vsel %vm768_vm2, %v14530_v54, 0.0  ;;  %v16053_v39 = vld [vmem:[#allocation19_spill] sm:$0xff] }
 0x85f   : > { %6128 = vadd.xlane.f32.xlu1 %v6127_v47  ;;  %v6124_v26 = vsel %vm768_vm2, %v14532_v24, 0.0  ;;  %v16056_v47 = vld [vmem:[#allocation22_spill] sm:$0xff] }
 0x860   : > { %11898 = vpow2.f32 %v6047_v17  ;;  %6125 = vadd.xlane.f32.xlu0 %v6124_v26  ;;  %v16055_v17 = vld [vmem:[#allocation21_spill] sm:$0xff]  ;;  %v16057_v26 = vld [vmem:[#allocation23_spill] sm:$0xff] }
 0x861   : > { %v14538_v63 = vpop.eup %11890 }
 0x862   : > { %v14540_v3 = vpop.eup %11892  ;;  %v6133_v27 = vsel %vm768_vm2, %v14538_v63, 0.0 }
 0x863   : > { %6134 = vadd.xlane.f32.xlu1 %v6133_v27  ;;  %v6130_v50 = vsel %vm768_vm2, %v14540_v3, 0.0  ;;  %v16058_v27 = vld [vmem:[#allocation24_spill] sm:$0xff] }
 0x864   : > { %6131 = vadd.xlane.f32.xlu0 %v6130_v50  ;;  %v16059_v50 = vld [vmem:[#allocation25_spill] sm:$0xff] }
 0x865   : > { %v14546_v7 = vpop.eup %11894 }
 0x866   : > { %v14548_v11 = vpop.eup %11896  ;;  %v6139_v58 = vsel %vm768_vm2, %v14546_v7, 0.0 }
 0x867   : > { %6140 = vadd.xlane.f32.xlu1 %v6139_v58  ;;  %v6136_v21 = vsel %vm768_vm2, %v14548_v11, 0.0  ;;  %v16060_v58 = vld [vmem:[#allocation27_spill] sm:$0xff] }
 0x868   : > { %6137 = vadd.xlane.f32.xlu0 %v6136_v21  ;;  %v16061_v21 = vld [vmem:[#allocation29_spill] sm:$0xff] }
 0x86a   : > { %v14554_v18 = vpop.eup %11898 }
 0x86b   : > { %v6142_v9 = vsel %vm768_vm2, %v14554_v18, 0.0 }
 0x86c   : > { %6143 = vadd.xlane.f32.xlu0 %v6142_v9  ;;  %v16062_v9 = vld [vmem:[#allocation31_spill] sm:$0xff] }
 0x878   : > { %7172 = vrot.lane.b32.xlu1 %v16021_v36, %s12260_s17 }
 0x87c   : > { %7278 = vrot.lane.b32.xlu1 %v16049_v44, %s12261_s18 }
 0x880   : > { %7330 = vrot.lane.b32.xlu1 %v16050_v56, %s12261_s18 }
 0x882   : > { %7226 = vrot.lane.b32.xlu0 %v16022_v2, %s12261_s18 }
 0x884   : > { %7382 = vrot.lane.b32.xlu1 %v16051_v43, %s12261_s18 }
 0x886   : > { %7224 = vrot.lane.b32.xlu0 %v16022_v2, %s12260_s17 }
 0x888   : > { %7434 = vrot.lane.b32.xlu1 %v16052_v53, %s12261_s18 }
 0x88a   : > { %7276 = vrot.lane.b32.xlu0 %v16049_v44, %s12260_s17 }
 0x88c   : > { %7486 = vrot.lane.b32.xlu1 %v16053_v39, %s12261_s18 }
 0x88e   : > { %7328 = vrot.lane.b32.xlu0 %v16050_v56, %s12260_s17 }
 0x890   : > { %7538 = vrot.lane.b32.xlu1 %v16054_v37, %s12261_s18 }
 0x892   : > { %7380 = vrot.lane.b32.xlu0 %v16051_v43, %s12260_s17 }
 0x894   : > { %7590 = vrot.lane.b32.xlu1 %v16055_v17, %s12261_s18 }
 0x896   : > { %7432 = vrot.lane.b32.xlu0 %v16052_v53, %s12260_s17 }
 0x898   : > { %7642 = vrot.lane.b32.xlu1 %v16056_v47, %s12261_s18 }
 0x89a   : > { %7484 = vrot.lane.b32.xlu0 %v16053_v39, %s12260_s17 }
 0x89c   : > { %7694 = vrot.lane.b32.xlu1 %v16057_v26, %s12261_s18 }
 0x89e   : > { %7536 = vrot.lane.b32.xlu0 %v16054_v37, %s12260_s17 }
 0x8a0   : > { %7746 = vrot.lane.b32.xlu1 %v16058_v27, %s12261_s18 }
 0x8a2   : > { %7588 = vrot.lane.b32.xlu0 %v16055_v17, %s12260_s17 }
 0x8a4   : > { %7798 = vrot.lane.b32.xlu1 %v16059_v50, %s12261_s18 }
 0x8a6   : > { %7640 = vrot.lane.b32.xlu0 %v16056_v47, %s12260_s17 }
 0x8a8   : > { %7850 = vrot.lane.b32.xlu1 %v16060_v58, %s12261_s18 }
 0x8aa   : > { %7692 = vrot.lane.b32.xlu0 %v16057_v26, %s12260_s17 }
 0x8ac   : > { %7902 = vrot.lane.b32.xlu1 %v16061_v21, %s12261_s18 }
 0x8ae   : > { %7744 = vrot.lane.b32.xlu0 %v16058_v27, %s12260_s17 }
 0x8b0   : > { %7954 = vrot.lane.b32.xlu1 %v16062_v9, %s12261_s18  ;;  %s15718_s18 = scalar_lea.vmem [#allocation9], %s9817_s27 }
 0x8b2   : > { %7796 = vrot.lane.b32.xlu0 %v16059_v50, %s12260_s17 }
 0x8b4   : > { %7952 = vrot.lane.b32.xlu1 %v16062_v9, %s12260_s17 }
 0x8b6   : > { %7848 = vrot.lane.b32.xlu0 %v16060_v58, %s12260_s17 }
 0x8b8   : > { %v6051_v14 = vpop.xlane.xlu1 %6050  ;;  %8516 = vrot.lane.b32.xlu1 %v16021_v36, %s12263_s19 }
 0x8b9   : > { %11900 = vrcp.f32 %v6051_v14 }
 0x8ba   : > { %7900 = vrot.lane.b32.xlu0 %v16061_v21, %s12260_s17  ;;  %v6054_v23 = vpop.xlane.xlu0 %6053 }
 0x8bb   : > { %11902 = vrcp.f32 %v6054_v23 }
 0x8bc   : > { %8610 = vrot.lane.b32.xlu1 %v16049_v44, %s12263_s19  ;;  %v6057_v31 = vpop.xlane.xlu1 %6056 }
 0x8bd   : > { %11904 = vrcp.f32 %v6057_v31 }
 0x8be   : > { %8563 = vrot.lane.b32.xlu0 %v16022_v2, %s12263_s19 }
 0x8c0   : > { %8704 = vrot.lane.b32.xlu1 %v16051_v43, %s12263_s19  ;;  %v6063_v40 = vpop.xlane.xlu1 %6062 }
 0x8c1   : > { %11906 = vrcp.f32 %v6063_v40  ;;  %v6060_v36 = vpop.xlane.xlu0 %6059 }
 0x8c2   : > { %11908 = vrcp.f32 %v6060_v36  ;;  %8657 = vrot.lane.b32.xlu0 %v16050_v56, %s12263_s19 }
 0x8c3   : > { %v11901_v14 = vpop.eup %11900 }
 0x8c4   : > { %v6177_v23 = vmul.f32 %v11901_v14, %v14405_v29  ;;  %8798 = vrot.lane.b32.xlu1 %v16053_v39, %s12263_s19  ;;  %v6069_v31 = vpop.xlane.xlu1 %6068 }
 0x8c5   : > { %v11903_v16 = vpop.eup %11902  ;;  %11910 = vrcp.f32 %v6069_v31  ;;  %v6066_v2 = vpop.xlane.xlu0 %6065 }
 0x8c6   : > { %v10307_v46 = vpack.c.bf16 %v6177_v23, %v6177_v23  ;;  %v6178_v40 = vmul.f32 %v11903_v16, %v14409_v30  ;;  %11912 = vrcp.f32 %v6066_v2  ;;  %8751 = vrot.lane.b32.xlu0 %v16052_v53, %s12263_s19 }
 0x8c7   : > { %v11905_v36 = vpop.eup %11904 }
 0x8c8   : > { %10069 = vst.msk [vmem:[%s13199_s15 + $0x10] sm:$0xf] %vm2046_vm3, %v10307_v46  ;;  %v10308_v61 = vpack.c.bf16 %v6178_v40, %v6178_v40  ;;  %v6179_v29 = vmul.f32 %v11905_v36, %v14415_v8  ;;  %8892 = vrot.lane.b32.xlu1 %v16055_v17, %s12263_s19  ;;  %v6075_v14 = vpop.xlane.xlu1 %6074  ;;  %v6209_v31 = vpack.c.bf16 %v6178_v40, %v6177_v23 }
 0x8c9   : > { %11914 = vrcp.f32 %v6075_v14  ;;  %v6072_v4 = vpop.xlane.xlu0 %6071 }
 0x8ca   : > { %10070 = vst.msk [vmem:[%s13199_s15 + $0x14] sm:$0xf] %vm2046_vm3, %v10308_v61  ;;  %v10309_v16 = vpack.c.bf16 %v6179_v29, %v6179_v29  ;;  %11916 = vrcp.f32 %v6072_v4  ;;  %8845 = vrot.lane.b32.xlu0 %v16054_v37, %s12263_s19  ;;  %11132 = vmatmul.mubr.msk.bf16.vlgmr.msra.gmra.mrb[192].mxu1 %vm768_vm2, %v6209_v31 }
 0x8cb   : > { %v11907_v46 = vpop.eup %11906  ;;  %11142 = vmatpush3.bf16.msra.mxu1 %v16049_v44  ;;  %11143 = vmatprep.mubr.msk.bf16.mxu1 %vm12259_vm1, %v15986_v34 }
 0x8cc   : > { %v11909_v30 = vpop.eup %11908  ;;  %10071 = vst.msk [vmem:[%s13199_s15 + $0x30] sm:$0xf] %vm2046_vm3, %v10309_v16  ;;  %v6181_v8 = vmul.f32 %v11907_v46, %v14421_v35  ;;  %8986 = vrot.lane.b32.xlu1 %v16057_v26, %s12263_s19  ;;  %v6081_v61 = vpop.xlane.xlu1 %6080  ;;  %11153 = vmatprep.subr.bf16.mxu1 %v15986_v34 }
 0x8cd   : > { %v6180_v4 = vmul.f32 %v11909_v30, %v14423_v28  ;;  %11918 = vrcp.f32 %v6081_v61  ;;  %v6078_v44 = vpop.xlane.xlu0 %6077 }
 0x8ce   : > { %v10311_v23 = vpack.c.bf16 %v6181_v8, %v6181_v8  ;;  %11920 = vrcp.f32 %v6078_v44  ;;  %8939 = vrot.lane.b32.xlu0 %v16056_v47, %s12263_s19 }
 0x8cf   : > { %v11911_v2 = vpop.eup %11910  ;;  %v10310_v40 = vpack.c.bf16 %v6180_v4, %v6180_v4  ;;  %v6210_v36 = vpack.c.bf16 %v6180_v4, %v6179_v29 }
 0x8d0   : > { %v11913_v35 = vpop.eup %11912  ;;  %10073 = vst.msk [vmem:[%s13199_s15 + $0x50] sm:$0xf] %vm2046_vm3, %v10311_v23  ;;  %v6183_v14 = vmul.f32 %v11911_v2, %v14431_v15  ;;  %9033 = vrot.lane.b32.xlu1 %v16058_v27, %s12263_s19  ;;  %v6087_v28 = vpop.xlane.xlu1 %6086 }
 0x8d1   : > { %10072 = vst.msk [vmem:[%s13199_s15 + $0x34] sm:$0xf] %vm2046_vm3, %v10310_v40  ;;  %v6182_v31 = vmul.f32 %v11913_v35, %v14433_v45  ;;  %11922 = vrcp.f32 %v6087_v28  ;;  %11138 = vmatmul.mubr.msk.bf16.vlgmr.msra.gmra.mrb[192].mxu0 %vm768_vm2, %v6210_v36  ;;  %v6084_v16 = vpop.xlane.xlu0 %6083 }
 0x8d2   : > { %v10313_v29 = vpack.c.bf16 %v6183_v14, %v6183_v14  ;;  %11148 = vmatpush3.bf16.msra.mxu0 %v16050_v56  ;;  %11924 = vrcp.f32 %v6084_v16  ;;  %11149 = vmatprep.mubr.msk.bf16.mxu0 %vm12259_vm1, %v15986_v34 }
 0x8d3   : > { %v11915_v15 = vpop.eup %11914  ;;  %v10312_v46 = vpack.c.bf16 %v6182_v31, %v6182_v31  ;;  %v6211_v30 = vpack.c.bf16 %v6182_v31, %v6181_v8  ;;  %11159 = vmatprep.subr.bf16.mxu0 %v15986_v34 }
 0x8d4   : > { %v11917_v61 = vpop.eup %11916  ;;  %10075 = vst.msk [vmem:[%s13199_s15 + $0x70] sm:$0xf] %vm2046_vm3, %v10313_v29  ;;  %v6185_v45 = vmul.f32 %v11915_v15, %v14441_v6  ;;  %v6093_v4 = vpop.xlane.xlu1 %6092 }
 0x8d5   : > { %10074 = vst.msk [vmem:[%s13199_s15 + $0x54] sm:$0xf] %vm2046_vm3, %v10312_v46  ;;  %v6184_v56 = vmul.f32 %v11917_v61, %v14443_v52  ;;  %11926 = vrcp.f32 %v6093_v4  ;;  %11144 = vmatmul.mubr.msk.bf16.vlgmr.msra.gmra.mrb[196].mxu1 %vm768_vm2, %v6211_v30  ;;  %v6090_v44 = vpop.xlane.xlu0 %6089 }
 0x8d6   : > { %v10315_v23 = vpack.c.bf16 %v6185_v45, %v6185_v45  ;;  %11154 = vmatpush3.bf16.msra.mxu1 %v16051_v43  ;;  %11928 = vrcp.f32 %v6090_v44  ;;  %11155 = vmatprep.mubr.msk.bf16.mxu1 %vm12259_vm1, %v15986_v34 }
 0x8d7   : > { %v11919_v8 = vpop.eup %11918  ;;  %v10314_v6 = vpack.c.bf16 %v6184_v56, %v6184_v56  ;;  %v6212_v2 = vpack.c.bf16 %v6184_v56, %v6183_v14  ;;  %11165 = vmatprep.subr.bf16.mxu1 %v15986_v34 }
 0x8d8   : > { %v11921_v40 = vpop.eup %11920  ;;  %10077 = vst.msk [vmem:[%s13199_s15 + $0x90] sm:$0xf] %vm2046_vm3, %v10315_v23  ;;  %v6187_v52 = vmul.f32 %v11919_v8, %v14451_v0  ;;  %v6099_v36 = vpop.xlane.xlu1 %6098 }
 0x8d9   : > { %10076 = vst.msk [vmem:[%s13199_s15 + $0x74] sm:$0xf] %vm2046_vm3, %v10314_v6  ;;  %v6186_v43 = vmul.f32 %v11921_v40, %v14453_v32  ;;  %11930 = vrcp.f32 %v6099_v36  ;;  %11150 = vmatmul.mubr.msk.bf16.vlgmr.msra.gmra.mrb[196].mxu0 %vm768_vm2, %v6212_v2  ;;  %v6096_v35 = vpop.xlane.xlu0 %6095 }
 0x8da   : > { %v10317_v28 = vpack.c.bf16 %v6187_v52, %v6187_v52  ;;  %11160 = vmatpush3.bf16.msra.mxu0 %v16052_v53  ;;  %11932 = vrcp.f32 %v6096_v35  ;;  %11161 = vmatprep.mubr.msk.bf16.mxu0 %vm12259_vm1, %v15986_v34 }
 0x8db   : > { %v11923_v14 = vpop.eup %11922  ;;  %v10316_v0 = vpack.c.bf16 %v6186_v43, %v6186_v43  ;;  %v6213_v31 = vpack.c.bf16 %v6186_v43, %v6185_v45  ;;  %11171 = vmatprep.subr.bf16.mxu0 %v15986_v34 }
 0x8dc   : > { %v11925_v16 = vpop.eup %11924  ;;  %10079 = vst.msk [vmem:[%s13199_s15 + $0xb0] sm:$0xf] %vm2046_vm3, %v10317_v28  ;;  %v6189_v32 = vmul.f32 %v11923_v14, %v14461_v42  ;;  %v6105_v29 = vpop.xlane.xlu1 %6104 }
 0x8dd   : > { %10078 = vst.msk [vmem:[%s13199_s15 + $0x94] sm:$0xf] %vm2046_vm3, %v10316_v0  ;;  %v6188_v53 = vmul.f32 %v11925_v16, %v14463_v33  ;;  %11934 = vrcp.f32 %v6105_v29  ;;  %11156 = vmatmul.mubr.msk.bf16.vlgmr.msra.gmra.mrb[200].mxu1 %vm768_vm2, %v6213_v31  ;;  %v6102_v15 = vpop.xlane.xlu0 %6101 }
 0x8de   : > { %v10319_v46 = vpack.c.bf16 %v6189_v32, %v6189_v32  ;;  %11166 = vmatpush3.bf16.msra.mxu1 %v16053_v39  ;;  %11936 = vrcp.f32 %v6102_v15  ;;  %11167 = vmatprep.mubr.msk.bf16.mxu1 %vm12259_vm1, %v15986_v34 }
 0x8df   : > { %v11927_v30 = vpop.eup %11926  ;;  %v10318_v42 = vpack.c.bf16 %v6188_v53, %v6188_v53  ;;  %v6214_v61 = vpack.c.bf16 %v6188_v53, %v6187_v52  ;;  %11177 = vmatprep.subr.bf16.mxu1 %v15986_v34 }
 0x8e0   : > { %v11929_v45 = vpop.eup %11928  ;;  %10081 = vst.msk [vmem:[%s13199_s15 + $0xd0] sm:$0xf] %vm2046_vm3, %v10319_v46  ;;  %v6191_v33 = vmul.f32 %v11927_v30, %v14471_v51  ;;  %v6111_v4 = vpop.xlane.xlu1 %6110 }
 0x8e1   : > { %10080 = vst.msk [vmem:[%s13199_s15 + $0xb4] sm:$0xf] %vm2046_vm3, %v10318_v42  ;;  %v6190_v39 = vmul.f32 %v11929_v45, %v14473_v49  ;;  %11938 = vrcp.f32 %v6111_v4  ;;  %11162 = vmatmul.mubr.msk.bf16.vlgmr.msra.gmra.mrb[200].mxu0 %vm768_vm2, %v6214_v61  ;;  %v6108_v56 = vpop.xlane.xlu0 %6107 }
 0x8e2   : > { %v10321_v44 = vpack.c.bf16 %v6191_v33, %v6191_v33  ;;  %11172 = vmatpush3.bf16.msra.mxu0 %v16054_v37  ;;  %11940 = vrcp.f32 %v6108_v56  ;;  %11173 = vmatprep.mubr.msk.bf16.mxu0 %vm12259_vm1, %v15986_v34 }
 0x8e3   : > { %v11931_v23 = vpop.eup %11930  ;;  %v10320_v51 = vpack.c.bf16 %v6190_v39, %v6190_v39  ;;  %v6215_v8 = vpack.c.bf16 %v6190_v39, %v6189_v32  ;;  %11183 = vmatprep.subr.bf16.mxu0 %v15986_v34 }
 0x8e4   : > { %v11933_v6 = vpop.eup %11932  ;;  %10083 = vst.msk [vmem:[%s13199_s15 + $0xf0] sm:$0xf] %vm2046_vm3, %v10321_v44  ;;  %v6193_v49 = vmul.f32 %v11931_v23, %v14481_v20  ;;  %v6117_v2 = vpop.xlane.xlu1 %6116 }
 0x8e5   : > { %10082 = vst.msk [vmem:[%s13199_s15 + $0xd4] sm:$0xf] %vm2046_vm3, %v10320_v51  ;;  %v6192_v37 = vmul.f32 %v11933_v6, %v14483_v57  ;;  %11942 = vrcp.f32 %v6117_v2  ;;  %11168 = vmatmul.mubr.msk.bf16.vlgmr.msra.gmra.mrb[204].mxu1 %vm768_vm2, %v6215_v8  ;;  %v6114_v40 = vpop.xlane.xlu0 %6113 }
 0x8e6   : > { %v10323_v52 = vpack.c.bf16 %v6193_v49, %v6193_v49  ;;  %11178 = vmatpush3.bf16.msra.mxu1 %v16055_v17  ;;  %11944 = vrcp.f32 %v6114_v40  ;;  %11179 = vmatprep.mubr.msk.bf16.mxu1 %vm12259_vm1, %v15986_v34 }
 0x8e7   : > { %v11935_v36 = vpop.eup %11934  ;;  %v10322_v20 = vpack.c.bf16 %v6192_v37, %v6192_v37  ;;  %v6216_v43 = vpack.c.bf16 %v6192_v37, %v6191_v33  ;;  %11189 = vmatprep.subr.bf16.mxu1 %v15986_v34 }
 0x8e8   : > { %v11937_v35 = vpop.eup %11936  ;;  %10085 = vst.msk [vmem:[%s13199_s15 + $0x110] sm:$0xf] %vm2046_vm3, %v10323_v52  ;;  %v6195_v57 = vmul.f32 %v11935_v36, %v14491_v38  ;;  %v6123_v28 = vpop.xlane.xlu1 %6122 }
 0x8e9   : > { %10084 = vst.msk [vmem:[%s13199_s15 + $0xf4] sm:$0xf] %vm2046_vm3, %v10322_v20  ;;  %v6194_v17 = vmul.f32 %v11937_v35, %v14493_v10  ;;  %11946 = vrcp.f32 %v6123_v28  ;;  %11174 = vmatmul.mubr.msk.bf16.vlgmr.msra.gmra.mrb[204].mxu0 %vm768_vm2, %v6216_v43  ;;  %v6120_v14 = vpop.xlane.xlu0 %6119 }
 0x8ea   : > { %v10325_v0 = vpack.c.bf16 %v6195_v57, %v6195_v57  ;;  %11184 = vmatpush3.bf16.msra.mxu0 %v16056_v47  ;;  %11948 = vrcp.f32 %v6120_v14  ;;  %11185 = vmatprep.mubr.msk.bf16.mxu0 %vm12259_vm1, %v15986_v34 }
 0x8eb   : > { %v11939_v31 = vpop.eup %11938  ;;  %v10324_v38 = vpack.c.bf16 %v6194_v17, %v6194_v17  ;;  %v6217_v16 = vpack.c.bf16 %v6194_v17, %v6193_v49  ;;  %11195 = vmatprep.subr.bf16.mxu0 %v15986_v34 }
 0x8ec   : > { %v11941_v32 = vpop.eup %11940  ;;  %10087 = vst.msk [vmem:[%s13199_s15 + $0x130] sm:$0xf] %vm2046_vm3, %v10325_v0  ;;  %v6197_v10 = vmul.f32 %v11939_v31, %v14501_v25  ;;  %v6129_v29 = vpop.xlane.xlu1 %6128 }
 0x8ed   : > { %10086 = vst.msk [vmem:[%s13199_s15 + $0x114] sm:$0xf] %vm2046_vm3, %v10324_v38  ;;  %v6196_v47 = vmul.f32 %v11941_v32, %v14503_v22  ;;  %11950 = vrcp.f32 %v6129_v29  ;;  %11180 = vmatmul.mubr.msk.bf16.vlgmr.msra.gmra.mrb[208].mxu1 %vm768_vm2, %v6217_v16  ;;  %v6126_v53 = vpop.xlane.xlu0 %6125 }
 0x8ee   : > { %v10327_v15 = vpack.c.bf16 %v6197_v10, %v6197_v10  ;;  %11190 = vmatpush3.bf16.msra.mxu1 %v16057_v26  ;;  %11952 = vrcp.f32 %v6126_v53  ;;  %11191 = vmatprep.mubr.msk.bf16.mxu1 %vm12259_vm1, %v15986_v34 }
 0x8ef   : > { %v11943_v46 = vpop.eup %11942  ;;  %v10326_v25 = vpack.c.bf16 %v6196_v47, %v6196_v47  ;;  %v6218_v30 = vpack.c.bf16 %v6196_v47, %v6195_v57  ;;  %11201 = vmatprep.subr.bf16.mxu1 %v15986_v34 }
 0x8f0   : > { %v11945_v42 = vpop.eup %11944  ;;  %10089 = vst.msk [vmem:[%s13199_s15 + $0x150] sm:$0xf] %vm2046_vm3, %v10327_v15  ;;  %v6199_v22 = vmul.f32 %v11943_v46, %v14511_v60  ;;  %v6135_v61 = vpop.xlane.xlu1 %6134  ;;  %v7180_v46 = vsel %vm768_vm2, %v14614_v59, 0 }
 0x8f1   : > { %10088 = vst.msk [vmem:[%s13199_s15 + $0x134] sm:$0xf] %vm2046_vm3, %v10326_v25  ;;  %v6198_v26 = vmul.f32 %v11945_v42, %v14513_v1  ;;  %11954 = vrcp.f32 %v6135_v61  ;;  %11186 = vmatmul.mubr.msk.bf16.vlgmr.msra.gmra.mrb[208].mxu0 %vm768_vm2, %v6218_v30  ;;  %v6132_v45 = vpop.xlane.xlu0 %6131 }
 0x8f2   : > { %v10329_v33 = vpack.c.bf16 %v6199_v22, %v6199_v22  ;;  %11196 = vmatpush3.bf16.msra.mxu0 %v16058_v27  ;;  %11956 = vrcp.f32 %v6132_v45  ;;  %11197 = vmatprep.mubr.msk.bf16.mxu0 %vm12259_vm1, %v15986_v34 }
 0x8f3   : > { %v11947_v4 = vpop.eup %11946  ;;  %v10328_v60 = vpack.c.bf16 %v6198_v26, %v6198_v26  ;;  %v6219_v39 = vpack.c.bf16 %v6198_v26, %v6197_v10  ;;  %11207 = vmatprep.subr.bf16.mxu0 %v15986_v34 }
 0x8f4   : > { %v11949_v56 = vpop.eup %11948  ;;  %10091 = vst.msk [vmem:[%s13199_s15 + $0x170] sm:$0xf] %vm2046_vm3, %v10329_v33  ;;  %v6201_v1 = vmul.f32 %v11947_v4, %v14521_v62  ;;  %v6141_v44 = vpop.xlane.xlu1 %6140 }
 0x8f5   : > { %10090 = vst.msk [vmem:[%s13199_s15 + $0x154] sm:$0xf] %vm2046_vm3, %v10328_v60  ;;  %v6200_v27 = vmul.f32 %v11949_v56, %v14523_v41  ;;  %11958 = vrcp.f32 %v6141_v44  ;;  %11192 = vmatmul.mubr.msk.bf16.vlgmr.msra.gmra.mrb[212].mxu1 %vm768_vm2, %v6219_v39  ;;  %v6138_v23 = vpop.xlane.xlu0 %6137 }
 0x8f6   : > { %v10331_v51 = vpack.c.bf16 %v6201_v1, %v6201_v1  ;;  %11202 = vmatpush3.bf16.msra.mxu1 %v16059_v50  ;;  %11960 = vrcp.f32 %v6138_v23  ;;  %11203 = vmatprep.mubr.msk.bf16.mxu1 %vm12259_vm1, %v15986_v34 }
 0x8f7   : > { %v11951_v8 = vpop.eup %11950  ;;  %v10330_v62 = vpack.c.bf16 %v6200_v27, %v6200_v27  ;;  %v6220_v6 = vpack.c.bf16 %v6200_v27, %v6199_v22  ;;  %11213 = vmatprep.subr.bf16.mxu1 %v15986_v34 }
 0x8f8   : > { %v11953_v49 = vpop.eup %11952  ;;  %10093 = vst.msk [vmem:[%s13199_s15 + $0x190] sm:$0xf] %vm2046_vm3, %v10331_v51  ;;  %v6203_v41 = vmul.f32 %v11951_v8, %v14530_v54  ;;  %v14775_v2 = vpop.permute.xlu1 %7172 }
 0x8f9   : > { %10092 = vst.msk [vmem:[%s13199_s15 + $0x174] sm:$0xf] %vm2046_vm3, %v10330_v62  ;;  %v6202_v37 = vmul.f32 %v11953_v49, %v14532_v24  ;;  %11198 = vmatmul.mubr.msk.bf16.vlgmr.msra.gmra.mrb[212].mxu0 %vm768_vm2, %v6220_v6  ;;  %v6144_v40 = vpop.xlane.xlu0 %6143 }
 0x8fa   : > { %v10333_v52 = vpack.c.bf16 %v6203_v41, %v6203_v41  ;;  %11208 = vmatpush3.bf16.msra.mxu0 %v16060_v58  ;;  %11962 = vrcp.f32 %v6144_v40  ;;  %11209 = vmatprep.mubr.msk.bf16.mxu0 %vm12259_vm1, %v15986_v34 }
 0x8fb   : > { %v11955_v36 = vpop.eup %11954  ;;  %v10332_v20 = vpack.c.bf16 %v6202_v37, %v6202_v37  ;;  %v6221_v54 = vpack.c.bf16 %v6202_v37, %v6201_v1  ;;  %11219 = vmatprep.subr.bf16.mxu0 %v15986_v34 }
 0x8fc   : > { %v11957_v43 = vpop.eup %11956  ;;  %10095 = vst.msk [vmem:[%s13199_s15 + $0x1b0] sm:$0xf] %vm2046_vm3, %v10333_v52  ;;  %v6205_v24 = vmul.f32 %v11955_v36, %v14538_v63  ;;  %v7279_v35 = vpop.permute.xlu1 %7278 }
 0x8fd   : > { %10094 = vst.msk [vmem:[%s13199_s15 + $0x194] sm:$0xf] %vm2046_vm3, %v10332_v20  ;;  %v6204_v57 = vmul.f32 %v11957_v43, %v14540_v3  ;;  %11204 = vmatmul.mubr.msk.bf16.vlgmr.msra.gmra.mrb[216].mxu1 %vm768_vm2, %v6221_v54  ;;  %v7227_v28 = vpop.permute.xlu0 %7226  ;;  %v7284_v26 = vsel %vm768_vm2, %v7279_v35, 0 }
 0x8fe   : > { %v10335_v17 = vpack.c.bf16 %v6205_v24, %v6205_v24  ;;  %11214 = vmatpush3.bf16.msra.mxu1 %v16061_v21  ;;  %11215 = vmatprep.mubr.msk.bf16.mxu1 %vm12259_vm1, %v15986_v34  ;;  %v7232_v22 = vsel %vm768_vm2, %v7227_v28, 0 }
 0x8ff   : > { %v11959_v14 = vpop.eup %11958  ;;  %v10334_v0 = vpack.c.bf16 %v6204_v57, %v6204_v57  ;;  %v6222_v31 = vpack.c.bf16 %v6204_v57, %v6203_v41  ;;  %11225 = vmatprep.subr.bf16.mxu1 %v15986_v34 }
 0x900   : > { %v11961_v63 = vpop.eup %11960  ;;  %10097 = vst.msk [vmem:[%s13199_s15 + $0x1d0] sm:$0xf] %vm2046_vm3, %v10335_v17  ;;  %v6207_v3 = vmul.f32 %v11959_v14, %v14546_v7  ;;  %v7331_v38 = vpop.permute.xlu1 %7330 }
 0x901   : > { %10096 = vst.msk [vmem:[%s13199_s15 + $0x1b4] sm:$0xf] %vm2046_vm3, %v10334_v0  ;;  %v6206_v16 = vmul.f32 %v11961_v63, %v14548_v11  ;;  %11210 = vmatmul.mubr.msk.bf16.vlgmr.msra.gmra.mrb[216].mxu0 %vm768_vm2, %v6222_v31  ;;  %v7225_v32 = vpop.permute.xlu0 %7224  ;;  %v7336_v4 = vsel %vm768_vm2, %v7331_v38, 0 }
 0x902   : > { %v10337_v10 = vpack.c.bf16 %v6207_v3, %v6207_v3  ;;  %11220 = vmatpush3.bf16.msra.mxu0 %v16062_v9  ;;  %11221 = vmatprep.mubr.msk.bf16.mxu0 %vm12259_vm1, %v15986_v34 }
 0x903   : > { %v10336_v29 = vpack.c.bf16 %v6206_v16, %v6206_v16  ;;  %v6223_v47 = vpack.c.bf16 %v6206_v16, %v6205_v24  ;;  %11231 = vmatprep.subr.bf16.mxu0 %v15986_v34 }
 0x904   : > { %v11963_v7 = vpop.eup %11962  ;;  %10099 = vst.msk [vmem:[%s13199_s15 + $0x1f0] sm:$0xf] %vm2046_vm3, %v10337_v10  ;;  %v7383_v53 = vpop.permute.xlu1 %7382 }
 0x905   : > { %10098 = vst.msk [vmem:[%s13199_s15 + $0x1d4] sm:$0xf] %vm2046_vm3, %v10336_v29  ;;  %v6208_v11 = vmul.f32 %v11963_v7, %v14554_v18  ;;  %11216 = vmatmul.mubr.msk.bf16.vlgmr.msra.gmra.mrb[220].mxu1 %vm768_vm2, %v6223_v47  ;;  %v7277_v15 = vpop.permute.xlu0 %7276  ;;  %v7388_v56 = vsel %vm768_vm2, %v7383_v53, 0 }
 0x906   : > { %11227 = vmatprep.mubr.msk.bf16.mxu1 %vm12259_vm1, %v15986_v34 }
 0x907   : > { %v10338_v25 = vpack.c.bf16 %v6208_v11, %v6208_v11  ;;  %11226 = vmatpush3.bf16.xpose.msra.mxu1 %v7180_v46  ;;  %v6224_v30 = vpack.c.bf16 %v6208_v11, %v6207_v3 }
 0x908   : > { %v7435_v42 = vpop.permute.xlu1 %7434  ;;  %11237 = vmatprep.subr.bf16.mxu1 %v15986_v34 }
 0x909   : > { %10100 = vst.msk [vmem:[%s13199_s15 + $0x1f4] sm:$0xf] %vm2046_vm3, %v10338_v25  ;;  %11222 = vmatmul.mubr.msk.bf16.vlgmr.msra.gmra.mrb[220].mxu0 %vm768_vm2, %v6224_v30  ;;  %v7329_v18 = vpop.permute.xlu0 %7328  ;;  %v7440_v44 = vsel %vm768_vm2, %v7435_v42, 0 }
 0x90a   : > { %11233 = vmatprep.mubr.msk.bf16.mxu0 %vm12259_vm1, %v15986_v34 }
 0x90b   : > { %11232 = vmatpush3.bf16.xpose.msra.mxu0 %v7232_v22 }
 0x90c   : > { %v7487_v59 = vpop.permute.xlu1 %7486  ;;  %11243 = vmatprep.subr.bf16.mxu0 %v15986_v34 }
 0x90d   : > { %v7381_v61 = vpop.permute.xlu0 %7380  ;;  %v7492_v51 = vsel %vm768_vm2, %v7487_v59, 0 }
 0x90e   : > { %11228 = vmatmul.mubr.msk.bf16.vlgmr.msra.gmra.mrb[224].mxu1 %vm768_vm2, %v14775_v2 }
 0x90f   : > { %11238 = vmatpush3.bf16.xpose.msra.mxu1 %v7284_v26  ;;  %11239 = vmatprep.mubr.msk.bf16.mxu1 %vm12259_vm1, %v15986_v34 }
 0x910   : > { %v7539_v45 = vpop.permute.xlu1 %7538  ;;  %11249 = vmatprep.subr.bf16.mxu1 %v15986_v34 }
 0x911   : > { %v7433_v33 = vpop.permute.xlu0 %7432  ;;  %v7544_v62 = vsel %vm768_vm2, %v7539_v45, 0 }
 0x912   : > { %11234 = vmatmul.mubr.msk.bf16.vlgmr.msra.gmra.mrb[224].mxu0 %vm768_vm2, %v7225_v32 }
 0x913   : > { %11244 = vmatpush3.bf16.xpose.msra.mxu0 %v7336_v4  ;;  %11245 = vmatprep.mubr.msk.bf16.mxu0 %vm12259_vm1, %v15986_v34 }
 0x914   : > { %v7591_v60 = vpop.permute.xlu1 %7590  ;;  %11255 = vmatprep.subr.bf16.mxu0 %v15986_v34 }
 0x915   : > { %v7485_v39 = vpop.permute.xlu0 %7484  ;;  %v7596_v49 = vsel %vm768_vm2, %v7591_v60, 0 }
 0x916   : > { %11240 = vmatmul.mubr.msk.bf16.vlgmr.msra.gmra.mrb[228].mxu1 %vm768_vm2, %v7277_v15 }
 0x917   : > { %11250 = vmatpush3.bf16.xpose.msra.mxu1 %v7388_v56  ;;  %11251 = vmatprep.mubr.msk.bf16.mxu1 %vm12259_vm1, %v15986_v34 }
 0x918   : > { %v7643_v1 = vpop.permute.xlu1 %7642  ;;  %11261 = vmatprep.subr.bf16.mxu1 %v15986_v34 }
 0x919   : > { %v7537_v27 = vpop.permute.xlu0 %7536  ;;  %v7648_v37 = vsel %vm768_vm2, %v7643_v1, 0 }
 0x91a   : > { %11246 = vmatmul.mubr.msk.bf16.vlgmr.msra.gmra.mrb[228].mxu0 %vm768_vm2, %v7329_v18 }
 0x91b   : > { %11256 = vmatpush3.bf16.xpose.msra.mxu0 %v7440_v44  ;;  %11257 = vmatprep.mubr.msk.bf16.mxu0 %vm12259_vm1, %v15986_v34 }
 0x91c   : > { %v7695_v23 = vpop.permute.xlu1 %7694  ;;  %11267 = vmatprep.subr.bf16.mxu0 %v15986_v34 }
 0x91d   : > { %v7589_v8 = vpop.permute.xlu0 %7588  ;;  %v7700_v52 = vsel %vm768_vm2, %v7695_v23, 0 }
 0x91e   : > { %11252 = vmatmul.mubr.msk.bf16.vlgmr.msra.gmra.mrb[232].mxu1 %vm768_vm2, %v7381_v61 }
 0x91f   : > { %11262 = vmatpush3.bf16.xpose.msra.mxu1 %v7492_v51  ;;  %11263 = vmatprep.mubr.msk.bf16.mxu1 %vm12259_vm1, %v15986_v34 }
 0x920   : > { %11273 = vmatprep.subr.bf16.mxu1 %v15986_v34  ;;  %v7747_v6 = vpop.permute.xlu1 %7746 }
 0x921   : > { %v7641_v41 = vpop.permute.xlu0 %7640  ;;  %v7752_v20 = vsel %vm768_vm2, %v7747_v6, 0 }
 0x922   : > { %11258 = vmatmul.mubr.msk.bf16.vlgmr.msra.gmra.mrb[232].mxu0 %vm768_vm2, %v7433_v33 }
 0x923   : > { %11268 = vmatpush3.bf16.xpose.msra.mxu0 %v7544_v62  ;;  %11269 = vmatprep.mubr.msk.bf16.mxu0 %vm12259_vm1, %v15986_v34 }
 0x924   : > { %11279 = vmatprep.subr.bf16.mxu0 %v15986_v34  ;;  %v7799_v2 = vpop.permute.xlu1 %7798 }
 0x925   : > { %v7693_v40 = vpop.permute.xlu0 %7692  ;;  %v7804_v24 = vsel %vm768_vm2, %v7799_v2, 0 }
 0x926   : > { %11264 = vmatmul.mubr.msk.bf16.vlgmr.msra.gmra.mrb[236].mxu1 %vm768_vm2, %v7485_v39 }
 0x927   : > { %11274 = vmatpush3.bf16.xpose.msra.mxu1 %v7596_v49  ;;  %11275 = vmatprep.mubr.msk.bf16.mxu1 %vm12259_vm1, %v15986_v34 }
 0x928   : > { %11285 = vmatprep.subr.bf16.mxu1 %v15986_v34  ;;  %v7851_v36 = vpop.permute.xlu1 %7850 }
 0x929   : > { %v7745_v54 = vpop.permute.xlu0 %7744  ;;  %v7856_v57 = vsel %vm768_vm2, %v7851_v36, 0 }
 0x92a   : > { %11270 = vmatmul.mubr.msk.bf16.vlgmr.msra.gmra.mrb[236].mxu0 %vm768_vm2, %v7537_v27 }
 0x92b   : > { %11280 = vmatpush3.bf16.xpose.msra.mxu0 %v7648_v37  ;;  %11281 = vmatprep.mubr.msk.bf16.mxu0 %vm12259_vm1, %v15986_v34 }
 0x92c   : > { %11291 = vmatprep.subr.bf16.mxu0 %v15986_v34  ;;  %v7903_v43 = vpop.permute.xlu1 %7902 }
 0x92d   : > { %v7797_v35 = vpop.permute.xlu0 %7796  ;;  %v7908_v17 = vsel %vm768_vm2, %v7903_v43, 0 }
 0x92e   : > { %11276 = vmatmul.mubr.msk.bf16.vlgmr.msra.gmra.mrb[240].mxu1 %vm768_vm2, %v7589_v8 }
 0x92f   : > { %11286 = vmatpush3.bf16.xpose.msra.mxu1 %v7700_v52  ;;  %11287 = vmatprep.mubr.msk.bf16.mxu1 %vm12259_vm1, %v15986_v34 }
 0x930   : > { %11297 = vmatprep.subr.bf16.mxu1 %v15986_v34  ;;  %v7955_v28 = vpop.permute.xlu1 %7954 }
 0x931   : > { %v7849_v14 = vpop.permute.xlu0 %7848  ;;  %v7960_v31 = vsel %vm768_vm2, %v7955_v28, 0 }
 0x932   : > { %11282 = vmatmul.mubr.msk.bf16.vlgmr.msra.gmra.mrb[240].mxu0 %vm768_vm2, %v7641_v41 }
 0x933   : > { %11292 = vmatpush3.bf16.xpose.msra.mxu0 %v7752_v20  ;;  %11293 = vmatprep.mubr.msk.bf16.mxu0 %vm12259_vm1, %v15986_v34 }
 0x934   : > { %11303 = vmatprep.subr.bf16.mxu0 %v15986_v34  ;;  %v7953_v0 = vpop.permute.xlu1 %7952 }
 0x935   : > { %v7901_v63 = vpop.permute.xlu0 %7900 }
 0x936   : > { %11288 = vmatmul.mubr.msk.bf16.vlgmr.msra.gmra.mrb[244].mxu1 %vm768_vm2, %v7693_v40 }
 0x937   : > { %11298 = vmatpush3.bf16.xpose.msra.mxu1 %v7804_v24  ;;  %11299 = vmatprep.mubr.msk.bf16.mxu1 %vm12259_vm1, %v15986_v34 }
 0x938   : > { %11309 = vmatprep.subr.bf16.mxu1 %v15986_v34  ;;  %v8517_v3 = vpop.permute.xlu1 %8516 }
 0x939   : > { %v8564_v38 = vpop.permute.xlu0 %8563 }
 0x93a   : > { %11294 = vmatmul.mubr.msk.bf16.vlgmr.msra.gmra.mrb[244].mxu0 %vm768_vm2, %v7745_v54 }
 0x93b   : > { %11304 = vmatpush3.bf16.xpose.msra.mxu0 %v7856_v57  ;;  %11305 = vmatprep.mubr.msk.bf16.mxu0 %vm12259_vm1, %v15986_v34 }
 0x93c   : > { %11315 = vmatprep.subr.bf16.mxu0 %v15986_v34 }
 0x93e   : > { %11300 = vmatmul.mubr.msk.bf16.vlgmr.msra.gmra.mrb[248].mxu1 %vm768_vm2, %v7797_v35 }
 0x93f   : > { %11310 = vmatpush3.bf16.xpose.msra.mxu1 %v7908_v17  ;;  %11311 = vmatprep.mubr.msk.bf16.mxu1 %vm12259_vm1, %v15986_v34 }
 0x940   : > { %11321 = vmatprep.subr.bf16.mxu1 %v15986_v34 }
 0x942   : > { %11306 = vmatmul.mubr.msk.bf16.vlgmr.msra.gmra.mrb[248].mxu0 %vm768_vm2, %v7849_v14 }
 0x943   : > { %11316 = vmatpush3.bf16.xpose.msra.mxu0 %v7960_v31  ;;  %11317 = vmatprep.mubr.msk.bf16.mxu0 %vm12259_vm1, %v15986_v34 }
 0x944   : > { %11327 = vmatprep.subr.bf16.mxu0 %v15986_v34 }
 0x946   : > { %11312 = vmatmul.mubr.msk.bf16.vlgmr.msra.gmra.mrb[252].mxu1 %vm768_vm2, %v7901_v63 }
 0x947   : > { %11322 = vmatpush3.bf16.msra.mxu1 %v8517_v3  ;;  %11323 = vmatprep.mubr.msk.bf16.mxu1 %vm12259_vm1, %v15986_v34 }
 0x948   : > { %11333 = vmatprep.subr.bf16.mxu1 %v15986_v34 }
 0x94a   : > { %11318 = vmatmul.mubr.msk.bf16.vlgmr.msra.gmra.mrb[252].mxu0 %vm768_vm2, %v7953_v0 }
 0x94b   : > { %11328 = vmatpush3.bf16.msra.mxu0 %v8564_v38  ;;  %11329 = vmatprep.mubr.msk.bf16.mxu0 %vm12259_vm1, %v15986_v34 }
 0x94c   : > { %11339 = vmatprep.subr.bf16.mxu0 %v15986_v34 }
 0x99d   : > { %v14904_v16 = vpop.f32.mrb[192].mxu1 }
 0x99e   : > { %16063 = vst [vmem:[#allocation15_spill] sm:$0xff] %v14904_v16  ;;  %v11133_v32 = vpop.f32.mrb[193].mxu1 }
 0x99f   : > { %v14906_v10 = vpop.f32.mrb[194].mxu1 }
 0x9a0   : > { %16064 = vst [vmem:[#allocation16_spill] sm:$0xff] %v14906_v10  ;;  %v11134_v47 = vpop.f32.mrb[195].mxu1 }
 0x9a4   : > { %v14910_v7 = vpop.f32.mrb[192].mxu0 }
 0x9a5   : > { %16065 = vst [vmem:[#allocation17_spill] sm:$0xff] %v14910_v7  ;;  %v11139_v53 = vpop.f32.mrb[193].mxu0 }
 0x9a6   : > { %v14912_v11 = vpop.f32.mrb[194].mxu0 }
 0x9a7   : > { %16066 = vst [vmem:[#allocation18_spill] sm:$0xff] %v14912_v11  ;;  %v11140_v46 = vpop.f32.mrb[195].mxu0 }
 0x9a8   : > { %v14916_v25 = vpop.f32.mrb[196].mxu1 }
 0x9a9   : > { %16067 = vst [vmem:[#allocation19_spill] sm:$0xff] %v14916_v25  ;;  %v11145_v30 = vpop.f32.mrb[197].mxu1 }
 0x9aa   : > { %v14918_v42 = vpop.f32.mrb[198].mxu1 }
 0x9ab   : > { %16068 = vst [vmem:[#allocation20_spill] sm:$0xff] %v14918_v42  ;;  %v11146_v22 = vpop.f32.mrb[199].mxu1 }
 0x9ac   : > { %v14922_v59 = vpop.f32.mrb[196].mxu0 }
 0x9ad   : > { %16069 = vst [vmem:[#allocation21_spill] sm:$0xff] %v14922_v59  ;;  %v11151_v61 = vpop.f32.mrb[197].mxu0 }
 0x9ae   : > { %v14924_v26 = vpop.f32.mrb[198].mxu0 }
 0x9af   : > { %16070 = vst [vmem:[#allocation22_spill] sm:$0xff] %v14924_v26  ;;  %v11152_v33 = vpop.f32.mrb[199].mxu0 }
 0x9b0   : > { %v14928_v4 = vpop.f32.mrb[200].mxu1 }
 0x9b1   : > { %16071 = vst [vmem:[#allocation23_spill] sm:$0xff] %v14928_v4  ;;  %v11157_v60 = vpop.f32.mrb[201].mxu1 }
 0x9b2   : > { %v14930_v39 = vpop.f32.mrb[202].mxu1 }
 0x9b3   : > { %16072 = vst [vmem:[#allocation24_spill] sm:$0xff] %v14930_v39  ;;  %v11158_v1 = vpop.f32.mrb[203].mxu1 }
 0x9b4   : > { %v14934_v44 = vpop.f32.mrb[200].mxu0 }
 0x9b5   : > { %16073 = vst [vmem:[#allocation25_spill] sm:$0xff] %v14934_v44  ;;  %v11163_v27 = vpop.f32.mrb[201].mxu0 }
 0x9b6   : > { %v14936_v23 = vpop.f32.mrb[202].mxu0 }
 0x9b7   : > { %16074 = vst [vmem:[#allocation27_spill] sm:$0xff] %v14936_v23  ;;  %v11164_v8 = vpop.f32.mrb[203].mxu0 }
 0x9b8   : > { %v14940_v62 = vpop.f32.mrb[204].mxu1 }
 0x9b9   : > { %v11169_v6 = vpop.f32.mrb[205].mxu1 }
 0x9ba   : > { %v14942_v49 = vpop.f32.mrb[206].mxu1 }
 0x9bb   : > { %v11170_v2 = vpop.f32.mrb[207].mxu1 }
 0x9bc   : > { %v14946_v37 = vpop.f32.mrb[204].mxu0 }
 0x9bd   : > { %v11175_v40 = vpop.f32.mrb[205].mxu0 }
 0x9be   : > { %v14948_v52 = vpop.f32.mrb[206].mxu0 }
 0x9bf   : > { %v11176_v20 = vpop.f32.mrb[207].mxu0 }
 0x9c0   : > { %v14952_v54 = vpop.f32.mrb[208].mxu1 }
 0x9c1   : > { %v11181_v43 = vpop.f32.mrb[209].mxu1 }
 0x9c2   : > { %v14954_v24 = vpop.f32.mrb[210].mxu1 }
 0x9c3   : > { %v11182_v57 = vpop.f32.mrb[211].mxu1 }
 0x9c4   : > { %v14958_v28 = vpop.f32.mrb[208].mxu0 }
 0x9c5   : > { %v11187_v17 = vpop.f32.mrb[209].mxu0 }
 0x9c6   : > { %v14960_v14 = vpop.f32.mrb[210].mxu0 }
 0x9c7   : > { %v11188_v31 = vpop.f32.mrb[211].mxu0 }
 0x9c8   : > { %v14964_v63 = vpop.f32.mrb[212].mxu1 }
 0x9c9   : > { %v11193_v3 = vpop.f32.mrb[213].mxu1 }
 0x9ca   : > { %v14966_v38 = vpop.f32.mrb[214].mxu1 }
 0x9cb   : > { %v11194_v47 = vpop.f32.mrb[215].mxu1 }
 0x9cc   : > { %v14970_v53 = vpop.f32.mrb[212].mxu0 }
 0x9cd   : > { %16075 = vst [vmem:[#allocation29_spill] sm:$0xff] %v14970_v53  ;;  %v11199_v46 = vpop.f32.mrb[213].mxu0 }
 0x9ce   : > { %v14972_v30 = vpop.f32.mrb[214].mxu0 }
 0x9cf   : > { %16076 = vst [vmem:[#allocation31_spill] sm:$0xff] %v14972_v30  ;;  %v11200_v61 = vpop.f32.mrb[215].mxu0 }
 0x9d0   : > { %v14976_v33 = vpop.f32.mrb[216].mxu1 }
 0x9d1   : > { %16077 = vst [vmem:[#allocation53_spill] sm:$0xff] %v14976_v33  ;;  %v11205_v60 = vpop.f32.mrb[217].mxu1 }
 0x9d2   : > { %v14978_v1 = vpop.f32.mrb[218].mxu1 }
 0x9d3   : > { %16078 = vst [vmem:[#allocation54_spill] sm:$0xff] %v14978_v1  ;;  %v11206_v8 = vpop.f32.mrb[219].mxu1 }
 0x9d4   : > { %v14982_v6 = vpop.f32.mrb[216].mxu0 }
 0x9d5   : > { %16079 = vst [vmem:[#allocation55_spill] sm:$0xff] %v14982_v6  ;;  %v11211_v2 = vpop.f32.mrb[217].mxu0 }
 0x9d6   : > { %v14984_v40 = vpop.f32.mrb[218].mxu0 }
 0x9d7   : > { %16080 = vst [vmem:[#allocation56_spill] sm:$0xff] %v14984_v40  ;;  %v11212_v43 = vpop.f32.mrb[219].mxu0 }
 0x9d8   : > { %v14988_v57 = vpop.f32.mrb[220].mxu1 }
 0x9d9   : > { %16081 = vst [vmem:[#allocation57_spill] sm:$0xff] %v14988_v57  ;;  %v11217_v17 = vpop.f32.mrb[221].mxu1 }
 0x9da   : > { %v14990_v31 = vpop.f32.mrb[222].mxu1 }
 0x9db   : > { %16082 = vst [vmem:[#allocation58_spill] sm:$0xff] %v14990_v31  ;;  %v11218_v47 = vpop.f32.mrb[223].mxu1 }
 0x9dc   : > { %v14994_v46 = vpop.f32.mrb[220].mxu0 }
 0x9dd   : > { %16083 = vst [vmem:[#allocation59_spill] sm:$0xff] %v14994_v46  ;;  %v11223_v61 = vpop.f32.mrb[221].mxu0 }
 0x9de   : > { %v14996_v60 = vpop.f32.mrb[222].mxu0 }
 0x9df   : > { %16084 = vst [vmem:[#allocation60_spill] sm:$0xff] %v14996_v60  ;;  %v11224_v2 = vpop.f32.mrb[223].mxu0 }
 0x9e1   : > { %v15000_v51 = vpop.f32.mrb[224].mxu1 }
 0x9e2   : > { %v11229_v43 = vpop.f32.mrb[225].mxu1  ;;  %v8003_v17 = vsel %vm768_vm2, %v15000_v51, -inf }
 0x9e3   : > { %8004 = vmax.xlane.f32.xlu0 %v8003_v17  ;;  %v15004_v56 = vpop.f32.mrb[226].mxu1 }
 0x9e4   : > { %v11230_v3 = vpop.f32.mrb[227].mxu1  ;;  %v8006_v47 = vsel %vm768_vm2, %v15004_v56, -inf }
 0x9e5   : > { %8007 = vmax.xlane.f32.xlu1 %v8006_v47  ;;  %v15008_v61 = vpop.f32.mrb[224].mxu0 }
 0x9e6   : > { %v11235_v45 = vpop.f32.mrb[225].mxu0  ;;  %v8009_v2 = vsel %vm768_vm2, %v15008_v61, -inf }
 0x9e7   : > { %8010 = vmax.xlane.f32.xlu0 %v8009_v2  ;;  %v15012_v8 = vpop.f32.mrb[226].mxu0 }
 0x9e8   : > { %v11236_v43 = vpop.f32.mrb[227].mxu0  ;;  %v8012_v3 = vsel %vm768_vm2, %v15012_v8, -inf }
 0x9e9   : > { %v15014_v18 = vpop.f32.mrb[228].mxu1 }
 0x9ea   : > { %v11241_v17 = vpop.f32.mrb[229].mxu1  ;;  %v8015_v20 = vsel %vm768_vm2, %v15014_v18, -inf }
 0x9eb   : > { %8013 = vmax.xlane.f32.xlu0 %v8012_v3  ;;  %8016 = vmax.xlane.f32.xlu1 %v8015_v20  ;;  %v15020_v47 = vpop.f32.mrb[230].mxu1 }
 0x9ec   : > { %v11242_v45 = vpop.f32.mrb[231].mxu1  ;;  %v8018_v43 = vsel %vm768_vm2, %v15020_v47, -inf }
 0x9ed   : > { %v15022_v27 = vpop.f32.mrb[228].mxu0 }
 0x9ee   : > { %v11247_v2 = vpop.f32.mrb[229].mxu0  ;;  %v8021_v17 = vsel %vm768_vm2, %v15022_v27, -inf }
 0x9ef   : > { %8019 = vmax.xlane.f32.xlu0 %v8018_v43  ;;  %8022 = vmax.xlane.f32.xlu1 %v8021_v17  ;;  %v15028_v15 = vpop.f32.mrb[230].mxu0 }
 0x9f0   : > { %v11248_v29 = vpop.f32.mrb[231].mxu0  ;;  %v8024_v3 = vsel %vm768_vm2, %v15028_v15, -inf }
 0x9f1   : > { %v15030_v22 = vpop.f32.mrb[232].mxu1 }
 0x9f2   : > { %v11253_v20 = vpop.f32.mrb[233].mxu1  ;;  %v8027_v45 = vsel %vm768_vm2, %v15030_v22, -inf }
 0x9f3   : > { %8025 = vmax.xlane.f32.xlu0 %v8024_v3  ;;  %8028 = vmax.xlane.f32.xlu1 %v8027_v45  ;;  %v15036_v2 = vpop.f32.mrb[234].mxu1 }
 0x9f4   : > { %v11254_v32 = vpop.f32.mrb[235].mxu1  ;;  %v8030_v29 = vsel %vm768_vm2, %v15036_v2, -inf }
 0x9f5   : > { %v15038_v35 = vpop.f32.mrb[232].mxu0 }
 0x9f6   : > { %v11259_v43 = vpop.f32.mrb[233].mxu0  ;;  %v8033_v17 = vsel %vm768_vm2, %v15038_v35, -inf }
 0x9f7   : > { %8031 = vmax.xlane.f32.xlu0 %v8030_v29  ;;  %8034 = vmax.xlane.f32.xlu1 %v8033_v17  ;;  %v15044_v20 = vpop.f32.mrb[234].mxu0 }
 0x9f8   : > { %v11260_v41 = vpop.f32.mrb[235].mxu0  ;;  %v8036_v32 = vsel %vm768_vm2, %v15044_v20, -inf }
 0x9f9   : > { %v15046_v0 = vpop.f32.mrb[236].mxu1 }
 0x9fa   : > { %v11265_v3 = vpop.f32.mrb[237].mxu1  ;;  %v8039_v45 = vsel %vm768_vm2, %v15046_v0, -inf }
 0x9fb   : > { %8037 = vmax.xlane.f32.xlu0 %v8036_v32  ;;  %8040 = vmax.xlane.f32.xlu1 %v8039_v45  ;;  %v15052_v43 = vpop.f32.mrb[238].mxu1 }
 0x9fc   : > { %v11266_v36 = vpop.f32.mrb[239].mxu1  ;;  %v8042_v41 = vsel %vm768_vm2, %v15052_v43, -inf }
 0x9fd   : > { %v15054_v44 = vpop.f32.mrb[236].mxu0 }
 0x9fe   : > { %v11271_v29 = vpop.f32.mrb[237].mxu0  ;;  %v8045_v17 = vsel %vm768_vm2, %v15054_v44, -inf }
 0x9ff   : > { %8043 = vmax.xlane.f32.xlu0 %v8042_v41  ;;  %8046 = vmax.xlane.f32.xlu1 %v8045_v17  ;;  %v15060_v3 = vpop.f32.mrb[238].mxu0 }
 0xa00   : > { %v11272_v23 = vpop.f32.mrb[239].mxu0  ;;  %v8048_v36 = vsel %vm768_vm2, %v15060_v3, -inf }
 0xa01   : > { %v15062_v4 = vpop.f32.mrb[240].mxu1 }
 0xa02   : > { %v11277_v32 = vpop.f32.mrb[241].mxu1  ;;  %v8051_v45 = vsel %vm768_vm2, %v15062_v4, -inf }
 0xa03   : > { %8049 = vmax.xlane.f32.xlu0 %v8048_v36  ;;  %8052 = vmax.xlane.f32.xlu1 %v8051_v45  ;;  %v15068_v29 = vpop.f32.mrb[242].mxu1 }
 0xa04   : > { %v11278_v39 = vpop.f32.mrb[243].mxu1  ;;  %v8054_v23 = vsel %vm768_vm2, %v15068_v29, -inf }
 0xa05   : > { %v15070_v46 = vpop.f32.mrb[240].mxu0 }
 0xa06   : > { %v11283_v41 = vpop.f32.mrb[241].mxu0  ;;  %v8057_v17 = vsel %vm768_vm2, %v15070_v46, -inf }
 0xa07   : > { %8055 = vmax.xlane.f32.xlu0 %v8054_v23  ;;  %8058 = vmax.xlane.f32.xlu1 %v8057_v17  ;;  %v15076_v32 = vpop.f32.mrb[242].mxu0 }
 0xa08   : > { %v11284_v60 = vpop.f32.mrb[243].mxu0  ;;  %v8060_v39 = vsel %vm768_vm2, %v15076_v32, -inf }
 0xa09   : > { %v15078_v57 = vpop.f32.mrb[244].mxu1 }
 0xa0a   : > { %v11289_v36 = vpop.f32.mrb[245].mxu1  ;;  %v8063_v45 = vsel %vm768_vm2, %v15078_v57, -inf }
 0xa0b   : > { %8061 = vmax.xlane.f32.xlu0 %v8060_v39  ;;  %8064 = vmax.xlane.f32.xlu1 %v8063_v45  ;;  %v15084_v41 = vpop.f32.mrb[246].mxu1 }
 0xa0c   : > { %v11290_v31 = vpop.f32.mrb[247].mxu1  ;;  %v8066_v60 = vsel %vm768_vm2, %v15084_v41, -inf }
 0xa0d   : > { %v15086_v34 = vpop.f32.mrb[244].mxu0 }
 0xa0e   : > { %v11295_v23 = vpop.f32.mrb[245].mxu0  ;;  %v8069_v17 = vsel %vm768_vm2, %v15086_v34, -inf }
 0xa0f   : > { %8067 = vmax.xlane.f32.xlu0 %v8066_v60  ;;  %8070 = vmax.xlane.f32.xlu1 %v8069_v17  ;;  %v15092_v36 = vpop.f32.mrb[246].mxu0 }
 0xa10   : > { %v11296_v59 = vpop.f32.mrb[247].mxu0  ;;  %v8072_v31 = vsel %vm768_vm2, %v15092_v36, -inf }
 0xa11   : > { %v15094_v26 = vpop.f32.mrb[248].mxu1 }
 0xa12   : > { %v11301_v39 = vpop.f32.mrb[249].mxu1  ;;  %v8075_v45 = vsel %vm768_vm2, %v15094_v26, -inf }
 0xa13   : > { %8073 = vmax.xlane.f32.xlu0 %v8072_v31  ;;  %8076 = vmax.xlane.f32.xlu1 %v8075_v45  ;;  %v15100_v23 = vpop.f32.mrb[250].mxu1 }
 0xa14   : > { %v11302_v25 = vpop.f32.mrb[251].mxu1  ;;  %v8078_v59 = vsel %vm768_vm2, %v15100_v23, -inf }
 0xa15   : > { %v15102_v42 = vpop.f32.mrb[248].mxu0 }
 0xa16   : > { %v11307_v60 = vpop.f32.mrb[249].mxu0  ;;  %v8081_v17 = vsel %vm768_vm2, %v15102_v42, -inf }
 0xa17   : > { %8079 = vmax.xlane.f32.xlu0 %v8078_v59  ;;  %8082 = vmax.xlane.f32.xlu1 %v8081_v17  ;;  %v15108_v39 = vpop.f32.mrb[250].mxu0 }
 0xa18   : > { %v11308_v6 = vpop.f32.mrb[251].mxu0  ;;  %v8084_v25 = vsel %vm768_vm2, %v15108_v39, -inf }
 0xa19   : > { %v15110_v40 = vpop.f32.mrb[252].mxu1 }
 0xa1a   : > { %v11313_v31 = vpop.f32.mrb[253].mxu1  ;;  %v8087_v45 = vsel %vm768_vm2, %v15110_v40, -inf }
 0xa1b   : > { %8085 = vmax.xlane.f32.xlu0 %v8084_v25  ;;  %8088 = vmax.xlane.f32.xlu1 %v8087_v45  ;;  %v15116_v60 = vpop.f32.mrb[254].mxu1 }
 0xa1c   : > { %v11314_v33 = vpop.f32.mrb[255].mxu1  ;;  %v8090_v17 = vsel %vm768_vm2, %v15116_v60, -inf }
 0xa1d   : > { %v15118_v1 = vpop.f32.mrb[252].mxu0  ;;  %v15132_v33 = vpop.permute.xlu1 %8610 }
 0xa1e   : > { %v11319_v59 = vpop.f32.mrb[253].mxu0  ;;  %v8093_v6 = vsel %vm768_vm2, %v15118_v1, -inf  ;;  %16085 = vst [vmem:[#allocation61_spill] sm:$0xff] %v15132_v33 }
 0xa1f   : > { %v15124_v31 = vpop.f32.mrb[254].mxu0  ;;  %8094 = vmax.xlane.f32.xlu1 %v8093_v6  ;;  %8091 = vmax.xlane.f32.xlu0 %v8090_v17  ;;  %v15136_v59 = vpop.permute.xlu0 %8657 }
 0xa20   : > { %v11320_v7 = vpop.f32.mrb[255].mxu0  ;;  %v8096_v25 = vsel %vm768_vm2, %v15124_v31, -inf  ;;  %16087 = vst [vmem:[#allocation63_spill] sm:$0xff] %v15136_v59 }
 0xa21   : > { %v15134_v45 = vpop.permute.xlu1 %8704 }
 0xa22   : > { %16086 = vst [vmem:[#allocation62_spill] sm:$0xff] %v15134_v45 }
 0xa23   : > { %8097 = vmax.xlane.f32.xlu0 %v8096_v25  ;;  %v15140_v6 = vpop.permute.xlu0 %8751 }
 0xa24   : > { %16089 = vst [vmem:[#allocation65_spill] sm:$0xff] %v15140_v6 }
 0xa25   : > { %v15138_v11 = vpop.permute.xlu1 %8798 }
 0xa26   : > { %16088 = vst [vmem:[#allocation64_spill] sm:$0xff] %v15138_v11 }
 0xa27   : > { %v15144_v17 = vpop.permute.xlu0 %8845 }
 0xa28   : > { %16091 = vst [vmem:[#allocation67_spill] sm:$0xff] %v15144_v17 }
 0xa29   : > { %v15142_v7 = vpop.permute.xlu1 %8892 }
 0xa2a   : > { %16090 = vst [vmem:[#allocation66_spill] sm:$0xff] %v15142_v7 }
 0xa2d   : > { %v15146_v25 = vpop.permute.xlu1 %8986 }
 0xa2e   : > { %16092 = vst [vmem:[#allocation68_spill] sm:$0xff] %v15146_v25 }
 0xa30   : > { %9127 = vrot.lane.b32.xlu1 %v16060_v58, %s12263_s19  ;;  %v15148_v58 = vpop.permute.xlu0 %8939 }
 0xa31   : > { %16093 = vst [vmem:[#allocation69_spill] sm:$0xff] %v15148_v58  ;;  %v15150_v16 = vpop.permute.xlu1 %9033 }
 0xa32   : > { %16094 = vst [vmem:[#allocation70_spill] sm:$0xff] %v15150_v16 }
 0xa39   : > { %9080 = vrot.lane.b32.xlu0 %v16059_v50, %s12263_s19 }
 0xa70   : > { %v8005_v50 = vpop.xlane.xlu0 %8004 }
 0xa71   : > { %v8099_v33 = vsub.f32 %v15000_v51, %v8005_v50 }
 0xa72   : > { %v8008_v45 = vpop.xlane.xlu1 %8007 }
 0xa73   : > { %v8131_v10 = vmul.f32 1.442695, %v8099_v33  ;;  %v8100_v59 = vsub.f32 %v15004_v56, %v8008_v45 }
 0xa74   : > { %v8011_v11 = vpop.xlane.xlu0 %8010 }
 0xa75   : > { %11964 = vpow2.f32 %v8131_v10  ;;  %v8133_v6 = vmul.f32 1.442695, %v8100_v59  ;;  %v8101_v7 = vsub.f32 %v15008_v61, %v8011_v11 }
 0xa77   : > { %11966 = vpow2.f32 %v8133_v6  ;;  %v8135_v17 = vmul.f32 1.442695, %v8101_v7 }
 0xa78   : > { %v8017_v53 = vpop.xlane.xlu1 %8016  ;;  %v8014_v25 = vpop.xlane.xlu0 %8013 }
 0xa79   : > { %11968 = vpow2.f32 %v8135_v17  ;;  %v8103_v58 = vsub.f32 %v15014_v18, %v8017_v53  ;;  %v8102_v16 = vsub.f32 %v15012_v8, %v8014_v25 }
 0xa7b   : > { %v8139_v30 = vmul.f32 1.442695, %v8103_v58  ;;  %v8137_v51 = vmul.f32 1.442695, %v8102_v16 }
 0xa7c   : > { %v8023_v50 = vpop.xlane.xlu1 %8022  ;;  %v8020_v33 = vpop.xlane.xlu0 %8019 }
 0xa7d   : > { %11970 = vpow2.f32 %v8139_v30  ;;  %v8105_v56 = vsub.f32 %v15022_v27, %v8023_v50  ;;  %v8104_v10 = vsub.f32 %v15020_v47, %v8020_v33 }
 0xa7e   : > { %11972 = vpow2.f32 %v8137_v51 }
 0xa7f   : > { %v15159_v11 = vpop.eup %11964  ;;  %v8143_v61 = vmul.f32 1.442695, %v8105_v56  ;;  %v8141_v45 = vmul.f32 1.442695, %v8104_v10 }
 0xa80   : > { %v8029_v59 = vpop.xlane.xlu1 %8028  ;;  %v8026_v6 = vpop.xlane.xlu0 %8025  ;;  %v8195_v18 = vsel %vm768_vm2, %v15159_v11, 0.0 }
 0xa81   : > { %v15163_v53 = vpop.eup %11966  ;;  %11974 = vpow2.f32 %v8143_v61  ;;  %v8107_v16 = vsub.f32 %v15030_v22, %v8029_v59  ;;  %v8106_v30 = vsub.f32 %v15028_v15, %v8026_v6  ;;  %8196 = vadd.xlane.f32.xlu1 %v8195_v18 }
 0xa82   : > { %11976 = vpow2.f32 %v8141_v45  ;;  %v8198_v27 = vsel %vm768_vm2, %v15163_v53, 0.0 }
 0xa83   : > { %v15169_v8 = vpop.eup %11968  ;;  %v8147_v47 = vmul.f32 1.442695, %v8107_v16  ;;  %v8145_v7 = vmul.f32 1.442695, %v8106_v30  ;;  %8199 = vadd.xlane.f32.xlu0 %v8198_v27 }
 0xa84   : > { %v8035_v17 = vpop.xlane.xlu1 %8034  ;;  %v8032_v25 = vpop.xlane.xlu0 %8031  ;;  %v8201_v58 = vsel %vm768_vm2, %v15169_v8, 0.0 }
 0xa85   : > { %11978 = vpow2.f32 %v8147_v47  ;;  %v8109_v22 = vsub.f32 %v15038_v35, %v8035_v17  ;;  %v8108_v15 = vsub.f32 %v15036_v2, %v8032_v25  ;;  %8202 = vadd.xlane.f32.xlu1 %v8201_v58 }
 0xa86   : > { %11980 = vpow2.f32 %v8145_v7 }
 0xa87   : > { %v15175_v51 = vpop.eup %11970  ;;  %v8151_v50 = vmul.f32 1.442695, %v8109_v22  ;;  %v8149_v33 = vmul.f32 1.442695, %v8108_v15 }
 0xa88   : > { %v15177_v56 = vpop.eup %11972  ;;  %v8041_v10 = vpop.xlane.xlu1 %8040  ;;  %v8207_v45 = vsel %vm768_vm2, %v15175_v51, 0.0 }
 0xa89   : > { %v8038_v61 = vpop.xlane.xlu0 %8037  ;;  %11982 = vpow2.f32 %v8151_v50  ;;  %v8111_v59 = vsub.f32 %v15046_v0, %v8041_v10  ;;  %8208 = vadd.xlane.f32.xlu1 %v8207_v45  ;;  %v8204_v2 = vsel %vm768_vm2, %v15177_v56, 0.0 }
 0xa8a   : > { %v8110_v35 = vsub.f32 %v15044_v20, %v8038_v61  ;;  %11984 = vpow2.f32 %v8149_v33  ;;  %8205 = vadd.xlane.f32.xlu0 %v8204_v2 }
 0xa8b   : > { %v15185_v6 = vpop.eup %11974  ;;  %v8155_v18 = vmul.f32 1.442695, %v8111_v59 }
 0xa8c   : > { %v8153_v16 = vmul.f32 1.442695, %v8110_v35  ;;  %v15187_v30 = vpop.eup %11976  ;;  %v8047_v27 = vpop.xlane.xlu1 %8046  ;;  %v8213_v7 = vsel %vm768_vm2, %v15185_v6, 0.0 }
 0xa8d   : > { %v8044_v47 = vpop.xlane.xlu0 %8043  ;;  %11986 = vpow2.f32 %v8155_v18  ;;  %v8113_v0 = vsub.f32 %v15054_v44, %v8047_v27  ;;  %8214 = vadd.xlane.f32.xlu1 %v8213_v7  ;;  %v8210_v17 = vsel %vm768_vm2, %v15187_v30, 0.0 }
 0xa8e   : > { %v8112_v20 = vsub.f32 %v15052_v43, %v8044_v47  ;;  %11988 = vpow2.f32 %v8153_v16  ;;  %8211 = vadd.xlane.f32.xlu0 %v8210_v17 }
 0xa8f   : > { %v15195_v25 = vpop.eup %11978  ;;  %v8159_v58 = vmul.f32 1.442695, %v8113_v0 }
 0xa90   : > { %v8157_v22 = vmul.f32 1.442695, %v8112_v20  ;;  %v15197_v15 = vpop.eup %11980  ;;  %v8053_v50 = vpop.xlane.xlu1 %8052  ;;  %v8219_v10 = vsel %vm768_vm2, %v15195_v25, 0.0 }
 0xa91   : > { %v8050_v33 = vpop.xlane.xlu0 %8049  ;;  %11990 = vpow2.f32 %v8159_v58  ;;  %v8115_v44 = vsub.f32 %v15062_v4, %v8053_v50  ;;  %8220 = vadd.xlane.f32.xlu1 %v8219_v10  ;;  %v8216_v61 = vsel %vm768_vm2, %v15197_v15, 0.0 }
 0xa92   : > { %v8114_v43 = vsub.f32 %v15060_v3, %v8050_v33  ;;  %11992 = vpow2.f32 %v8157_v22  ;;  %8217 = vadd.xlane.f32.xlu0 %v8216_v61 }
 0xa93   : > { %v15205_v45 = vpop.eup %11982  ;;  %v8163_v59 = vmul.f32 1.442695, %v8115_v44 }
 0xa94   : > { %v8161_v35 = vmul.f32 1.442695, %v8114_v43  ;;  %v15207_v2 = vpop.eup %11984  ;;  %v8059_v18 = vpop.xlane.xlu1 %8058  ;;  %v8225_v27 = vsel %vm768_vm2, %v15205_v45, 0.0 }
 0xa95   : > { %v8056_v16 = vpop.xlane.xlu0 %8055  ;;  %11994 = vpow2.f32 %v8163_v59  ;;  %v8117_v4 = vsub.f32 %v15070_v46, %v8059_v18  ;;  %8226 = vadd.xlane.f32.xlu1 %v8225_v27  ;;  %v8222_v47 = vsel %vm768_vm2, %v15207_v2, 0.0 }
 0xa96   : > { %v8116_v3 = vsub.f32 %v15068_v29, %v8056_v16  ;;  %11996 = vpow2.f32 %v8161_v35  ;;  %8223 = vadd.xlane.f32.xlu0 %v8222_v47 }
 0xa97   : > { %v15215_v7 = vpop.eup %11986  ;;  %v8167_v0 = vmul.f32 1.442695, %v8117_v4 }
 0xa98   : > { %v8165_v20 = vmul.f32 1.442695, %v8116_v3  ;;  %v15217_v17 = vpop.eup %11988  ;;  %v8065_v58 = vpop.xlane.xlu1 %8064  ;;  %v8231_v50 = vsel %vm768_vm2, %v15215_v7, 0.0 }
 0xa99   : > { %v8062_v22 = vpop.xlane.xlu0 %8061  ;;  %11998 = vpow2.f32 %v8167_v0  ;;  %v8119_v46 = vsub.f32 %v15078_v57, %v8065_v58  ;;  %8232 = vadd.xlane.f32.xlu1 %v8231_v50  ;;  %v8228_v33 = vsel %vm768_vm2, %v15217_v17, 0.0 }
 0xa9a   : > { %v8118_v29 = vsub.f32 %v15076_v32, %v8062_v22  ;;  %12000 = vpow2.f32 %v8165_v20  ;;  %8229 = vadd.xlane.f32.xlu0 %v8228_v33 }
 0xa9b   : > { %v15225_v10 = vpop.eup %11990  ;;  %v8171_v44 = vmul.f32 1.442695, %v8119_v46 }
 0xa9c   : > { %v8169_v43 = vmul.f32 1.442695, %v8118_v29  ;;  %v15227_v61 = vpop.eup %11992  ;;  %v8071_v59 = vpop.xlane.xlu1 %8070  ;;  %v8237_v18 = vsel %vm768_vm2, %v15225_v10, 0.0 }
 0xa9d   : > { %v8068_v35 = vpop.xlane.xlu0 %8067  ;;  %12002 = vpow2.f32 %v8171_v44  ;;  %v8121_v57 = vsub.f32 %v15086_v34, %v8071_v59  ;;  %8238 = vadd.xlane.f32.xlu1 %v8237_v18  ;;  %v8234_v16 = vsel %vm768_vm2, %v15227_v61, 0.0 }
 0xa9e   : > { %v8120_v32 = vsub.f32 %v15084_v41, %v8068_v35  ;;  %12004 = vpow2.f32 %v8169_v43  ;;  %8235 = vadd.xlane.f32.xlu0 %v8234_v16 }
 0xa9f   : > { %v15235_v27 = vpop.eup %11994  ;;  %v8175_v4 = vmul.f32 1.442695, %v8121_v57 }
 0xaa0   : > { %v8173_v3 = vmul.f32 1.442695, %v8120_v32  ;;  %v15237_v47 = vpop.eup %11996  ;;  %v8077_v0 = vpop.xlane.xlu1 %8076  ;;  %v8243_v58 = vsel %vm768_vm2, %v15235_v27, 0.0 }
 0xaa1   : > { %v8074_v20 = vpop.xlane.xlu0 %8073  ;;  %12006 = vpow2.f32 %v8175_v4  ;;  %v8123_v34 = vsub.f32 %v15094_v26, %v8077_v0  ;;  %8244 = vadd.xlane.f32.xlu1 %v8243_v58  ;;  %v8240_v22 = vsel %vm768_vm2, %v15237_v47, 0.0 }
 0xaa2   : > { %v8122_v41 = vsub.f32 %v15092_v36, %v8074_v20  ;;  %12008 = vpow2.f32 %v8173_v3  ;;  %8241 = vadd.xlane.f32.xlu0 %v8240_v22 }
 0xaa3   : > { %v15245_v50 = vpop.eup %11998  ;;  %v8179_v46 = vmul.f32 1.442695, %v8123_v34 }
 0xaa4   : > { %v8177_v29 = vmul.f32 1.442695, %v8122_v41  ;;  %v15247_v33 = vpop.eup %12000  ;;  %v8083_v44 = vpop.xlane.xlu1 %8082  ;;  %v8249_v59 = vsel %vm768_vm2, %v15245_v50, 0.0 }
 0xaa5   : > { %v8080_v43 = vpop.xlane.xlu0 %8079  ;;  %12010 = vpow2.f32 %v8179_v46  ;;  %v8125_v26 = vsub.f32 %v15102_v42, %v8083_v44  ;;  %8250 = vadd.xlane.f32.xlu1 %v8249_v59  ;;  %v8246_v35 = vsel %vm768_vm2, %v15247_v33, 0.0 }
 0xaa6   : > { %v8124_v36 = vsub.f32 %v15100_v23, %v8080_v43  ;;  %12012 = vpow2.f32 %v8177_v29  ;;  %8247 = vadd.xlane.f32.xlu0 %v8246_v35 }
 0xaa7   : > { %v15255_v18 = vpop.eup %12002  ;;  %v8183_v57 = vmul.f32 1.442695, %v8125_v26 }
 0xaa8   : > { %v8181_v32 = vmul.f32 1.442695, %v8124_v36  ;;  %v15257_v16 = vpop.eup %12004  ;;  %v8089_v4 = vpop.xlane.xlu1 %8088  ;;  %v8255_v0 = vsel %vm768_vm2, %v15255_v18, 0.0 }
 0xaa9   : > { %v8086_v3 = vpop.xlane.xlu0 %8085  ;;  %12014 = vpow2.f32 %v8183_v57  ;;  %v8127_v42 = vsub.f32 %v15110_v40, %v8089_v4  ;;  %8256 = vadd.xlane.f32.xlu1 %v8255_v0  ;;  %v8252_v20 = vsel %vm768_vm2, %v15257_v16, 0.0 }
 0xaaa   : > { %v8126_v23 = vsub.f32 %v15108_v39, %v8086_v3  ;;  %12016 = vpow2.f32 %v8181_v32  ;;  %8253 = vadd.xlane.f32.xlu0 %v8252_v20 }
 0xaab   : > { %v15265_v58 = vpop.eup %12006  ;;  %v8187_v34 = vmul.f32 1.442695, %v8127_v42 }
 0xaac   : > { %v8185_v41 = vmul.f32 1.442695, %v8126_v23  ;;  %v15267_v22 = vpop.eup %12008  ;;  %v8095_v46 = vpop.xlane.xlu1 %8094  ;;  %v8261_v44 = vsel %vm768_vm2, %v15265_v58, 0.0 }
 0xaad   : > { %v8092_v29 = vpop.xlane.xlu0 %8091  ;;  %12018 = vpow2.f32 %v8187_v34  ;;  %v8129_v40 = vsub.f32 %v15118_v1, %v8095_v46  ;;  %8262 = vadd.xlane.f32.xlu1 %v8261_v44  ;;  %v8258_v43 = vsel %vm768_vm2, %v15267_v22, 0.0 }
 0xaae   : > { %v8128_v39 = vsub.f32 %v15116_v60, %v8092_v29  ;;  %12020 = vpow2.f32 %v8185_v41  ;;  %8259 = vadd.xlane.f32.xlu0 %v8258_v43 }
 0xaaf   : > { %v15275_v59 = vpop.eup %12010  ;;  %v8191_v26 = vmul.f32 1.442695, %v8129_v40 }
 0xab0   : > { %v8189_v36 = vmul.f32 1.442695, %v8128_v39  ;;  %v15277_v35 = vpop.eup %12012  ;;  %v8267_v32 = vsel %vm768_vm2, %v15275_v59, 0.0 }
 0xab1   : > { %v8098_v57 = vpop.xlane.xlu0 %8097  ;;  %12022 = vpow2.f32 %v8191_v26  ;;  %8268 = vadd.xlane.f32.xlu1 %v8267_v32  ;;  %v8264_v60 = vsel %vm768_vm2, %v15277_v35, 0.0  ;;  %v16095_v26 = vpack.c.bf16 %v14216_v12, %v14214_v19  ;;  %v16099_v19 = vpack.c.bf16 %v14960_v14, %v14958_v28  ;;  %v16108_v32 = vld [vmem:[#allocation43_spill] sm:$0xff]  ;;  %v16112_v14 = vld [vmem:[#allocation33_spill] sm:$0xff] }
 0xab2   : > { %v8130_v1 = vsub.f32 %v15124_v31, %v8098_v57  ;;  %12024 = vpow2.f32 %v8189_v36  ;;  %8265 = vadd.xlane.f32.xlu0 %v8264_v60  ;;  %v16096_v36 = vpack.c.bf16 %v14948_v52, %v14946_v37  ;;  %v16097_v57 = vpack.c.bf16 %v14228_v5, %v14226_v48  ;;  %v16102_v37 = vld [vmem:[#allocation41_spill] sm:$0xff]  ;;  %v16104_v5 = vld [vmem:[#allocation14_spill] sm:$0xff] }
 0xab3   : > { %v15284_v4 = vpop.eup %12014  ;;  %v16100_v12 = vpack.c.bf16 %v14942_v49, %v14940_v62  ;;  %v16105_v52 = vld [vmem:[#allocation13_spill] sm:$0xff]  ;;  %v16110_v62 = vpack.c.bf16 %v14954_v24, %v14952_v54  ;;  %v16111_v49 = vpack.c.bf16 %v14966_v38, %v14964_v63  ;;  %v16121_v24 = vld [vmem:[#allocation46_spill] sm:$0xff]  ;;  %v16124_v38 = vld [vmem:[#allocation16_spill] sm:$0xff] }
 0xab4   : > { %v8193_v3 = vmul.f32 1.442695, %v8130_v1  ;;  %v15286_v0 = vpop.eup %12016  ;;  %v8273_v42 = vsel %vm768_vm2, %v15284_v4, 0.0  ;;  %v16113_v1 = vld [vmem:[#allocation40_spill] sm:$0xff] }
 0xab5   : > { %8274 = vadd.xlane.f32.xlu1 %v8273_v42  ;;  %v8270_v23 = vsel %vm768_vm2, %v15286_v0, 0.0  ;;  %v16114_v60 = vpack.c.bf16 %v16112_v14, %v16113_v1  ;;  %v16116_v42 = vld [vmem:[#allocation29_spill] sm:$0xff]  ;;  %v16145_v1 = vld [vmem:[#allocation20_spill] sm:$0xff] }
 0xab6   : > { %12026 = vpow2.f32 %v8193_v3  ;;  %8271 = vadd.xlane.f32.xlu0 %v8270_v23  ;;  %v16115_v3 = vld [vmem:[#allocation31_spill] sm:$0xff] }
 0xab7   : > { %v15292_v31 = vpop.eup %12018  ;;  %v16117_v23 = vpack.c.bf16 %v16115_v3, %v16116_v42  ;;  %v16148_v42 = vld [vmem:[#allocation22_spill] sm:$0xff] }
 0xab8   : > { %v15294_v20 = vpop.eup %12020  ;;  %v8279_v34 = vsel %vm768_vm2, %v15292_v31, 0.0 }
 0xab9   : > { %8280 = vadd.xlane.f32.xlu1 %v8279_v34  ;;  %v8276_v41 = vsel %vm768_vm2, %v15294_v20, 0.0  ;;  %v16118_v34 = vld [vmem:[#allocation32_spill] sm:$0xff] }
 0xaba   : > { %8277 = vadd.xlane.f32.xlu0 %v8276_v41  ;;  %v16119_v41 = vld [vmem:[#allocation26_spill] sm:$0xff] }
 0xabb   : > { %v15300_v46 = vpop.eup %12022  ;;  %v16120_v54 = vpack.c.bf16 %v16118_v34, %v16119_v41  ;;  %v15412_v41 = vpop.permute.xlu1 %9127 }
 0xabc   : > { %v15302_v29 = vpop.eup %12024  ;;  %v8285_v44 = vsel %vm768_vm2, %v15300_v46, 0.0 }
 0xabd   : > { %8286 = vadd.xlane.f32.xlu1 %v8285_v44  ;;  %v8282_v40 = vsel %vm768_vm2, %v15302_v29, 0.0  ;;  %v16122_v44 = vld [vmem:[#allocation45_spill] sm:$0xff] }
 0xabe   : > { %8283 = vadd.xlane.f32.xlu0 %v8282_v40  ;;  %v16123_v63 = vpack.c.bf16 %v16121_v24, %v16122_v44  ;;  %v16125_v40 = vld [vmem:[#allocation15_spill] sm:$0xff] }
 0xac0   : > { %v15308_v39 = vpop.eup %12026 }
 0xac1   : > { %v8288_v43 = vsel %vm768_vm2, %v15308_v39, 0.0 }
 0xac2   : > { %8289 = vadd.xlane.f32.xlu0 %v8288_v43  ;;  %v16126_v43 = vpack.c.bf16 %v16124_v38, %v16125_v40 }
 0xace   : > { %9221 = vrot.lane.b32.xlu1 %v16062_v9, %s12263_s19  ;;  %v16098_v9 = vpack.c.bf16 %v14210_v13, %v14208_v55  ;;  %v16106_v55 = vpack.c.bf16 %v16104_v5, %v16105_v52  ;;  %v16107_v13 = vld [vmem:[#allocation44_spill] sm:$0xff]  ;;  %v16136_v5 = vld [vmem:[#allocation35_spill] sm:$0xff] }
 0xacf   : > { %v16109_v28 = vpack.c.bf16 %v16107_v13, %v16108_v32  ;;  %v16137_v52 = vld [vmem:[#allocation28_spill] sm:$0xff]  ;;  %v16140_v32 = vld [vmem:[#allocation55_spill] sm:$0xff] }
 0xad0   : > { %v16139_v13 = vld [vmem:[#allocation56_spill] sm:$0xff] }
 0xad2   : > { %4990 = vrot.lane.b32.xlu1 %v16095_v26, %s12265_s7  ;;  %v16127_v26 = vld [vmem:[#allocation48_spill] sm:$0xff] }
 0xad6   : > { %7120 = vrot.lane.b32.xlu1 %v16096_v36, %s12266_s12  ;;  %v16128_v36 = vld [vmem:[#allocation47_spill] sm:$0xff] }
 0xad8   : > { %9174 = vrot.lane.b32.xlu0 %v16061_v21, %s12263_s19  ;;  %v16101_v21 = vld [vmem:[#allocation42_spill] sm:$0xff]  ;;  %s9682_s19 = sshll.u32 %s15718_s18, 4  ;;  %s15814_s19 = int_to_ptr.vmem [resolvable:$true] %s9682_s19 }
 0xad9   : > { %v16103_v48 = vpack.c.bf16 %v16101_v21, %v16102_v37  ;;  %v16133_v21 = vld [vmem:[#allocation54_spill] sm:$0xff]  ;;  %v16134_v37 = vld [vmem:[#allocation53_spill] sm:$0xff]  ;;  %s12178_s10 = scalar_lea.vmem %s15814_s19, 4096 }
 0xada   : > { %4994 = vrot.lane.b32.xlu1 %v16097_v57, %s12265_s7  ;;  %v16129_v57 = vpack.c.bf16 %v16127_v26, %v16128_v36  ;;  %p12179_p0 = scmp.ne.s32.totalorder %s15814_s19, %s12178_s10 }
 0xadc   : > { %4988 = vrot.lane.b32.xlu0 %v16098_v9, %s12265_s7  ;;  %v16130_v9 = vld [vmem:[#allocation18_spill] sm:$0xff]  ;;  %p12180_p3 = pnand %p12179_p0, %p16186_p1 }
 0xade   : > { %7124 = vrot.lane.b32.xlu1 %v16099_v19, %s12266_s12  ;;  %v16131_v19 = vld [vmem:[#allocation17_spill] sm:$0xff]  ;;  %p12181_p5 = pneg %p12180_p3 }
 0xae0   : > { %7118 = vrot.lane.b32.xlu0 %v16100_v12, %s12266_s12  ;;  %v16132_v12 = vpack.c.bf16 %v16130_v9, %v16131_v19 }
 0xae2   : > { %4996 = vrot.lane.b32.xlu1 %v16103_v48, %s12265_s7  ;;  %v16135_v48 = vpack.c.bf16 %v16133_v21, %v16134_v37 }
 0xae4   : > { %4992 = vrot.lane.b32.xlu0 %v16106_v55, %s12265_s7  ;;  %v16138_v55 = vpack.c.bf16 %v16136_v5, %v16137_v52 }
 0xae6   : > { %4998 = vrot.lane.b32.xlu1 %v16109_v28, %s12265_s7  ;;  %v16141_v28 = vpack.c.bf16 %v16139_v13, %v16140_v32  ;;  %v16152_v32 = vmov 0.0  }
 0xae8   : > { %7122 = vrot.lane.b32.xlu0 %v16110_v62, %s12266_s12  ;;  %v16142_v62 = vld [vmem:[#allocation37_spill] sm:$0xff] }
 0xaea   : > { %7126 = vrot.lane.b32.xlu1 %v16111_v49, %s12266_s12  ;;  %v16143_v49 = vld [vmem:[#allocation30_spill] sm:$0xff] }
 0xaeb   : > { %v16144_v14 = vpack.c.bf16 %v16142_v62, %v16143_v49 }
 0xaec   : > { %4976 = vrot.lane.b32.xlu0 %v16114_v60, %s12265_s7  ;;  %v16146_v60 = vld [vmem:[#allocation19_spill] sm:$0xff] }
 0xaed   : > { %v16147_v3 = vpack.c.bf16 %v16145_v1, %v16146_v60 }
 0xaee   : > { %7128 = vrot.lane.b32.xlu1 %v16117_v23, %s12266_s12  ;;  %v16149_v23 = vld [vmem:[#allocation21_spill] sm:$0xff] }
 0xaef   : > { %v16150_v34 = vpack.c.bf16 %v16148_v42, %v16149_v23 }
 0xaf0   : > { %4978 = vrot.lane.b32.xlu0 %v16120_v54, %s12265_s7  ;;  %v15414_v54 = vpop.permute.xlu0 %9080 }
 0xaf2   : > { %5000 = vrot.lane.b32.xlu1 %v16123_v63, %s12265_s7 }
 0xaf4   : > { %7106 = vrot.lane.b32.xlu0 %v16126_v43, %s12266_s12 }
 0xaf6   : > { %5002 = vrot.lane.b32.xlu1 %v16129_v57, %s12265_s7 }
 0xaf8   : > { %7108 = vrot.lane.b32.xlu0 %v16132_v12, %s12266_s12 }
 0xafa   : > { %7130 = vrot.lane.b32.xlu1 %v16135_v48, %s12266_s12 }
 0xafc   : > { %4980 = vrot.lane.b32.xlu0 %v16138_v55, %s12265_s7 }
 0xafe   : > { %7132 = vrot.lane.b32.xlu1 %v16141_v28, %s12266_s12 }
 0xb00   : > { %4982 = vrot.lane.b32.xlu0 %v16144_v14, %s12265_s7 }
 0xb04   : > { %7110 = vrot.lane.b32.xlu0 %v16147_v3, %s12266_s12 }
 0xb08   : > { %7112 = vrot.lane.b32.xlu0 %v16150_v34, %s12266_s12 }
 0xb0e   : > { %v8197_v24 = vpop.xlane.xlu1 %8196 }
 0xb0f   : > { %12028 = vrcp.f32 %v8197_v24 }
 0xb10   : > { %v8200_v44 = vpop.xlane.xlu0 %8199 }
 0xb11   : > { %12030 = vrcp.f32 %v8200_v44 }
 0xb12   : > { %v8203_v63 = vpop.xlane.xlu1 %8202 }
 0xb13   : > { %12032 = vrcp.f32 %v8203_v63  ;;  %v16153_v63 = vld [vmem:[#allocation63_spill] sm:$0xff] }
 0xb16   : > { %v8209_v38 = vpop.xlane.xlu1 %8208 }
 0xb17   : > { %12034 = vrcp.f32 %v8209_v38  ;;  %v8206_v40 = vpop.xlane.xlu0 %8205 }
 0xb18   : > { %12036 = vrcp.f32 %v8206_v40 }
 0xb19   : > { %v12029_v43 = vpop.eup %12028 }
 0xb1a   : > { %v8323_v26 = vmul.f32 %v12029_v43, %v15159_v11  ;;  %v8215_v36 = vpop.xlane.xlu1 %8214 }
 0xb1b   : > { %v12031_v57 = vpop.eup %12030  ;;  %12038 = vrcp.f32 %v8215_v36  ;;  %v8212_v9 = vpop.xlane.xlu0 %8211 }
 0xb1c   : > { %v10339_v19 = vpack.c.bf16 %v8323_v26, %v8323_v26  ;;  %v8324_v12 = vmul.f32 %v12031_v57, %v15163_v53  ;;  %12040 = vrcp.f32 %v8212_v9  ;;  %v16151_v53 = vld [vmem:[#allocation61_spill] sm:$0xff] }
 0xb1d   : > { %v12033_v21 = vpop.eup %12032 }
 0xb1e   : > { %10165 = vst.msk [vmem:[%s13199_s15 + $0x18] sm:$0xf] %vm2046_vm3, %v10339_v19  ;;  %v8355_v37 = vpack.c.bf16 %v8324_v12, %v8323_v26  ;;  %v10340_v48 = vpack.c.bf16 %v8324_v12, %v8324_v12  ;;  %v8325_v5 = vmul.f32 %v12033_v21, %v15169_v8  ;;  %v8221_v52 = vpop.xlane.xlu1 %8220  ;;  %v16154_v19 = vld [vmem:[#allocation62_spill] sm:$0xff] }
 0xb1f   : > { %12042 = vrcp.f32 %v8221_v52  ;;  %v8218_v11 = vpop.xlane.xlu0 %8217 }
 0xb20   : > { %10166 = vst.msk [vmem:[%s13199_s15 + $0x1c] sm:$0xf] %vm2046_vm3, %v10340_v48  ;;  %v10341_v55 = vpack.c.bf16 %v8325_v5, %v8325_v5  ;;  %12044 = vrcp.f32 %v8218_v11  ;;  %11324 = vmatmul.mubr.msk.bf16.vlgmr.msra.gmra.mrb[0].mxu1 %vm768_vm2, %v8355_v37 }
 0xb21   : > { %v12035_v13 = vpop.eup %12034  ;;  %11334 = vmatpush3.bf16.msra.mxu1 %v16151_v53  ;;  %11335 = vmatprep.mubr.msk.bf16.mxu1 %vm12259_vm1, %v16152_v32 }
 0xb22   : > { %v12037_v28 = vpop.eup %12036  ;;  %10167 = vst.msk [vmem:[%s13199_s15 + $0x38] sm:$0xf] %vm2046_vm3, %v10341_v55  ;;  %v8327_v8 = vmul.f32 %v12035_v13, %v15175_v51  ;;  %v8227_v62 = vpop.xlane.xlu1 %8226  ;;  %11345 = vmatprep.subr.bf16.mxu1 %v16152_v32  ;;  %v16155_v55 = vld [vmem:[#allocation65_spill] sm:$0xff] }
 0xb23   : > { %v8326_v49 = vmul.f32 %v12037_v28, %v15177_v56  ;;  %12046 = vrcp.f32 %v8227_v62  ;;  %v8224_v14 = vpop.xlane.xlu0 %8223 }
 0xb24   : > { %v10343_v1 = vpack.c.bf16 %v8327_v8, %v8327_v8  ;;  %12048 = vrcp.f32 %v8224_v14 }
 0xb25   : > { %v12039_v60 = vpop.eup %12038  ;;  %v8356_v3 = vpack.c.bf16 %v8326_v49, %v8325_v5  ;;  %v10342_v42 = vpack.c.bf16 %v8326_v49, %v8326_v49 }
 0xb26   : > { %v12041_v23 = vpop.eup %12040  ;;  %10169 = vst.msk [vmem:[%s13199_s15 + $0x58] sm:$0xf] %vm2046_vm3, %v10343_v1  ;;  %v8329_v34 = vmul.f32 %v12039_v60, %v15185_v6  ;;  %v8233_v24 = vpop.xlane.xlu1 %8232  ;;  %v16156_v1 = vld [vmem:[#allocation64_spill] sm:$0xff] }
 0xb27   : > { %10168 = vst.msk [vmem:[%s13199_s15 + $0x3c] sm:$0xf] %vm2046_vm3, %v10342_v42  ;;  %v8328_v51 = vmul.f32 %v12041_v23, %v15187_v30  ;;  %12050 = vrcp.f32 %v8233_v24  ;;  %11330 = vmatmul.mubr.msk.bf16.vlgmr.msra.gmra.mrb[0].mxu0 %vm768_vm2, %v8356_v3  ;;  %v8230_v56 = vpop.xlane.xlu0 %8229 }
 0xb28   : > { %v10345_v44 = vpack.c.bf16 %v8329_v34, %v8329_v34  ;;  %11340 = vmatpush3.bf16.msra.mxu0 %v16153_v63  ;;  %12052 = vrcp.f32 %v8230_v56  ;;  %11341 = vmatprep.mubr.msk.bf16.mxu0 %vm12259_vm1, %v16152_v32  ;;  %v16157_v56 = vld [vmem:[#allocation67_spill] sm:$0xff] }
 0xb29   : > { %v12043_v38 = vpop.eup %12042  ;;  %v8357_v6 = vpack.c.bf16 %v8328_v51, %v8327_v8  ;;  %v10344_v40 = vpack.c.bf16 %v8328_v51, %v8328_v51  ;;  %11351 = vmatprep.subr.bf16.mxu0 %v16152_v32 }
 0xb2a   : > { %v12045_v43 = vpop.eup %12044  ;;  %10171 = vst.msk [vmem:[%s13199_s15 + $0x78] sm:$0xf] %vm2046_vm3, %v10345_v44  ;;  %v8331_v30 = vmul.f32 %v12043_v38, %v15195_v25  ;;  %v8239_v26 = vpop.xlane.xlu1 %8238 }
 0xb2b   : > { %10170 = vst.msk [vmem:[%s13199_s15 + $0x5c] sm:$0xf] %vm2046_vm3, %v10344_v40  ;;  %v8330_v36 = vmul.f32 %v12045_v43, %v15197_v15  ;;  %12054 = vrcp.f32 %v8239_v26  ;;  %11336 = vmatmul.mubr.msk.bf16.vlgmr.msra.gmra.mrb[4].mxu1 %vm768_vm2, %v8357_v6  ;;  %v8236_v57 = vpop.xlane.xlu0 %8235  ;;  %v16158_v26 = vld [vmem:[#allocation66_spill] sm:$0xff] }
 0xb2c   : > { %v10347_v9 = vpack.c.bf16 %v8331_v30, %v8331_v30  ;;  %11346 = vmatpush3.bf16.msra.mxu1 %v16154_v19  ;;  %12056 = vrcp.f32 %v8236_v57  ;;  %11347 = vmatprep.mubr.msk.bf16.mxu1 %vm12259_vm1, %v16152_v32 }
 0xb2d   : > { %v12047_v12 = vpop.eup %12046  ;;  %v8358_v25 = vpack.c.bf16 %v8330_v36, %v8329_v34  ;;  %v10346_v21 = vpack.c.bf16 %v8330_v36, %v8330_v36  ;;  %11357 = vmatprep.subr.bf16.mxu1 %v16152_v32 }
 0xb2e   : > { %v12049_v37 = vpop.eup %12048  ;;  %10173 = vst.msk [vmem:[%s13199_s15 + $0x98] sm:$0xf] %vm2046_vm3, %v10347_v9  ;;  %v8333_v15 = vmul.f32 %v12047_v12, %v15205_v45  ;;  %v8245_v48 = vpop.xlane.xlu1 %8244 }
 0xb2f   : > { %10172 = vst.msk [vmem:[%s13199_s15 + $0x7c] sm:$0xf] %vm2046_vm3, %v10346_v21  ;;  %v8332_v5 = vmul.f32 %v12049_v37, %v15207_v2  ;;  %12058 = vrcp.f32 %v8245_v48  ;;  %11342 = vmatmul.mubr.msk.bf16.vlgmr.msra.gmra.mrb[4].mxu0 %vm768_vm2, %v8358_v25  ;;  %v8242_v52 = vpop.xlane.xlu0 %8241  ;;  %v16159_v37 = vld [vmem:[#allocation69_spill] sm:$0xff] }
 0xb30   : > { %v10349_v11 = vpack.c.bf16 %v8333_v15, %v8333_v15  ;;  %11352 = vmatpush3.bf16.msra.mxu0 %v16155_v55  ;;  %12060 = vrcp.f32 %v8242_v52  ;;  %11353 = vmatprep.mubr.msk.bf16.mxu0 %vm12259_vm1, %v16152_v32 }
 0xb31   : > { %v12051_v13 = vpop.eup %12050  ;;  %v8359_v45 = vpack.c.bf16 %v8332_v5, %v8331_v30  ;;  %v10348_v53 = vpack.c.bf16 %v8332_v5, %v8332_v5  ;;  %11363 = vmatprep.subr.bf16.mxu0 %v16152_v32 }
 0xb32   : > { %v12053_v28 = vpop.eup %12052  ;;  %10175 = vst.msk [vmem:[%s13199_s15 + $0xb8] sm:$0xf] %vm2046_vm3, %v10349_v11  ;;  %v8335_v2 = vmul.f32 %v12051_v13, %v15215_v7  ;;  %v8251_v8 = vpop.xlane.xlu1 %8250 }
 0xb33   : > { %10174 = vst.msk [vmem:[%s13199_s15 + $0x9c] sm:$0xf] %vm2046_vm3, %v10348_v53  ;;  %v8334_v62 = vmul.f32 %v12053_v28, %v15217_v17  ;;  %12062 = vrcp.f32 %v8251_v8  ;;  %11348 = vmatmul.mubr.msk.bf16.vlgmr.msra.gmra.mrb[8].mxu1 %vm768_vm2, %v8359_v45  ;;  %v8248_v49 = vpop.xlane.xlu0 %8247  ;;  %v16160_v45 = vld [vmem:[#allocation68_spill] sm:$0xff] }
 0xb34   : > { %v10351_v14 = vpack.c.bf16 %v8335_v2, %v8335_v2  ;;  %11358 = vmatpush3.bf16.msra.mxu1 %v16156_v1  ;;  %12064 = vrcp.f32 %v8248_v49  ;;  %11359 = vmatprep.mubr.msk.bf16.mxu1 %vm12259_vm1, %v16152_v32  ;;  %v16161_v1 = vld [vmem:[#allocation70_spill] sm:$0xff] }
 0xb35   : > { %v12055_v60 = vpop.eup %12054  ;;  %v8360_v7 = vpack.c.bf16 %v8334_v62, %v8333_v15  ;;  %v10350_v3 = vpack.c.bf16 %v8334_v62, %v8334_v62  ;;  %11369 = vmatprep.subr.bf16.mxu1 %v16152_v32 }
 0xb36   : > { %v12057_v42 = vpop.eup %12056  ;;  %10177 = vst.msk [vmem:[%s13199_s15 + $0xd8] sm:$0xf] %vm2046_vm3, %v10351_v14  ;;  %v8337_v17 = vmul.f32 %v12055_v60, %v15225_v10  ;;  %v8257_v23 = vpop.xlane.xlu1 %8256 }
 0xb37   : > { %10176 = vst.msk [vmem:[%s13199_s15 + $0xbc] sm:$0xf] %vm2046_vm3, %v10350_v3  ;;  %v8336_v34 = vmul.f32 %v12057_v42, %v15227_v61  ;;  %12066 = vrcp.f32 %v8257_v23  ;;  %11354 = vmatmul.mubr.msk.bf16.vlgmr.msra.gmra.mrb[8].mxu0 %vm768_vm2, %v8360_v7  ;;  %v8254_v24 = vpop.xlane.xlu0 %8253 }
 0xb38   : > { %v10353_v51 = vpack.c.bf16 %v8337_v17, %v8337_v17  ;;  %11364 = vmatpush3.bf16.msra.mxu0 %v16157_v56  ;;  %12068 = vrcp.f32 %v8254_v24  ;;  %11365 = vmatprep.mubr.msk.bf16.mxu0 %vm12259_vm1, %v16152_v32 }
 0xb39   : > { %v12059_v44 = vpop.eup %12058  ;;  %v8361_v10 = vpack.c.bf16 %v8336_v34, %v8335_v2  ;;  %v10352_v63 = vpack.c.bf16 %v8336_v34, %v8336_v34  ;;  %11375 = vmatprep.subr.bf16.mxu0 %v16152_v32 }
 0xb3a   : > { %v12061_v38 = vpop.eup %12060  ;;  %10179 = vst.msk [vmem:[%s13199_s15 + $0xf8] sm:$0xf] %vm2046_vm3, %v10353_v51  ;;  %v8339_v61 = vmul.f32 %v12059_v44, %v15235_v27  ;;  %v8263_v6 = vpop.xlane.xlu1 %8262 }
 0xb3b   : > { %10178 = vst.msk [vmem:[%s13199_s15 + $0xdc] sm:$0xf] %vm2046_vm3, %v10352_v63  ;;  %v8338_v40 = vmul.f32 %v12061_v38, %v15237_v47  ;;  %12070 = vrcp.f32 %v8263_v6  ;;  %11360 = vmatmul.mubr.msk.bf16.vlgmr.msra.gmra.mrb[12].mxu1 %vm768_vm2, %v8361_v10  ;;  %v8260_v43 = vpop.xlane.xlu0 %8259 }
 0xb3c   : > { %v10355_v30 = vpack.c.bf16 %v8339_v61, %v8339_v61  ;;  %11370 = vmatpush3.bf16.msra.mxu1 %v16158_v26  ;;  %12072 = vrcp.f32 %v8260_v43  ;;  %11371 = vmatprep.mubr.msk.bf16.mxu1 %vm12259_vm1, %v16152_v32 }
 0xb3d   : > { %v12063_v36 = vpop.eup %12062  ;;  %v8362_v27 = vpack.c.bf16 %v8338_v40, %v8337_v17  ;;  %v10354_v57 = vpack.c.bf16 %v8338_v40, %v8338_v40  ;;  %11381 = vmatprep.subr.bf16.mxu1 %v16152_v32 }
 0xb3e   : > { %v12065_v9 = vpop.eup %12064  ;;  %10181 = vst.msk [vmem:[%s13199_s15 + $0x118] sm:$0xf] %vm2046_vm3, %v10355_v30  ;;  %v8341_v47 = vmul.f32 %v12063_v36, %v15245_v50  ;;  %v8269_v19 = vpop.xlane.xlu1 %8268 }
 0xb3f   : > { %10180 = vst.msk [vmem:[%s13199_s15 + $0xfc] sm:$0xf] %vm2046_vm3, %v10354_v57  ;;  %v8340_v12 = vmul.f32 %v12065_v9, %v15247_v33  ;;  %12074 = vrcp.f32 %v8269_v19  ;;  %11366 = vmatmul.mubr.msk.bf16.vlgmr.msra.gmra.mrb[12].mxu0 %vm768_vm2, %v8362_v27  ;;  %v8266_v25 = vpop.xlane.xlu0 %8265 }
 0xb40   : > { %v10357_v21 = vpack.c.bf16 %v8341_v47, %v8341_v47  ;;  %11376 = vmatpush3.bf16.msra.mxu0 %v16159_v37  ;;  %12076 = vrcp.f32 %v8266_v25  ;;  %11377 = vmatprep.mubr.msk.bf16.mxu0 %vm12259_vm1, %v16152_v32 }
 0xb41   : > { %v12067_v15 = vpop.eup %12066  ;;  %v8363_v50 = vpack.c.bf16 %v8340_v12, %v8339_v61  ;;  %v10356_v48 = vpack.c.bf16 %v8340_v12, %v8340_v12  ;;  %11387 = vmatprep.subr.bf16.mxu0 %v16152_v32 }
 0xb42   : > { %v12069_v5 = vpop.eup %12068  ;;  %10183 = vst.msk [vmem:[%s13199_s15 + $0x138] sm:$0xf] %vm2046_vm3, %v10357_v21  ;;  %v8343_v33 = vmul.f32 %v12067_v15, %v15255_v18  ;;  %v8275_v52 = vpop.xlane.xlu1 %8274 }
 0xb43   : > { %10182 = vst.msk [vmem:[%s13199_s15 + $0x11c] sm:$0xf] %vm2046_vm3, %v10356_v48  ;;  %v8342_v11 = vmul.f32 %v12069_v5, %v15257_v16  ;;  %12078 = vrcp.f32 %v8275_v52  ;;  %11372 = vmatmul.mubr.msk.bf16.vlgmr.msra.gmra.mrb[16].mxu1 %vm768_vm2, %v8363_v50  ;;  %v8272_v55 = vpop.xlane.xlu0 %8271 }
 0xb44   : > { %v10359_v13 = vpack.c.bf16 %v8343_v33, %v8343_v33  ;;  %11382 = vmatpush3.bf16.msra.mxu1 %v16160_v45  ;;  %12080 = vrcp.f32 %v8272_v55  ;;  %11383 = vmatprep.mubr.msk.bf16.mxu1 %vm12259_vm1, %v16152_v32 }
 0xb45   : > { %v12071_v53 = vpop.eup %12070  ;;  %v8364_v18 = vpack.c.bf16 %v8342_v11, %v8341_v47  ;;  %v10358_v28 = vpack.c.bf16 %v8342_v11, %v8342_v11  ;;  %11393 = vmatprep.subr.bf16.mxu1 %v16152_v32 }
 0xb46   : > { %v12073_v2 = vpop.eup %12072  ;;  %10185 = vst.msk [vmem:[%s13199_s15 + $0x158] sm:$0xf] %vm2046_vm3, %v10359_v13  ;;  %v8345_v16 = vmul.f32 %v12071_v53, %v15265_v58  ;;  %v8281_v8 = vpop.xlane.xlu1 %8280 }
 0xb47   : > { %10184 = vst.msk [vmem:[%s13199_s15 + $0x13c] sm:$0xf] %vm2046_vm3, %v10358_v28  ;;  %v8344_v62 = vmul.f32 %v12073_v2, %v15267_v22  ;;  %12082 = vrcp.f32 %v8281_v8  ;;  %11378 = vmatmul.mubr.msk.bf16.vlgmr.msra.gmra.mrb[16].mxu0 %vm768_vm2, %v8364_v18  ;;  %v8278_v49 = vpop.xlane.xlu0 %8277 }
 0xb48   : > { %v10361_v14 = vpack.c.bf16 %v8345_v16, %v8345_v16  ;;  %11388 = vmatpush3.bf16.msra.mxu0 %v16161_v1  ;;  %12084 = vrcp.f32 %v8278_v49  ;;  %11389 = vmatprep.mubr.msk.bf16.mxu0 %vm12259_vm1, %v16152_v32  ;;  %v11576_v1 = vld [vmem:[#allocation8] sm:$0xff]  }
 0xb49   : > { %v12075_v60 = vpop.eup %12074  ;;  %v8365_v58 = vpack.c.bf16 %v8344_v62, %v8343_v33  ;;  %v10360_v7 = vpack.c.bf16 %v8344_v62, %v8344_v62  ;;  %11399 = vmatprep.subr.bf16.mxu0 %v16152_v32 }
 0xb4a   : > { %v12077_v3 = vpop.eup %12076  ;;  %10187 = vst.msk [vmem:[%s13199_s15 + $0x178] sm:$0xf] %vm2046_vm3, %v10361_v14  ;;  %v8347_v22 = vmul.f32 %v12075_v60, %v15275_v59  ;;  %v8287_v42 = vpop.xlane.xlu1 %8286  ;;  %v11577_v60 = vld [vmem:[#allocation8 + $0x8] sm:$0xff]  }
 0xb4b   : > { %10186 = vst.msk [vmem:[%s13199_s15 + $0x15c] sm:$0xf] %vm2046_vm3, %v10360_v7  ;;  %v8346_v17 = vmul.f32 %v12077_v3, %v15277_v35  ;;  %12086 = vrcp.f32 %v8287_v42  ;;  %11384 = vmatmul.mubr.msk.bf16.vlgmr.msra.gmra.mrb[20].mxu1 %vm768_vm2, %v8365_v58  ;;  %v8284_v23 = vpop.xlane.xlu0 %8283  ;;  %v11578_v58 = vld [vmem:[#allocation8 + $0x10] sm:$0xff]   ;;  %v11579_v3 = vld [vmem:[#allocation8 + $0x18] sm:$0xff]  }
 0xb4c   : > { %v10363_v34 = vpack.c.bf16 %v8347_v22, %v8347_v22  ;;  %11394 = vmatpush3.bf16.msra.mxu1 %v15414_v54  ;;  %12088 = vrcp.f32 %v8284_v23  ;;  %11395 = vmatprep.mubr.msk.bf16.mxu1 %vm12259_vm1, %v16152_v32 }
 0xb4d   : > { %v12079_v24 = vpop.eup %12078  ;;  %v8366_v59 = vpack.c.bf16 %v8346_v17, %v8345_v16  ;;  %v10362_v51 = vpack.c.bf16 %v8346_v17, %v8346_v17  ;;  %11405 = vmatprep.subr.bf16.mxu1 %v16152_v32 }
 0xb4e   : > { %v12081_v56 = vpop.eup %12080  ;;  %10189 = vst.msk [vmem:[%s13199_s15 + $0x198] sm:$0xf] %vm2046_vm3, %v10363_v34  ;;  %v8349_v35 = vmul.f32 %v12079_v24, %v15284_v4  ;;  %v9222_v44 = vpop.permute.xlu1 %9221 }
 0xb4f   : > { %10188 = vst.msk [vmem:[%s13199_s15 + $0x17c] sm:$0xf] %vm2046_vm3, %v10362_v51  ;;  %v8348_v54 = vmul.f32 %v12081_v56, %v15286_v0  ;;  %11390 = vmatmul.mubr.msk.bf16.vlgmr.msra.gmra.mrb[20].mxu0 %vm768_vm2, %v8366_v59  ;;  %v8290_v10 = vpop.xlane.xlu0 %8289 }
 0xb50   : > { %v10365_v63 = vpack.c.bf16 %v8349_v35, %v8349_v35  ;;  %11400 = vmatpush3.bf16.msra.mxu0 %v15412_v41  ;;  %12090 = vrcp.f32 %v8290_v10  ;;  %11401 = vmatprep.mubr.msk.bf16.mxu0 %vm12259_vm1, %v16152_v32 }
 0xb51   : > { %v12083_v38 = vpop.eup %12082  ;;  %v8367_v4 = vpack.c.bf16 %v8348_v54, %v8347_v22  ;;  %v10364_v61 = vpack.c.bf16 %v8348_v54, %v8348_v54  ;;  %11411 = vmatprep.subr.bf16.mxu0 %v16152_v32 }
 0xb52   : > { %v12085_v6 = vpop.eup %12084  ;;  %10191 = vst.msk [vmem:[%s13199_s15 + $0x1b8] sm:$0xf] %vm2046_vm3, %v10365_v63  ;;  %v8351_v0 = vmul.f32 %v12083_v38, %v15292_v31  ;;  %v4991_v40 = vpop.permute.xlu1 %4990 }
 0xb53   : > { %10190 = vst.msk [vmem:[%s13199_s15 + $0x19c] sm:$0xf] %vm2046_vm3, %v10364_v61  ;;  %v8350_v41 = vmul.f32 %v12085_v6, %v15294_v20  ;;  %11396 = vmatmul.mubr.msk.bf16.vlgmr.msra.gmra.mrb[24].mxu1 %vm768_vm2, %v8367_v4  ;;  %v9175_v43 = vpop.permute.xlu0 %9174 }
 0xb54   : > { %5032 = vst.msk [vmem:[#allocation2 + $0x38] sm:$0xff] %vm5024_vm4, %v4991_v40  ;;  %v10367_v30 = vpack.c.bf16 %v8351_v0, %v8351_v0  ;;  %11406 = vmatpush3.bf16.msra.mxu1 %v9175_v43  ;;  %11407 = vmatprep.mubr.msk.bf16.mxu1 %vm12259_vm1, %v16152_v32 }
 0xb55   : > { %v12087_v26 = vpop.eup %12086  ;;  %v8368_v36 = vpack.c.bf16 %v8350_v41, %v8349_v35  ;;  %v10366_v31 = vpack.c.bf16 %v8350_v41, %v8350_v41  ;;  %11457 = vmatprep.subr.bf16.mxu1 %v11576_v1 }
 0xb56   : > { %v12089_v27 = vpop.eup %12088  ;;  %10193 = vst.msk [vmem:[%s13199_s15 + $0x1d8] sm:$0xf] %vm2046_vm3, %v10367_v30  ;;  %v8353_v20 = vmul.f32 %v12087_v26, %v15300_v46  ;;  %v7121_v57 = vpop.permute.xlu1 %7120 }
 0xb57   : > { %10192 = vst.msk [vmem:[%s13199_s15 + $0x1bc] sm:$0xf] %vm2046_vm3, %v10366_v31  ;;  %v8352_v9 = vmul.f32 %v12089_v27, %v15302_v29  ;;  %11402 = vmatmul.mubr.msk.bf16.vlgmr.msra.gmra.mrb[24].mxu0 %vm768_vm2, %v8368_v36  ;;  %v4989_v47 = vpop.permute.xlu0 %4988 }
 0xb58   : > { %7162 = vst.msk [vmem:[#allocation2 + $0x38] sm:$0xff] %vm7154_vm5, %v7121_v57  ;;  %v10369_v19 = vpack.c.bf16 %v8353_v20, %v8353_v20  ;;  %11412 = vmatpush3.bf16.msra.mxu0 %v9222_v44  ;;  %11413 = vmatprep.mubr.msk.bf16.mxu0 %vm12259_vm1, %v16152_v32 }
 0xb59   : > { %5031 = vst.msk [vmem:[#allocation2 + $0x30] sm:$0xff] %vm5024_vm4, %v4989_v47  ;;  %v8369_v46 = vpack.c.bf16 %v8352_v9, %v8351_v0  ;;  %v10368_v12 = vpack.c.bf16 %v8352_v9, %v8352_v9  ;;  %11417 = vmatprep.subr.bf16.mxu0 %v11576_v1 }
 0xb5a   : > { %v12091_v25 = vpop.eup %12090  ;;  %10195 = vst.msk [vmem:[%s13199_s15 + $0x1f8] sm:$0xf] %vm2046_vm3, %v10369_v19  ;;  %v4995_v21 = vpop.permute.xlu1 %4994 }
 0xb5b   : > { %10194 = vst.msk [vmem:[%s13199_s15 + $0x1dc] sm:$0xf] %vm2046_vm3, %v10368_v12  ;;  %v8354_v29 = vmul.f32 %v12091_v25, %v15308_v39  ;;  %11408 = vmatmul.mubr.msk.bf16.vlgmr.msra.gmra.mrb[28].mxu1 %vm768_vm2, %v8369_v46  ;;  %v7119_v37 = vpop.permute.xlu0 %7118 }
 0xb5c   : > { %5034 = vst.msk [vmem:[#allocation2 + $0x48] sm:$0xff] %vm5024_vm4, %v4995_v21  ;;  %11461 = vmatpush3.bf16.msra.mxu1 %v11576_v1 }
 0xb5d   : > { %7161 = vst.msk [vmem:[#allocation2 + $0x30] sm:$0xff] %vm7154_vm5, %v7119_v37  ;;  %v8370_v15 = vpack.c.bf16 %v8354_v29, %v8353_v20  ;;  %v10370_v50 = vpack.c.bf16 %v8354_v29, %v8354_v29  ;;  %11458 = vmatprep.subr.bf16.mxu1 %v11577_v60 }
 0xb5e   : > { %v7125_v32 = vpop.permute.xlu1 %7124 }
 0xb5f   : > { %10196 = vst.msk [vmem:[%s13199_s15 + $0x1fc] sm:$0xf] %vm2046_vm3, %v10370_v50  ;;  %11414 = vmatmul.mubr.msk.bf16.vlgmr.msra.gmra.mrb[28].mxu0 %vm768_vm2, %v8370_v15  ;;  %v4993_v48 = vpop.permute.xlu0 %4992  ;;  %s12267_s15 = smov [#allocation9]  }
 0xb60   : > { %7164 = vst.msk [vmem:[#allocation2 + $0x48] sm:$0xff] %vm7154_vm5, %v7125_v32  ;;  %11418 = vmatpush3.bf16.msra.mxu0 %v11576_v1  ;;  %11462 = vmatpush3.bf16.msra.mxu1 %v11577_v60 }
 0xb61   : > { %5033 = vst.msk [vmem:[#allocation2 + $0x40] sm:$0xff] %vm5024_vm4, %v4993_v48  ;;  %11419 = vmatprep.subr.bf16.mxu0 %v11577_v60  ;;  %11459 = vmatprep.subr.bf16.mxu1 %v11578_v58 }
 0xb62   : > { %v4997_v39 = vpop.permute.xlu1 %4996 }
 0xb63   : > { %5035 = vst.msk [vmem:[#allocation2 + $0x50] sm:$0xff] %vm5024_vm4, %v4997_v39  ;;  %v7123_v5 = vpop.permute.xlu0 %7122 }
 0xb64   : > { %7163 = vst.msk [vmem:[#allocation2 + $0x40] sm:$0xff] %vm7154_vm5, %v7123_v5  ;;  %11420 = vmatpush3.bf16.msra.mxu0 %v11577_v60  ;;  %11463 = vmatpush3.bf16.msra.mxu1 %v11578_v58 }
 0xb65   : > { %11421 = vmatprep.subr.bf16.mxu0 %v11578_v58  ;;  %11460 = vmatprep.subr.bf16.mxu1 %v11579_v3 }
 0xb66   : > { %v4999_v33 = vpop.permute.xlu1 %4998 }
 0xb67   : > { %5036 = vst.msk [vmem:[#allocation2 + $0x58] sm:$0xff] %vm5024_vm4, %v4999_v33  ;;  %v4977_v52 = vpop.permute.xlu0 %4976 }
 0xb68   : > { %5025 = vst.msk [vmem:[#allocation2] sm:$0xff] %vm5024_vm4, %v4977_v52  ;;  %11422 = vmatpush3.bf16.msra.mxu0 %v11578_v58  ;;  %11464 = vmatpush3.bf16.msra.mxu1 %v11579_v3  ;;  %v16162_v52 = vld [vmem:[#allocation50_spill] sm:$0xff] }
 0xb69   : > { %11423 = vmatprep.subr.bf16.mxu0 %v11579_v3  ;;  %v16168_v58 = vld [vmem:[#allocation58_spill] sm:$0xff] }
 0xb6a   : > { %v7127_v11 = vpop.permute.xlu1 %7126 }
 0xb6b   : > { %7165 = vst.msk [vmem:[#allocation2 + $0x50] sm:$0xff] %vm7154_vm5, %v7127_v11  ;;  %v4979_v55 = vpop.permute.xlu0 %4978  ;;  %v16163_v11 = vld [vmem:[#allocation49_spill] sm:$0xff] }
 0xb6c   : > { %5026 = vst.msk [vmem:[#allocation2 + $0x8] sm:$0xff] %vm5024_vm4, %v4979_v55  ;;  %11424 = vmatpush3.bf16.msra.mxu0 %v11579_v3  ;;  %v16164_v55 = vpack.c.bf16 %v16162_v52, %v16163_v11 }
 0xb6e   : > { %v7129_v13 = vpop.permute.xlu1 %7128 }
 0xb6f   : > { %7166 = vst.msk [vmem:[#allocation2 + $0x58] sm:$0xff] %vm7154_vm5, %v7129_v13  ;;  %v7107_v45 = vpop.permute.xlu0 %7106 }
 0xb70   : > { %7155 = vst.msk [vmem:[#allocation2] sm:$0xff] %vm7154_vm5, %v7107_v45 }
 0xb72   : > { %v5001_v53 = vpop.permute.xlu1 %5000 }
 0xb73   : > { %5037 = vst.msk [vmem:[#allocation2 + $0x60] sm:$0xff] %vm5024_vm4, %v5001_v53  ;;  %v7109_v18 = vpop.permute.xlu0 %7108 }
 0xb74   : > { %7156 = vst.msk [vmem:[#allocation2 + $0x8] sm:$0xff] %vm7154_vm5, %v7109_v18 }
 0xb76   : > { %v5003_v28 = vpop.permute.xlu1 %5002 }
 0xb77   : > { %5038 = vst.msk [vmem:[#allocation2 + $0x68] sm:$0xff] %vm5024_vm4, %v5003_v28  ;;  %v4981_v2 = vpop.permute.xlu0 %4980 }
 0xb78   : > { %5027 = vst.msk [vmem:[#allocation2 + $0x10] sm:$0xff] %vm5024_vm4, %v4981_v2  ;;  %v16165_v2 = vld [vmem:[#allocation52_spill] sm:$0xff] }
 0xb7a   : > { %v7131_v16 = vpop.permute.xlu1 %7130 }
 0xb7b   : > { %7167 = vst.msk [vmem:[#allocation2 + $0x60] sm:$0xff] %vm7154_vm5, %v7131_v16  ;;  %v4983_v8 = vpop.permute.xlu0 %4982  ;;  %v16166_v16 = vld [vmem:[#allocation51_spill] sm:$0xff] }
 0xb7c   : > { %5028 = vst.msk [vmem:[#allocation2 + $0x18] sm:$0xff] %vm5024_vm4, %v4983_v8  ;;  %v16167_v8 = vpack.c.bf16 %v16165_v2, %v16166_v16 }
 0xb7e   : > { %v7133_v62 = vpop.permute.xlu1 %7132 }
 0xb7f   : > { %7168 = vst.msk [vmem:[#allocation2 + $0x68] sm:$0xff] %vm7154_vm5, %v7133_v62  ;;  %v7111_v49 = vpop.permute.xlu0 %7110 }
 0xb80   : > { %7157 = vst.msk [vmem:[#allocation2 + $0x10] sm:$0xff] %vm7154_vm5, %v7111_v49 }
 0xb83   : > { %v7113_v14 = vpop.permute.xlu0 %7112 }
 0xb84   : > { %7158 = vst.msk [vmem:[#allocation2 + $0x18] sm:$0xff] %vm7154_vm5, %v7113_v14 }
 0xbf3   : > { %v8556_v7 = vpop.f32.mrb[0].mxu1 }
 0xbf4   : > { %v11325_v22 = vpop.f32.mrb[1].mxu1 }
 0xbf5   : > { %v8559_v42 = vpop.f32.mrb[2].mxu1  ;;  %v16171_v22 = vld [vmem:[#allocation36_spill] sm:$0xff] }
 0xbf6   : > { %v9268_v17 = vpack.c.bf16 %v8559_v42, %v8556_v7  ;;  %v11326_v23 = vpop.f32.mrb[3].mxu1  ;;  %v16169_v7 = vld [vmem:[#allocation57_spill] sm:$0xff]  ;;  %v16172_v42 = vld [vmem:[#allocation34_spill] sm:$0xff] }
 0xbf7   : > { %v16170_v3 = vpack.c.bf16 %v16168_v58, %v16169_v7 }
 0xbf8   : > { %9300 = vrot.lane.b32.xlu0 %v9268_v17, %s12264_s14  ;;  %v16173_v17 = vpack.c.bf16 %v16171_v22, %v16172_v42 }
 0xbfa   : > { %v8603_v34 = vpop.f32.mrb[0].mxu0 }
 0xbfb   : > { %v11331_v24 = vpop.f32.mrb[1].mxu0 }
 0xbfc   : > { %v8606_v59 = vpop.f32.mrb[2].mxu0 }
 0xbfd   : > { %v9269_v51 = vpack.c.bf16 %v8606_v59, %v8603_v34  ;;  %v11332_v56 = vpop.f32.mrb[3].mxu0 }
 0xbfe   : > { %v8650_v35 = vpop.f32.mrb[4].mxu1  ;;  %v16174_v56 = vld [vmem:[#allocation60_spill] sm:$0xff] }
 0xbff   : > { %9302 = vrot.lane.b32.xlu0 %v9269_v51, %s12264_s14  ;;  %v11337_v44 = vpop.f32.mrb[5].mxu1 }
 0xc00   : > { %v8653_v54 = vpop.f32.mrb[6].mxu1 }
 0xc01   : > { %v9270_v10 = vpack.c.bf16 %v8653_v54, %v8650_v35  ;;  %v11338_v63 = vpop.f32.mrb[7].mxu1  ;;  %v16175_v35 = vld [vmem:[#allocation59_spill] sm:$0xff] }
 0xc02   : > { %v8697_v38 = vpop.f32.mrb[4].mxu0  ;;  %v16176_v44 = vpack.c.bf16 %v16174_v56, %v16175_v35  ;;  %v16177_v54 = vld [vmem:[#allocation39_spill] sm:$0xff] }
 0xc03   : > { %v11343_v4 = vpop.f32.mrb[5].mxu0 }
 0xc04   : > { %v8700_v61 = vpop.f32.mrb[6].mxu0 }
 0xc05   : > { %v9271_v6 = vpack.c.bf16 %v8700_v61, %v8697_v38  ;;  %v11344_v0 = vpop.f32.mrb[7].mxu0 }
 0xc06   : > { %v15606_v40 = vpop.f32.mrb[8].mxu1 }
 0xc07   : > { %v11349_v41 = vpop.f32.mrb[9].mxu1 }
 0xc08   : > { %v15608_v43 = vpop.f32.mrb[10].mxu1  ;;  %v16180_v41 = vld [vmem:[#allocation24_spill] sm:$0xff] }
 0xc09   : > { %v9272_v30 = vpack.c.bf16 %v15608_v43, %v15606_v40  ;;  %v11350_v26 = vpop.f32.mrb[11].mxu1 }
 0xc0a   : > { %v15612_v36 = vpop.f32.mrb[8].mxu0  ;;  %v16181_v26 = vld [vmem:[#allocation23_spill] sm:$0xff] }
 0xc0b   : > { %v11355_v31 = vpop.f32.mrb[9].mxu0 }
 0xc0c   : > { %v15614_v27 = vpop.f32.mrb[10].mxu0  ;;  %v16182_v31 = vpack.c.bf16 %v16180_v41, %v16181_v26 }
 0xc0d   : > { %v9273_v20 = vpack.c.bf16 %v15614_v27, %v15612_v36  ;;  %v11356_v57 = vpop.f32.mrb[11].mxu0 }
 0xc0e   : > { %v8838_v9 = vpop.f32.mrb[12].mxu1 }
 0xc0f   : > { %v11361_v47 = vpop.f32.mrb[13].mxu1 }
 0xc10   : > { %v8841_v19 = vpop.f32.mrb[14].mxu1 }
 0xc11   : > { %v9274_v46 = vpack.c.bf16 %v8841_v19, %v8838_v9  ;;  %v11362_v12 = vpop.f32.mrb[15].mxu1 }
 0xc12   : > { %v8885_v25 = vpop.f32.mrb[12].mxu0  ;;  %v16183_v12 = vld [vmem:[#allocation27_spill] sm:$0xff] }
 0xc13   : > { %9312 = vrot.lane.b32.xlu0 %v9274_v46, %s12264_s14  ;;  %v11367_v21 = vpop.f32.mrb[13].mxu0 }
 0xc14   : > { %v8888_v29 = vpop.f32.mrb[14].mxu0 }
 0xc15   : > { %v9275_v37 = vpack.c.bf16 %v8888_v29, %v8885_v25  ;;  %v11368_v15 = vpop.f32.mrb[15].mxu0  ;;  %v16184_v25 = vld [vmem:[#allocation25_spill] sm:$0xff] }
 0xc16   : > { %v8932_v50 = vpop.f32.mrb[16].mxu1  ;;  %v16185_v21 = vpack.c.bf16 %v16183_v12, %v16184_v25 }
 0xc17   : > { %9304 = vrot.lane.b32.xlu0 %v9270_v10, %s12264_s14  ;;  %9314 = vrot.lane.b32.xlu1 %v9275_v37, %s12264_s14  ;;  %v11373_v32 = vpop.f32.mrb[17].mxu1  ;;  %v16178_v10 = vld [vmem:[#allocation38_spill] sm:$0xff] }
 0xc18   : > { %v8935_v48 = vpop.f32.mrb[18].mxu1  ;;  %v16179_v63 = vpack.c.bf16 %v16177_v54, %v16178_v10 }
 0xc19   : > { %v9276_v39 = vpack.c.bf16 %v8935_v48, %v8932_v50  ;;  %v11374_v5 = vpop.f32.mrb[19].mxu1 }
 0xc1a   : > { %v8979_v33 = vpop.f32.mrb[16].mxu0 }
 0xc1b   : > { %5004 = vrot.lane.b32.xlu1 %v16164_v55, %s12265_s7  ;;  %9316 = vrot.lane.b32.xlu0 %v9276_v39, %s12264_s14  ;;  %v11379_v13 = vpop.f32.mrb[17].mxu0 }
 0xc1c   : > { %v8982_v45 = vpop.f32.mrb[18].mxu0 }
 0xc1d   : > { %v9277_v53 = vpack.c.bf16 %v8982_v45, %v8979_v33  ;;  %v11380_v18 = vpop.f32.mrb[19].mxu0 }
 0xc1e   : > { %v9026_v28 = vpop.f32.mrb[20].mxu1 }
 0xc1f   : > { %5006 = vrot.lane.b32.xlu1 %v16167_v8, %s12265_s7  ;;  %9306 = vrot.lane.b32.xlu0 %v9271_v6, %s12264_s14  ;;  %v11385_v62 = vpop.f32.mrb[21].mxu1 }
 0xc20   : > { %v9029_v49 = vpop.f32.mrb[22].mxu1 }
 0xc21   : > { %v9278_v14 = vpack.c.bf16 %v9029_v49, %v9026_v28  ;;  %v11386_v1 = vpop.f32.mrb[23].mxu1 }
 0xc22   : > { %v9073_v60 = vpop.f32.mrb[20].mxu0 }
 0xc23   : > { %7134 = vrot.lane.b32.xlu1 %v16170_v3, %s12266_s12  ;;  %4984 = vrot.lane.b32.xlu0 %v16173_v17, %s12265_s7  ;;  %v11391_v23 = vpop.f32.mrb[21].mxu0 }
 0xc24   : > { %v9076_v34 = vpop.f32.mrb[22].mxu0 }
 0xc25   : > { %v9279_v24 = vpack.c.bf16 %v9076_v34, %v9073_v60  ;;  %v11392_v59 = vpop.f32.mrb[23].mxu0 }
 0xc26   : > { %v9120_v51 = vpop.f32.mrb[24].mxu1 }
 0xc27   : > { %7136 = vrot.lane.b32.xlu1 %v16176_v44, %s12266_s12  ;;  %4986 = vrot.lane.b32.xlu0 %v16179_v63, %s12265_s7  ;;  %v11397_v38 = vpop.f32.mrb[25].mxu1 }
 0xc28   : > { %v9123_v4 = vpop.f32.mrb[26].mxu1 }
 0xc29   : > { %v9280_v61 = vpack.c.bf16 %v9123_v4, %v9120_v51  ;;  %v11398_v6 = vpop.f32.mrb[27].mxu1  ;;  %v15714_v4 = vld [vmem:[%s15869_s4] ss:$0 sm:$0xff] }
 0xc2a   : > { %v9167_v0 = vpop.f32.mrb[24].mxu0 }
 0xc2b   : > { %7114 = vrot.lane.b32.xlu0 %v16182_v31, %s12266_s12  ;;  %9318 = vrot.lane.b32.xlu1 %v9277_v53, %s12264_s14  ;;  %v11403_v57 = vpop.f32.mrb[25].mxu0 }
 0xc2c   : > { %v9170_v9 = vpop.f32.mrb[26].mxu0 }
 0xc2d   : > { %v9281_v47 = vpack.c.bf16 %v9170_v9, %v9167_v0  ;;  %v11404_v19 = vpop.f32.mrb[27].mxu0 }
 0xc2e   : > { %v9214_v46 = vpop.f32.mrb[28].mxu1 }
 0xc2f   : > { %7116 = vrot.lane.b32.xlu0 %v16185_v21, %s12266_s12  ;;  %9320 = vrot.lane.b32.xlu1 %v9278_v14, %s12264_s14  ;;  %v11409_v29 = vpop.f32.mrb[29].mxu1 }
 0xc30   : > { %v9217_v37 = vpop.f32.mrb[30].mxu1 }
 0xc31   : > { %v9282_v15 = vpack.c.bf16 %v9217_v37, %v9214_v46  ;;  %v11410_v50 = vpop.f32.mrb[31].mxu1 }
 0xc32   : > { %v9261_v32 = vpop.f32.mrb[28].mxu0 }
 0xc33   : > { %9308 = vrot.lane.b32.xlu0 %v9272_v30, %s12264_s14  ;;  %9322 = vrot.lane.b32.xlu1 %v9279_v24, %s12264_s14  ;;  %v11415_v48 = vpop.f32.mrb[29].mxu0 }
 0xc34   : > { %v9264_v39 = vpop.f32.mrb[30].mxu0 }
 0xc35   : > { %v9283_v5 = vpack.c.bf16 %v9264_v39, %v9261_v32  ;;  %v11416_v33 = vpop.f32.mrb[31].mxu0 }
 0xc37   : > { %9310 = vrot.lane.b32.xlu0 %v9273_v20, %s12264_s14  ;;  %9324 = vrot.lane.b32.xlu1 %v9280_v61, %s12264_s14 }
 0xc3b   : > { %9326 = vrot.lane.b32.xlu1 %v9281_v47, %s12264_s14 }
 0xc3f   : > { %9328 = vrot.lane.b32.xlu1 %v9282_v15, %s12264_s14 }
 0xc43   : > { %9330 = vrot.lane.b32.xlu1 %v9283_v5, %s12264_s14  ;;  %s12182_s14 = sshll.u32 %s12267_s15, 4  ;;  %s12183_s14 = int_to_ptr.vmem [resolvable:$false] %s12182_s14 }
 0xc44   : > { %s12184_s7 = scalar_lea.vmem %s12183_s14, 8192  ;;  %p12185_p9 = scmp.lt.s32.totalorder %s15814_s19, %s12183_s14 }
 0xc45   : > { %p12186_p12 = scmp.lt.s32.totalorder %s12184_s7, %s12178_s10 }
 0xc47   : > { %p12187_p2 = por %p12186_p12, %p12185_p9 }
 0xc49   : > { %p12188_p13 = pnand %p12187_p2, %p12181_p5 }
 0xc6a   : > { %v9301_v40 = vpop.permute.xlu0 %9300 }
 0xc6b   : > { %9349 = vst.msk [vmem:[#allocation2] sm:$0xff] %vm9348_vm6, %v9301_v40 }
 0xc71   : > { %v9303_v43 = vpop.permute.xlu0 %9302 }
 0xc72   : > { %9350 = vst.msk [vmem:[#allocation2 + $0x8] sm:$0xff] %vm9348_vm6, %v9303_v43  ;;  %v9365_v30 = vld [vmem:[#allocation2] sm:$0xff] }
 0xc73   : > { %11425 = vmatprep.mubr.msk.bf16.mxu0 %vm491_vm0, %v9365_v30 }
 0xc79   : > { %v9366_v36 = vld [vmem:[#allocation2 + $0x8] sm:$0xff] }
 0xc7a   : > { %11426 = vmatmul.mubr.msk.bf16.vlgmr.msra.gmra.mrb[32].mxu0 %vm491_vm0, %v9366_v36 }
 0xc85   : > { %v9313_v27 = vpop.permute.xlu0 %9312 }
 0xc86   : > { %9355 = vst.msk [vmem:[#allocation2 + $0x30] sm:$0xff] %vm9348_vm6, %v9313_v27 }
 0xc89   : > { %v9315_v20 = vpop.permute.xlu1 %9314  ;;  %v9305_v52 = vpop.permute.xlu0 %9304 }
 0xc8a   : > { %9356 = vst.msk [vmem:[#allocation2 + $0x38] sm:$0xff] %vm9348_vm6, %v9315_v20  ;;  %9351 = vst.msk [vmem:[#allocation2 + $0x10] sm:$0xff] %vm9348_vm6, %v9305_v52 }
 0xc8d   : > { %v5005_v11 = vpop.permute.xlu1 %5004  ;;  %v9317_v55 = vpop.permute.xlu0 %9316  ;;  %v9371_v13 = vld [vmem:[#allocation2 + $0x30] sm:$0xff] }
 0xc8e   : > { %5039 = vst.msk [vmem:[#allocation2 + $0x70] sm:$0xff] %vm5024_vm4, %v5005_v11  ;;  %11437 = vmatprep.mubr.msk.bf16.mxu1 %vm491_vm0, %v9371_v13 }
 0xc8f   : > { %9357 = vst.msk [vmem:[#allocation2 + $0x40] sm:$0xff] %vm9348_vm6, %v9317_v55 }
 0xc91   : > { %v5007_v45 = vpop.permute.xlu1 %5006  ;;  %v9307_v53 = vpop.permute.xlu0 %9306  ;;  %v9367_v18 = vld [vmem:[#allocation2 + $0x10] sm:$0xff]  ;;  %v9372_v28 = vld [vmem:[#allocation2 + $0x38] sm:$0xff] }
 0xc92   : > { %5040 = vst.msk [vmem:[#allocation2 + $0x78] sm:$0xff] %vm5024_vm4, %v5007_v45  ;;  %11429 = vmatprep.mubr.msk.bf16.mxu0 %vm491_vm0, %v9367_v18  ;;  %11438 = vmatmul.mubr.msk.bf16.vlgmr.msra.gmra.mrb[32].mxu1 %vm491_vm0, %v9372_v28 }
 0xc93   : > { %9352 = vst.msk [vmem:[#allocation2 + $0x18] sm:$0xff] %vm9348_vm6, %v9307_v53 }
 0xc95   : > { %v7135_v2 = vpop.permute.xlu1 %7134  ;;  %v4985_v16 = vpop.permute.xlu0 %4984 }
 0xc96   : > { %v9373_v8 = vld [vmem:[#allocation2 + $0x40] sm:$0xff]  ;;  %7169 = vst.msk [vmem:[#allocation2 + $0x70] sm:$0xff] %vm7154_vm5, %v7135_v2 }
 0xc97   : > { %5029 = vst.msk [vmem:[#allocation2 + $0x20] sm:$0xff] %vm5024_vm4, %v4985_v16  ;;  %11441 = vmatprep.mubr.msk.bf16.mxu1 %vm491_vm0, %v9373_v8 }
 0xc99   : > { %v7137_v62 = vpop.permute.xlu1 %7136  ;;  %v4987_v49 = vpop.permute.xlu0 %4986 }
 0xc9a   : > { %v9368_v14 = vld [vmem:[#allocation2 + $0x18] sm:$0xff]  ;;  %7170 = vst.msk [vmem:[#allocation2 + $0x78] sm:$0xff] %vm7154_vm5, %v7137_v62 }
 0xc9b   : > { %5030 = vst.msk [vmem:[#allocation2 + $0x28] sm:$0xff] %vm5024_vm4, %v4987_v49  ;;  %11430 = vmatmul.mubr.msk.bf16.gmra.mrb[36].mxu0 %vm491_vm0, %v9368_v14 }
 0xc9d   : > { %v9319_v1 = vpop.permute.xlu1 %9318  ;;  %v7115_v60 = vpop.permute.xlu0 %7114 }
 0xc9e   : > { %9358 = vst.msk [vmem:[#allocation2 + $0x48] sm:$0xff] %vm9348_vm6, %v9319_v1 }
 0xc9f   : > { %7159 = vst.msk [vmem:[#allocation2 + $0x20] sm:$0xff] %vm7154_vm5, %v7115_v60 }
 0xca1   : > { %v9321_v58 = vpop.permute.xlu1 %9320  ;;  %v7117_v7 = vpop.permute.xlu0 %7116 }
 0xca2   : > { %9359 = vst.msk [vmem:[#allocation2 + $0x50] sm:$0xff] %vm9348_vm6, %v9321_v58 }
 0xca3   : > { %7160 = vst.msk [vmem:[#allocation2 + $0x28] sm:$0xff] %vm7154_vm5, %v7117_v7 }
 0xca5   : > { %v9323_v3 = vpop.permute.xlu1 %9322  ;;  %v9309_v22 = vpop.permute.xlu0 %9308  ;;  %v9374_v42 = vld [vmem:[#allocation2 + $0x48] sm:$0xff] }
 0xca6   : > { %9360 = vst.msk [vmem:[#allocation2 + $0x58] sm:$0xff] %vm9348_vm6, %v9323_v3  ;;  %9353 = vst.msk [vmem:[#allocation2 + $0x20] sm:$0xff] %vm9348_vm6, %v9309_v22  ;;  %11442 = vmatmul.mubr.msk.bf16.gmra.mrb[36].mxu1 %vm491_vm0, %v9374_v42 }
 0xca9   : > { %v9325_v17 = vpop.permute.xlu1 %9324  ;;  %v9311_v23 = vpop.permute.xlu0 %9310  ;;  %v9375_v34 = vld [vmem:[#allocation2 + $0x50] sm:$0xff] }
 0xcaa   : > { %9361 = vst.msk [vmem:[#allocation2 + $0x60] sm:$0xff] %vm9348_vm6, %v9325_v17  ;;  %9354 = vst.msk [vmem:[#allocation2 + $0x28] sm:$0xff] %vm9348_vm6, %v9311_v23  ;;  %11445 = vmatprep.mubr.msk.bf16.mxu1 %vm491_vm0, %v9375_v34 }
 0xcad   : > { %v9327_v24 = vpop.permute.xlu1 %9326  ;;  %v9369_v59 = vld [vmem:[#allocation2 + $0x20] sm:$0xff]  ;;  %v9376_v51 = vld [vmem:[#allocation2 + $0x58] sm:$0xff] }
 0xcae   : > { %9362 = vst.msk [vmem:[#allocation2 + $0x68] sm:$0xff] %vm9348_vm6, %v9327_v24  ;;  %11433 = vmatprep.mubr.msk.bf16.mxu0 %vm491_vm0, %v9369_v59  ;;  %11446 = vmatmul.mubr.msk.bf16.gmra.mrb[40].mxu1 %vm491_vm0, %v9376_v51 }
 0xcb1   : > { %v9329_v56 = vpop.permute.xlu1 %9328  ;;  %v9370_v35 = vld [vmem:[#allocation2 + $0x28] sm:$0xff]  ;;  %v9377_v44 = vld [vmem:[#allocation2 + $0x60] sm:$0xff] }
 0xcb2   : > { %9363 = vst.msk [vmem:[#allocation2 + $0x70] sm:$0xff] %vm9348_vm6, %v9329_v56  ;;  %11434 = vmatmul.mubr.msk.bf16.gmra.mrb[40].mxu0 %vm491_vm0, %v9370_v35  ;;  %11449 = vmatprep.mubr.msk.bf16.mxu1 %vm491_vm0, %v9377_v44 }
 0xcb5   : > { %v9331_v54 = vpop.permute.xlu1 %9330  ;;  %v9378_v10 = vld [vmem:[#allocation2 + $0x68] sm:$0xff] }
 0xcb6   : > { %9364 = vst.msk [vmem:[#allocation2 + $0x78] sm:$0xff] %vm9348_vm6, %v9331_v54  ;;  %11450 = vmatmul.mubr.msk.bf16.gmra.mrb[44].mxu1 %vm491_vm0, %v9378_v10 }
 0xcb9   : > { %v9379_v63 = vld [vmem:[#allocation2 + $0x70] sm:$0xff] }
 0xcba   : > { %11453 = vmatprep.mubr.msk.bf16.mxu1 %vm491_vm0, %v9379_v63 }
 0xcbd   : > { %v9380_v38 = vld [vmem:[#allocation2 + $0x78] sm:$0xff] }
 0xcbe   : > { %11454 = vmatmul.mubr.msk.bf16.gmra.mrb[48].mxu1 %vm491_vm0, %v9380_v38 }
 0xd4d   : > { %v11427_v61 = vpop.f32.mrb[32].mxu0 }
 0xd4e   : > { %v9511_v6 = vadd.f32 %v11427_v61, %v15714_v4  ;;  %v9502_v0 = vpop.f32.mrb[33].mxu0 }
 0xd4f   : > { %v9503_v41 = vadd.f32 %v15714_v4, %v9502_v0  ;;  %v11428_v26 = vpop.f32.mrb[34].mxu0 }
 0xd50   : > { %9631 = vst.msk [vmem:[%s15718_s18 + $0x10] sm:$0xff] %vm491_vm0, %v9511_v6  ;;  %v9514_v31 = vadd.f32 %v11428_v26, %v15714_v4  ;;  %v9505_v57 = vpop.f32.mrb[35].mxu0 }
 0xd51   : > { %9629 = vst.msk [vmem:[%s15718_s18] sm:$0xff] %vm491_vm0, %v9503_v41  ;;  %v9506_v9 = vadd.f32 %v15714_v4, %v9505_v57 }
 0xd52   : > { %9632 = vst.msk [vmem:[%s15718_s18 + $0x18] sm:$0xff] %vm491_vm0, %v9514_v31 }
 0xd53   : > { %9630 = vst.msk [vmem:[%s15718_s18 + $0x8] sm:$0xff] %vm491_vm0, %v9506_v9 }
 0xd65   : > { %v11439_v47 = vpop.f32.mrb[32].mxu1 }
 0xd66   : > { %v9559_v19 = vadd.f32 %v11439_v47, %v15714_v4  ;;  %v9550_v46 = vpop.f32.mrb[33].mxu1 }
 0xd67   : > { %v9551_v12 = vadd.f32 %v15714_v4, %v9550_v46  ;;  %v11440_v25 = vpop.f32.mrb[34].mxu1 }
 0xd68   : > { %9643 = vst.msk [vmem:[%s15718_s18 + $0x70] sm:$0xff] %vm491_vm0, %v9559_v19  ;;  %v9562_v21 = vadd.f32 %v11440_v25, %v15714_v4  ;;  %v9553_v29 = vpop.f32.mrb[35].mxu1 }
 0xd69   : > { %9641 = vst.msk [vmem:[%s15718_s18 + $0x60] sm:$0xff] %vm491_vm0, %v9551_v12  ;;  %v9554_v37 = vadd.f32 %v15714_v4, %v9553_v29 }
 0xd6a   : > { %9644 = vst.msk [vmem:[%s15718_s18 + $0x78] sm:$0xff] %vm491_vm0, %v9562_v21 }
 0xd6b   : > { %9642 = vst.msk [vmem:[%s15718_s18 + $0x68] sm:$0xff] %vm491_vm0, %v9554_v37 }
 0xd6e   : > { %v11431_v15 = vpop.f32.mrb[36].mxu0 }
 0xd6f   : > { %v9527_v50 = vadd.f32 %v11431_v15, %v15714_v4  ;;  %v9518_v32 = vpop.f32.mrb[37].mxu0 }
 0xd70   : > { %v9519_v48 = vadd.f32 %v15714_v4, %v9518_v32  ;;  %v11432_v39 = vpop.f32.mrb[38].mxu0 }
 0xd71   : > { %9635 = vst.msk [vmem:[%s15718_s18 + $0x30] sm:$0xff] %vm491_vm0, %v9527_v50  ;;  %v9530_v5 = vadd.f32 %v11432_v39, %v15714_v4  ;;  %v9521_v33 = vpop.f32.mrb[39].mxu0 }
 0xd72   : > { %9633 = vst.msk [vmem:[%s15718_s18 + $0x20] sm:$0xff] %vm491_vm0, %v9519_v48  ;;  %v9522_v40 = vadd.f32 %v15714_v4, %v9521_v33 }
 0xd73   : > { %9636 = vst.msk [vmem:[%s15718_s18 + $0x38] sm:$0xff] %vm491_vm0, %v9530_v5 }
 0xd74   : > { %9634 = vst.msk [vmem:[%s15718_s18 + $0x28] sm:$0xff] %vm491_vm0, %v9522_v40 }
 0xd79   : > { %v11443_v43 = vpop.f32.mrb[36].mxu1 }
 0xd7a   : > { %v9575_v30 = vadd.f32 %v11443_v43, %v15714_v4  ;;  %v9566_v36 = vpop.f32.mrb[37].mxu1 }
 0xd7b   : > { %v9567_v27 = vadd.f32 %v15714_v4, %v9566_v36  ;;  %v11444_v20 = vpop.f32.mrb[38].mxu1 }
 0xd7c   : > { %9647 = vst.msk [vmem:[%s15718_s18 + $0x90] sm:$0xff] %vm491_vm0, %v9575_v30  ;;  %v9578_v52 = vadd.f32 %v11444_v20, %v15714_v4  ;;  %v9569_v11 = vpop.f32.mrb[39].mxu1 }
 0xd7d   : > { %9645 = vst.msk [vmem:[%s15718_s18 + $0x80] sm:$0xff] %vm491_vm0, %v9567_v27  ;;  %v9570_v55 = vadd.f32 %v15714_v4, %v9569_v11 }
 0xd7e   : > { %9648 = vst.msk [vmem:[%s15718_s18 + $0x98] sm:$0xff] %vm491_vm0, %v9578_v52 }
 0xd7f   : > { %9646 = vst.msk [vmem:[%s15718_s18 + $0x88] sm:$0xff] %vm491_vm0, %v9570_v55 }
 0xd81   : > { %v11447_v13 = vpop.f32.mrb[40].mxu1 }
 0xd82   : > { %v9591_v45 = vadd.f32 %v11447_v13, %v15714_v4  ;;  %v9582_v53 = vpop.f32.mrb[41].mxu1 }
 0xd83   : > { %v9583_v18 = vadd.f32 %v15714_v4, %v9582_v53  ;;  %v11448_v28 = vpop.f32.mrb[42].mxu1 }
 0xd84   : > { %9651 = vst.msk [vmem:[%s15718_s18 + $0xb0] sm:$0xff] %vm491_vm0, %v9591_v45  ;;  %v9594_v2 = vadd.f32 %v11448_v28, %v15714_v4  ;;  %v9585_v16 = vpop.f32.mrb[43].mxu1 }
 0xd85   : > { %9649 = vst.msk [vmem:[%s15718_s18 + $0xa0] sm:$0xff] %vm491_vm0, %v9583_v18  ;;  %v9586_v8 = vadd.f32 %v15714_v4, %v9585_v16  ;;  %v11435_v62 = vpop.f32.mrb[40].mxu0 }
 0xd86   : > { %9652 = vst.msk [vmem:[%s15718_s18 + $0xb8] sm:$0xff] %vm491_vm0, %v9594_v2  ;;  %v9543_v49 = vadd.f32 %v11435_v62, %v15714_v4  ;;  %v9534_v14 = vpop.f32.mrb[41].mxu0 }
 0xd87   : > { %9650 = vst.msk [vmem:[%s15718_s18 + $0xa8] sm:$0xff] %vm491_vm0, %v9586_v8  ;;  %v9535_v1 = vadd.f32 %v15714_v4, %v9534_v14  ;;  %v11436_v60 = vpop.f32.mrb[42].mxu0 }
 0xd88   : > { %9639 = vst.msk [vmem:[%s15718_s18 + $0x50] sm:$0xff] %vm491_vm0, %v9543_v49  ;;  %v9546_v58 = vadd.f32 %v11436_v60, %v15714_v4  ;;  %v9537_v7 = vpop.f32.mrb[43].mxu0 }
 0xd89   : > { %9637 = vst.msk [vmem:[%s15718_s18 + $0x40] sm:$0xff] %vm491_vm0, %v9535_v1  ;;  %v9538_v3 = vadd.f32 %v15714_v4, %v9537_v7  ;;  %v11451_v22 = vpop.f32.mrb[44].mxu1 }
 0xd8a   : > { %9640 = vst.msk [vmem:[%s15718_s18 + $0x58] sm:$0xff] %vm491_vm0, %v9546_v58  ;;  %v9607_v42 = vadd.f32 %v11451_v22, %v15714_v4  ;;  %v9598_v17 = vpop.f32.mrb[45].mxu1 }
 0xd8b   : > { %9638 = vst.msk [vmem:[%s15718_s18 + $0x48] sm:$0xff] %vm491_vm0, %v9538_v3  ;;  %v9599_v23 = vadd.f32 %v15714_v4, %v9598_v17  ;;  %v11452_v34 = vpop.f32.mrb[46].mxu1 }
 0xd8c   : > { %9655 = vst.msk [vmem:[%s15718_s18 + $0xd0] sm:$0xff] %vm491_vm0, %v9607_v42  ;;  %v9610_v24 = vadd.f32 %v11452_v34, %v15714_v4  ;;  %v9601_v59 = vpop.f32.mrb[47].mxu1 }
 0xd8d   : > { %9653 = vst.msk [vmem:[%s15718_s18 + $0xc0] sm:$0xff] %vm491_vm0, %v9599_v23  ;;  %v9602_v51 = vadd.f32 %v15714_v4, %v9601_v59 }
 0xd8e   : > { %9656 = vst.msk [vmem:[%s15718_s18 + $0xd8] sm:$0xff] %vm491_vm0, %v9610_v24 }
 0xd8f   : > { %9654 = vst.msk [vmem:[%s15718_s18 + $0xc8] sm:$0xff] %vm491_vm0, %v9602_v51 }
 0xd91   : > { %v11455_v56 = vpop.f32.mrb[48].mxu1 }
 0xd92   : > { %v9623_v35 = vadd.f32 %v11455_v56, %v15714_v4  ;;  %v9614_v44 = vpop.f32.mrb[49].mxu1 }
 0xd93   : > { %v9615_v54 = vadd.f32 %v15714_v4, %v9614_v44  ;;  %v11456_v10 = vpop.f32.mrb[50].mxu1 }
 0xd94   : > { %9659 = vst.msk [vmem:[%s15718_s18 + $0xf0] sm:$0xff] %vm491_vm0, %v9623_v35  ;;  %v9626_v63 = vadd.f32 %v11456_v10, %v15714_v4  ;;  %v9617_v38 = vpop.f32.mrb[51].mxu1 }
 0xd95   : > { %9657 = vst.msk [vmem:[%s15718_s18 + $0xe0] sm:$0xff] %vm491_vm0, %v9615_v54  ;;  %v9618_v61 = vadd.f32 %v15714_v4, %v9617_v38 }
 0xd96   : > { %9660 = vst.msk [vmem:[%s15718_s18 + $0xf8] sm:$0xff] %vm491_vm0, %v9626_v63 }
 0xd97   : > { %9658 = vst.msk [vmem:[%s15718_s18 + $0xe8] sm:$0xff] %vm491_vm0, %v9618_v61 }
 0xd98   : > { %12191 = shalt.err (!%p12188_p13)
}
 0xd99   : > { %s12192_s12 = scalar_lea.hbm %s15812_s13, 4096  ;;  %s12196_s17 = scalar_lea.hbm %s15870_s5, 8192 }
 0xd9a   : > { %p12193_p6 = scmp.ne.s32.totalorder %s15812_s13, %s12192_s12  ;;  %p12197_p7 = scmp.lt.u32.totalorder %s15812_s13, %s15870_s5 }
 0xd9b   : > { %p12198_p8 = scmp.lt.u32.totalorder %s12196_s17, %s12192_s12  ;;  %p12200_p0 = scmp.lt.u32.totalorder %s12192_s12, %s15812_s13 }
 0xd9c   : > { %p12194_p10 = pnand %p12193_p6, %p16186_p1 }
 0xd9d   : > { %p12199_p11 = por %p12198_p8, %p12197_p7 }
 0xd9e   : > { %p12195_p4 = pneg %p12194_p10 }
 0xd9f   : > { %p12201_p3 = por %p12200_p0, %p12199_p11 }
 0xda1   : > { %p12202_p5 = pnand %p12201_p3, %p12195_p4 }
 0xda3   : > { %12205 = shalt.err (!%p12202_p5)
}
 0xda4   : > { %s12268_s20 = smov 128   ;;  %s12269_s30 = smov 8  }
 0xda5   : > { %11475 = dma.vmem_to_hbm [thread:$0]  (%p16186_p1), %s15814_s19, 4096, %s15812_s13, %s9662_s25, %s12268_s20, %s12268_s20, %s12269_s30  }
 0xda6 PF: > { %s9701_s10 = sand.u32 1, %s12236_s21   ;;  %p16187_p9 = scmp.ne.s32.totalorder %s15949_s28, 0 }
 0xda7   : > { %p16188_p12 = scmp.ge.s32.totalorder %s12248_s24, 2  ;;  %s9702_s15 = scalar_lea.sflag [#allocation5], %s9701_s10 }
 0xda9   : > { %p11489_p2 = pnand %p16188_p12, %p16187_p9 }
 0xdab   : > { %12231 = dma.done.wait (!%p11489_p2), %s9702_s15, 4096  }
 0xdac   : > { %12233 = vsyncadd (!%p11489_p2), %s9702_s15, 4294963200  ;;  %p21_p13 = scmp.ge.s32.totalorder %s12418_s26, 4   ;;  %s16189_s21 = smov %s12240_s22 }
 0xdad   : > { %s16190_s22 = smov %s12244_s23  ;;  %s16191_s23 = smov %s12427_s11 }
 0xdae   : > { %s16192_s24 = smov %s12418_s26  ;;  %23 = sbr.rel (!%p21_p13) target bundleno = 6 (0x6), region = 108 }
 0xdb5   :  { %9716 = vsyncpa [#allocation4], 1 }
 0xdb6   :  { %9718 = vsyncpa [#allocation4 + $0x1], 1 }
 0xdb7   :  { %9719 = vsyncpa [#allocation7], 1 }
 0xdb8   :  { %9720 = vsyncpa [#allocation5], 1 }
 0xdb9   :  { %9722 = vsyncpa [#allocation5 + $0x1], 1 }

</bundles_post_ra>
